<compile_context>
chip_gen: v5e
topology: v5e:2x2
jax: 0.10.0
libtpu: 0.0.40
codegen_flags: <defaults>
</compile_context>

<pallas_src>
import jax
import jax.numpy as jnp
from jax.experimental import pallas as pl
from jax.experimental.pallas import tpu as pltpu

BN_EPS = 1e-5  # PyTorch BatchNorm1d default


def _round_up(x, m):
    return ((x + m - 1) // m) * m


# ---------------------------------------------------------------------------
# Fused whole-network kernel (one batch tile per grid step)
# ---------------------------------------------------------------------------
def _autoencoder_kernel(spec_ref, cond_ref,
                        e_w0, e_b0, e_w1, e_b1, e_w2, e_b2, e_w3, e_b3,
                        d_w0, d_b0, d_w1, d_b1, d_w2, d_b2, d_w3, d_b3,
                        o_ref):
    def dense(x, w_ref, b_ref, relu):
        # bf16 x bf16 on the MXU, f32 accumulate; bias/ReLU epilogue in f32.
        y = jnp.dot(x.astype(w_ref.dtype), w_ref[...],
                    preferred_element_type=jnp.float32)
        y = y + b_ref[...]
        if relu:
            y = jnp.maximum(y, 0.0)
        return y

    # ---- encoder: Linear(+folded BN)+ReLU x3, then plain Linear -> latent ----
    x = dense(spec_ref[...], e_w0, e_b0, True)      # spec_ref already bf16
    x = dense(x, e_w1, e_b1, True)
    x = dense(x, e_w2, e_b2, True)
    latent = dense(x, e_w3, e_b3, False)            # (TB, LP); cols >= latent_dim are 0

    # ---- torch.cat([latent, params]) fused away:
    # cond arrives pre-placed in columns [latent_dim : latent_dim+param_dim] of
    # a zero (TB, LP) slab, so one VPU add reconstructs the concatenation and a
    # single (LP, 256) matmul replaces the two tiny-K dots. ----
    x = latent + cond_ref[...]

    # ---- decoder ----
    x = dense(x, d_w0, d_b0, True)
    x = dense(x, d_w1, d_b1, True)
    x = dense(x, d_w2, d_b2, True)
    x = dense(x, d_w3, d_b3, False)

    o_ref[...] = x.astype(o_ref.dtype)


def autoencoder_forward(spectrum, cond, enc, dec, latent_dim, *, tile_b=256):
    """SpectrumAutoencoderEmulator.forward(spectrum, params) in one pallas_call."""
    B, spectrum_dim = spectrum.shape
    param_dim = cond.shape[1]
    LP = dec["w0"].shape[0]                         # lane-padded concat width

    # Activations enter in bf16 (halves activation DMA); cond stays f32 because
    # it is added to the f32 latent before the bf16 cast at the next dot.
    spectrum = spectrum.astype(jnp.bfloat16)
    cond_slab = jnp.zeros((B, LP), jnp.float32).at[
        :, latent_dim:latent_dim + param_dim].set(cond.astype(jnp.float32))

    # Pad batch to a sublane-friendly tile; TB sized for the MXU (<= 256 rows).
    B_pad = _round_up(B, 8)
    TB = min(tile_b, B_pad)
    B_pad = _round_up(B_pad, TB)
    if B_pad != B:
        spectrum = jnp.pad(spectrum, ((0, B_pad - B), (0, 0)))
        cond_slab = jnp.pad(cond_slab, ((0, B_pad - B), (0, 0)))

    weights = [
        enc["w0"], enc["b0"], enc["w1"], enc["b1"],
        enc["w2"], enc["b2"], enc["w3"], enc["b3"],
        dec["w0"], dec["b0"], dec["w1"], dec["b1"],
        dec["w2"], dec["b2"], dec["w3"], dec["b3"],
    ]
    args = [spectrum, cond_slab] + weights

    grid = (B_pad // TB,)
    act_specs = [
        pl.BlockSpec((TB, spectrum_dim), lambda i: (i, 0)),   # spectrum tile
        pl.BlockSpec((TB, LP), lambda i: (i, 0)),             # cond slab tile
    ]
    # Weights/biases: constant block index -> DMA'd once, VMEM-resident for all tiles.
    w_specs = [pl.BlockSpec(w.shape, lambda i: (0, 0)) for w in weights]

    flops = 2 * B_pad * sum(int(w.shape[0]) * int(w.shape[1])
                            for w in weights[0::2])
    bytes_accessed = (sum(int(a.size) * a.dtype.itemsize for a in args)
                      + B_pad * spectrum_dim * 4)

    out = pl.pallas_call(
        _autoencoder_kernel,
        out_shape=jax.ShapeDtypeStruct((B_pad, spectrum_dim), jnp.float32),
        grid=grid,
        in_specs=act_specs + w_specs,
        out_specs=pl.BlockSpec((TB, spectrum_dim), lambda i: (i, 0)),
        compiler_params=pltpu.CompilerParams(
            dimension_semantics=("parallel",),       # megacore split on v7x
            vmem_limit_bytes=32 * 1024 * 1024),      # safe on v5e/v6e/v7x
        cost_estimate=pl.CostEstimate(flops=flops, transcendentals=0,
                                      bytes_accessed=bytes_accessed),
    )(*args)
    return out[:B]


# ---------------------------------------------------------------------------
# Parameter construction (deterministic, synthetic), BN folded, concat fused
# ---------------------------------------------------------------------------
def _make_linear(key, in_f, out_f):
    kw, kb = jax.random.split(key)
    bound = 1.0 / (float(in_f) ** 0.5)
    w = jax.random.uniform(kw, (in_f, out_f), jnp.float32, -bound, bound)
    b = jax.random.uniform(kb, (out_f,), jnp.float32, -bound, bound)
    return w, b


def _make_bn_affine(key, n):
    kg, kb, km, kv = jax.random.split(key, 4)
    gamma = 1.0 + 0.1 * jax.random.normal(kg, (n,), jnp.float32)
    beta = 0.1 * jax.random.normal(kb, (n,), jnp.float32)
    mean = 0.1 * jax.random.normal(km, (n,), jnp.float32)
    var = 1.0 + 0.1 * jax.random.uniform(kv, (n,), jnp.float32)
    scale = gamma / jnp.sqrt(var + BN_EPS)           # eval-mode BN fold
    shift = beta - mean * scale
    return scale, shift


def make_params(key, spectrum_dim, latent_dim, param_dim):
    LP = _round_up(latent_dim + param_dim, 32)       # lane-friendly concat width
    keys = jax.random.split(key, 16)
    enc_dims = [(spectrum_dim, 1024), (1024, 512), (512, 256), (256, latent_dim)]
    dec_dims = [(latent_dim + param_dim, 256), (256, 512), (512, 1024),
                (1024, spectrum_dim)]

    def build(dims, ks_lin, ks_bn):
        out = []
        for i, (fi, fo) in enumerate(dims):
            w, b = _make_linear(ks_lin[i], fi, fo)
            if i < len(dims) - 1:                    # last Linear has no BN/ReLU
                scale, shift = _make_bn_affine(ks_bn[i], fo)
                # y = (x@W + b)*scale + shift == x @ (W*scale) + (b*scale + shift)
                w = w * scale[None, :]
                b = b * scale + shift
            out.append((w.astype(jnp.bfloat16),
                        b.reshape(1, fo).astype(jnp.float32)))
        return out

    enc_list = build(enc_dims, keys[0:4], keys[4:8])
    dec_list = build(dec_dims, keys[8:12], keys[12:16])

    # Lane-pad the encoder's last layer: latent width latent_dim -> LP.
    # Extra output columns (weights and bias) are exactly zero.
    w3, b3 = enc_list[3]
    w3 = jnp.pad(w3, ((0, 0), (0, LP - latent_dim)))
    b3 = jnp.pad(b3, ((0, 0), (0, LP - latent_dim)))
    enc_list[3] = (w3, b3)

    # Fuse the decoder concat into one weight: rows [0:latent_dim] = latent rows,
    # rows [latent_dim:latent_dim+param_dim] = cond rows, remaining rows = 0.
    w0, b0 = dec_list[0]
    w0 = jnp.pad(w0, ((0, LP - (latent_dim + param_dim)), (0, 0)))
    dec_list[0] = (w0, b0)

    enc = {f"w{i}": enc_list[i][0] for i in range(4)}
    enc.update({f"b{i}": enc_list[i][1] for i in range(4)})
    dec = {f"w{i}": dec_list[i][0] for i in range(4)}
    dec.update({f"b{i}": dec_list[i][1] for i in range(4)})
    return enc, dec


# ---------------------------------------------------------------------------
# Pure-JAX reference (identical arithmetic: bf16 weights, f32 accumulate)
# ---------------------------------------------------------------------------
def reference_forward(spectrum, cond, enc, dec, latent_dim):
    LP = dec["w0"].shape[0]
    B, param_dim = cond.shape

    def dense(x, w, b, relu):
        y = jnp.dot(x.astype(w.dtype), w, preferred_element_type=jnp.float32) + b
        return jnp.maximum(y, 0.0) if relu else y

    x = spectrum.astype(jnp.bfloat16)
    x = dense(x, enc["w0"], enc["b0"], True)
    x = dense(x, enc["w1"], enc["b1"], True)
    x = dense(x, enc["w2"], enc["b2"], True)
    latent = dense(x, enc["w3"], enc["b3"], False)

    cond_slab = jnp.zeros((B, LP), jnp.float32).at[
        :, latent_dim:latent_dim + param_dim].set(cond.astype(jnp.float32))
    x = latent + cond_slab
    x = dense(x, dec["w0"], dec["b0"], True)
    x = dense(x, dec["w1"], dec["b1"], True)
    x = dense(x, dec["w2"], dec["b2"], True)
    x = dense(x, dec["w3"], dec["b3"], False)
    return x


if __name__ == "__main__":
    B = 8
    SPECTRUM_DIM = 256
    LATENT_DIM = 16
    PARAM_DIM = 8

    root = jax.random.PRNGKey(0)
    k_params, k_spec, k_cond = jax.random.split(root, 3)

    enc, dec = make_params(k_params, SPECTRUM_DIM, LATENT_DIM, PARAM_DIM)
    spectrum = jax.random.normal(k_spec, (B, SPECTRUM_DIM), jnp.float32)
    cond = jax.random.normal(k_cond, (B, PARAM_DIM), jnp.float32)

    # Single-tile path (small batch fits one grid step).
    out = jax.block_until_ready(
        autoencoder_forward(spectrum, cond, enc, dec, LATENT_DIM))
    ref = reference_forward(spectrum, cond, enc, dec, LATENT_DIM)
    assert out.shape == (B, SPECTRUM_DIM), out.shape
    max_err = float(jnp.max(jnp.abs(out - ref)))
    assert jnp.allclose(out, ref, rtol=2e-2, atol=2e-2), f"mismatch: {max_err}"

    # Multi-tile batch grid path (weights stay resident; batch padded + trimmed).
    B2 = 20
    spectrum2 = jax.random.normal(jax.random.PRNGKey(1), (B2, SPECTRUM_DIM),
                                  jnp.float32)
    cond2 = jax.random.normal(jax.random.PRNGKey(2), (B2, PARAM_DIM), jnp.float32)
    out2 = jax.block_until_ready(
        autoencoder_forward(spectrum2, cond2, enc, dec, LATENT_DIM, tile_b=8))
    ref2 = reference_forward(spectrum2, cond2, enc, dec, LATENT_DIM)
    assert out2.shape == (B2, SPECTRUM_DIM), out2.shape
    max_err2 = float(jnp.max(jnp.abs(out2 - ref2)))
    assert jnp.allclose(out2, ref2, rtol=2e-2, atol=2e-2), f"mismatch: {max_err2}"

    print("KERNEL_OK")
</pallas_src>

<mosaic_0001>
module attributes {stable_mosaic.version = 11 : i64} {
  func.func @_autoencoder_kernel(%arg0: i32, %arg1: memref<8x256xbf16, #tpu.memory_space<vmem>>, %arg2: memref<8x32xf32, #tpu.memory_space<vmem>>, %arg3: memref<256x1024xbf16, #tpu.memory_space<vmem>>, %arg4: memref<1x1024xf32, #tpu.memory_space<vmem>>, %arg5: memref<1024x512xbf16, #tpu.memory_space<vmem>>, %arg6: memref<1x512xf32, #tpu.memory_space<vmem>>, %arg7: memref<512x256xbf16, #tpu.memory_space<vmem>>, %arg8: memref<1x256xf32, #tpu.memory_space<vmem>>, %arg9: memref<256x32xbf16, #tpu.memory_space<vmem>>, %arg10: memref<1x32xf32, #tpu.memory_space<vmem>>, %arg11: memref<32x256xbf16, #tpu.memory_space<vmem>>, %arg12: memref<1x256xf32, #tpu.memory_space<vmem>>, %arg13: memref<256x512xbf16, #tpu.memory_space<vmem>>, %arg14: memref<1x512xf32, #tpu.memory_space<vmem>>, %arg15: memref<512x1024xbf16, #tpu.memory_space<vmem>>, %arg16: memref<1x1024xf32, #tpu.memory_space<vmem>>, %arg17: memref<1024x256xbf16, #tpu.memory_space<vmem>>, %arg18: memref<1x256xf32, #tpu.memory_space<vmem>>, %arg19: memref<8x256xf32, #tpu.memory_space<vmem>>) attributes {dimension_semantics = [#tpu.dimension_semantics<parallel>], iteration_bounds = array<i64: 1>, scalar_prefetch = 0 : i64, scratch_operands = 0 : i64, tpu.core_type = #tpu.core_type<tc>, window_params = [{transform_indices = @transform_0, window_bounds = array<i64: 8, 256>}, {transform_indices = @transform_1, window_bounds = array<i64: 8, 32>}, {pipeline_mode = #tpu.pipeline_mode<synchronous>, transform_indices = @transform_2, window_bounds = array<i64: 256, 1024>}, {pipeline_mode = #tpu.pipeline_mode<synchronous>, transform_indices = @transform_3, window_bounds = array<i64: 1, 1024>}, {pipeline_mode = #tpu.pipeline_mode<synchronous>, transform_indices = @transform_4, window_bounds = array<i64: 1024, 512>}, {pipeline_mode = #tpu.pipeline_mode<synchronous>, transform_indices = @transform_5, window_bounds = array<i64: 1, 512>}, {pipeline_mode = #tpu.pipeline_mode<synchronous>, transform_indices = @transform_6, window_bounds = array<i64: 512, 256>}, {pipeline_mode = #tpu.pipeline_mode<synchronous>, transform_indices = @transform_7, window_bounds = array<i64: 1, 256>}, {pipeline_mode = #tpu.pipeline_mode<synchronous>, transform_indices = @transform_8, window_bounds = array<i64: 256, 32>}, {pipeline_mode = #tpu.pipeline_mode<synchronous>, transform_indices = @transform_9, window_bounds = array<i64: 1, 32>}, {pipeline_mode = #tpu.pipeline_mode<synchronous>, transform_indices = @transform_10, window_bounds = array<i64: 32, 256>}, {pipeline_mode = #tpu.pipeline_mode<synchronous>, transform_indices = @transform_11, window_bounds = array<i64: 1, 256>}, {pipeline_mode = #tpu.pipeline_mode<synchronous>, transform_indices = @transform_12, window_bounds = array<i64: 256, 512>}, {pipeline_mode = #tpu.pipeline_mode<synchronous>, transform_indices = @transform_13, window_bounds = array<i64: 1, 512>}, {pipeline_mode = #tpu.pipeline_mode<synchronous>, transform_indices = @transform_14, window_bounds = array<i64: 512, 1024>}, {pipeline_mode = #tpu.pipeline_mode<synchronous>, transform_indices = @transform_15, window_bounds = array<i64: 1, 1024>}, {pipeline_mode = #tpu.pipeline_mode<synchronous>, transform_indices = @transform_16, window_bounds = array<i64: 1024, 256>}, {pipeline_mode = #tpu.pipeline_mode<synchronous>, transform_indices = @transform_17, window_bounds = array<i64: 1, 256>}, {transform_indices = @transform_18, window_bounds = array<i64: 8, 256>}]} {
    %c0 = arith.constant 0 : index
    %c0_0 = arith.constant 0 : index
    %0 = vector.load %arg1[%c0, %c0_0] : memref<8x256xbf16, #tpu.memory_space<vmem>>, vector<8x256xbf16>
    %c0_1 = arith.constant 0 : index
    %c0_2 = arith.constant 0 : index
    %1 = vector.load %arg3[%c0_1, %c0_2] : memref<256x1024xbf16, #tpu.memory_space<vmem>>, vector<256x1024xbf16>
    %cst = arith.constant dense<0.000000e+00> : vector<8x1024xf32>
    %2 = tpu.matmul %0, %1, %cst {dimension_numbers = #tpu.dot_dimension_numbers<[1], [0], [0], [1], [0, 0, 1, 1], [], []>} : vector<8x256xbf16>, vector<256x1024xbf16>, vector<8x1024xf32> -> vector<8x1024xf32>
    %c0_3 = arith.constant 0 : index
    %c0_4 = arith.constant 0 : index
    %3 = vector.load %arg4[%c0_3, %c0_4] : memref<1x1024xf32, #tpu.memory_space<vmem>>, vector<1x1024xf32>
    %4 = vector.broadcast %3 : vector<1x1024xf32> to vector<8x1024xf32>
    %5 = arith.addf %2, %4 : vector<8x1024xf32>
    %cst_5 = arith.constant 0.000000e+00 : f32
    %6 = vector.broadcast %cst_5 : f32 to vector<8x1024xf32>
    %7 = arith.maximumf %5, %6 : vector<8x1024xf32>
    %8 = arith.truncf %7 : vector<8x1024xf32> to vector<8x1024xbf16>
    %c0_6 = arith.constant 0 : index
    %c0_7 = arith.constant 0 : index
    %9 = vector.load %arg5[%c0_6, %c0_7] : memref<1024x512xbf16, #tpu.memory_space<vmem>>, vector<1024x512xbf16>
    %cst_8 = arith.constant dense<0.000000e+00> : vector<8x512xf32>
    %10 = tpu.matmul %8, %9, %cst_8 {dimension_numbers = #tpu.dot_dimension_numbers<[1], [0], [0], [1], [0, 0, 1, 1], [], []>} : vector<8x1024xbf16>, vector<1024x512xbf16>, vector<8x512xf32> -> vector<8x512xf32>
    %c0_9 = arith.constant 0 : index
    %c0_10 = arith.constant 0 : index
    %11 = vector.load %arg6[%c0_9, %c0_10] : memref<1x512xf32, #tpu.memory_space<vmem>>, vector<1x512xf32>
    %12 = vector.broadcast %11 : vector<1x512xf32> to vector<8x512xf32>
    %13 = arith.addf %10, %12 : vector<8x512xf32>
    %cst_11 = arith.constant 0.000000e+00 : f32
    %14 = vector.broadcast %cst_11 : f32 to vector<8x512xf32>
    %15 = arith.maximumf %13, %14 : vector<8x512xf32>
    %16 = arith.truncf %15 : vector<8x512xf32> to vector<8x512xbf16>
    %c0_12 = arith.constant 0 : index
    %c0_13 = arith.constant 0 : index
    %17 = vector.load %arg7[%c0_12, %c0_13] : memref<512x256xbf16, #tpu.memory_space<vmem>>, vector<512x256xbf16>
    %cst_14 = arith.constant dense<0.000000e+00> : vector<8x256xf32>
    %18 = tpu.matmul %16, %17, %cst_14 {dimension_numbers = #tpu.dot_dimension_numbers<[1], [0], [0], [1], [0, 0, 1, 1], [], []>} : vector<8x512xbf16>, vector<512x256xbf16>, vector<8x256xf32> -> vector<8x256xf32>
    %c0_15 = arith.constant 0 : index
    %c0_16 = arith.constant 0 : index
    %19 = vector.load %arg8[%c0_15, %c0_16] : memref<1x256xf32, #tpu.memory_space<vmem>>, vector<1x256xf32>
    %20 = vector.broadcast %19 : vector<1x256xf32> to vector<8x256xf32>
    %21 = arith.addf %18, %20 : vector<8x256xf32>
    %cst_17 = arith.constant 0.000000e+00 : f32
    %22 = vector.broadcast %cst_17 : f32 to vector<8x256xf32>
    %23 = arith.maximumf %21, %22 : vector<8x256xf32>
    %24 = arith.truncf %23 : vector<8x256xf32> to vector<8x256xbf16>
    %c0_18 = arith.constant 0 : index
    %c0_19 = arith.constant 0 : index
    %25 = vector.load %arg9[%c0_18, %c0_19] : memref<256x32xbf16, #tpu.memory_space<vmem>>, vector<256x32xbf16>
    %cst_20 = arith.constant dense<0.000000e+00> : vector<8x32xf32>
    %26 = tpu.matmul %24, %25, %cst_20 {dimension_numbers = #tpu.dot_dimension_numbers<[1], [0], [0], [1], [0, 0, 1, 1], [], []>} : vector<8x256xbf16>, vector<256x32xbf16>, vector<8x32xf32> -> vector<8x32xf32>
    %c0_21 = arith.constant 0 : index
    %c0_22 = arith.constant 0 : index
    %27 = vector.load %arg10[%c0_21, %c0_22] : memref<1x32xf32, #tpu.memory_space<vmem>>, vector<1x32xf32>
    %28 = vector.broadcast %27 : vector<1x32xf32> to vector<8x32xf32>
    %29 = arith.addf %26, %28 : vector<8x32xf32>
    %c0_23 = arith.constant 0 : index
    %c0_24 = arith.constant 0 : index
    %30 = vector.load %arg2[%c0_23, %c0_24] : memref<8x32xf32, #tpu.memory_space<vmem>>, vector<8x32xf32>
    %31 = arith.addf %29, %30 : vector<8x32xf32>
    %32 = arith.truncf %31 : vector<8x32xf32> to vector<8x32xbf16>
    %c0_25 = arith.constant 0 : index
    %c0_26 = arith.constant 0 : index
    %33 = vector.load %arg11[%c0_25, %c0_26] : memref<32x256xbf16, #tpu.memory_space<vmem>>, vector<32x256xbf16>
    %cst_27 = arith.constant dense<0.000000e+00> : vector<8x256xf32>
    %34 = tpu.matmul %32, %33, %cst_27 {dimension_numbers = #tpu.dot_dimension_numbers<[1], [0], [0], [1], [0, 0, 1, 1], [], []>} : vector<8x32xbf16>, vector<32x256xbf16>, vector<8x256xf32> -> vector<8x256xf32>
    %c0_28 = arith.constant 0 : index
    %c0_29 = arith.constant 0 : index
    %35 = vector.load %arg12[%c0_28, %c0_29] : memref<1x256xf32, #tpu.memory_space<vmem>>, vector<1x256xf32>
    %36 = vector.broadcast %35 : vector<1x256xf32> to vector<8x256xf32>
    %37 = arith.addf %34, %36 : vector<8x256xf32>
    %cst_30 = arith.constant 0.000000e+00 : f32
    %38 = vector.broadcast %cst_30 : f32 to vector<8x256xf32>
    %39 = arith.maximumf %37, %38 : vector<8x256xf32>
    %40 = arith.truncf %39 : vector<8x256xf32> to vector<8x256xbf16>
    %c0_31 = arith.constant 0 : index
    %c0_32 = arith.constant 0 : index
    %41 = vector.load %arg13[%c0_31, %c0_32] : memref<256x512xbf16, #tpu.memory_space<vmem>>, vector<256x512xbf16>
    %cst_33 = arith.constant dense<0.000000e+00> : vector<8x512xf32>
    %42 = tpu.matmul %40, %41, %cst_33 {dimension_numbers = #tpu.dot_dimension_numbers<[1], [0], [0], [1], [0, 0, 1, 1], [], []>} : vector<8x256xbf16>, vector<256x512xbf16>, vector<8x512xf32> -> vector<8x512xf32>
    %c0_34 = arith.constant 0 : index
    %c0_35 = arith.constant 0 : index
    %43 = vector.load %arg14[%c0_34, %c0_35] : memref<1x512xf32, #tpu.memory_space<vmem>>, vector<1x512xf32>
    %44 = vector.broadcast %43 : vector<1x512xf32> to vector<8x512xf32>
    %45 = arith.addf %42, %44 : vector<8x512xf32>
    %cst_36 = arith.constant 0.000000e+00 : f32
    %46 = vector.broadcast %cst_36 : f32 to vector<8x512xf32>
    %47 = arith.maximumf %45, %46 : vector<8x512xf32>
    %48 = arith.truncf %47 : vector<8x512xf32> to vector<8x512xbf16>
    %c0_37 = arith.constant 0 : index
    %c0_38 = arith.constant 0 : index
    %49 = vector.load %arg15[%c0_37, %c0_38] : memref<512x1024xbf16, #tpu.memory_space<vmem>>, vector<512x1024xbf16>
    %cst_39 = arith.constant dense<0.000000e+00> : vector<8x1024xf32>
    %50 = tpu.matmul %48, %49, %cst_39 {dimension_numbers = #tpu.dot_dimension_numbers<[1], [0], [0], [1], [0, 0, 1, 1], [], []>} : vector<8x512xbf16>, vector<512x1024xbf16>, vector<8x1024xf32> -> vector<8x1024xf32>
    %c0_40 = arith.constant 0 : index
    %c0_41 = arith.constant 0 : index
    %51 = vector.load %arg16[%c0_40, %c0_41] : memref<1x1024xf32, #tpu.memory_space<vmem>>, vector<1x1024xf32>
    %52 = vector.broadcast %51 : vector<1x1024xf32> to vector<8x1024xf32>
    %53 = arith.addf %50, %52 : vector<8x1024xf32>
    %cst_42 = arith.constant 0.000000e+00 : f32
    %54 = vector.broadcast %cst_42 : f32 to vector<8x1024xf32>
    %55 = arith.maximumf %53, %54 : vector<8x1024xf32>
    %56 = arith.truncf %55 : vector<8x1024xf32> to vector<8x1024xbf16>
    %c0_43 = arith.constant 0 : index
    %c0_44 = arith.constant 0 : index
    %57 = vector.load %arg17[%c0_43, %c0_44] : memref<1024x256xbf16, #tpu.memory_space<vmem>>, vector<1024x256xbf16>
    %cst_45 = arith.constant dense<0.000000e+00> : vector<8x256xf32>
    %58 = tpu.matmul %56, %57, %cst_45 {dimension_numbers = #tpu.dot_dimension_numbers<[1], [0], [0], [1], [0, 0, 1, 1], [], []>} : vector<8x1024xbf16>, vector<1024x256xbf16>, vector<8x256xf32> -> vector<8x256xf32>
    %c0_46 = arith.constant 0 : index
    %c0_47 = arith.constant 0 : index
    %59 = vector.load %arg18[%c0_46, %c0_47] : memref<1x256xf32, #tpu.memory_space<vmem>>, vector<1x256xf32>
    %60 = vector.broadcast %59 : vector<1x256xf32> to vector<8x256xf32>
    %61 = arith.addf %58, %60 : vector<8x256xf32>
    %c0_48 = arith.constant 0 : index
    %c0_49 = arith.constant 0 : index
    %62 = vector.load %arg19[%c0_48, %c0_49] : memref<8x256xf32, #tpu.memory_space<vmem>>, vector<8x256xf32>
    tpu.vector_store %arg19[%c0_48, %c0_49], %61 {strides = array<i32>} : memref<8x256xf32, #tpu.memory_space<vmem>>, vector<8x256xf32>,
    return
  }
  func.func @transform_0(%arg0: i32) -> (i32, i32) {
    %c0_i32 = arith.constant 0 : i32
    %c0_i32_0 = arith.constant 0 : i32
    return %arg0, %c0_i32 : i32, i32
  }
  func.func @transform_1(%arg0: i32) -> (i32, i32) {
    %c0_i32 = arith.constant 0 : i32
    %c0_i32_0 = arith.constant 0 : i32
    return %arg0, %c0_i32 : i32, i32
  }
  func.func @transform_2(%arg0: i32) -> (i32, i32) {
    %c0_i32 = arith.constant 0 : i32
    %c0_i32_0 = arith.constant 0 : i32
    %c0_i32_1 = arith.constant 0 : i32
    return %c0_i32, %c0_i32_0 : i32, i32
  }
  func.func @transform_3(%arg0: i32) -> (i32, i32) {
    %c0_i32 = arith.constant 0 : i32
    %c0_i32_0 = arith.constant 0 : i32
    %c0_i32_1 = arith.constant 0 : i32
    return %c0_i32, %c0_i32_0 : i32, i32
  }
  func.func @transform_4(%arg0: i32) -> (i32, i32) {
    %c0_i32 = arith.constant 0 : i32
    %c0_i32_0 = arith.constant 0 : i32
    %c0_i32_1 = arith.constant 0 : i32
    return %c0_i32, %c0_i32_0 : i32, i32
  }
  func.func @transform_5(%arg0: i32) -> (i32, i32) {
    %c0_i32 = arith.constant 0 : i32
    %c0_i32_0 = arith.constant 0 : i32
    %c0_i32_1 = arith.constant 0 : i32
    return %c0_i32, %c0_i32_0 : i32, i32
  }
  func.func @transform_6(%arg0: i32) -> (i32, i32) {
    %c0_i32 = arith.constant 0 : i32
    %c0_i32_0 = arith.constant 0 : i32
    %c0_i32_1 = arith.constant 0 : i32
    return %c0_i32, %c0_i32_0 : i32, i32
  }
  func.func @transform_7(%arg0: i32) -> (i32, i32) {
    %c0_i32 = arith.constant 0 : i32
    %c0_i32_0 = arith.constant 0 : i32
    %c0_i32_1 = arith.constant 0 : i32
    return %c0_i32, %c0_i32_0 : i32, i32
  }
  func.func @transform_8(%arg0: i32) -> (i32, i32) {
    %c0_i32 = arith.constant 0 : i32
    %c0_i32_0 = arith.constant 0 : i32
    %c0_i32_1 = arith.constant 0 : i32
    return %c0_i32, %c0_i32_0 : i32, i32
  }
  func.func @transform_9(%arg0: i32) -> (i32, i32) {
    %c0_i32 = arith.constant 0 : i32
    %c0_i32_0 = arith.constant 0 : i32
    %c0_i32_1 = arith.constant 0 : i32
    return %c0_i32, %c0_i32_0 : i32, i32
  }
  func.func @transform_10(%arg0: i32) -> (i32, i32) {
    %c0_i32 = arith.constant 0 : i32
    %c0_i32_0 = arith.constant 0 : i32
    %c0_i32_1 = arith.constant 0 : i32
    return %c0_i32, %c0_i32_0 : i32, i32
  }
  func.func @transform_11(%arg0: i32) -> (i32, i32) {
    %c0_i32 = arith.constant 0 : i32
    %c0_i32_0 = arith.constant 0 : i32
    %c0_i32_1 = arith.constant 0 : i32
    return %c0_i32, %c0_i32_0 : i32, i32
  }
  func.func @transform_12(%arg0: i32) -> (i32, i32) {
    %c0_i32 = arith.constant 0 : i32
    %c0_i32_0 = arith.constant 0 : i32
    %c0_i32_1 = arith.constant 0 : i32
    return %c0_i32, %c0_i32_0 : i32, i32
  }
  func.func @transform_13(%arg0: i32) -> (i32, i32) {
    %c0_i32 = arith.constant 0 : i32
    %c0_i32_0 = arith.constant 0 : i32
    %c0_i32_1 = arith.constant 0 : i32
    return %c0_i32, %c0_i32_0 : i32, i32
  }
  func.func @transform_14(%arg0: i32) -> (i32, i32) {
    %c0_i32 = arith.constant 0 : i32
    %c0_i32_0 = arith.constant 0 : i32
    %c0_i32_1 = arith.constant 0 : i32
    return %c0_i32, %c0_i32_0 : i32, i32
  }
  func.func @transform_15(%arg0: i32) -> (i32, i32) {
    %c0_i32 = arith.constant 0 : i32
    %c0_i32_0 = arith.constant 0 : i32
    %c0_i32_1 = arith.constant 0 : i32
    return %c0_i32, %c0_i32_0 : i32, i32
  }
  func.func @transform_16(%arg0: i32) -> (i32, i32) {
    %c0_i32 = arith.constant 0 : i32
    %c0_i32_0 = arith.constant 0 : i32
    %c0_i32_1 = arith.constant 0 : i32
    return %c0_i32, %c0_i32_0 : i32, i32
  }
  func.func @transform_17(%arg0: i32) -> (i32, i32) {
    %c0_i32 = arith.constant 0 : i32
    %c0_i32_0 = arith.constant 0 : i32
    %c0_i32_1 = arith.constant 0 : i32
    return %c0_i32, %c0_i32_0 : i32, i32
  }
  func.func @transform_18(%arg0: i32) -> (i32, i32) {
    %c0_i32 = arith.constant 0 : i32
    %c0_i32_0 = arith.constant 0 : i32
    return %arg0, %c0_i32 : i32, i32
  }
}

</mosaic_0001>

<bundles_post_ra>
// kernel: tpu_custom_call.1
= control target key start
LH: loop header
LB: loop body
LE: loop exit
PB: predicated region body
PF: predicated region fallthrough
CT: control target
= control target key end

     0   :  { %s12643_s0 = inlined_call_operand.vmem [shape: bf16[8,256], index: 0, kind: input, shape index: {}]   ;;  %s12644_s1 = inlined_call_operand.vmem [shape: f32[8,32], index: 1, kind: input, shape index: {}]   ;;  %s12645_s2 = inlined_call_operand.hbm [shape: bf16[256,1024], index: 2, kind: input, shape index: {}]   ;;  %s12646_s3 = inlined_call_operand.vmem [shape: f32[1,1024], index: 3, kind: input, shape index: {}]   ;;  %s12647_s4 = inlined_call_operand.hbm [shape: bf16[1024,512], index: 4, kind: input, shape index: {}]   ;;  %s12648_s5 = inlined_call_operand.vmem [shape: f32[1,512], index: 5, kind: input, shape index: {}]   ;;  %s12649_s6 = inlined_call_operand.hbm [shape: bf16[512,256], index: 6, kind: input, shape index: {}]   ;;  %s12650_s7 = inlined_call_operand.vmem [shape: f32[1,256], index: 7, kind: input, shape index: {}]   ;;  %s12651_s8 = inlined_call_operand.vmem [shape: bf16[256,32], index: 8, kind: input, shape index: {}]   ;;  %s12652_s9 = inlined_call_operand.vmem [shape: f32[1,32], index: 9, kind: input, shape index: {}]   ;;  %s12653_s10 = inlined_call_operand.vmem [shape: bf16[32,256], index: 10, kind: input, shape index: {}]   ;;  %s12654_s11 = inlined_call_operand.vmem [shape: f32[1,256], index: 11, kind: input, shape index: {}]   ;;  %s12655_s12 = inlined_call_operand.hbm [shape: bf16[256,512], index: 12, kind: input, shape index: {}]   ;;  %s12656_s13 = inlined_call_operand.vmem [shape: f32[1,512], index: 13, kind: input, shape index: {}]   ;;  %s12657_s14 = inlined_call_operand.hbm [shape: bf16[512,1024], index: 14, kind: input, shape index: {}]   ;;  %s12658_s15 = inlined_call_operand.vmem [shape: f32[1,1024], index: 15, kind: input, shape index: {}]   ;;  %s12659_s16 = inlined_call_operand.hbm [shape: bf16[1024,256], index: 16, kind: input, shape index: {}]   ;;  %s12660_s17 = inlined_call_operand.vmem [shape: f32[1,256], index: 17, kind: input, shape index: {}]   ;;  %s12661_s18 = inlined_call_operand.hbm [shape: f32[8,256], index: 18, kind: output, shape index: {}]  }
   0x1   :  { %12662 = sst [smem:[#allocation19_spill]] %s12643_s0 }
   0x2   :  { %12663 = sst [smem:[#allocation20_spill]] %s12644_s1 }
   0x3   :  { %12664 = sst [smem:[#allocation21_spill]] %s12645_s2 }
   0x4   :  { %12665 = sst [smem:[#allocation22_spill]] %s12661_s18 }
   0x5   :  { %23 = vsyncpa [#allocation3], 0 }
   0x6   :  { %24 = vsyncpa [#allocation6], 0 }
   0x7   :  { %25 = vsyncpa [#allocation9], 0 }
   0x8   :  { %26 = vsyncpa [#allocation12], 0  ;;  %s51_s29 = sshll.u32 %s12647_s4, 4  ;;  %s52_s29 = int_to_ptr.hbm [resolvable:$true] %s51_s29 }
   0x9   :  { %27 = vsyncpa [#allocation4], 0  ;;  %s12138_s30 = smov [#allocation5]   ;;  %s89_s20 = sshll.u32 %s12655_s12, 4  ;;  %s90_s20 = int_to_ptr.hbm [resolvable:$true] %s89_s20 }
   0xa   :  { %s53_s0 = sshll.u32 %s12138_s30, 4  ;;  %s12139_s21 = smov 256   ;;  %s54_s0 = int_to_ptr.vmem [resolvable:$true] %s53_s0 }
   0xb   :  { %s12140_s22 = smov 16   ;;  %s12141_s2 = smov [#allocation8]  }
   0xc   :  { %59 = dma.hbm_to_vmem [thread:$0]  %s52_s29, 32768, %s54_s0, [#allocation6], %s12139_s21, %s12139_s21, %s12140_s22  }
   0xd   :  { %s91_s23 = sshll.u32 %s12141_s2, 4  ;;  %s12666_s26 = sld [smem:[#allocation21_spill]]  ;;  %s92_s23 = int_to_ptr.vmem [resolvable:$true] %s91_s23 }
   0xe   :  { %97 = dma.hbm_to_vmem [thread:$0]  %s90_s20, 8192, %s92_s23, [#allocation9], %s12139_s21, %s12139_s21, %s12140_s22  }
   0xf   :  { %s12142_s4 = smov [#allocation2]   ;;  %s66_s12 = sshll.u32 %s12649_s6, 4  ;;  %s67_s12 = int_to_ptr.hbm [resolvable:$true] %s66_s12 }
  0x10   :  { %s38_s28 = sshll.u32 %s12142_s4, 4  ;;  %s12143_s19 = smov 512   ;;  %s39_s28 = int_to_ptr.vmem [resolvable:$true] %s38_s28 }
  0x11   :  { %s12144_s1 = smov 32   ;;  %s12145_s29 = smov [#allocation7]  }
  0x12   :  { %s68_s0 = sshll.u32 %s12145_s29, 4  ;;  %s12146_s2 = smov 128   ;;  %s69_s0 = int_to_ptr.vmem [resolvable:$true] %s68_s0 }
  0x13   :  { %s36_s27 = sshll.u32 %s12666_s26, 4  ;;  %s12147_s24 = smov 8   ;;  %s37_s27 = int_to_ptr.hbm [resolvable:$true] %s36_s27 }
  0x14   :  { %44 = dma.hbm_to_vmem [thread:$0]  %s37_s27, 16384, %s39_s28, [#allocation3], %s12143_s19, %s12143_s19, %s12144_s1  }
  0x15   :  { %74 = dma.hbm_to_vmem [thread:$0]  %s67_s12, 8192, %s69_s0, [#allocation6], %s12146_s2, %s12146_s2, %s12147_s24  }
  0x16   :  { %s104_s20 = sshll.u32 %s12657_s14, 4  ;;  %s12148_s21 = smov [#allocation10]   ;;  %s105_s20 = int_to_ptr.hbm [resolvable:$true] %s104_s20 }
  0x17   :  { %s106_s22 = sshll.u32 %s12148_s21, 4  ;;  %s119_s23 = sshll.u32 %s12659_s16, 4  ;;  %s107_s22 = int_to_ptr.vmem [resolvable:$true] %s106_s22  ;;  %s120_s23 = int_to_ptr.hbm [resolvable:$true] %s119_s23 }
  0x18   :  { %112 = dma.hbm_to_vmem [thread:$0]  %s105_s20, 32768, %s107_s22, [#allocation9], %s12143_s19, %s12143_s19, %s12144_s1  }
  0x19   :  { %s12149_s27 = smov [#allocation11]  }
  0x1a   :  { %s121_s4 = sshll.u32 %s12149_s27, 4  ;;  %s122_s4 = int_to_ptr.vmem [resolvable:$true] %s121_s4 }
  0x1b   :  { %127 = dma.hbm_to_vmem [thread:$0]  %s120_s23, 16384, %s122_s4, [#allocation12], %s12146_s2, %s12146_s2, %s12147_s24  }
  0x1c   :  { %12128 = dma.done.wait [#allocation3], 16384  }
  0x1d   :  { %12129 = vsyncadd [#allocation3], 4294950912 }
  0x1e   :  { %12130 = dma.done.wait [#allocation6], 40960  }
  0x1f   :  { %12131 = vsyncadd [#allocation6], 4294926336 }
  0x20   :  { %12132 = dma.done.wait [#allocation9], 40960  }
  0x21   :  { %12133 = vsyncadd [#allocation9], 4294926336 }
  0x22   :  { %12134 = dma.done.wait [#allocation12], 16384  }
  0x23   :  { %12135 = vsyncadd [#allocation12], 4294950912  ;;  %v7588_v0 = vld [vmem:[#allocation2 + $0x1c0] sm:$0xf]  ;;  %v11084_v5 = vld [vmem:[#allocation2 + $0x1c4] sm:$0xf] }
  0x24   :  { %v11088_v1 = vld [vmem:[#allocation2 + $0x1dc] sm:$0xf0]  ;;  %v7590_v6 = vld [vmem:[#allocation2 + $0x1e0] sm:$0xf0]  ;;  %s12667_s28 = sld [smem:[#allocation19_spill]]  ;;  %vm3832_vm0 = vcmask 261120  }
  0x25   :  { %v7844_v2 = vld [vmem:[#allocation2 + $0x3c0] sm:$0xf]  ;;  %v7589_v3 = vor.u32 %v11088_v1, %v7588_v0  ;;  %v7593_v8 = vor.u32 %v11084_v5, %v7590_v6  ;;  %v11148_v9 = vld [vmem:[#allocation2 + $0x3c4] sm:$0xf]  ;;  %s12668_s24 = sld [smem:[#allocation20_spill]] }
  0x26   :  { %v11152_v4 = vld [vmem:[#allocation2 + $0x3dc] sm:$0xf0]  ;;  %v7846_v10 = vld [vmem:[#allocation2 + $0x3e0] sm:$0xf0]  ;;  %s12669_s27 = sld [smem:[#allocation22_spill]] }
  0x27   :  { %v7845_v7 = vor.u32 %v11152_v4, %v7844_v2  ;;  %v7556_v11 = vld [vmem:[#allocation2 + $0x180] sm:$0xf]  ;;  %949 = vmatpush.bf16.msra.mxu0 %v7589_v3  ;;  %v7849_v12 = vor.u32 %v11148_v9, %v7846_v10  ;;  %975 = vmatpush.bf16.msra.mxu2 %v7593_v8  ;;  %v11076_v18 = vld [vmem:[#allocation2 + $0x184] sm:$0xf] }
  0x28   :  { %v11080_v13 = vld [vmem:[#allocation2 + $0x19c] sm:$0xf0]  ;;  %v7558_v19 = vld [vmem:[#allocation2 + $0x1a0] sm:$0xf0] }
  0x29   :  { %v7812_v14 = vld [vmem:[#allocation2 + $0x380] sm:$0xf]  ;;  %962 = vmatpush.bf16.msra.mxu1 %v7845_v7  ;;  %v7557_v16 = vor.u32 %v11080_v13, %v7556_v11  ;;  %v11140_v20 = vld [vmem:[#allocation2 + $0x384] sm:$0xf]  ;;  %988 = vmatpush.bf16.msra.mxu3 %v7849_v12  ;;  %v7561_v21 = vor.u32 %v11076_v18, %v7558_v19 }
  0x2a   :  { %v11144_v15 = vld [vmem:[#allocation2 + $0x39c] sm:$0xf0]  ;;  %v7814_v22 = vld [vmem:[#allocation2 + $0x3a0] sm:$0xf0] }
  0x2b   :  { %v7813_v17 = vor.u32 %v11144_v15, %v7812_v14  ;;  %v7524_v23 = vld [vmem:[#allocation2 + $0x140] sm:$0xf]  ;;  %v7817_v25 = vor.u32 %v11140_v20, %v7814_v22  ;;  %v11068_v28 = vld [vmem:[#allocation2 + $0x144] sm:$0xf]  ;;  %950 = vmatpush.bf16.msra.mxu0 %v7557_v16  ;;  %976 = vmatpush.bf16.msra.mxu2 %v7561_v21 }
  0x2c   :  { %v11072_v24 = vld [vmem:[#allocation2 + $0x15c] sm:$0xf0]  ;;  %v7526_v30 = vld [vmem:[#allocation2 + $0x160] sm:$0xf0]  ;;  %s7349_s4 = sshll.u32 %s12669_s27, 4  ;;  %s7350_s4 = int_to_ptr.hbm [resolvable:$true] %s7349_s4 }
  0x2d   :  { %v7780_v26 = vld [vmem:[#allocation2 + $0x340] sm:$0xf]  ;;  %v7525_v29 = vor.u32 %v11072_v24, %v7524_v23  ;;  %v11132_v31 = vld [vmem:[#allocation2 + $0x344] sm:$0xf]  ;;  %963 = vmatpush.bf16.msra.mxu1 %v7813_v17  ;;  %v7529_v34 = vor.u32 %v11068_v28, %v7526_v30  ;;  %989 = vmatpush.bf16.msra.mxu3 %v7817_v25  ;;  %v7596_v28 = vld [vmem:[#allocation2 + $0x1c8] sm:$0xf] }
  0x2e   :  { %v11136_v27 = vld [vmem:[#allocation2 + $0x35c] sm:$0xf0]  ;;  %v7782_v32 = vld [vmem:[#allocation2 + $0x360] sm:$0xf0]  ;;  %v7852_v30 = vld [vmem:[#allocation2 + $0x3c8] sm:$0xf] }
  0x2f   :  { %v7781_v33 = vor.u32 %v11136_v27, %v7780_v26  ;;  %v7492_v35 = vld [vmem:[#allocation2 + $0x100] sm:$0xf]  ;;  %v7785_v38 = vor.u32 %v11132_v31, %v7782_v32  ;;  %v11060_v40 = vld [vmem:[#allocation2 + $0x104] sm:$0xf]  ;;  %951 = vmatpush.bf16.msra.mxu0 %v7525_v29  ;;  %977 = vmatpush.bf16.msra.mxu2 %v7529_v34  ;;  %v11089_v29 = vld [vmem:[#allocation2 + $0x1e4] sm:$0xf0] }
  0x30   :  { %v11064_v36 = vld [vmem:[#allocation2 + $0x11c] sm:$0xf0]  ;;  %v7494_v41 = vld [vmem:[#allocation2 + $0x120] sm:$0xf0]  ;;  %v11153_v32 = vld [vmem:[#allocation2 + $0x3e4] sm:$0xf0] }
  0x31   :  { %v7748_v37 = vld [vmem:[#allocation2 + $0x300] sm:$0xf]  ;;  %v11124_v42 = vld [vmem:[#allocation2 + $0x304] sm:$0xf]  ;;  %v7493_v44 = vor.u32 %v11064_v36, %v7492_v35  ;;  %964 = vmatpush.bf16.msra.mxu1 %v7781_v33  ;;  %v7497_v46 = vor.u32 %v11060_v40, %v7494_v41  ;;  %990 = vmatpush.bf16.msra.mxu3 %v7785_v38  ;;  %v11085_v33 = vld [vmem:[#allocation2 + $0x1cc] sm:$0xf]  ;;  %v7597_v40 = vor.u32 %v11089_v29, %v7596_v28 }
  0x32   :  { %v11128_v39 = vld [vmem:[#allocation2 + $0x31c] sm:$0xf0]  ;;  %v7750_v43 = vld [vmem:[#allocation2 + $0x320] sm:$0xf0]  ;;  %v7598_v34 = vld [vmem:[#allocation2 + $0x1e8] sm:$0xf0]  ;;  %v7853_v41 = vor.u32 %v11153_v32, %v7852_v30 }
  0x33   :  { %v7749_v45 = vor.u32 %v11128_v39, %v7748_v37  ;;  %v7460_v47 = vld [vmem:[#allocation2 + $0xc0] sm:$0xf]  ;;  %v7753_v50 = vor.u32 %v11124_v42, %v7750_v43  ;;  %v11052_v52 = vld [vmem:[#allocation2 + $0xc4] sm:$0xf]  ;;  %952 = vmatpush.bf16.msra.mxu0 %v7493_v44  ;;  %978 = vmatpush.bf16.msra.mxu2 %v7497_v46  ;;  %v11149_v37 = vld [vmem:[#allocation2 + $0x3cc] sm:$0xf]  ;;  %v7601_v42 = vor.u32 %v11085_v33, %v7598_v34 }
  0x34   :  { %v11056_v48 = vld [vmem:[#allocation2 + $0xdc] sm:$0xf0]  ;;  %v7462_v53 = vld [vmem:[#allocation2 + $0xe0] sm:$0xf0]  ;;  %v7854_v38 = vld [vmem:[#allocation2 + $0x3e8] sm:$0xf0] }
  0x35   :  { %v7716_v49 = vld [vmem:[#allocation2 + $0x2c0] sm:$0xf]  ;;  %v11116_v54 = vld [vmem:[#allocation2 + $0x2c4] sm:$0xf]  ;;  %v7461_v56 = vor.u32 %v11056_v48, %v7460_v47  ;;  %965 = vmatpush.bf16.msra.mxu1 %v7749_v45  ;;  %v7465_v58 = vor.u32 %v11052_v52, %v7462_v53  ;;  %991 = vmatpush.bf16.msra.mxu3 %v7753_v50  ;;  %v7564_v43 = vld [vmem:[#allocation2 + $0x188] sm:$0xf]  ;;  %v7857_v46 = vor.u32 %v11149_v37, %v7854_v38 }
  0x36   :  { %v11120_v51 = vld [vmem:[#allocation2 + $0x2dc] sm:$0xf0]  ;;  %v7718_v55 = vld [vmem:[#allocation2 + $0x2e0] sm:$0xf0]  ;;  %v11081_v44 = vld [vmem:[#allocation2 + $0x1a4] sm:$0xf0] }
  0x37   :  { %v7717_v57 = vor.u32 %v11120_v51, %v7716_v49  ;;  %v7428_v59 = vld [vmem:[#allocation2 + $0x80] sm:$0xf]  ;;  %v7721_v62 = vor.u32 %v11116_v54, %v7718_v55  ;;  %v11044_v0 = vld [vmem:[#allocation2 + $0x84] sm:$0xf]  ;;  %953 = vmatpush.bf16.msra.mxu0 %v7461_v56  ;;  %979 = vmatpush.bf16.msra.mxu2 %v7465_v58  ;;  %v7820_v45 = vld [vmem:[#allocation2 + $0x388] sm:$0xf]  ;;  %v7565_v53 = vor.u32 %v11081_v44, %v7564_v43 }
  0x38   :  { %v11048_v60 = vld [vmem:[#allocation2 + $0x9c] sm:$0xf0]  ;;  %v7430_v1 = vld [vmem:[#allocation2 + $0xa0] sm:$0xf0]  ;;  %v11145_v47 = vld [vmem:[#allocation2 + $0x3a4] sm:$0xf0] }
  0x39   :  { %v7684_v61 = vld [vmem:[#allocation2 + $0x280] sm:$0xf]  ;;  %v11108_v2 = vld [vmem:[#allocation2 + $0x284] sm:$0xf]  ;;  %v7429_v4 = vor.u32 %v11048_v60, %v7428_v59  ;;  %966 = vmatpush.bf16.msra.mxu1 %v7717_v57  ;;  %v7433_v6 = vor.u32 %v11044_v0, %v7430_v1  ;;  %992 = vmatpush.bf16.msra.mxu3 %v7721_v62  ;;  %v11077_v48 = vld [vmem:[#allocation2 + $0x18c] sm:$0xf]  ;;  %v7821_v56 = vor.u32 %v11145_v47, %v7820_v45 }
  0x3a   :  { %v11112_v63 = vld [vmem:[#allocation2 + $0x29c] sm:$0xf0]  ;;  %v7686_v3 = vld [vmem:[#allocation2 + $0x2a0] sm:$0xf0]  ;;  %v7566_v49 = vld [vmem:[#allocation2 + $0x1a8] sm:$0xf0] }
  0x3b   :  { %v7685_v5 = vor.u32 %v11112_v63, %v7684_v61  ;;  %v7396_v7 = vld [vmem:[#allocation2 + $0x40] sm:$0xf]  ;;  %v7689_v10 = vor.u32 %v11108_v2, %v7686_v3  ;;  %v11036_v12 = vld [vmem:[#allocation2 + $0x44] sm:$0xf]  ;;  %954 = vmatpush.bf16.msra.mxu0 %v7429_v4  ;;  %980 = vmatpush.bf16.msra.mxu2 %v7433_v6  ;;  %v11141_v50 = vld [vmem:[#allocation2 + $0x38c] sm:$0xf]  ;;  %v7569_v57 = vor.u32 %v11077_v48, %v7566_v49 }
  0x3c   :  { %v11040_v8 = vld [vmem:[#allocation2 + $0x5c] sm:$0xf0]  ;;  %v7398_v13 = vld [vmem:[#allocation2 + $0x60] sm:$0xf0]  ;;  %v7822_v51 = vld [vmem:[#allocation2 + $0x3a8] sm:$0xf0] }
  0x3d   :  { %v7652_v9 = vld [vmem:[#allocation2 + $0x240] sm:$0xf]  ;;  %v11100_v14 = vld [vmem:[#allocation2 + $0x244] sm:$0xf]  ;;  %v7397_v16 = vor.u32 %v11040_v8, %v7396_v7  ;;  %967 = vmatpush.bf16.msra.mxu1 %v7685_v5  ;;  %v7401_v20 = vor.u32 %v11036_v12, %v7398_v13  ;;  %993 = vmatpush.bf16.msra.mxu3 %v7689_v10  ;;  %v7532_v58 = vld [vmem:[#allocation2 + $0x148] sm:$0xf]  ;;  %v7825_v61 = vor.u32 %v11141_v50, %v7822_v51 }
  0x3e   :  { %v11104_v11 = vld [vmem:[#allocation2 + $0x25c] sm:$0xf0]  ;;  %v7654_v15 = vld [vmem:[#allocation2 + $0x260] sm:$0xf0]  ;;  %v11073_v59 = vld [vmem:[#allocation2 + $0x164] sm:$0xf0] }
  0x3f   :  { %v7364_v17 = vld [vmem:[#allocation2] sm:$0xf]  ;;  %v7653_v19 = vor.u32 %v11104_v11, %v7652_v9  ;;  %v11028_v23 = vld [vmem:[#allocation2 + $0x4] sm:$0xf]  ;;  %v7657_v24 = vor.u32 %v11100_v14, %v7654_v15  ;;  %955 = vmatpush.bf16.msra.mxu0 %v7397_v16  ;;  %981 = vmatpush.bf16.msra.mxu2 %v7401_v20  ;;  %v7788_v60 = vld [vmem:[#allocation2 + $0x348] sm:$0xf]  ;;  %v7533_v5 = vor.u32 %v11073_v59, %v7532_v58 }
  0x40   :  { %v11032_v18 = vld [vmem:[#allocation2 + $0x1c] sm:$0xf0]  ;;  %v7366_v25 = vld [vmem:[#allocation2 + $0x20] sm:$0xf0]  ;;  %v11137_v62 = vld [vmem:[#allocation2 + $0x364] sm:$0xf0] }
  0x41   :  { %v7620_v21 = vld [vmem:[#allocation2 + $0x200] sm:$0xf]  ;;  %v11092_v26 = vld [vmem:[#allocation2 + $0x204] sm:$0xf]  ;;  %v7365_v31 = vor.u32 %v11032_v18, %v7364_v17  ;;  %968 = vmatpush.bf16.msra.mxu1 %v7653_v19  ;;  %v7369_v36 = vor.u32 %v11028_v23, %v7366_v25  ;;  %994 = vmatpush.bf16.msra.mxu3 %v7657_v24  ;;  %v11069_v63 = vld [vmem:[#allocation2 + $0x14c] sm:$0xf]  ;;  %v7789_v6 = vor.u32 %v11137_v62, %v7788_v60 }
  0x42   :  { %v11096_v22 = vld [vmem:[#allocation2 + $0x21c] sm:$0xf0]  ;;  %v7622_v27 = vld [vmem:[#allocation2 + $0x220] sm:$0xf0]  ;;  %v7534_v0 = vld [vmem:[#allocation2 + $0x168] sm:$0xf0] }
  0x43   :  { %v7621_v35 = vor.u32 %v11096_v22, %v7620_v21  ;;  %v7625_v39 = vor.u32 %v11092_v26, %v7622_v27  ;;  %956 = vmatpush.bf16.msra.mxu0 %v7365_v31  ;;  %982 = vmatpush.bf16.msra.mxu2 %v7369_v36  ;;  %v155_v52 = vld [vmem:[%s12667_s28] sm:$0xff]  ;;  %v11133_v2 = vld [vmem:[#allocation2 + $0x34c] sm:$0xf]  ;;  %v7537_v7 = vor.u32 %v11069_v63, %v7534_v0  ;;  %v7500_v8 = vld [vmem:[#allocation2 + $0x108] sm:$0xf] }
  0x44   :  { %v303_v54 = vunpack.c.l.b16 %v155_v52  ;;  %v304_v55 = vunpack.c.h.b16 %v155_v52  ;;  %v7790_v3 = vld [vmem:[#allocation2 + $0x368] sm:$0xf0]  ;;  %v11065_v9 = vld [vmem:[#allocation2 + $0x124] sm:$0xf0] }
  0x45   :  { %969 = vmatpush.bf16.msra.mxu1 %v7621_v35  ;;  %995 = vmatpush.bf16.msra.mxu3 %v7625_v39  ;;  %v7756_v10 = vld [vmem:[#allocation2 + $0x308] sm:$0xf]  ;;  %v7793_v11 = vor.u32 %v11133_v2, %v7790_v3  ;;  %v11061_v13 = vld [vmem:[#allocation2 + $0x10c] sm:$0xf]  ;;  %v7501_v17 = vor.u32 %v11065_v9, %v7500_v8  ;;  %v7604_v2 = vld [vmem:[#allocation2 + $0x1d0] sm:$0xf] }
  0x46   :  { %v12267_v1 = vpack.c.b16 %v303_v54, %v303_v54  ;;  %v12269_v4 = vpack.c.b16 %v304_v55, %v304_v55  ;;  %v11129_v12 = vld [vmem:[#allocation2 + $0x324] sm:$0xf0]  ;;  %v7502_v14 = vld [vmem:[#allocation2 + $0x128] sm:$0xf0]  ;;  %v11090_v3 = vld [vmem:[#allocation2 + $0x1ec] sm:$0xf0] }
  0x47   :  { %1001 = vmatpush.bf16.msrb.mxu0 %v7597_v40  ;;  %1027 = vmatpush.bf16.msrb.mxu2 %v7601_v42  ;;  %v11125_v15 = vld [vmem:[#allocation2 + $0x30c] sm:$0xf]  ;;  %v7757_v18 = vor.u32 %v11129_v12, %v7756_v10  ;;  %v7505_v19 = vor.u32 %v11061_v13, %v7502_v14  ;;  %v7468_v20 = vld [vmem:[#allocation2 + $0xc8] sm:$0xf]  ;;  %v11086_v8 = vld [vmem:[#allocation2 + $0x1d4] sm:$0xf] }
  0x48   :  { %983 = vmatmul.bf16.vlgmr.msra.gmra.mxu2 %v12267_v1  ;;  %957 = vmatmul.bf16.vlgmr.msra.gmra.mxu0 %v12267_v1  ;;  %v7758_v16 = vld [vmem:[#allocation2 + $0x328] sm:$0xf0]  ;;  %v11057_v21 = vld [vmem:[#allocation2 + $0xe4] sm:$0xf0]  ;;  %v7606_v9 = vld [vmem:[#allocation2 + $0x1f0] sm:$0xf0] }
  0x49   :  { %1014 = vmatpush.bf16.msrb.mxu1 %v7853_v41  ;;  %1040 = vmatpush.bf16.msrb.mxu3 %v7857_v46  ;;  %v7724_v22 = vld [vmem:[#allocation2 + $0x2c8] sm:$0xf]  ;;  %v7761_v23 = vor.u32 %v11125_v15, %v7758_v16  ;;  %v11053_v25 = vld [vmem:[#allocation2 + $0xcc] sm:$0xf]  ;;  %v7469_v29 = vor.u32 %v11057_v21, %v7468_v20  ;;  %v11150_v12 = vld [vmem:[#allocation2 + $0x3d4] sm:$0xf]  ;;  %v7605_v15 = vor.u32 %v11090_v3, %v7604_v2 }
  0x4a   :  { %970 = vmatmul.bf16.vlgmr.msra.gmra.mxu1 %v12269_v4  ;;  %996 = vmatmul.bf16.vlgmr.msra.gmra.mxu3 %v12269_v4  ;;  %v11121_v24 = vld [vmem:[#allocation2 + $0x2e4] sm:$0xf0]  ;;  %v7470_v26 = vld [vmem:[#allocation2 + $0xe8] sm:$0xf0]  ;;  %v7862_v13 = vld [vmem:[#allocation2 + $0x3f0] sm:$0xf0] }
  0x4b   :  { %1002 = vmatpush.bf16.msrb.mxu0 %v7565_v53  ;;  %1028 = vmatpush.bf16.msrb.mxu2 %v7569_v57  ;;  %v11117_v27 = vld [vmem:[#allocation2 + $0x2cc] sm:$0xf]  ;;  %v7725_v30 = vor.u32 %v11121_v24, %v7724_v22  ;;  %v7473_v31 = vor.u32 %v11053_v25, %v7470_v26  ;;  %v7436_v32 = vld [vmem:[#allocation2 + $0x88] sm:$0xf]  ;;  %v7828_v20 = vld [vmem:[#allocation2 + $0x390] sm:$0xf]  ;;  %v7865_v21 = vor.u32 %v11150_v12, %v7862_v13 }
  0x4c   :  { %v7726_v28 = vld [vmem:[#allocation2 + $0x2e8] sm:$0xf0]  ;;  %v11049_v33 = vld [vmem:[#allocation2 + $0xa4] sm:$0xf0]  ;;  %v11146_v22 = vld [vmem:[#allocation2 + $0x3ac] sm:$0xf0] }
  0x4d   :  { %1015 = vmatpush.bf16.msrb.mxu1 %v7821_v56  ;;  %1041 = vmatpush.bf16.msrb.mxu3 %v7825_v61  ;;  %v7692_v34 = vld [vmem:[#allocation2 + $0x288] sm:$0xf]  ;;  %v7729_v35 = vor.u32 %v11117_v27, %v7726_v28  ;;  %v11045_v37 = vld [vmem:[#allocation2 + $0x8c] sm:$0xf]  ;;  %v7437_v41 = vor.u32 %v11049_v33, %v7436_v32  ;;  %v7574_v24 = vld [vmem:[#allocation2 + $0x1b0] sm:$0xf0]  ;;  %v7829_v28 = vor.u32 %v11146_v22, %v7828_v20 }
  0x4e   :  { %v11113_v36 = vld [vmem:[#allocation2 + $0x2a4] sm:$0xf0]  ;;  %v7438_v38 = vld [vmem:[#allocation2 + $0xa8] sm:$0xf0]  ;;  %v11142_v25 = vld [vmem:[#allocation2 + $0x394] sm:$0xf] }
  0x4f   :  { %1003 = vmatpush.bf16.msrb.mxu0 %v7533_v5  ;;  %1029 = vmatpush.bf16.msrb.mxu2 %v7537_v7  ;;  %v11109_v39 = vld [vmem:[#allocation2 + $0x28c] sm:$0xf]  ;;  %v7693_v42 = vor.u32 %v11113_v36, %v7692_v34  ;;  %v7441_v43 = vor.u32 %v11045_v37, %v7438_v38  ;;  %v7404_v44 = vld [vmem:[#allocation2 + $0x48] sm:$0xf]  ;;  %v7860_v5 = vld [vmem:[#allocation2 + $0x3d0] sm:$0xf] }
  0x50   :  { %v7694_v40 = vld [vmem:[#allocation2 + $0x2a8] sm:$0xf0]  ;;  %v11041_v45 = vld [vmem:[#allocation2 + $0x64] sm:$0xf0]  ;;  %v11154_v7 = vld [vmem:[#allocation2 + $0x3ec] sm:$0xf0] }
  0x51   :  { %1016 = vmatpush.bf16.msrb.mxu1 %v7789_v6  ;;  %1042 = vmatpush.bf16.msrb.mxu3 %v7793_v11  ;;  %v7660_v46 = vld [vmem:[#allocation2 + $0x248] sm:$0xf]  ;;  %v7697_v47 = vor.u32 %v11109_v39, %v7694_v40  ;;  %v11037_v49 = vld [vmem:[#allocation2 + $0x4c] sm:$0xf]  ;;  %v7405_v53 = vor.u32 %v11041_v45, %v7404_v44  ;;  %v7861_v16 = vor.u32 %v11154_v7, %v7860_v5  ;;  %v7830_v26 = vld [vmem:[#allocation2 + $0x3b0] sm:$0xf0] }
  0x52   :  { %v11105_v48 = vld [vmem:[#allocation2 + $0x264] sm:$0xf0]  ;;  %v7406_v50 = vld [vmem:[#allocation2 + $0x68] sm:$0xf0]  ;;  %v7796_v32 = vld [vmem:[#allocation2 + $0x350] sm:$0xf]  ;;  %v7833_v33 = vor.u32 %v11142_v25, %v7830_v26 }
  0x53   :  { %1004 = vmatpush.bf16.msrb.mxu0 %v7501_v17  ;;  %1030 = vmatpush.bf16.msrb.mxu2 %v7505_v19  ;;  %v11101_v51 = vld [vmem:[#allocation2 + $0x24c] sm:$0xf]  ;;  %v7372_v54 = vld [vmem:[#allocation2 + $0x8] sm:$0xf]  ;;  %v7661_v56 = vor.u32 %v11105_v48, %v7660_v46  ;;  %v7409_v57 = vor.u32 %v11037_v49, %v7406_v50  ;;  %v7609_v17 = vor.u32 %v11086_v8, %v7606_v9  ;;  %v11082_v19 = vld [vmem:[#allocation2 + $0x1ac] sm:$0xf0] }
  0x54   :  { %v7662_v52 = vld [vmem:[#allocation2 + $0x268] sm:$0xf0]  ;;  %v11033_v55 = vld [vmem:[#allocation2 + $0x24] sm:$0xf0]  ;;  %v11138_v34 = vld [vmem:[#allocation2 + $0x36c] sm:$0xf0] }
  0x55   :  { %1017 = vmatpush.bf16.msrb.mxu1 %v7757_v18  ;;  %1043 = vmatpush.bf16.msrb.mxu3 %v7761_v23  ;;  %v7628_v58 = vld [vmem:[#allocation2 + $0x208] sm:$0xf]  ;;  %v11029_v60 = vld [vmem:[#allocation2 + $0xc] sm:$0xf]  ;;  %v7665_v61 = vor.u32 %v11101_v51, %v7662_v52  ;;  %v7373_v6 = vor.u32 %v11033_v55, %v7372_v54  ;;  %v7572_v18 = vld [vmem:[#allocation2 + $0x190] sm:$0xf]  ;;  %v7797_v40 = vor.u32 %v11138_v34, %v7796_v32 }
  0x56   :  { %v11097_v59 = vld [vmem:[#allocation2 + $0x224] sm:$0xf0]  ;;  %v7374_v62 = vld [vmem:[#allocation2 + $0x28] sm:$0xf0]  ;;  %v11078_v23 = vld [vmem:[#allocation2 + $0x194] sm:$0xf]  ;;  %v7573_v27 = vor.u32 %v11082_v19, %v7572_v18 }
  0x57   :  { %1005 = vmatpush.bf16.msrb.mxu0 %v7469_v29  ;;  %1031 = vmatpush.bf16.msrb.mxu2 %v7473_v31  ;;  %v11093_v63 = vld [vmem:[#allocation2 + $0x20c] sm:$0xf]  ;;  %v7629_v10 = vor.u32 %v11097_v59, %v7628_v58  ;;  %v7377_v11 = vor.u32 %v11029_v60, %v7374_v62  ;;  %v7577_v29 = vor.u32 %v11078_v23, %v7574_v24  ;;  %v11074_v31 = vld [vmem:[#allocation2 + $0x16c] sm:$0xf0]  ;;  %v7542_v36 = vld [vmem:[#allocation2 + $0x170] sm:$0xf0] }
  0x58   :  { %v7630_v0 = vld [vmem:[#allocation2 + $0x228] sm:$0xf0]  ;;  %v11134_v37 = vld [vmem:[#allocation2 + $0x354] sm:$0xf]  ;;  %v7764_v44 = vld [vmem:[#allocation2 + $0x310] sm:$0xf] }
  0x59   :  { %1018 = vmatpush.bf16.msrb.mxu1 %v7725_v30  ;;  %1044 = vmatpush.bf16.msrb.mxu3 %v7729_v35  ;;  %v7633_v14 = vor.u32 %v11093_v63, %v7630_v0  ;;  %v7540_v30 = vld [vmem:[#allocation2 + $0x150] sm:$0xf]  ;;  %v11070_v35 = vld [vmem:[#allocation2 + $0x154] sm:$0xf] }
  0x5a   :  { %v7798_v38 = vld [vmem:[#allocation2 + $0x370] sm:$0xf0]  ;;  %v7541_v39 = vor.u32 %v11074_v31, %v7540_v30  ;;  %v11130_v46 = vld [vmem:[#allocation2 + $0x32c] sm:$0xf0] }
  0x5b   :  { %1006 = vmatpush.bf16.msrb.mxu0 %v7437_v41  ;;  %1032 = vmatpush.bf16.msrb.mxu2 %v7441_v43  ;;  %v7545_v41 = vor.u32 %v11070_v35, %v7542_v36  ;;  %v11066_v43 = vld [vmem:[#allocation2 + $0x12c] sm:$0xf0]  ;;  %v7801_v45 = vor.u32 %v11134_v37, %v7798_v38  ;;  %v7510_v48 = vld [vmem:[#allocation2 + $0x130] sm:$0xf0]  ;;  %v7765_v52 = vor.u32 %v11130_v46, %v7764_v44  ;;  %v7612_v37 = vld [vmem:[#allocation2 + $0x1d8] sm:$0xf] }
  0x5c   :  { %v11126_v49 = vld [vmem:[#allocation2 + $0x314] sm:$0xf]  ;;  %v7476_v54 = vld [vmem:[#allocation2 + $0xd0] sm:$0xf]  ;;  %v11091_v38 = vld [vmem:[#allocation2 + $0x1f4] sm:$0xf0] }
  0x5d   :  { %1019 = vmatpush.bf16.msrb.mxu1 %v7693_v42  ;;  %1045 = vmatpush.bf16.msrb.mxu3 %v7697_v47  ;;  %v7508_v42 = vld [vmem:[#allocation2 + $0x110] sm:$0xf]  ;;  %v11062_v47 = vld [vmem:[#allocation2 + $0x114] sm:$0xf]  ;;  %v11151_v46 = vld [vmem:[#allocation2 + $0x3dc] sm:$0xf] }
  0x5e   :  { %v7766_v50 = vld [vmem:[#allocation2 + $0x330] sm:$0xf0]  ;;  %v7509_v51 = vor.u32 %v11066_v43, %v7508_v42  ;;  %v11058_v55 = vld [vmem:[#allocation2 + $0xec] sm:$0xf0]  ;;  %v11087_v42 = vld [vmem:[#allocation2 + $0x1dc] sm:$0xf] }
  0x5f   :  { %1007 = vmatpush.bf16.msrb.mxu0 %v7405_v53  ;;  %1033 = vmatpush.bf16.msrb.mxu2 %v7409_v57  ;;  %v7513_v53 = vor.u32 %v11062_v47, %v7510_v48  ;;  %v7769_v57 = vor.u32 %v11126_v49, %v7766_v50  ;;  %v11122_v58 = vld [vmem:[#allocation2 + $0x2ec] sm:$0xf0]  ;;  %v11054_v59 = vld [vmem:[#allocation2 + $0xd4] sm:$0xf]  ;;  %v7477_v63 = vor.u32 %v11058_v55, %v7476_v54  ;;  %v7614_v43 = vld [vmem:[#allocation2 + $0x1f8] sm:$0xf0] }
  0x60   :  { %v7478_v60 = vld [vmem:[#allocation2 + $0xf0] sm:$0xf0]  ;;  %v7444_v3 = vld [vmem:[#allocation2 + $0x90] sm:$0xf]  ;;  %v7870_v47 = vld [vmem:[#allocation2 + $0x3f8] sm:$0xf0]  ;;  %v7613_v49 = vor.u32 %v11091_v38, %v7612_v37 }
  0x61   :  { %1020 = vmatpush.bf16.msrb.mxu1 %v7661_v56  ;;  %1046 = vmatpush.bf16.msrb.mxu3 %v7665_v61  ;;  %v7732_v56 = vld [vmem:[#allocation2 + $0x2d0] sm:$0xf]  ;;  %v11118_v61 = vld [vmem:[#allocation2 + $0x2d4] sm:$0xf]  ;;  %v7481_v2 = vor.u32 %v11054_v59, %v7478_v60  ;;  %v7836_v54 = vld [vmem:[#allocation2 + $0x398] sm:$0xf]  ;;  %v7873_v55 = vor.u32 %v11151_v46, %v7870_v47 }
  0x62   :  { %v7734_v62 = vld [vmem:[#allocation2 + $0x2f0] sm:$0xf0]  ;;  %v7733_v0 = vor.u32 %v11122_v58, %v7732_v56  ;;  %v11050_v5 = vld [vmem:[#allocation2 + $0xac] sm:$0xf0]  ;;  %v11147_v56 = vld [vmem:[#allocation2 + $0x3b4] sm:$0xf0] }
  0x63   :  { %1008 = vmatpush.bf16.msrb.mxu0 %v7373_v6  ;;  %1034 = vmatpush.bf16.msrb.mxu2 %v7377_v11  ;;  %v7700_v6 = vld [vmem:[#allocation2 + $0x290] sm:$0xf]  ;;  %v7737_v7 = vor.u32 %v11118_v61, %v7734_v62  ;;  %v11046_v9 = vld [vmem:[#allocation2 + $0x94] sm:$0xf]  ;;  %v7445_v13 = vor.u32 %v11050_v5, %v7444_v3  ;;  %v7582_v58 = vld [vmem:[#allocation2 + $0x1b8] sm:$0xf0]  ;;  %v7837_v62 = vor.u32 %v11147_v56, %v7836_v54 }
  0x64   :  { %v11114_v8 = vld [vmem:[#allocation2 + $0x2ac] sm:$0xf0]  ;;  %v11110_v11 = vld [vmem:[#allocation2 + $0x294] sm:$0xf]  ;;  %v11143_v59 = vld [vmem:[#allocation2 + $0x39c] sm:$0xf] }
  0x65   :  { %1021 = vmatpush.bf16.msrb.mxu1 %v7629_v10  ;;  %1047 = vmatpush.bf16.msrb.mxu3 %v7633_v14  ;;  %v7446_v10 = vld [vmem:[#allocation2 + $0xb0] sm:$0xf0]  ;;  %v7701_v14 = vor.u32 %v11114_v8, %v7700_v6  ;;  %v7668_v18 = vld [vmem:[#allocation2 + $0x250] sm:$0xf]  ;;  %v7838_v60 = vld [vmem:[#allocation2 + $0x3b8] sm:$0xf0] }
  0x66   :  { %1009 = vmatmul.bf16.vlgmr.msrb.gmra.mxu0 %v12267_v1  ;;  %1035 = vmatmul.bf16.vlgmr.msrb.gmra.mxu2 %v12267_v1  ;;  %v7702_v12 = vld [vmem:[#allocation2 + $0x2b0] sm:$0xf0]  ;;  %v11106_v20 = vld [vmem:[#allocation2 + $0x26c] sm:$0xf0]  ;;  %v7804_v3 = vld [vmem:[#allocation2 + $0x358] sm:$0xf]  ;;  %v7841_v5 = vor.u32 %v11143_v59, %v7838_v60 }
  0x67   :  { %1053 = vmatpush.bf16.msra.mxu0 %v7605_v15  ;;  %1079 = vmatpush.bf16.msra.mxu2 %v7609_v17  ;;  %v7449_v15 = vor.u32 %v11046_v9, %v7446_v10  ;;  %v11042_v17 = vld [vmem:[#allocation2 + $0x6c] sm:$0xf0]  ;;  %v7705_v19 = vor.u32 %v11110_v11, %v7702_v12  ;;  %v7414_v22 = vld [vmem:[#allocation2 + $0x70] sm:$0xf0]  ;;  %v11139_v6 = vld [vmem:[#allocation2 + $0x374] sm:$0xf0] }
  0x68   :  { %1022 = vmatmul.bf16.vlgmr.msrb.gmra.mxu1 %v12269_v4  ;;  %1048 = vmatmul.bf16.vlgmr.msrb.gmra.mxu3 %v12269_v4  ;;  %v11102_v23 = vld [vmem:[#allocation2 + $0x254] sm:$0xf]  ;;  %v7380_v26 = vld [vmem:[#allocation2 + $0x10] sm:$0xf]  ;;  %v7550_v8 = vld [vmem:[#allocation2 + $0x178] sm:$0xf0]  ;;  %v7805_v12 = vor.u32 %v11139_v6, %v7804_v3 }
  0x69   :  { %1066 = vmatpush.bf16.msra.mxu1 %v7861_v16  ;;  %1092 = vmatpush.bf16.msra.mxu3 %v7865_v21  ;;  %v7412_v16 = vld [vmem:[#allocation2 + $0x50] sm:$0xf]  ;;  %v11038_v21 = vld [vmem:[#allocation2 + $0x54] sm:$0xf]  ;;  %v11135_v9 = vld [vmem:[#allocation2 + $0x35c] sm:$0xf] }
  0x6a   :  { %v7670_v24 = vld [vmem:[#allocation2 + $0x270] sm:$0xf0]  ;;  %v7413_v25 = vor.u32 %v11042_v17, %v7412_v16  ;;  %v7636_v30 = vld [vmem:[#allocation2 + $0x210] sm:$0xf]  ;;  %v7806_v10 = vld [vmem:[#allocation2 + $0x378] sm:$0xf0] }
  0x6b   :  { %1054 = vmatpush.bf16.msra.mxu0 %v7573_v27  ;;  %1080 = vmatpush.bf16.msra.mxu2 %v7577_v29  ;;  %v11034_v27 = vld [vmem:[#allocation2 + $0x2c] sm:$0xf0]  ;;  %v7417_v29 = vor.u32 %v11038_v21, %v7414_v22  ;;  %v11030_v32 = vld [vmem:[#allocation2 + $0x14] sm:$0xf]  ;;  %v7772_v16 = vld [vmem:[#allocation2 + $0x318] sm:$0xf]  ;;  %v7809_v17 = vor.u32 %v11135_v9, %v7806_v10 }
  0x6c   :  { %v11098_v31 = vld [vmem:[#allocation2 + $0x22c] sm:$0xf0]  ;;  %v7382_v34 = vld [vmem:[#allocation2 + $0x30] sm:$0xf0]  ;;  %v11127_v21 = vld [vmem:[#allocation2 + $0x31c] sm:$0xf] }
  0x6d   :  { %1067 = vmatpush.bf16.msra.mxu1 %v7829_v28  ;;  %1093 = vmatpush.bf16.msra.mxu3 %v7833_v33  ;;  %v7669_v28 = vor.u32 %v11106_v20, %v7668_v18  ;;  %v7673_v33 = vor.u32 %v11102_v23, %v7670_v24  ;;  %v11094_v35 = vld [vmem:[#allocation2 + $0x214] sm:$0xf]  ;;  %v7637_v44 = vor.u32 %v11098_v31, %v7636_v30  ;;  %v11131_v18 = vld [vmem:[#allocation2 + $0x334] sm:$0xf0]  ;;  %v7518_v20 = vld [vmem:[#allocation2 + $0x138] sm:$0xf0] }
  0x6e   :  { %v7638_v36 = vld [vmem:[#allocation2 + $0x230] sm:$0xf0]  ;;  %v7774_v22 = vld [vmem:[#allocation2 + $0x338] sm:$0xf0]  ;;  %v7773_v24 = vor.u32 %v11131_v18, %v7772_v16  ;;  %v11123_v30 = vld [vmem:[#allocation2 + $0x2f4] sm:$0xf0] }
  0x6f   :  { %1055 = vmatpush.bf16.msra.mxu0 %v7541_v39  ;;  %1081 = vmatpush.bf16.msra.mxu2 %v7545_v41  ;;  %v7868_v39 = vld [vmem:[#allocation2 + $0x3d8] sm:$0xf]  ;;  %v7641_v48 = vor.u32 %v11094_v35, %v7638_v36  ;;  %v11055_v31 = vld [vmem:[#allocation2 + $0xdc] sm:$0xf]  ;;  %v7988_v9 = vld [vmem:[#allocation5 + $0xe0] sm:$0xf] }
  0x70   :  { %v11155_v41 = vld [vmem:[#allocation2 + $0x3f4] sm:$0xf0]  ;;  %v7710_v46 = vld [vmem:[#allocation2 + $0x2b8] sm:$0xf0]  ;;  %v11186_v10 = vld [vmem:[#allocation5 + $0xec] sm:$0xf0] }
  0x71   :  { %1068 = vmatpush.bf16.msra.mxu1 %v7797_v40  ;;  %1094 = vmatpush.bf16.msra.mxu3 %v7801_v45  ;;  %v7381_v40 = vor.u32 %v11034_v27, %v7380_v26  ;;  %v7385_v45 = vor.u32 %v11030_v32, %v7382_v34  ;;  %v7869_v50 = vor.u32 %v11155_v41, %v7868_v39  ;;  %v7484_v26 = vld [vmem:[#allocation2 + $0xd8] sm:$0xf]  ;;  %v7486_v32 = vld [vmem:[#allocation2 + $0xf8] sm:$0xf0]  ;;  %v8244_v18 = vld [vmem:[#allocation5 + $0x2e0] sm:$0xf] }
  0x72   :  { %v11059_v27 = vld [vmem:[#allocation2 + $0xf4] sm:$0xf0]  ;;  %v7742_v34 = vld [vmem:[#allocation2 + $0x2f8] sm:$0xf0]  ;;  %v7489_v37 = vor.u32 %v11055_v31, %v7486_v32  ;;  %v8084_v32 = vld [vmem:[#allocation5 + $0x1a0] sm:$0xf] }
  0x73   :  { %1056 = vmatpush.bf16.msra.mxu0 %v7509_v51  ;;  %1082 = vmatpush.bf16.msra.mxu2 %v7513_v53  ;;  %v7617_v51 = vor.u32 %v11087_v42, %v7614_v43  ;;  %v11083_v53 = vld [vmem:[#allocation2 + $0x1b4] sm:$0xf0]  ;;  %v7485_v35 = vor.u32 %v11059_v27, %v7484_v26  ;;  %v11047_v43 = vld [vmem:[#allocation2 + $0x9c] sm:$0xf]  ;;  %v8228_v27 = vld [vmem:[#allocation5 + $0x2c0] sm:$0xf] }
  0x74   :  { %v7452_v38 = vld [vmem:[#allocation2 + $0x98] sm:$0xf]  ;;  %v7422_v56 = vld [vmem:[#allocation2 + $0x78] sm:$0xf0] }
  0x75   :  { %1069 = vmatpush.bf16.msra.mxu1 %v7765_v52  ;;  %1095 = vmatpush.bf16.msra.mxu3 %v7769_v57  ;;  %v7580_v52 = vld [vmem:[#allocation2 + $0x198] sm:$0xf]  ;;  %v11079_v57 = vld [vmem:[#allocation2 + $0x19c] sm:$0xf] }
  0x76   :  { %v7581_v61 = vor.u32 %v11083_v53, %v7580_v52  ;;  %v11051_v39 = vld [vmem:[#allocation2 + $0xb4] sm:$0xf0]  ;;  %v7390_v6 = vld [vmem:[#allocation2 + $0x38] sm:$0xf0] }
  0x77   :  { %1057 = vmatpush.bf16.msra.mxu0 %v7477_v63  ;;  %1083 = vmatpush.bf16.msra.mxu2 %v7481_v2  ;;  %v7585_v63 = vor.u32 %v11079_v57, %v7582_v58  ;;  %v11075_v2 = vld [vmem:[#allocation2 + $0x174] sm:$0xf0]  ;;  %v7453_v47 = vor.u32 %v11051_v39, %v7452_v38  ;;  %v11103_v57 = vld [vmem:[#allocation2 + $0x25c] sm:$0xf]  ;;  %v8068_v39 = vld [vmem:[#allocation5 + $0x180] sm:$0xf] }
  0x78   :  { %v11115_v42 = vld [vmem:[#allocation2 + $0x2b4] sm:$0xf0]  ;;  %v7678_v58 = vld [vmem:[#allocation2 + $0x278] sm:$0xf0] }
  0x79   :  { %1070 = vmatpush.bf16.msra.mxu1 %v7733_v0  ;;  %1096 = vmatpush.bf16.msra.mxu3 %v7737_v7  ;;  %v7548_v0 = vld [vmem:[#allocation2 + $0x158] sm:$0xf]  ;;  %v11071_v7 = vld [vmem:[#allocation2 + $0x15c] sm:$0xf]  ;;  %v7681_v3 = vor.u32 %v11103_v57, %v7678_v58  ;;  %v11242_v57 = vld [vmem:[#allocation5 + $0x2ac] sm:$0xf0] }
  0x7a   :  { %v7549_v11 = vor.u32 %v11075_v2, %v7548_v0  ;;  %v7676_v52 = vld [vmem:[#allocation2 + $0x258] sm:$0xf]  ;;  %v11162_v58 = vld [vmem:[#allocation5 + $0x2c] sm:$0xf0] }
  0x7b   :  { %1058 = vmatpush.bf16.msra.mxu0 %v7445_v13  ;;  %1084 = vmatpush.bf16.msra.mxu2 %v7449_v15  ;;  %v7553_v13 = vor.u32 %v11071_v7, %v7550_v8  ;;  %v11067_v15 = vld [vmem:[#allocation2 + $0x134] sm:$0xf0]  ;;  %v11095_v7 = vld [vmem:[#allocation2 + $0x21c] sm:$0xf] }
  0x7c   :  { %v11107_v54 = vld [vmem:[#allocation2 + $0x274] sm:$0xf0]  ;;  %v7646_v8 = vld [vmem:[#allocation2 + $0x238] sm:$0xf0] }
  0x7d   :  { %1071 = vmatpush.bf16.msra.mxu1 %v7701_v14  ;;  %1097 = vmatpush.bf16.msra.mxu3 %v7705_v19  ;;  %v7516_v14 = vld [vmem:[#allocation2 + $0x118] sm:$0xf]  ;;  %v11063_v19 = vld [vmem:[#allocation2 + $0x11c] sm:$0xf]  ;;  %v7649_v16 = vor.u32 %v11095_v7, %v7646_v8  ;;  %v11158_v8 = vld [vmem:[#allocation5 + $0xc] sm:$0xf0] }
  0x7e   :  { %v7517_v23 = vor.u32 %v11067_v15, %v7516_v14  ;;  %v7388_v60 = vld [vmem:[#allocation2 + $0x18] sm:$0xf] }
  0x7f   :  { %1059 = vmatpush.bf16.msra.mxu0 %v7413_v25  ;;  %1085 = vmatpush.bf16.msra.mxu2 %v7417_v29  ;;  %v7521_v25 = vor.u32 %v11063_v19, %v7518_v20  ;;  %v7777_v29 = vor.u32 %v11127_v21, %v7774_v22  ;;  %v7644_v0 = vld [vmem:[#allocation2 + $0x218] sm:$0xf]  ;;  %v11250_v19 = vld [vmem:[#allocation5 + $0x2ec] sm:$0xf0]  ;;  %v7972_v20 = vld [vmem:[#allocation5 + $0xc0] sm:$0xf] }
  0x80   :  { %v11099_v2 = vld [vmem:[#allocation2 + $0x234] sm:$0xf0]  ;;  %v11182_v21 = vld [vmem:[#allocation5 + $0xcc] sm:$0xf0] }
  0x81   :  { %1072 = vmatpush.bf16.msra.mxu1 %v7669_v28  ;;  %1098 = vmatpush.bf16.msra.mxu3 %v7673_v33  ;;  %v7740_v28 = vld [vmem:[#allocation2 + $0x2d8] sm:$0xf]  ;;  %v11119_v33 = vld [vmem:[#allocation2 + $0x2dc] sm:$0xf]  ;;  %v7645_v14 = vor.u32 %v11099_v2, %v7644_v0  ;;  %v7973_v26 = vor.u32 %v11182_v21, %v7972_v20  ;;  %v11194_v0 = vld [vmem:[#allocation5 + $0x12c] sm:$0xf0] }
  0x82   :  { %v7741_v36 = vor.u32 %v11123_v30, %v7740_v28  ;;  %v7745_v41 = vor.u32 %v11119_v33, %v7742_v34  ;;  %v11246_v28 = vld [vmem:[#allocation5 + $0x2cc] sm:$0xf0]  ;;  %v8628_v20 = vld [vmem:[#allocation5 + $0x5e0] sm:$0xf] }
  0x83   :  { %1060 = vmatpush.bf16.msra.mxu0 %v7381_v40  ;;  %1086 = vmatpush.bf16.msra.mxu2 %v7385_v45  ;;  %v7708_v40 = vld [vmem:[#allocation2 + $0x298] sm:$0xf]  ;;  %v11111_v45 = vld [vmem:[#allocation2 + $0x29c] sm:$0xf]  ;;  %v11178_v30 = vld [vmem:[#allocation5 + $0xac] sm:$0xf0]  ;;  %v8229_v34 = vor.u32 %v11246_v28, %v8228_v27 }
  0x84   :  { %v7713_v53 = vor.u32 %v11111_v45, %v7710_v46  ;;  %v11210_v33 = vld [vmem:[#allocation5 + $0x1ac] sm:$0xf0] }
  0x85   :  { %1073 = vmatpush.bf16.msra.mxu1 %v7637_v44  ;;  %1099 = vmatpush.bf16.msra.mxu3 %v7641_v48  ;;  %v7454_v44 = vld [vmem:[#allocation2 + $0xb8] sm:$0xf0]  ;;  %v7709_v48 = vor.u32 %v11115_v42, %v7708_v40  ;;  %v8085_v38 = vor.u32 %v11210_v33, %v8084_v32  ;;  %v11206_v40 = vld [vmem:[#allocation5 + $0x18c] sm:$0xf0]  ;;  %v7924_v42 = vld [vmem:[#allocation5 + $0x60] sm:$0xf] }
  0x86   :  { %1061 = vmatmul.bf16.vlgmr.msra.gmra.mxu0 %v12267_v1  ;;  %1087 = vmatmul.bf16.vlgmr.msra.gmra.mxu2 %v12267_v1  ;;  %v11202_v45 = vld [vmem:[#allocation5 + $0x16c] sm:$0xf0] }
  0x87   :  { %1105 = vmatpush.bf16.msrb.mxu0 %v7613_v49  ;;  %1131 = vmatpush.bf16.msrb.mxu2 %v7617_v51  ;;  %v7457_v49 = vor.u32 %v11047_v43, %v7454_v44  ;;  %v11043_v51 = vld [vmem:[#allocation2 + $0x74] sm:$0xf0]  ;;  %v8069_v43 = vor.u32 %v11206_v40, %v8068_v39  ;;  %v8052_v44 = vld [vmem:[#allocation5 + $0x160] sm:$0xf]  ;;  %v11282_v46 = vld [vmem:[#allocation5 + $0x3ec] sm:$0xf0] }
  0x88   :  { %1074 = vmatmul.bf16.vlgmr.msra.gmra.mxu1 %v12269_v4  ;;  %1100 = vmatmul.bf16.vlgmr.msra.gmra.mxu3 %v12269_v4  ;;  %v11346_v21 = vld [vmem:[#allocation5 + $0x5ec] sm:$0xf0] }
  0x89   :  { %1118 = vmatpush.bf16.msrb.mxu1 %v7869_v50  ;;  %1144 = vmatpush.bf16.msrb.mxu3 %v7873_v55  ;;  %v7420_v50 = vld [vmem:[#allocation2 + $0x58] sm:$0xf]  ;;  %v11039_v55 = vld [vmem:[#allocation2 + $0x5c] sm:$0xf]  ;;  %v11310_v32 = vld [vmem:[#allocation5 + $0x4cc] sm:$0xf0]  ;;  %v8629_v33 = vor.u32 %v11346_v21, %v8628_v20 }
  0x8a   :  { %v7421_v59 = vor.u32 %v11043_v51, %v7420_v50  ;;  %v11166_v50 = vld [vmem:[#allocation5 + $0x4c] sm:$0xf0]  ;;  %v8053_v51 = vor.u32 %v11202_v45, %v8052_v44  ;;  %v8452_v44 = vld [vmem:[#allocation5 + $0x480] sm:$0xf] }
  0x8b   :  { %1106 = vmatpush.bf16.msrb.mxu0 %v7581_v61  ;;  %1132 = vmatpush.bf16.msrb.mxu2 %v7585_v63  ;;  %v7677_v61 = vor.u32 %v11107_v54, %v7676_v52  ;;  %v11035_v63 = vld [vmem:[#allocation2 + $0x34] sm:$0xf0]  ;;  %v8036_v52 = vld [vmem:[#allocation5 + $0x140] sm:$0xf]  ;;  %v11306_v39 = vld [vmem:[#allocation5 + $0x4ac] sm:$0xf0] }
  0x8c   :  { %v11302_v45 = vld [vmem:[#allocation5 + $0x48c] sm:$0xf0] }
  0x8d   :  { %1119 = vmatpush.bf16.msrb.mxu1 %v7837_v62  ;;  %1145 = vmatpush.bf16.msrb.mxu3 %v7841_v5  ;;  %v7425_v62 = vor.u32 %v11039_v55, %v7422_v56  ;;  %v11031_v5 = vld [vmem:[#allocation2 + $0x1c] sm:$0xf]  ;;  %v7892_v55 = vld [vmem:[#allocation5 + $0x20] sm:$0xf]  ;;  %v11378_v20 = vld [vmem:[#allocation5 + $0x6ec] sm:$0xf0] }
  0x8e   :  { %v7393_v15 = vor.u32 %v11031_v5, %v7390_v6  ;;  %v8212_v56 = vld [vmem:[#allocation5 + $0x2a0] sm:$0xf]  ;;  %v11238_v6 = vld [vmem:[#allocation5 + $0x28c] sm:$0xf0]  ;;  %v7893_v7 = vor.u32 %v11162_v58, %v7892_v55 }
  0x8f   :  { %1107 = vmatpush.bf16.msrb.mxu0 %v7549_v11  ;;  %1133 = vmatpush.bf16.msrb.mxu2 %v7553_v13  ;;  %v7389_v11 = vor.u32 %v11035_v63, %v7388_v60  ;;  %v11218_v13 = vld [vmem:[#allocation5 + $0x1ec] sm:$0xf0]  ;;  %v8213_v60 = vor.u32 %v11242_v57, %v8212_v56  ;;  %v8020_v63 = vld [vmem:[#allocation5 + $0x120] sm:$0xf] }
  0x90   :  { %v8196_v5 = vld [vmem:[#allocation5 + $0x280] sm:$0xf]  ;;  %v11298_v56 = vld [vmem:[#allocation5 + $0x46c] sm:$0xf0] }
  0x91   :  { %1120 = vmatpush.bf16.msrb.mxu1 %v7805_v12  ;;  %1146 = vmatpush.bf16.msrb.mxu3 %v7809_v17  ;;  %v8116_v12 = vld [vmem:[#allocation5 + $0x1e0] sm:$0xf]  ;;  %v7989_v17 = vor.u32 %v11186_v10, %v7988_v9  ;;  %v11314_v10 = vld [vmem:[#allocation5 + $0x4ec] sm:$0xf0] }
  0x92   :  { %v8117_v22 = vor.u32 %v11218_v13, %v8116_v12  ;;  %v8500_v9 = vld [vmem:[#allocation5 + $0x4e0] sm:$0xf]  ;;  %v8021_v12 = vor.u32 %v11194_v0, %v8020_v63 }
  0x93   :  { %1108 = vmatpush.bf16.msrb.mxu0 %v7517_v23  ;;  %1134 = vmatpush.bf16.msrb.mxu2 %v7521_v25  ;;  %v8100_v23 = vld [vmem:[#allocation5 + $0x1c0] sm:$0xf]  ;;  %v8245_v25 = vor.u32 %v11250_v19, %v8244_v18  ;;  %v11234_v19 = vld [vmem:[#allocation5 + $0x26c] sm:$0xf0] }
  0x94   :  { %v8004_v13 = vld [vmem:[#allocation5 + $0x100] sm:$0xf] }
  0x95   :  { %1121 = vmatpush.bf16.msrb.mxu1 %v7773_v24  ;;  %1147 = vmatpush.bf16.msrb.mxu3 %v7777_v29  ;;  %v11214_v24 = vld [vmem:[#allocation5 + $0x1cc] sm:$0xf0]  ;;  %v7956_v29 = vld [vmem:[#allocation5 + $0xa0] sm:$0xf] }
  0x96   :  { %v8101_v31 = vor.u32 %v11214_v24, %v8100_v23  ;;  %v8180_v18 = vld [vmem:[#allocation5 + $0x260] sm:$0xf] }
  0x97   :  { %1109 = vmatpush.bf16.msrb.mxu0 %v7485_v35  ;;  %1135 = vmatpush.bf16.msrb.mxu2 %v7489_v37  ;;  %v7957_v35 = vor.u32 %v11178_v30, %v7956_v29  ;;  %v11174_v37 = vld [vmem:[#allocation5 + $0x8c] sm:$0xf0]  ;;  %v8324_v23 = vld [vmem:[#allocation5 + $0x380] sm:$0xf] }
  0x98   :  { %v8164_v29 = vld [vmem:[#allocation5 + $0x240] sm:$0xf]  ;;  %v11230_v30 = vld [vmem:[#allocation5 + $0x24c] sm:$0xf0] }
  0x99   :  { %1122 = vmatpush.bf16.msrb.mxu1 %v7741_v36  ;;  %1148 = vmatpush.bf16.msrb.mxu3 %v7745_v41  ;;  %v7940_v36 = vld [vmem:[#allocation5 + $0x80] sm:$0xf] }
  0x9a   :  { %v7941_v41 = vor.u32 %v11174_v37, %v7940_v36  ;;  %v8165_v36 = vor.u32 %v11230_v30, %v8164_v29  ;;  %v8436_v55 = vld [vmem:[#allocation5 + $0x460] sm:$0xf]  ;;  %v11322_v30 = vld [vmem:[#allocation5 + $0x52c] sm:$0xf0] }
  0x9b   :  { %1110 = vmatpush.bf16.msrb.mxu0 %v7453_v47  ;;  %1136 = vmatpush.bf16.msrb.mxu2 %v7457_v49  ;;  %v7908_v49 = vld [vmem:[#allocation5 + $0x40] sm:$0xf] }
  0x9c   :  { %v7909_v54 = vor.u32 %v11166_v50, %v7908_v49  ;;  %v11266_v49 = vld [vmem:[#allocation5 + $0x36c] sm:$0xf0]  ;;  %v8532_v29 = vld [vmem:[#allocation5 + $0x520] sm:$0xf] }
  0x9d   :  { %1123 = vmatpush.bf16.msrb.mxu1 %v7709_v48  ;;  %1149 = vmatpush.bf16.msrb.mxu3 %v7713_v53  ;;  %v11198_v53 = vld [vmem:[#allocation5 + $0x14c] sm:$0xf0] }
  0x9f   :  { %1111 = vmatpush.bf16.msrb.mxu0 %v7421_v59  ;;  %1137 = vmatpush.bf16.msrb.mxu2 %v7425_v62  ;;  %v8037_v59 = vor.u32 %v11198_v53, %v8036_v52  ;;  %v11278_v62 = vld [vmem:[#allocation5 + $0x3cc] sm:$0xf0]  ;;  %v8453_v52 = vor.u32 %v11302_v45, %v8452_v44  ;;  %v8148_v53 = vld [vmem:[#allocation5 + $0x220] sm:$0xf]  ;;  %v7990_v44 = vld [vmem:[#allocation5 + $0xf0] sm:$0xf0] }
  0xa1   :  { %1124 = vmatpush.bf16.msrb.mxu1 %v7677_v61  ;;  %1150 = vmatpush.bf16.msrb.mxu3 %v7681_v3  ;;  %v8356_v61 = vld [vmem:[#allocation5 + $0x3c0] sm:$0xf] }
  0xa2   :  { %v8357_v2 = vor.u32 %v11278_v62, %v8356_v61  ;;  %v7876_v3 = vld [vmem:[#allocation5] sm:$0xf]  ;;  %v11262_v62 = vld [vmem:[#allocation5 + $0x34c] sm:$0xf0] }
  0xa3   :  { %1112 = vmatpush.bf16.msrb.mxu0 %v7389_v11  ;;  %1138 = vmatpush.bf16.msrb.mxu2 %v7393_v15  ;;  %v8197_v11 = vor.u32 %v11238_v6, %v8196_v5  ;;  %v11274_v15 = vld [vmem:[#allocation5 + $0x3ac] sm:$0xf0]  ;;  %v7877_v24 = vor.u32 %v11158_v8, %v7876_v3  ;;  %v8292_v61 = vld [vmem:[#allocation5 + $0x340] sm:$0xf]  ;;  %v8437_v3 = vor.u32 %v11298_v56, %v8436_v55  ;;  %v8118_v55 = vld [vmem:[#allocation5 + $0x1f0] sm:$0xf0] }
  0xa4   :  { %v8293_v63 = vor.u32 %v11262_v62, %v8292_v61  ;;  %v8132_v5 = vld [vmem:[#allocation5 + $0x200] sm:$0xf]  ;;  %v11222_v6 = vld [vmem:[#allocation5 + $0x20c] sm:$0xf0] }
  0xa5   :  { %1125 = vmatpush.bf16.msrb.mxu1 %v7645_v14  ;;  %1151 = vmatpush.bf16.msrb.mxu3 %v7649_v16  ;;  %v8340_v14 = vld [vmem:[#allocation5 + $0x3a0] sm:$0xf]  ;;  %v11190_v16 = vld [vmem:[#allocation5 + $0x10c] sm:$0xf0] }
  0xa6   :  { %1113 = vmatmul.bf16.vlgmr.msrb.gmra.mxu0 %v12267_v1  ;;  %1139 = vmatmul.bf16.vlgmr.msrb.gmra.mxu2 %v12267_v1  ;;  %v11170_v1 = vld [vmem:[#allocation5 + $0x6c] sm:$0xf0]  ;;  %v8005_v27 = vor.u32 %v11190_v16, %v8004_v13  ;;  %v8548_v13 = vld [vmem:[#allocation5 + $0x540] sm:$0xf] }
  0xa7   :  { %2719 = vmatpush.bf16.msra.mxu0 %v7989_v17  ;;  %2745 = vmatpush.bf16.msra.mxu2 %v8245_v25  ;;  %v7925_v48 = vor.u32 %v11170_v1, %v7924_v42  ;;  %v8341_v17 = vor.u32 %v11274_v15, %v8340_v14  ;;  %v11270_v25 = vld [vmem:[#allocation5 + $0x38c] sm:$0xf0]  ;;  %v12290_v1 = vld [vmem:[%s12646_s3] sm:$0xff] }
  0xa8   :  { %1126 = vmatmul.bf16.vlgmr.msrb.gmra.mxu1 %v12269_v4  ;;  %1152 = vmatmul.bf16.vlgmr.msrb.gmra.mxu3 %v12269_v4  ;;  %v8372_v4 = vld [vmem:[#allocation5 + $0x3e0] sm:$0xf]  ;;  %v8325_v28 = vor.u32 %v11270_v25, %v8324_v23  ;;  %v11338_v42 = vld [vmem:[#allocation5 + $0x5ac] sm:$0xf0] }
  0xa9   :  { %2732 = vmatpush.bf16.msra.mxu1 %v8117_v22  ;;  %v8373_v47 = vor.u32 %v11282_v46, %v8372_v4  ;;  %v8181_v22 = vor.u32 %v11234_v19, %v8180_v18  ;;  %v8580_v46 = vld [vmem:[#allocation5 + $0x580] sm:$0xf]  ;;  %v11326_v14 = vld [vmem:[#allocation5 + $0x54c] sm:$0xf0] }
  0xaa   :  { %v8276_v15 = vld [vmem:[#allocation5 + $0x320] sm:$0xf]  ;;  %v11258_v16 = vld [vmem:[#allocation5 + $0x32c] sm:$0xf0] }
  0xab   :  { %2720 = vmatpush.bf16.msra.mxu0 %v7973_v26  ;;  %2746 = vmatpush.bf16.msra.mxu2 %v8229_v34  ;;  %v8501_v26 = vor.u32 %v11314_v10, %v8500_v9  ;;  %v8612_v34 = vld [vmem:[#allocation5 + $0x5c0] sm:$0xf]  ;;  %v11294_v10 = vld [vmem:[#allocation5 + $0x44c] sm:$0xf0]  ;;  %v8277_v18 = vor.u32 %v11258_v16, %v8276_v15 }
  0xac   :  { %2758 = vmatpush.bf16.msra.mxu3 %v8373_v47  ;;  %v11334_v47 = vld [vmem:[#allocation5 + $0x58c] sm:$0xf0]  ;;  %v8420_v9 = vld [vmem:[#allocation5 + $0x440] sm:$0xf] }
  0xad   :  { %2733 = vmatpush.bf16.msra.mxu1 %v8101_v31  ;;  %v8484_v31 = vld [vmem:[#allocation5 + $0x4c0] sm:$0xf]  ;;  %v8581_v57 = vor.u32 %v11334_v47, %v8580_v46  ;;  %v8533_v46 = vor.u32 %v11322_v30, %v8532_v29  ;;  %v11370_v56 = vld [vmem:[#allocation5 + $0x6ac] sm:$0xf0]  ;;  %v11172_v30 = vld [vmem:[#allocation5 + $0x84] sm:$0xf] }
  0xae   :  { %v8485_v37 = vor.u32 %v11310_v32, %v8484_v31  ;;  %v8756_v19 = vld [vmem:[#allocation5 + $0x6e0] sm:$0xf]  ;;  %v11254_v32 = vld [vmem:[#allocation5 + $0x30c] sm:$0xf0] }
  0xaf   :  { %2721 = vmatpush.bf16.msra.mxu0 %v7957_v35  ;;  %2747 = vmatpush.bf16.msra.mxu2 %v8213_v60  ;;  %v11342_v35 = vld [vmem:[#allocation5 + $0x5cc] sm:$0xf0]  ;;  %v8404_v23 = vld [vmem:[#allocation5 + $0x420] sm:$0xf] }
  0xb0   :  { %2759 = vmatpush.bf16.msra.mxu3 %v8357_v2  ;;  %v8613_v40 = vor.u32 %v11342_v35, %v8612_v34  ;;  %v11330_v60 = vld [vmem:[#allocation5 + $0x56c] sm:$0xf0]  ;;  %v287_v2 = vperm.slane %v12290_v1, 1  ;;  %v8260_v31 = vld [vmem:[#allocation5 + $0x300] sm:$0xf] }
  0xb1   :  { %2734 = vmatpush.bf16.msra.mxu1 %v8085_v38  ;;  %v8468_v38 = vld [vmem:[#allocation5 + $0x4a0] sm:$0xf]  ;;  %v11406_v62 = vld [vmem:[#allocation5 + $0x7cc] sm:$0xf0] }
  0xb2   :  { %v8388_v35 = vld [vmem:[#allocation5 + $0x400] sm:$0xf] }
  0xb3   :  { %2722 = vmatpush.bf16.msra.mxu0 %v7941_v41  ;;  %2748 = vmatpush.bf16.msra.mxu2 %v8197_v11  ;;  %v8596_v41 = vld [vmem:[#allocation5 + $0x5a0] sm:$0xf] }
  0xb4   :  { %2760 = vmatpush.bf16.msra.mxu3 %v8341_v17  ;;  %v8597_v4 = vor.u32 %v11338_v42, %v8596_v41  ;;  %v11286_v42 = vld [vmem:[#allocation5 + $0x40c] sm:$0xf0]  ;;  %v8516_v47 = vld [vmem:[#allocation5 + $0x500] sm:$0xf] }
  0xb5   :  { %2735 = vmatpush.bf16.msra.mxu1 %v8069_v43  ;;  %v8469_v43 = vor.u32 %v11306_v39, %v8468_v38  ;;  %v11374_v38 = vld [vmem:[#allocation5 + $0x6cc] sm:$0xf0]  ;;  %v8868_v61 = vld [vmem:[#allocation5 + $0x7c0] sm:$0xf] }
  0xb6   :  { %v8692_v16 = vld [vmem:[#allocation5 + $0x660] sm:$0xf] }
  0xb7   :  { %2723 = vmatpush.bf16.msra.mxu0 %v7925_v48  ;;  %2749 = vmatpush.bf16.msra.mxu2 %v8181_v22  ;;  %v8308_v48 = vld [vmem:[#allocation5 + $0x360] sm:$0xf]  ;;  %v8421_v22 = vor.u32 %v11294_v10, %v8420_v9 }
  0xb8   :  { %2761 = vmatpush.bf16.msra.mxu3 %v8325_v28  ;;  %v8309_v50 = vor.u32 %v11266_v49, %v8308_v48  ;;  %v8549_v28 = vor.u32 %v11326_v14, %v8548_v13  ;;  %v8884_v48 = vld [vmem:[#allocation5 + $0x7e0] sm:$0xf]  ;;  %v11410_v49 = vld [vmem:[#allocation5 + $0x7ec] sm:$0xf0]  ;;  %v8102_v13 = vld [vmem:[#allocation5 + $0x1d0] sm:$0xf0] }
  0xb9   :  { %2736 = vmatpush.bf16.msra.mxu1 %v8053_v51  ;;  %v286_v51 = vperm.slane %v12290_v1, 0  ;;  %v8852_v10 = vld [vmem:[#allocation5 + $0x7a0] sm:$0xf]  ;;  %v11402_v14 = vld [vmem:[#allocation5 + $0x7ac] sm:$0xf0] }
  0xba   :  { %v8853_v15 = vor.u32 %v11402_v14, %v8852_v10 }
  0xbb   :  { %2724 = vmatpush.bf16.msra.mxu0 %v7909_v54  ;;  %2750 = vmatpush.bf16.msra.mxu2 %v8165_v36  ;;  %v11226_v54 = vld [vmem:[#allocation5 + $0x22c] sm:$0xf0]  ;;  %v8261_v36 = vor.u32 %v11254_v32, %v8260_v31  ;;  %v7942_v31 = vld [vmem:[#allocation5 + $0x90] sm:$0xf0] }
  0xbc   :  { %2762 = vmatpush.bf16.msra.mxu3 %v8309_v50  ;;  %v8149_v58 = vor.u32 %v11226_v54, %v8148_v53  ;;  %v8724_v53 = vld [vmem:[#allocation5 + $0x6a0] sm:$0xf]  ;;  %v11216_v54 = vld [vmem:[#allocation5 + $0x1e4] sm:$0xf] }
  0xbd   :  { %2737 = vmatpush.bf16.msra.mxu1 %v8037_v59  ;;  %v8564_v59 = vld [vmem:[#allocation5 + $0x560] sm:$0xf] }
  0xbe   :  { %v8565_v11 = vor.u32 %v11330_v60, %v8564_v59  ;;  %v8389_v59 = vor.u32 %v11286_v42, %v8388_v35  ;;  %v8725_v60 = vor.u32 %v11370_v56, %v8724_v53  ;;  %v8070_v35 = vld [vmem:[#allocation5 + $0x190] sm:$0xf0]  ;;  %v11164_v56 = vld [vmem:[#allocation5 + $0x44] sm:$0xf] }
  0xbf   :  { %2725 = vmatpush.bf16.msra.mxu0 %v7893_v7  ;;  %2751 = vmatpush.bf16.msra.mxu2 %v8149_v58 }
  0xc0   :  { %2763 = vmatpush.bf16.msra.mxu3 %v8293_v63 }
  0xc1   :  { %2738 = vmatpush.bf16.msra.mxu1 %v8021_v12  ;;  %v8133_v12 = vor.u32 %v11222_v6, %v8132_v5  ;;  %v11366_v5 = vld [vmem:[#allocation5 + $0x68c] sm:$0xf0]  ;;  %v11180_v6 = vld [vmem:[#allocation5 + $0xc4] sm:$0xf] }
  0xc3   :  { %2726 = vmatpush.bf16.msra.mxu0 %v7877_v24  ;;  %2752 = vmatpush.bf16.msra.mxu2 %v8133_v12  ;;  %v8757_v24 = vor.u32 %v11378_v20, %v8756_v19  ;;  %v11212_v12 = vld [vmem:[#allocation5 + $0x1c4] sm:$0xf]  ;;  %v8836_v19 = vld [vmem:[#allocation5 + $0x780] sm:$0xf]  ;;  %v11398_v20 = vld [vmem:[#allocation5 + $0x78c] sm:$0xf0] }
  0xc4   :  { %2764 = vmatpush.bf16.msra.mxu3 %v8277_v18 }
  0xc5   :  { %2739 = vmatpush.bf16.msra.mxu1 %v8005_v27  ;;  %v958_v0 = vpop.f32.mrf.mxu0  ;;  %v11290_v27 = vld [vmem:[#allocation5 + $0x42c] sm:$0xf0] }
  0xc6   :  { %v959_v7 = vadd.f32 %v958_v0, %v286_v51  ;;  %v8405_v41 = vor.u32 %v11290_v27, %v8404_v23  ;;  %v11318_v51 = vld [vmem:[#allocation5 + $0x50c] sm:$0xf0]  ;;  %v8105_v23 = vor.u32 %v11212_v12, %v8102_v13  ;;  %v8837_v27 = vor.u32 %v11398_v20, %v8836_v19  ;;  %v8246_v12 = vld [vmem:[#allocation5 + $0x2f0] sm:$0xf0]  ;;  %v8788_v19 = vld [vmem:[#allocation5 + $0x720] sm:$0xf] }
  0xc7   :  { %2771 = vmatpush.bf16.msrb.mxu0 %v8501_v26  ;;  %v971_v8 = vpop.f32.mrf.mxu1  ;;  %2797 = vmatpush.bf16.msrb.mxu2 %v8757_v24  ;;  %v8517_v0 = vor.u32 %v11318_v51, %v8516_v47  ;;  %v11354_v51 = vld [vmem:[#allocation5 + $0x62c] sm:$0xf0] }
  0xc8   :  { %v972_v17 = vadd.f32 %v971_v8, %v959_v7  ;;  %2765 = vmatpush.bf16.msra.mxu3 %v8261_v36  ;;  %v7974_v7 = vld [vmem:[#allocation5 + $0xd0] sm:$0xf0]  ;;  %v8121_v8 = vor.u32 %v11216_v54, %v8118_v55  ;;  %v8676_v36 = vld [vmem:[#allocation5 + $0x640] sm:$0xf]  ;;  %v11386_v20 = vld [vmem:[#allocation5 + $0x72c] sm:$0xf0] }
  0xc9   :  { %2784 = vmatpush.bf16.msrb.mxu1 %v8629_v33  ;;  %v7977_v18 = vor.u32 %v11180_v6, %v7974_v7  ;;  %v11248_v7 = vld [vmem:[#allocation5 + $0x2e4] sm:$0xf] }
  0xca   :  { %v1157_v25 = vmax.f32 %v972_v17, 0.0  ;;  %v11362_v17 = vld [vmem:[#allocation5 + $0x66c] sm:$0xf0] }
  0xcb   :  { %2772 = vmatpush.bf16.msrb.mxu0 %v8485_v37  ;;  %v984_v21 = vpop.f32.mrf.mxu2  ;;  %v8740_v37 = vld [vmem:[#allocation5 + $0x6c0] sm:$0xf]  ;;  %v8693_v24 = vor.u32 %v11362_v17, %v8692_v16  ;;  %v7894_v16 = vld [vmem:[#allocation5 + $0x30] sm:$0xf0] }
  0xcc   :  { %v985_v26 = vadd.f32 %v984_v21, %v287_v2  ;;  %v12294_v33 = vpack.c.bf16 %v1157_v25, %v1157_v25  ;;  %v8741_v45 = vor.u32 %v11374_v38, %v8740_v37  ;;  %v8869_v2 = vor.u32 %v11406_v62, %v8868_v61  ;;  %v11176_v21 = vld [vmem:[#allocation5 + $0xa4] sm:$0xf]  ;;  %v11358_v37 = vld [vmem:[#allocation5 + $0x64c] sm:$0xf0] }
  0xcd   :  { %2785 = vmatpush.bf16.msrb.mxu1 %v8613_v40  ;;  %v997_v34 = vpop.f32.mrf.mxu3  ;;  %v960_v39 = vpop.f32.mrf.mxu0  ;;  %v11208_v25 = vld [vmem:[#allocation5 + $0x1a4] sm:$0xf]  ;;  %v8677_v38 = vor.u32 %v11358_v37, %v8676_v36 }
  0xce   :  { %v998_v40 = vadd.f32 %v997_v34, %v985_v26  ;;  %2727 = vmatmul.bf16.vlgmr.msra.gmra.mxu0 %v12294_v33  ;;  %2798 = vmatpush.bf16.msrb.mxu2 %v8741_v45  ;;  %v8086_v26 = vld [vmem:[#allocation5 + $0x1b0] sm:$0xf0]  ;;  %v11204_v34 = vld [vmem:[#allocation5 + $0x184] sm:$0xf]  ;;  %v7945_v39 = vor.u32 %v11172_v30, %v7942_v31  ;;  %v8772_v31 = vld [vmem:[#allocation5 + $0x700] sm:$0xf] }
  0xcf   :  { %2773 = vmatpush.bf16.msrb.mxu0 %v8469_v43  ;;  %v11184_v43 = vld [vmem:[#allocation5 + $0xe4] sm:$0xf]  ;;  %v8089_v32 = vor.u32 %v11208_v25, %v8086_v26  ;;  %v8073_v45 = vor.u32 %v11204_v34, %v8070_v35  ;;  %v7878_v35 = vld [vmem:[#allocation5 + $0x10] sm:$0xf0] }
  0xd0   :  { %v1158_v50 = vmax.f32 %v998_v40, 0.0  ;;  %v7993_v63 = vor.u32 %v11184_v43, %v7990_v44  ;;  %v8820_v40 = vld [vmem:[#allocation5 + $0x760] sm:$0xf]  ;;  %v11168_v43 = vld [vmem:[#allocation5 + $0x64] sm:$0xf] }
  0xd1   :  { %2786 = vmatpush.bf16.msrb.mxu1 %v8597_v4  ;;  %v973_v4 = vpop.f32.mrf.mxu1  ;;  %v7926_v44 = vld [vmem:[#allocation5 + $0x70] sm:$0xf0]  ;;  %v11244_v26 = vld [vmem:[#allocation5 + $0x2c4] sm:$0xf] }
  0xd2   :  { %2799 = vmatpush.bf16.msrb.mxu2 %v8725_v60  ;;  %v7929_v55 = vor.u32 %v11168_v43, %v7926_v44  ;;  %v7910_v60 = vld [vmem:[#allocation5 + $0x50] sm:$0xf0]  ;;  %v11240_v44 = vld [vmem:[#allocation5 + $0x2a4] sm:$0xf] }
  0xd3   :  { %2774 = vmatpush.bf16.msrb.mxu0 %v8453_v52  ;;  %v8885_v52 = vor.u32 %v11410_v49, %v8884_v48  ;;  %v986_v58 = vpop.f32.mrf.mxu2  ;;  %v8054_v49 = vld [vmem:[#allocation5 + $0x170] sm:$0xf0]  ;;  %v7913_v10 = vor.u32 %v11164_v56, %v7910_v60  ;;  %v11272_v56 = vld [vmem:[#allocation5 + $0x3a4] sm:$0xf] }
  0xd4   :  { %v8804_v58 = vld [vmem:[#allocation5 + $0x740] sm:$0xf]  ;;  %v11232_v60 = vld [vmem:[#allocation5 + $0x264] sm:$0xf] }
  0xd5   :  { %2787 = vmatpush.bf16.msrb.mxu1 %v8581_v57  ;;  %v12297_v57 = vpack.c.bf16 %v1158_v50, %v1158_v50  ;;  %2810 = vmatpush.bf16.msrb.mxu3 %v8885_v52  ;;  %v8660_v50 = vld [vmem:[#allocation5 + $0x620] sm:$0xf]  ;;  %v289_v52 = vperm.slane %v12290_v1, 3 }
  0xd6   :  { %v8661_v53 = vor.u32 %v11354_v51, %v8660_v50  ;;  %v11276_v50 = vld [vmem:[#allocation5 + $0x3c4] sm:$0xf]  ;;  %v8358_v51 = vld [vmem:[#allocation5 + $0x3d0] sm:$0xf0] }
  0xd7   :  { %2775 = vmatpush.bf16.msrb.mxu0 %v8437_v3  ;;  %v8708_v3 = vld [vmem:[#allocation5 + $0x680] sm:$0xf]  ;;  %2740 = vmatmul.bf16.vlgmr.msra.gmra.mxu1 %v12297_v57 }
  0xd8   :  { %v8709_v9 = vor.u32 %v11366_v5, %v8708_v3  ;;  %v8644_v3 = vld [vmem:[#allocation5 + $0x600] sm:$0xf]  ;;  %v11350_v5 = vld [vmem:[#allocation5 + $0x60c] sm:$0xf0] }
  0xd9   :  { %2788 = vmatpush.bf16.msrb.mxu1 %v8565_v11  ;;  %v999_v11 = vpop.f32.mrf.mxu3  ;;  %2811 = vmatpush.bf16.msrb.mxu3 %v8869_v2  ;;  %v8645_v6 = vor.u32 %v11350_v5, %v8644_v3  ;;  %v11228_v3 = vld [vmem:[#allocation5 + $0x244] sm:$0xf]  ;;  %v8166_v5 = vld [vmem:[#allocation5 + $0x250] sm:$0xf0] }
  0xda   :  { %2800 = vmatpush.bf16.msrb.mxu2 %v8709_v9  ;;  %v11160_v11 = vld [vmem:[#allocation5 + $0x24] sm:$0xf] }
  0xdb   :  { %2776 = vmatpush.bf16.msrb.mxu0 %v8421_v22  ;;  %v7958_v22 = vld [vmem:[#allocation5 + $0xb0] sm:$0xf0] }
  0xdc   :  { %v7961_v29 = vor.u32 %v11176_v21, %v7958_v22  ;;  %v8789_v22 = vor.u32 %v11386_v20, %v8788_v19  ;;  %v8294_v19 = vld [vmem:[#allocation5 + $0x350] sm:$0xf0] }
  0xdd   :  { %2789 = vmatpush.bf16.msrb.mxu1 %v8549_v28  ;;  %2812 = vmatpush.bf16.msrb.mxu3 %v8853_v15  ;;  %v288_v28 = vperm.slane %v12290_v1, 2 }
  0xde   :  { %2801 = vmatpush.bf16.msrb.mxu2 %v8693_v24  ;;  %v8022_v24 = vld [vmem:[#allocation5 + $0x130] sm:$0xf0] }
  0xdf   :  { %2777 = vmatpush.bf16.msrb.mxu0 %v8405_v41  ;;  %v11394_v41 = vld [vmem:[#allocation5 + $0x76c] sm:$0xf0] }
  0xe0   :  { %v8821_v4 = vor.u32 %v11394_v41, %v8820_v40  ;;  %v11280_v40 = vld [vmem:[#allocation5 + $0x3e4] sm:$0xf]  ;;  %v8374_v41 = vld [vmem:[#allocation5 + $0x3f0] sm:$0xf0] }
  0xe1   :  { %2790 = vmatpush.bf16.msrb.mxu1 %v8533_v46  ;;  %2813 = vmatpush.bf16.msrb.mxu3 %v8837_v27  ;;  %v11200_v46 = vld [vmem:[#allocation5 + $0x164] sm:$0xf]  ;;  %v8230_v27 = vld [vmem:[#allocation5 + $0x2d0] sm:$0xf0]  ;;  %v8377_v43 = vor.u32 %v11280_v40, %v8374_v41 }
  0xe2   :  { %2802 = vmatpush.bf16.msrb.mxu2 %v8677_v38  ;;  %v8057_v61 = vor.u32 %v11200_v46, %v8054_v49  ;;  %v8233_v30 = vor.u32 %v11244_v26, %v8230_v27  ;;  %v11188_v38 = vld [vmem:[#allocation5 + $0x104] sm:$0xf]  ;;  %v8134_v26 = vld [vmem:[#allocation5 + $0x210] sm:$0xf0] }
  0xe3   :  { %2778 = vmatpush.bf16.msrb.mxu0 %v8389_v59  ;;  %v1010_v42 = vpop.f32.mrf.mxu0  ;;  %v11390_v59 = vld [vmem:[#allocation5 + $0x74c] sm:$0xf0]  ;;  %v11344_v41 = vld [vmem:[#allocation5 + $0x5e4] sm:$0xf] }
  0xe4   :  { %v1011_v47 = vadd.f32 %v1010_v42, %v288_v28  ;;  %v8805_v62 = vor.u32 %v11390_v59, %v8804_v58  ;;  %v7897_v28 = vor.u32 %v11160_v11, %v7894_v16  ;;  %v8342_v58 = vld [vmem:[#allocation5 + $0x3b0] sm:$0xf0] }
  0xe5   :  { %2791 = vmatpush.bf16.msrb.mxu1 %v8517_v0  ;;  %v1023_v48 = vpop.f32.mrf.mxu1  ;;  %2814 = vmatpush.bf16.msrb.mxu3 %v8821_v4  ;;  %v8038_v0 = vld [vmem:[#allocation5 + $0x150] sm:$0xf0]  ;;  %v8345_v59 = vor.u32 %v11272_v56, %v8342_v58 }
  0xe6   :  { %v1024_v54 = vadd.f32 %v1023_v48, %v1011_v47  ;;  %2803 = vmatpush.bf16.msrb.mxu2 %v8661_v53  ;;  %v11236_v53 = vld [vmem:[#allocation5 + $0x284] sm:$0xf]  ;;  %v8614_v56 = vld [vmem:[#allocation5 + $0x5d0] sm:$0xf0] }
  0xe7   :  { %2823 = vmatpush.bf16.msra.mxu0 %v7993_v63  ;;  %v11196_v63 = vld [vmem:[#allocation5 + $0x144] sm:$0xf] }
  0xe8   :  { %v1159_v2 = vmax.f32 %v1024_v54, 0.0  ;;  %v8041_v17 = vor.u32 %v11196_v63, %v8038_v0  ;;  %v8198_v54 = vld [vmem:[#allocation5 + $0x290] sm:$0xf0]  ;;  %v11268_v63 = vld [vmem:[#allocation5 + $0x384] sm:$0xf] }
  0xe9   :  { %2836 = vmatpush.bf16.msra.mxu1 %v8121_v8  ;;  %2815 = vmatpush.bf16.msrb.mxu3 %v8805_v62  ;;  %v1036_v9 = vpop.f32.mrf.mxu2  ;;  %v8326_v0 = vld [vmem:[#allocation5 + $0x390] sm:$0xf0] }
  0xea   :  { %v12302_v8 = vpack.c.bf16 %v1159_v2, %v1159_v2  ;;  %v1037_v13 = vadd.f32 %v1036_v9, %v289_v52  ;;  %2804 = vmatpush.bf16.msrb.mxu2 %v8645_v6  ;;  %v8361_v52 = vor.u32 %v11276_v50, %v8358_v51  ;;  %v8329_v2 = vor.u32 %v11268_v63, %v8326_v0  ;;  %v11264_v9 = vld [vmem:[#allocation5 + $0x364] sm:$0xf] }
  0xeb   :  { %2824 = vmatpush.bf16.msra.mxu0 %v7977_v18  ;;  %v1049_v14 = vpop.f32.mrf.mxu3  ;;  %v1012_v15 = vpop.f32.mrf.mxu0  ;;  %v8249_v18 = vor.u32 %v11248_v7, %v8246_v12  ;;  %v290_v6 = vperm.slane %v12290_v1, 4  ;;  %v8169_v7 = vor.u32 %v11228_v3, %v8166_v5  ;;  %v11336_v0 = vld [vmem:[#allocation5 + $0x5a4] sm:$0xf]  ;;  %v8438_v5 = vld [vmem:[#allocation5 + $0x470] sm:$0xf0] }
  0xec   :  { %2753 = vmatmul.bf16.vlgmr.msra.gmra.mxu2 %v12302_v8  ;;  %v1050_v25 = vadd.f32 %v1049_v14, %v1037_v13  ;;  %v11224_v13 = vld [vmem:[#allocation5 + $0x224] sm:$0xf]  ;;  %v8150_v14 = vld [vmem:[#allocation5 + $0x230] sm:$0xf0] }
  0xed   :  { %2837 = vmatpush.bf16.msra.mxu1 %v8105_v23  ;;  %v1025_v21 = vpop.f32.mrf.mxu1  ;;  %v11192_v23 = vld [vmem:[#allocation5 + $0x124] sm:$0xf]  ;;  %2816 = vmatpush.bf16.msrb.mxu3 %v8789_v22  ;;  %v8502_v22 = vld [vmem:[#allocation5 + $0x4f0] sm:$0xf0] }
  0xee   :  { %2849 = vmatpush.bf16.msra.mxu2 %v8249_v18  ;;  %v1160_v34 = vmax.f32 %v1050_v25, 0.0  ;;  %v8025_v36 = vor.u32 %v11192_v23, %v8022_v24  ;;  %v11260_v18 = vld [vmem:[#allocation5 + $0x344] sm:$0xf]  ;;  %v291_v24 = vperm.slane %v12290_v1, 5 }
  0xef   :  { %2825 = vmatpush.bf16.msra.mxu0 %v7961_v29  ;;  %v11156_v29 = vld [vmem:[#allocation5 + $0x4] sm:$0xf]  ;;  %v8297_v23 = vor.u32 %v11260_v18, %v8294_v19  ;;  %v8406_v19 = vld [vmem:[#allocation5 + $0x430] sm:$0xf0] }
  0xf0   :  { %v12305_v42 = vpack.c.bf16 %v1160_v34, %v1160_v34  ;;  %v7881_v46 = vor.u32 %v11156_v29, %v7878_v35  ;;  %v11312_v21 = vld [vmem:[#allocation5 + $0x4e4] sm:$0xf]  ;;  %v8486_v34 = vld [vmem:[#allocation5 + $0x4d0] sm:$0xf0] }
  0xf1   :  { %2838 = vmatpush.bf16.msra.mxu1 %v8089_v32  ;;  %v11382_v32 = vld [vmem:[#allocation5 + $0x70c] sm:$0xf0]  ;;  %v1038_v4 = vpop.f32.mrf.mxu2  ;;  %v11220_v25 = vld [vmem:[#allocation5 + $0x204] sm:$0xf]  ;;  %v8505_v29 = vor.u32 %v11312_v21, %v8502_v22 }
  0xf2   :  { %v8773_v37 = vor.u32 %v11382_v32, %v8772_v31  ;;  %2850 = vmatpush.bf16.msra.mxu2 %v8233_v30  ;;  %2766 = vmatmul.bf16.vlgmr.msra.gmra.mxu3 %v12305_v42  ;;  %v11308_v30 = vld [vmem:[#allocation5 + $0x4c4] sm:$0xf]  ;;  %v8630_v4 = vld [vmem:[#allocation5 + $0x5f0] sm:$0xf0] }
  0xf3   :  { %2826 = vmatpush.bf16.msra.mxu0 %v7945_v39  ;;  %v8006_v39 = vld [vmem:[#allocation5 + $0x110] sm:$0xf0]  ;;  %v1051_v48 = vpop.f32.mrf.mxu3  ;;  %v11256_v35 = vld [vmem:[#allocation5 + $0x324] sm:$0xf] }
  0xf4   :  { %2817 = vmatpush.bf16.msrb.mxu3 %v8773_v37  ;;  %v8009_v49 = vor.u32 %v11188_v38, %v8006_v39  ;;  %v11304_v48 = vld [vmem:[#allocation5 + $0x4a4] sm:$0xf] }
  0xf5   :  { %2839 = vmatpush.bf16.msra.mxu1 %v8073_v45  ;;  %v8214_v45 = vld [vmem:[#allocation5 + $0x2b0] sm:$0xf0]  ;;  %v11296_v3 = vld [vmem:[#allocation5 + $0x464] sm:$0xf] }
  0xf6   :  { %v8217_v47 = vor.u32 %v11240_v44, %v8214_v45  ;;  %v8489_v45 = vor.u32 %v11308_v30, %v8486_v34  ;;  %v11288_v18 = vld [vmem:[#allocation5 + $0x424] sm:$0xf]  ;;  %v7996_v34 = vld [vmem:[#allocation5 + $0xe8] sm:$0xf] }
  0xf7   :  { %2827 = vmatpush.bf16.msra.mxu0 %v7929_v55  ;;  %v8201_v55 = vor.u32 %v11236_v53, %v8198_v54 }
  0xf8   :  { %2862 = vmatpush.bf16.msra.mxu3 %v8377_v43  ;;  %2851 = vmatpush.bf16.msra.mxu2 %v8217_v47  ;;  %v8262_v47 = vld [vmem:[#allocation5 + $0x310] sm:$0xf0] }
  0xf9   :  { %2840 = vmatpush.bf16.msra.mxu1 %v8057_v61  ;;  %v8182_v61 = vld [vmem:[#allocation5 + $0x270] sm:$0xf0] }
  0xfa   :  { %v8185_v62 = vor.u32 %v11232_v60, %v8182_v61  ;;  %v8454_v60 = vld [vmem:[#allocation5 + $0x490] sm:$0xf0] }
  0xfb   :  { %2828 = vmatpush.bf16.msra.mxu0 %v7913_v10  ;;  %v8310_v10 = vld [vmem:[#allocation5 + $0x370] sm:$0xf0] }
  0xfc   :  { %2863 = vmatpush.bf16.msra.mxu3 %v8361_v52  ;;  %2852 = vmatpush.bf16.msra.mxu2 %v8201_v55  ;;  %v8313_v11 = vor.u32 %v11264_v9, %v8310_v10  ;;  %v8633_v52 = vor.u32 %v11344_v41, %v8630_v4  ;;  %v11340_v55 = vld [vmem:[#allocation5 + $0x5c4] sm:$0xf]  ;;  %v8582_v10 = vld [vmem:[#allocation5 + $0x590] sm:$0xf0] }
  0xfd   :  { %2841 = vmatpush.bf16.msra.mxu1 %v8041_v17  ;;  %v8153_v17 = vor.u32 %v11224_v13, %v8150_v14  ;;  %v11332_v9 = vld [vmem:[#allocation5 + $0x584] sm:$0xf]  ;;  %v292_v14 = vperm.slane %v12290_v1, 6  ;;  %v8534_v41 = vld [vmem:[#allocation5 + $0x530] sm:$0xf0] }
  0xfe   :  { %v8585_v13 = vor.u32 %v11332_v9, %v8582_v10 }
  0xff   :  { %2829 = vmatpush.bf16.msra.mxu0 %v7897_v28  ;;  %v8137_v28 = vor.u32 %v11220_v25, %v8134_v26  ;;  %v11324_v25 = vld [vmem:[#allocation5 + $0x544] sm:$0xf]  ;;  %v8550_v26 = vld [vmem:[#allocation5 + $0x550] sm:$0xf0] }
 0x100   :  { %2864 = vmatpush.bf16.msra.mxu3 %v8345_v59  ;;  %2853 = vmatpush.bf16.msra.mxu2 %v8185_v62  ;;  %v11300_v59 = vld [vmem:[#allocation5 + $0x484] sm:$0xf]  ;;  %v8617_v62 = vor.u32 %v11340_v55, %v8614_v56  ;;  %v8518_v56 = vld [vmem:[#allocation5 + $0x510] sm:$0xf0] }
 0x101   :  { %2842 = vmatpush.bf16.msra.mxu1 %v8025_v36  ;;  %v8278_v36 = vld [vmem:[#allocation5 + $0x330] sm:$0xf0]  ;;  %v8457_v63 = vor.u32 %v11300_v59, %v8454_v60 }
 0x102   :  { %v8281_v40 = vor.u32 %v11256_v35, %v8278_v36  ;;  %v11187_v35 = vld [vmem:[#allocation5 + $0xf4] sm:$0xf0]  ;;  %v293_v36 = vperm.slane %v12290_v1, 7  ;;  %v8886_v59 = vld [vmem:[#allocation5 + $0x7f0] sm:$0xf0] }
 0x103   :  { %2830 = vmatpush.bf16.msra.mxu0 %v7881_v46  ;;  %v1062_v12 = vpop.f32.mrf.mxu0  ;;  %v11252_v46 = vld [vmem:[#allocation5 + $0x304] sm:$0xf] }
 0x104   :  { %2865 = vmatpush.bf16.msra.mxu3 %v8329_v2  ;;  %2854 = vmatpush.bf16.msra.mxu2 %v8169_v7  ;;  %v1063_v15 = vadd.f32 %v1062_v12, %v290_v6  ;;  %v8265_v50 = vor.u32 %v11252_v46, %v8262_v47  ;;  %v8598_v2 = vld [vmem:[#allocation5 + $0x5b0] sm:$0xf0]  ;;  %v8441_v7 = vor.u32 %v11296_v3, %v8438_v5  ;;  %v7964_v5 = vld [vmem:[#allocation5 + $0xa8] sm:$0xf] }
 0x105   :  { %2843 = vmatpush.bf16.msra.mxu1 %v8009_v49  ;;  %v1075_v16 = vpop.f32.mrf.mxu1  ;;  %v8470_v49 = vld [vmem:[#allocation5 + $0x4b0] sm:$0xf0]  ;;  %v8601_v6 = vor.u32 %v11336_v0, %v8598_v2  ;;  %v11219_v0 = vld [vmem:[#allocation5 + $0x1f4] sm:$0xf0]  ;;  %v11368_v2 = vld [vmem:[#allocation5 + $0x6a4] sm:$0xf] }
 0x106   :  { %v1076_v20 = vadd.f32 %v1075_v16, %v1063_v15  ;;  %v8473_v54 = vor.u32 %v11304_v48, %v8470_v49  ;;  %v8422_v12 = vld [vmem:[#allocation5 + $0x450] sm:$0xf0]  ;;  %v11328_v16 = vld [vmem:[#allocation5 + $0x564] sm:$0xf]  ;;  %v7980_v48 = vld [vmem:[#allocation5 + $0xc8] sm:$0xf] }
 0x107   :  { %v8742_v47 = vld [vmem:[#allocation5 + $0x6d0] sm:$0xf0]  ;;  %v11183_v49 = vld [vmem:[#allocation5 + $0xd4] sm:$0xf0] }
 0x108   :  { %2866 = vmatpush.bf16.msra.mxu3 %v8313_v11  ;;  %2855 = vmatpush.bf16.msra.mxu2 %v8153_v17  ;;  %v1161_v27 = vmax.f32 %v1076_v20, 0.0  ;;  %v11292_v11 = vld [vmem:[#allocation5 + $0x444] sm:$0xf]  ;;  %v8566_v17 = vld [vmem:[#allocation5 + $0x570] sm:$0xf0] }
 0x109   :  { %v1088_v32 = vpop.f32.mrf.mxu2  ;;  %v8425_v15 = vor.u32 %v11292_v11, %v8422_v12  ;;  %v8569_v21 = vor.u32 %v11328_v16, %v8566_v17  ;;  %v8726_v3 = vld [vmem:[#allocation5 + $0x6b0] sm:$0xf0]  ;;  %v11404_v12 = vld [vmem:[#allocation5 + $0x7c4] sm:$0xf]  ;;  %v8108_v17 = vld [vmem:[#allocation5 + $0x1c8] sm:$0xf] }
 0x10a   :  { %v12310_v31 = vpack.c.bf16 %v1161_v27, %v1161_v27  ;;  %v1089_v37 = vadd.f32 %v1088_v32, %v291_v24  ;;  %v8409_v24 = vor.u32 %v11288_v18, %v8406_v19  ;;  %v11284_v27 = vld [vmem:[#allocation5 + $0x404] sm:$0xf]  ;;  %v8758_v32 = vld [vmem:[#allocation5 + $0x6f0] sm:$0xf0]  ;;  %v11215_v18 = vld [vmem:[#allocation5 + $0x1d4] sm:$0xf0] }
 0x10b   :  { %v1101_v38 = vpop.f32.mrf.mxu3  ;;  %v1064_v39 = vpop.f32.mrf.mxu0  ;;  %v11364_v19 = vld [vmem:[#allocation5 + $0x684] sm:$0xf] }
 0x10c   :  { %2867 = vmatpush.bf16.msra.mxu3 %v8297_v23  ;;  %2856 = vmatpush.bf16.msra.mxu2 %v8137_v28  ;;  %v1102_v44 = vadd.f32 %v1101_v38, %v1089_v37  ;;  %v8390_v28 = vld [vmem:[#allocation5 + $0x410] sm:$0xf0]  ;;  %v8553_v37 = vor.u32 %v11324_v25, %v8550_v26  ;;  %v8109_v26 = vor.u32 %v11215_v18, %v8108_v17  ;;  %v8508_v17 = vld [vmem:[#allocation5 + $0x4e8] sm:$0xf]  ;;  %v11315_v18 = vld [vmem:[#allocation5 + $0x4f4] sm:$0xf0] }
 0x10d   :  { %2779 = vmatmul.bf16.vlgmr.msrb.gmra.mxu0 %v12310_v31  ;;  %v1077_v43 = vpop.f32.mrf.mxu1  ;;  %v8393_v39 = vor.u32 %v11284_v27, %v8390_v28  ;;  %v11400_v27 = vld [vmem:[#allocation5 + $0x7a4] sm:$0xf] }
 0x10e   :  { %2875 = vmatpush.bf16.msrb.mxu0 %v8505_v29  ;;  %v1162_v51 = vmax.f32 %v1102_v44, 0.0  ;;  %v11376_v29 = vld [vmem:[#allocation5 + $0x6e4] sm:$0xf]  ;;  %v7997_v44 = vor.u32 %v11187_v35, %v7996_v34  ;;  %v11211_v34 = vld [vmem:[#allocation5 + $0x1b4] sm:$0xf0] }
 0x10f   :  { %v8761_v43 = vor.u32 %v11376_v29, %v8758_v32  ;;  %v8092_v32 = vld [vmem:[#allocation5 + $0x1a8] sm:$0xf] }
 0x110   :  { %2868 = vmatpush.bf16.msra.mxu3 %v8281_v40  ;;  %v12313_v53 = vpack.c.bf16 %v1162_v51, %v1162_v51  ;;  %v11320_v40 = vld [vmem:[#allocation5 + $0x524] sm:$0xf]  ;;  %v7932_v35 = vld [vmem:[#allocation5 + $0x68] sm:$0xf] }
 0x111   :  { %v1090_v58 = vpop.f32.mrf.mxu2  ;;  %v8537_v1 = vor.u32 %v11320_v40, %v8534_v41  ;;  %v8093_v40 = vor.u32 %v11211_v34, %v8092_v32  ;;  %v11396_v41 = vld [vmem:[#allocation5 + $0x784] sm:$0xf]  ;;  %v8236_v32 = vld [vmem:[#allocation5 + $0x2c8] sm:$0xf] }
 0x112   :  { %2876 = vmatpush.bf16.msrb.mxu0 %v8489_v45  ;;  %2792 = vmatmul.bf16.vlgmr.msrb.gmra.mxu1 %v12313_v53  ;;  %v11372_v45 = vld [vmem:[#allocation5 + $0x6c4] sm:$0xf]  ;;  %v8492_v34 = vld [vmem:[#allocation5 + $0x4c8] sm:$0xf] }
 0x113   :  { %v1103_v61 = vpop.f32.mrf.mxu3  ;;  %2888 = vmatpush.bf16.msrb.mxu1 %v8633_v52  ;;  %v11408_v58 = vld [vmem:[#allocation5 + $0x7e4] sm:$0xf] }
 0x114   :  { %2869 = vmatpush.bf16.msra.mxu3 %v8265_v50  ;;  %v8745_v61 = vor.u32 %v11372_v45, %v8742_v47  ;;  %v8889_v10 = vor.u32 %v11408_v58, %v8886_v59  ;;  %v8076_v45 = vld [vmem:[#allocation5 + $0x188] sm:$0xf]  ;;  %v11203_v59 = vld [vmem:[#allocation5 + $0x174] sm:$0xf0] }
 0x115   :  { %v8060_v58 = vld [vmem:[#allocation5 + $0x168] sm:$0xf] }
 0x116   :  { %2877 = vmatpush.bf16.msrb.mxu0 %v8473_v54  ;;  %v11316_v54 = vld [vmem:[#allocation5 + $0x504] sm:$0xf] }
 0x117   :  { %2889 = vmatpush.bf16.msrb.mxu1 %v8617_v62  ;;  %v7981_v62 = vor.u32 %v11183_v49, %v7980_v48  ;;  %v8521_v9 = vor.u32 %v11316_v54, %v8518_v56  ;;  %v7916_v48 = vld [vmem:[#allocation5 + $0x48] sm:$0xf]  ;;  %v11167_v49 = vld [vmem:[#allocation5 + $0x54] sm:$0xf0]  ;;  %v11392_v54 = vld [vmem:[#allocation5 + $0x764] sm:$0xf] }
 0x118   :  { %v8822_v56 = vld [vmem:[#allocation5 + $0x770] sm:$0xf0] }
 0x11a   :  { %2878 = vmatpush.bf16.msrb.mxu0 %v8457_v63  ;;  %v8124_v63 = vld [vmem:[#allocation5 + $0x1e8] sm:$0xf] }
 0x11b   :  { %2890 = vmatpush.bf16.msrb.mxu1 %v8601_v6  ;;  %v11179_v6 = vld [vmem:[#allocation5 + $0xb4] sm:$0xf0]  ;;  %v8125_v11 = vor.u32 %v11219_v0, %v8124_v63  ;;  %v11352_v63 = vld [vmem:[#allocation5 + $0x624] sm:$0xf]  ;;  %v8662_v0 = vld [vmem:[#allocation5 + $0x630] sm:$0xf0] }
 0x11c   :  { %v7965_v16 = vor.u32 %v11179_v6, %v7964_v5  ;;  %v11388_v5 = vld [vmem:[#allocation5 + $0x744] sm:$0xf] }
 0x11d   :  { %2831 = vmatmul.bf16.vlgmr.msra.gmra.mxu0 %v12294_v33 }
 0x11e   :  { %2879 = vmatpush.bf16.msrb.mxu0 %v8441_v7 }
 0x11f   :  { %2891 = vmatpush.bf16.msrb.mxu1 %v8585_v13  ;;  %v8870_v13 = vld [vmem:[#allocation5 + $0x7d0] sm:$0xf0] }
 0x120   :  { %v8873_v25 = vor.u32 %v11404_v12, %v8870_v13  ;;  %v11348_v12 = vld [vmem:[#allocation5 + $0x604] sm:$0xf]  ;;  %v7884_v13 = vld [vmem:[#allocation5 + $0x8] sm:$0xf] }
 0x122   :  { %2880 = vmatpush.bf16.msrb.mxu0 %v8425_v15  ;;  %2844 = vmatmul.bf16.vlgmr.msra.gmra.mxu1 %v12297_v57  ;;  %v8729_v15 = vor.u32 %v11368_v2, %v8726_v3  ;;  %v8825_v2 = vor.u32 %v11392_v54, %v8822_v56  ;;  %v8061_v3 = vor.u32 %v11203_v59, %v8060_v58  ;;  %v8220_v54 = vld [vmem:[#allocation5 + $0x2a8] sm:$0xf] }
 0x123   :  { %v1114_v20 = vpop.f32.mrf.mxu0  ;;  %2892 = vmatpush.bf16.msrb.mxu1 %v8569_v21  ;;  %v8710_v21 = vld [vmem:[#allocation5 + $0x690] sm:$0xf0]  ;;  %v8364_v59 = vld [vmem:[#allocation5 + $0x3c8] sm:$0xf] }
 0x124   :  { %v1115_v22 = vadd.f32 %v1114_v20, %v292_v14  ;;  %v8713_v28 = vor.u32 %v11364_v19, %v8710_v21  ;;  %v8252_v21 = vld [vmem:[#allocation5 + $0x2e8] sm:$0xf] }
 0x125   :  { %v1127_v23 = vpop.f32.mrf.mxu1 }
 0x126   :  { %v1128_v30 = vadd.f32 %v1127_v23, %v1115_v22  ;;  %2881 = vmatpush.bf16.msrb.mxu0 %v8409_v24  ;;  %v7948_v22 = vld [vmem:[#allocation5 + $0x88] sm:$0xf]  ;;  %v11175_v23 = vld [vmem:[#allocation5 + $0x94] sm:$0xf0] }
 0x127   :  { %2893 = vmatpush.bf16.msrb.mxu1 %v8553_v37  ;;  %v7949_v29 = vor.u32 %v11175_v23, %v7948_v22  ;;  %v11360_v37 = vld [vmem:[#allocation5 + $0x664] sm:$0xf]  ;;  %v11251_v22 = vld [vmem:[#allocation5 + $0x2f4] sm:$0xf0] }
 0x128   :  { %v1163_v38 = vmax.f32 %v1128_v30, 0.0  ;;  %v8854_v30 = vld [vmem:[#allocation5 + $0x7b0] sm:$0xf0]  ;;  %v11384_v23 = vld [vmem:[#allocation5 + $0x724] sm:$0xf] }
 0x129   :  { %v1140_v46 = vpop.f32.mrf.mxu2 }
 0x12a   :  { %v12320_v4 = vpack.c.bf16 %v1163_v38, %v1163_v38  ;;  %v1141_v50 = vadd.f32 %v1140_v46, %v293_v36  ;;  %2882 = vmatpush.bf16.msrb.mxu0 %v8393_v39  ;;  %v11171_v36 = vld [vmem:[#allocation5 + $0x74] sm:$0xf0]  ;;  %v8694_v38 = vld [vmem:[#allocation5 + $0x670] sm:$0xf0]  ;;  %v8857_v39 = vor.u32 %v11400_v27, %v8854_v30  ;;  %v8253_v30 = vor.u32 %v11251_v22, %v8252_v21  ;;  %v8188_v21 = vld [vmem:[#allocation5 + $0x268] sm:$0xf] }
 0x12b   :  { %v1153_v51 = vpop.f32.mrf.mxu3  ;;  %v1116_v52 = vpop.f32.mrf.mxu0  ;;  %2894 = vmatpush.bf16.msrb.mxu1 %v8537_v1  ;;  %v11207_v46 = vld [vmem:[#allocation5 + $0x194] sm:$0xf0]  ;;  %v8697_v47 = vor.u32 %v11360_v37, %v8694_v38 }
 0x12c   :  { %2805 = vmatmul.bf16.vlgmr.msrb.gmra.mxu2 %v12320_v4  ;;  %v1154_v60 = vadd.f32 %v1153_v51, %v1141_v50  ;;  %v11356_v50 = vld [vmem:[#allocation5 + $0x644] sm:$0xf]  ;;  %v8678_v51 = vld [vmem:[#allocation5 + $0x650] sm:$0xf0]  ;;  %v8077_v1 = vor.u32 %v11207_v46, %v8076_v45  ;;  %v11195_v27 = vld [vmem:[#allocation5 + $0x134] sm:$0xf0] }
 0x12d   :  { %v1129_v55 = vpop.f32.mrf.mxu1  ;;  %2901 = vmatpush.bf16.msrb.mxu2 %v8761_v43  ;;  %2883 = vmatmul.bf16.vlgmr.msrb.gmra.mxu0 %v12310_v31  ;;  %v7933_v43 = vor.u32 %v11171_v36, %v7932_v35  ;;  %v11311_v35 = vld [vmem:[#allocation5 + $0x4d4] sm:$0xf0] }
 0x12e   :  { %2927 = vmatpush.bf16.msra.mxu0 %v7997_v44  ;;  %v1164_v7 = vmax.f32 %v1154_v60, 0.0  ;;  %v8838_v44 = vld [vmem:[#allocation5 + $0x790] sm:$0xf0]  ;;  %v7917_v55 = vor.u32 %v11167_v49, %v7916_v48  ;;  %v8681_v60 = vor.u32 %v11356_v50, %v8678_v51  ;;  %v11247_v38 = vld [vmem:[#allocation5 + $0x2d4] sm:$0xf0]  ;;  %v8493_v45 = vor.u32 %v11311_v35, %v8492_v34 }
 0x12f   :  { %2895 = vmatpush.bf16.msrb.mxu1 %v8521_v9  ;;  %v8841_v52 = vor.u32 %v11396_v41, %v8838_v44  ;;  %v8044_v9 = vld [vmem:[#allocation5 + $0x148] sm:$0xf]  ;;  %v11283_v46 = vld [vmem:[#allocation5 + $0x3f4] sm:$0xf0]  ;;  %v8237_v49 = vor.u32 %v11247_v38, %v8236_v32 }
 0x130   :  { %v12324_v14 = vpack.c.bf16 %v1164_v7, %v1164_v7  ;;  %v8806_v7 = vld [vmem:[#allocation5 + $0x750] sm:$0xf0]  ;;  %v8012_v41 = vld [vmem:[#allocation5 + $0x108] sm:$0xf]  ;;  %v11347_v48 = vld [vmem:[#allocation5 + $0x5f4] sm:$0xf0] }
 0x131   :  { %2902 = vmatpush.bf16.msrb.mxu2 %v8745_v61  ;;  %v1142_v20 = vpop.f32.mrf.mxu2  ;;  %v7900_v61 = vld [vmem:[#allocation5 + $0x28] sm:$0xf]  ;;  %v8809_v19 = vor.u32 %v11388_v5, %v8806_v7  ;;  %v11307_v51 = vld [vmem:[#allocation5 + $0x4b4] sm:$0xf0]  ;;  %v1429_v5 = vld [vmem:[%s12648_s5] sm:$0xf] }
 0x132   :  { %2928 = vmatpush.bf16.msra.mxu0 %v7981_v62  ;;  %2818 = vmatmul.bf16.vlgmr.msrb.gmra.mxu3 %v12324_v14  ;;  %v11163_v62 = vld [vmem:[#allocation5 + $0x34] sm:$0xf0]  ;;  %v8380_v44 = vld [vmem:[#allocation5 + $0x3e8] sm:$0xf] }
 0x133   :  { %v1155_v24 = vpop.f32.mrf.mxu3  ;;  %2914 = vmatpush.bf16.msrb.mxu3 %v8889_v10  ;;  %2940 = vmatpush.bf16.msra.mxu1 %v8125_v11  ;;  %v7901_v6 = vor.u32 %v11163_v62, %v7900_v61  ;;  %v11199_v10 = vld [vmem:[#allocation5 + $0x154] sm:$0xf0]  ;;  %v8665_v11 = vor.u32 %v11352_v63, %v8662_v0  ;;  %v8476_v50 = vld [vmem:[#allocation5 + $0x4a8] sm:$0xf]  ;;  %v8381_v56 = vor.u32 %v11283_v46, %v8380_v44 }
 0x134   :  { %2896 = vmatmul.bf16.vlgmr.msrb.gmra.mxu1 %v12313_v53  ;;  %v8045_v20 = vor.u32 %v11199_v10, %v8044_v9  ;;  %v11279_v61 = vld [vmem:[#allocation5 + $0x3d4] sm:$0xf0]  ;;  %v8620_v62 = vld [vmem:[#allocation5 + $0x5c8] sm:$0xf] }
 0x135   :  { %2903 = vmatpush.bf16.msrb.mxu2 %v8729_v15  ;;  %v11159_v15 = vld [vmem:[#allocation5 + $0x14] sm:$0xf0]  ;;  %v8365_v9 = vor.u32 %v11279_v61, %v8364_v59  ;;  %v8428_v35 = vld [vmem:[#allocation5 + $0x448] sm:$0xf] }
 0x136   :  { %2929 = vmatpush.bf16.msra.mxu0 %v7965_v16  ;;  %v8646_v16 = vld [vmem:[#allocation5 + $0x610] sm:$0xf0]  ;;  %v7885_v24 = vor.u32 %v11159_v15, %v7884_v13  ;;  %v11343_v63 = vld [vmem:[#allocation5 + $0x5d4] sm:$0xf0]  ;;  %v8604_v15 = vld [vmem:[#allocation5 + $0x5a8] sm:$0xf] }
 0x137   :  { %2915 = vmatpush.bf16.msrb.mxu3 %v8873_v25  ;;  %2941 = vmatpush.bf16.msra.mxu1 %v8109_v26  ;;  %v8790_v25 = vld [vmem:[#allocation5 + $0x730] sm:$0xf0]  ;;  %v8028_v26 = vld [vmem:[#allocation5 + $0x128] sm:$0xf]  ;;  %v11239_v7 = vld [vmem:[#allocation5 + $0x294] sm:$0xf0]  ;;  %v8621_v10 = vor.u32 %v11343_v63, %v8620_v62 }
 0x138   :  { %v8793_v36 = vor.u32 %v11384_v23, %v8790_v25  ;;  %v8029_v37 = vor.u32 %v11195_v27, %v8028_v26  ;;  %v11235_v22 = vld [vmem:[#allocation5 + $0x274] sm:$0xf0]  ;;  %v8332_v26 = vld [vmem:[#allocation5 + $0x388] sm:$0xf] }
 0x139   :  { %2904 = vmatpush.bf16.msrb.mxu2 %v8713_v28  ;;  %v8649_v28 = vor.u32 %v11348_v12, %v8646_v16  ;;  %v11275_v12 = vld [vmem:[#allocation5 + $0x3b4] sm:$0xf0]  ;;  %v8189_v34 = vor.u32 %v11235_v22, %v8188_v21  ;;  %v8572_v46 = vld [vmem:[#allocation5 + $0x568] sm:$0xf] }
 0x13a   :  { %2930 = vmatpush.bf16.msra.mxu0 %v7949_v29  ;;  %v8509_v29 = vor.u32 %v11315_v18, %v8508_v17  ;;  %v11339_v16 = vld [vmem:[#allocation5 + $0x5b4] sm:$0xf0]  ;;  %v1431_v17 = vperm.slane %v1429_v5, 0  ;;  %v8556_v61 = vld [vmem:[#allocation5 + $0x548] sm:$0xf] }
 0x13b   :  { %2916 = vmatpush.bf16.msrb.mxu3 %v8857_v39  ;;  %2942 = vmatpush.bf16.msra.mxu1 %v8093_v40  ;;  %v11380_v39 = vld [vmem:[#allocation5 + $0x704] sm:$0xf]  ;;  %v8774_v40 = vld [vmem:[#allocation5 + $0x710] sm:$0xf0]  ;;  %v8605_v25 = vor.u32 %v11339_v16, %v8604_v15  ;;  %v11231_v38 = vld [vmem:[#allocation5 + $0x254] sm:$0xf0] }
 0x13c   :  { %2857 = vmatmul.bf16.vlgmr.msra.gmra.mxu2 %v12302_v8  ;;  %v11327_v62 = vld [vmem:[#allocation5 + $0x554] sm:$0xf0] }
 0x13d   :  { %2905 = vmatpush.bf16.msrb.mxu2 %v8697_v47  ;;  %v8636_v47 = vld [vmem:[#allocation5 + $0x5e8] sm:$0xf]  ;;  %v11223_v5 = vld [vmem:[#allocation5 + $0x214] sm:$0xf0] }
 0x13e   :  { %2931 = vmatpush.bf16.msra.mxu0 %v7933_v43  ;;  %v11191_v43 = vld [vmem:[#allocation5 + $0x114] sm:$0xf0]  ;;  %v8637_v58 = vor.u32 %v11347_v48, %v8636_v47 }
 0x13f   :  { %2917 = vmatpush.bf16.msrb.mxu3 %v8841_v52  ;;  %2943 = vmatpush.bf16.msra.mxu1 %v8077_v1  ;;  %v8777_v52 = vor.u32 %v11380_v39, %v8774_v40  ;;  %v8013_v1 = vor.u32 %v11191_v43, %v8012_v41  ;;  %v8316_v41 = vld [vmem:[#allocation5 + $0x368] sm:$0xf]  ;;  %v11331_v47 = vld [vmem:[#allocation5 + $0x574] sm:$0xf0] }
 0x141   :  { %2906 = vmatpush.bf16.msrb.mxu2 %v8681_v60  ;;  %v8477_v60 = vor.u32 %v11307_v51, %v8476_v50  ;;  %v8412_v50 = vld [vmem:[#allocation5 + $0x428] sm:$0xf]  ;;  %v11291_v51 = vld [vmem:[#allocation5 + $0x434] sm:$0xf0] }
 0x142   :  { %2932 = vmatpush.bf16.msra.mxu0 %v7917_v55  ;;  %2870 = vmatmul.bf16.vlgmr.msra.gmra.mxu3 %v12305_v42  ;;  %v11243_v55 = vld [vmem:[#allocation5 + $0x2b4] sm:$0xf0]  ;;  %v8413_v59 = vor.u32 %v11291_v51, %v8412_v50  ;;  %v8876_v51 = vld [vmem:[#allocation5 + $0x7c8] sm:$0xf] }
 0x143   :  { %2918 = vmatpush.bf16.msrb.mxu3 %v8825_v2  ;;  %2944 = vmatpush.bf16.msra.mxu1 %v8061_v3  ;;  %v8221_v0 = vor.u32 %v11243_v55, %v8220_v54  ;;  %v8460_v2 = vld [vmem:[#allocation5 + $0x488] sm:$0xf]  ;;  %v11303_v3 = vld [vmem:[#allocation5 + $0x494] sm:$0xf0] }
 0x144   :  { %v8461_v13 = vor.u32 %v11303_v3, %v8460_v2  ;;  %v8396_v2 = vld [vmem:[#allocation5 + $0x408] sm:$0xf]  ;;  %v11287_v3 = vld [vmem:[#allocation5 + $0x414] sm:$0xf0] }
 0x145   :  { %2907 = vmatpush.bf16.msrb.mxu2 %v8665_v11  ;;  %v8348_v11 = vld [vmem:[#allocation5 + $0x3a8] sm:$0xf]  ;;  %v8397_v16 = vor.u32 %v11287_v3, %v8396_v2  ;;  %v11371_v50 = vld [vmem:[#allocation5 + $0x6b4] sm:$0xf0] }
 0x146   :  { %2933 = vmatpush.bf16.msra.mxu0 %v7901_v6  ;;  %v8204_v6 = vld [vmem:[#allocation5 + $0x288] sm:$0xf]  ;;  %v11403_v3 = vld [vmem:[#allocation5 + $0x7b4] sm:$0xf0] }
 0x147   :  { %2919 = vmatpush.bf16.msrb.mxu3 %v8809_v19  ;;  %2945 = vmatpush.bf16.msra.mxu1 %v8045_v20  ;;  %v8205_v18 = vor.u32 %v11239_v7, %v8204_v6  ;;  %v8444_v19 = vld [vmem:[#allocation5 + $0x468] sm:$0xf]  ;;  %v11299_v20 = vld [vmem:[#allocation5 + $0x474] sm:$0xf0]  ;;  %v11185_v6 = vld [vmem:[#allocation5 + $0xec] sm:$0xf] }
 0x148   :  { %v8445_v27 = vor.u32 %v11299_v20, %v8444_v19  ;;  %v7998_v7 = vld [vmem:[#allocation5 + $0xf8] sm:$0xf0]  ;;  %v11323_v19 = vld [vmem:[#allocation5 + $0x534] sm:$0xf0] }
 0x149   :  { %2908 = vmatpush.bf16.msrb.mxu2 %v8649_v28  ;;  %v11271_v28 = vld [vmem:[#allocation5 + $0x394] sm:$0xf0]  ;;  %v8001_v21 = vor.u32 %v11185_v6, %v7998_v7  ;;  %v8094_v6 = vld [vmem:[#allocation5 + $0x1b8] sm:$0xf0]  ;;  %v11169_v7 = vld [vmem:[#allocation5 + $0x6c] sm:$0xf] }
 0x14a   :  { %2934 = vmatpush.bf16.msra.mxu0 %v7885_v24  ;;  %v8349_v24 = vor.u32 %v11275_v12, %v8348_v11  ;;  %v8333_v39 = vor.u32 %v11271_v28, %v8332_v26  ;;  %v8764_v11 = vld [vmem:[#allocation5 + $0x6e8] sm:$0xf]  ;;  %v11379_v12 = vld [vmem:[#allocation5 + $0x6f4] sm:$0xf0] }
 0x14b   :  { %2920 = vmatpush.bf16.msrb.mxu3 %v8793_v36  ;;  %2946 = vmatpush.bf16.msra.mxu1 %v8029_v37  ;;  %v2728_v23 = vpop.f32.mrf.mxu0  ;;  %v11295_v36 = vld [vmem:[#allocation5 + $0x454] sm:$0xf0]  ;;  %v8172_v37 = vld [vmem:[#allocation5 + $0x248] sm:$0xf]  ;;  %v8765_v22 = vor.u32 %v11379_v12, %v8764_v11 }
 0x14c   :  { %2909 = vmatmul.bf16.vlgmr.msrb.gmra.mxu2 %v12320_v4  ;;  %v2729_v32 = vadd.f32 %v2728_v23, %v1431_v17  ;;  %v8429_v44 = vor.u32 %v11295_v36, %v8428_v35  ;;  %v11259_v17 = vld [vmem:[#allocation5 + $0x334] sm:$0xf0]  ;;  %v8748_v23 = vld [vmem:[#allocation5 + $0x6c8] sm:$0xf] }
 0x14d   :  { %2953 = vmatpush.bf16.msra.mxu2 %v8253_v30  ;;  %2935 = vmatmul.bf16.vlgmr.msra.gmra.mxu0 %v12294_v33  ;;  %v11335_v30 = vld [vmem:[#allocation5 + $0x594] sm:$0xf0]  ;;  %v8892_v35 = vld [vmem:[#allocation5 + $0x7e8] sm:$0xf] }
 0x14e   :  { %2979 = vmatpush.bf16.msrb.mxu0 %v8509_v29  ;;  %v8588_v29 = vld [vmem:[#allocation5 + $0x588] sm:$0xf]  ;;  %v11375_v28 = vld [vmem:[#allocation5 + $0x6d4] sm:$0xf0] }
 0x14f   :  { %2921 = vmatpush.bf16.msrb.mxu3 %v8777_v52  ;;  %2947 = vmatpush.bf16.msra.mxu1 %v8013_v1  ;;  %v8589_v40 = vor.u32 %v11335_v30, %v8588_v29  ;;  %v8156_v52 = vld [vmem:[#allocation5 + $0x228] sm:$0xf]  ;;  %v11227_v1 = vld [vmem:[#allocation5 + $0x234] sm:$0xf0] }
 0x150   :  { %v8157_v63 = vor.u32 %v11227_v1, %v8156_v52  ;;  %v8268_v29 = vld [vmem:[#allocation5 + $0x308] sm:$0xf]  ;;  %v11255_v30 = vld [vmem:[#allocation5 + $0x314] sm:$0xf0] }
 0x151   :  { %2954 = vmatpush.bf16.msra.mxu2 %v8237_v49  ;;  %v8173_v49 = vor.u32 %v11231_v38, %v8172_v37  ;;  %v11411_v37 = vld [vmem:[#allocation5 + $0x7f4] sm:$0xf0]  ;;  %v11217_v38 = vld [vmem:[#allocation5 + $0x1ec] sm:$0xf] }
 0x152   :  { %2980 = vmatpush.bf16.msrb.mxu0 %v8493_v45  ;;  %2948 = vmatmul.bf16.vlgmr.msra.gmra.mxu1 %v12297_v57  ;;  %v11267_v45 = vld [vmem:[#allocation5 + $0x374] sm:$0xf0] }
 0x153   :  { %2966 = vmatpush.bf16.msra.mxu3 %v8381_v56  ;;  %2992 = vmatpush.bf16.msrb.mxu1 %v8637_v58  ;;  %v2730_v54 = vpop.f32.mrf.mxu0  ;;  %v8317_v55 = vor.u32 %v11267_v45, %v8316_v41  ;;  %v8573_v56 = vor.u32 %v11331_v47, %v8572_v46  ;;  %v8300_v58 = vld [vmem:[#allocation5 + $0x348] sm:$0xf]  ;;  %v11177_v41 = vld [vmem:[#allocation5 + $0xac] sm:$0xf]  ;;  %v8893_v46 = vor.u32 %v11411_v37, %v8892_v35  ;;  %v11407_v1 = vld [vmem:[#allocation5 + $0x7d4] sm:$0xf0] }
 0x154   :  { %2922 = vmatmul.bf16.vlgmr.msrb.gmra.mxu3 %v12324_v14  ;;  %v2741_v43 = vpop.f32.mrf.mxu1  ;;  %v11213_v54 = vld [vmem:[#allocation5 + $0x1cc] sm:$0xf]  ;;  %v8062_v35 = vld [vmem:[#allocation5 + $0x178] sm:$0xf0] }
 0x155   :  { %2955 = vmatpush.bf16.msra.mxu2 %v8221_v0  ;;  %v12337_v48 = vadd.f32 %v2741_v43, %v2729_v32  ;;  %v8140_v0 = vld [vmem:[#allocation5 + $0x208] sm:$0xf]  ;;  %v7966_v43 = vld [vmem:[#allocation5 + $0xb8] sm:$0xf0] }
 0x156   :  { %2981 = vmatpush.bf16.msrb.mxu0 %v8477_v60  ;;  %v11263_v60 = vld [vmem:[#allocation5 + $0x354] sm:$0xf0]  ;;  %v8141_v20 = vor.u32 %v11223_v5, %v8140_v0  ;;  %v8524_v32 = vld [vmem:[#allocation5 + $0x508] sm:$0xf]  ;;  %v7969_v52 = vor.u32 %v11177_v41, %v7966_v43  ;;  %v11209_v5 = vld [vmem:[#allocation5 + $0x1ac] sm:$0xf] }
 0x157   :  { %2967 = vmatpush.bf16.msra.mxu3 %v8365_v9  ;;  %2993 = vmatpush.bf16.msrb.mxu1 %v8621_v10  ;;  %v8301_v9 = vor.u32 %v11263_v60, %v8300_v58  ;;  %v8557_v10 = vor.u32 %v11327_v62, %v8556_v61  ;;  %v7950_v58 = vld [vmem:[#allocation5 + $0x98] sm:$0xf0]  ;;  %v8877_v60 = vor.u32 %v11407_v1, %v8876_v51  ;;  %v8716_v62 = vld [vmem:[#allocation5 + $0x688] sm:$0xf]  ;;  %v11355_v43 = vld [vmem:[#allocation5 + $0x634] sm:$0xf0] }
 0x158   :  { %v8860_v0 = vld [vmem:[#allocation5 + $0x7a8] sm:$0xf]  ;;  %v8097_v12 = vor.u32 %v11209_v5, %v8094_v6  ;;  %v7902_v37 = vld [vmem:[#allocation5 + $0x38] sm:$0xf0]  ;;  %v11157_v51 = vld [vmem:[#allocation5 + $0xc] sm:$0xf] }
 0x159   :  { %2956 = vmatpush.bf16.msra.mxu2 %v8205_v18  ;;  %v8540_v18 = vld [vmem:[#allocation5 + $0x528] sm:$0xf]  ;;  %v8861_v11 = vor.u32 %v11403_v3, %v8860_v0  ;;  %v8254_v0 = vld [vmem:[#allocation5 + $0x2f8] sm:$0xf0]  ;;  %v11387_v3 = vld [vmem:[#allocation5 + $0x734] sm:$0xf0] }
 0x15a   :  { %2982 = vmatpush.bf16.msrb.mxu0 %v8461_v13  ;;  %v8284_v13 = vld [vmem:[#allocation5 + $0x328] sm:$0xf]  ;;  %v11193_v6 = vld [vmem:[#allocation5 + $0x12c] sm:$0xf] }
 0x15b   :  { %2968 = vmatpush.bf16.msra.mxu3 %v8349_v24  ;;  %2994 = vmatpush.bf16.msrb.mxu1 %v8605_v25  ;;  %v11181_v24 = vld [vmem:[#allocation5 + $0xcc] sm:$0xf]  ;;  %v7982_v25 = vld [vmem:[#allocation5 + $0xd8] sm:$0xf0]  ;;  %v8285_v26 = vor.u32 %v11259_v17, %v8284_v13  ;;  %v8700_v13 = vld [vmem:[#allocation5 + $0x668] sm:$0xf] }
 0x15c   :  { %v2743_v15 = vpop.f32.mrf.mxu1  ;;  %v7985_v36 = vor.u32 %v11181_v24, %v7982_v25  ;;  %v8668_v41 = vld [vmem:[#allocation5 + $0x628] sm:$0xf] }
 0x15d   :  { %2957 = vmatpush.bf16.msra.mxu2 %v8189_v34  ;;  %v11319_v34 = vld [vmem:[#allocation5 + $0x514] sm:$0xf0] }
 0x15e   :  { %2983 = vmatpush.bf16.msrb.mxu0 %v8445_v27  ;;  %v8541_v27 = vor.u32 %v11323_v19, %v8540_v18  ;;  %v8525_v45 = vor.u32 %v11319_v34, %v8524_v32  ;;  %v11363_v15 = vld [vmem:[#allocation5 + $0x674] sm:$0xf0]  ;;  %v11205_v19 = vld [vmem:[#allocation5 + $0x18c] sm:$0xf] }
 0x15f   :  { %2969 = vmatpush.bf16.msra.mxu3 %v8333_v39  ;;  %2995 = vmatpush.bf16.msrb.mxu1 %v8589_v40  ;;  %v8126_v39 = vld [vmem:[#allocation5 + $0x1f8] sm:$0xf0]  ;;  %v8749_v40 = vor.u32 %v11375_v28, %v8748_v23  ;;  %v11399_v18 = vld [vmem:[#allocation5 + $0x794] sm:$0xf0]  ;;  %v8701_v24 = vor.u32 %v11363_v15, %v8700_v13  ;;  %v11201_v34 = vld [vmem:[#allocation5 + $0x16c] sm:$0xf] }
 0x160   :  { %v8129_v47 = vor.u32 %v11217_v38, %v8126_v39  ;;  %v7918_v23 = vld [vmem:[#allocation5 + $0x58] sm:$0xf0]  ;;  %v11359_v28 = vld [vmem:[#allocation5 + $0x654] sm:$0xf0]  ;;  %v11245_v15 = vld [vmem:[#allocation5 + $0x2cc] sm:$0xf] }
 0x161   :  { %2958 = vmatpush.bf16.msra.mxu2 %v8173_v49  ;;  %v8732_v49 = vld [vmem:[#allocation5 + $0x6a8] sm:$0xf]  ;;  %v11395_v32 = vld [vmem:[#allocation5 + $0x774] sm:$0xf0] }
 0x162   :  { %2984 = vmatpush.bf16.msrb.mxu0 %v8429_v44  ;;  %v8269_v44 = vor.u32 %v11255_v30, %v8268_v29  ;;  %v8828_v29 = vld [vmem:[#allocation5 + $0x768] sm:$0xf] }
 0x163   :  { %2970 = vmatpush.bf16.msra.mxu3 %v8317_v55  ;;  %2996 = vmatpush.bf16.msrb.mxu1 %v8573_v56  ;;  %v8110_v55 = vld [vmem:[#allocation5 + $0x1d8] sm:$0xf0]  ;;  %v11173_v56 = vld [vmem:[#allocation5 + $0x8c] sm:$0xf]  ;;  %v8829_v39 = vor.u32 %v11395_v32, %v8828_v29 }
 0x164   :  { %v8113_v61 = vor.u32 %v11213_v54, %v8110_v55  ;;  %v7953_v2 = vor.u32 %v11173_v56, %v7950_v58  ;;  %v8669_v54 = vor.u32 %v11355_v43, %v8668_v41  ;;  %v11313_v55 = vld [vmem:[#allocation5 + $0x4ec] sm:$0xf]  ;;  %v8510_v56 = vld [vmem:[#allocation5 + $0x4f8] sm:$0xf0] }
 0x165   :  { %2959 = vmatpush.bf16.msra.mxu2 %v8157_v63  ;;  %v11367_v63 = vld [vmem:[#allocation5 + $0x694] sm:$0xf0]  ;;  %v8513_v5 = vor.u32 %v11313_v55, %v8510_v56  ;;  %v11305_v29 = vld [vmem:[#allocation5 + $0x4ac] sm:$0xf]  ;;  %v8366_v43 = vld [vmem:[#allocation5 + $0x3d8] sm:$0xf0] }
 0x166   :  { %2985 = vmatpush.bf16.msrb.mxu0 %v8413_v59  ;;  %v8733_v59 = vor.u32 %v11371_v50, %v8732_v49  ;;  %v11197_v49 = vld [vmem:[#allocation5 + $0x14c] sm:$0xf]  ;;  %v8046_v50 = vld [vmem:[#allocation5 + $0x158] sm:$0xf0] }
 0x167   :  { %2971 = vmatpush.bf16.msra.mxu3 %v8301_v9  ;;  %2997 = vmatpush.bf16.msrb.mxu1 %v8557_v10  ;;  %v7934_v9 = vld [vmem:[#allocation5 + $0x78] sm:$0xf0]  ;;  %v8717_v10 = vor.u32 %v11367_v63, %v8716_v62  ;;  %v11249_v62 = vld [vmem:[#allocation5 + $0x2ec] sm:$0xf] }
 0x168   :  { %v7937_v17 = vor.u32 %v11169_v7, %v7934_v9  ;;  %v8030_v7 = vld [vmem:[#allocation5 + $0x138] sm:$0xf0]  ;;  %v11277_v41 = vld [vmem:[#allocation5 + $0x3cc] sm:$0xf] }
 0x169   :  { %2960 = vmatpush.bf16.msra.mxu2 %v8141_v20  ;;  %v8078_v20 = vld [vmem:[#allocation5 + $0x198] sm:$0xf0]  ;;  %v11273_v56 = vld [vmem:[#allocation5 + $0x3ac] sm:$0xf] }
 0x16a   :  { %2986 = vmatpush.bf16.msrb.mxu0 %v8397_v16  ;;  %v8844_v16 = vld [vmem:[#allocation5 + $0x788] sm:$0xf] }
 0x16b   :  { %2972 = vmatpush.bf16.msra.mxu3 %v8285_v26  ;;  %2998 = vmatpush.bf16.msrb.mxu1 %v8541_v27  ;;  %v8845_v25 = vor.u32 %v11399_v18, %v8844_v16  ;;  %v8081_v26 = vor.u32 %v11205_v19, %v8078_v20  ;;  %v8684_v27 = vld [vmem:[#allocation5 + $0x648] sm:$0xf]  ;;  %v8238_v16 = vld [vmem:[#allocation5 + $0x2d8] sm:$0xf0]  ;;  %v8033_v18 = vor.u32 %v11193_v6, %v8030_v7  ;;  %v11383_v19 = vld [vmem:[#allocation5 + $0x714] sm:$0xf0] }
 0x16c   :  { %2961 = vmatmul.bf16.vlgmr.msra.gmra.mxu2 %v12302_v8  ;;  %v8685_v38 = vor.u32 %v11359_v28, %v8684_v27  ;;  %v11189_v20 = vld [vmem:[#allocation5 + $0x10c] sm:$0xf]  ;;  %v8638_v28 = vld [vmem:[#allocation5 + $0x5f8] sm:$0xf0]  ;;  %v8241_v32 = vor.u32 %v11245_v15, %v8238_v16 }
 0x16d   :  { %3005 = vmatpush.bf16.msrb.mxu2 %v8765_v22  ;;  %2987 = vmatmul.bf16.vlgmr.msrb.gmra.mxu0 %v12310_v31  ;;  %v11165_v22 = vld [vmem:[#allocation5 + $0x4c] sm:$0xf] }
 0x16e   :  { %3031 = vmatpush.bf16.msra.mxu0 %v8001_v21  ;;  %v7921_v30 = vor.u32 %v11165_v22, %v7918_v23  ;;  %v8014_v22 = vld [vmem:[#allocation5 + $0x118] sm:$0xf0]  ;;  %v11345_v27 = vld [vmem:[#allocation5 + $0x5ec] sm:$0xf] }
 0x16f   :  { %2973 = vmatpush.bf16.msra.mxu3 %v8269_v44  ;;  %2999 = vmatpush.bf16.msrb.mxu1 %v8525_v45  ;;  %v12343_v21 = vpop.f32.mrf.mxu2  ;;  %v8812_v44 = vld [vmem:[#allocation5 + $0x748] sm:$0xf]  ;;  %v11269_v7 = vld [vmem:[#allocation5 + $0x38c] sm:$0xf] }
 0x171   :  { %3006 = vmatpush.bf16.msrb.mxu2 %v8749_v40  ;;  %v8065_v40 = vor.u32 %v11201_v34, %v8062_v35  ;;  %v8017_v35 = vor.u32 %v11189_v20, %v8014_v22 }
 0x172   :  { %3032 = vmatpush.bf16.msra.mxu0 %v7985_v36  ;;  %2974 = vmatmul.bf16.vlgmr.msra.gmra.mxu3 %v12305_v42  ;;  %v11161_v36 = vld [vmem:[#allocation5 + $0x2c] sm:$0xf] }
 0x173   :  { %3018 = vmatpush.bf16.msrb.mxu3 %v8893_v46  ;;  %3044 = vmatpush.bf16.msra.mxu1 %v8129_v47  ;;  %v7905_v46 = vor.u32 %v11161_v36, %v7902_v37  ;;  %v11391_v47 = vld [vmem:[#allocation5 + $0x754] sm:$0xf0]  ;;  %v11241_v37 = vld [vmem:[#allocation5 + $0x2ac] sm:$0xf] }
 0x174   :  { %3000 = vmatmul.bf16.vlgmr.msrb.gmra.mxu1 %v12313_v53  ;;  %v8813_v58 = vor.u32 %v11391_v47, %v8812_v44  ;;  %v11341_v44 = vld [vmem:[#allocation5 + $0x5cc] sm:$0xf] }
 0x175   :  { %3007 = vmatpush.bf16.msrb.mxu2 %v8733_v59  ;;  %v12345_v45 = vpop.f32.mrf.mxu3  ;;  %v8049_v59 = vor.u32 %v11197_v49, %v8046_v50  ;;  %v11301_v47 = vld [vmem:[#allocation5 + $0x48c] sm:$0xf]  ;;  %v8462_v49 = vld [vmem:[#allocation5 + $0x498] sm:$0xf0] }
 0x176   :  { %3033 = vmatpush.bf16.msra.mxu0 %v7969_v52  ;;  %v7886_v52 = vld [vmem:[#allocation5 + $0x18] sm:$0xf0]  ;;  %v8465_v55 = vor.u32 %v11301_v47, %v8462_v49  ;;  %v11427_v47 = vld [vmem:[#allocation7 + $0x74] sm:$0xf0] }
 0x177   :  { %3019 = vmatpush.bf16.msrb.mxu3 %v8877_v60  ;;  %3045 = vmatpush.bf16.msra.mxu1 %v8113_v61  ;;  %v2756_v1 = vpop.f32.mrf.mxu2  ;;  %v8652_v60 = vld [vmem:[#allocation5 + $0x608] sm:$0xf]  ;;  %v11351_v61 = vld [vmem:[#allocation5 + $0x614] sm:$0xf0]  ;;  %v7889_v63 = vor.u32 %v11157_v51, %v7886_v52  ;;  %v11237_v51 = vld [vmem:[#allocation5 + $0x28c] sm:$0xf] }
 0x178   :  { %v8653_v9 = vor.u32 %v11351_v61, %v8652_v60  ;;  %v8206_v52 = vld [vmem:[#allocation5 + $0x298] sm:$0xf0]  ;;  %v11297_v61 = vld [vmem:[#allocation5 + $0x46c] sm:$0xf] }
 0x179   :  { %3008 = vmatpush.bf16.msrb.mxu2 %v8717_v10  ;;  %v11309_v10 = vld [vmem:[#allocation5 + $0x4cc] sm:$0xf]  ;;  %v8606_v60 = vld [vmem:[#allocation5 + $0x5b8] sm:$0xf0] }
 0x17a   :  { %3034 = vmatpush.bf16.msra.mxu0 %v7953_v2  ;;  %v8796_v2 = vld [vmem:[#allocation5 + $0x728] sm:$0xf] }
 0x17b   :  { %3020 = vmatpush.bf16.msrb.mxu3 %v8861_v11  ;;  %3046 = vmatpush.bf16.msra.mxu1 %v8097_v12  ;;  %v8494_v11 = vld [vmem:[#allocation5 + $0x4d8] sm:$0xf0]  ;;  %v8257_v12 = vor.u32 %v11249_v62, %v8254_v0  ;;  %v8797_v13 = vor.u32 %v11387_v3, %v8796_v2  ;;  %v11233_v2 = vld [vmem:[#allocation5 + $0x26c] sm:$0xf] }
 0x17c   :  { %v8446_v62 = vld [vmem:[#allocation5 + $0x478] sm:$0xf0] }
 0x17d   :  { %3009 = vmatpush.bf16.msrb.mxu2 %v8701_v24  ;;  %v2769_v23 = vpop.f32.mrf.mxu3  ;;  %v8497_v24 = vor.u32 %v11309_v10, %v8494_v11  ;;  %v8190_v3 = vld [vmem:[#allocation5 + $0x278] sm:$0xf0]  ;;  %v8449_v6 = vor.u32 %v11297_v61, %v8446_v62  ;;  %v11333_v10 = vld [vmem:[#allocation5 + $0x58c] sm:$0xf] }
 0x17e   :  { %3035 = vmatpush.bf16.msra.mxu0 %v7937_v17  ;;  %v8780_v17 = vld [vmem:[#allocation5 + $0x708] sm:$0xf]  ;;  %v8590_v11 = vld [vmem:[#allocation5 + $0x598] sm:$0xf0]  ;;  %v8193_v15 = vor.u32 %v11233_v2, %v8190_v3  ;;  %v11265_v23 = vld [vmem:[#allocation5 + $0x36c] sm:$0xf] }
 0x17f   :  { %3021 = vmatpush.bf16.msrb.mxu3 %v8845_v25  ;;  %3047 = vmatpush.bf16.msra.mxu1 %v8081_v26  ;;  %v11281_v25 = vld [vmem:[#allocation5 + $0x3ec] sm:$0xf]  ;;  %v8382_v26 = vld [vmem:[#allocation5 + $0x3f8] sm:$0xf0]  ;;  %v8781_v34 = vor.u32 %v11383_v19, %v8780_v17  ;;  %v8593_v20 = vor.u32 %v11333_v10, %v8590_v11  ;;  %v8948_v2 = vld [vmem:[#allocation7 + $0x60] sm:$0xf] }
 0x180   :  { %v8385_v36 = vor.u32 %v11281_v25, %v8382_v26  ;;  %v11229_v17 = vld [vmem:[#allocation5 + $0x24c] sm:$0xf]  ;;  %v8574_v26 = vld [vmem:[#allocation5 + $0x578] sm:$0xf0]  ;;  %v11425_v3 = vld [vmem:[#allocation7 + $0x64] sm:$0xf0] }
 0x181   :  { %3010 = vmatpush.bf16.msrb.mxu2 %v8685_v38  ;;  %v8222_v38 = vld [vmem:[#allocation5 + $0x2b8] sm:$0xf0]  ;;  %v11329_v25 = vld [vmem:[#allocation5 + $0x56c] sm:$0xf] }
 0x182   :  { %3036 = vmatpush.bf16.msra.mxu0 %v7921_v30  ;;  %v8478_v30 = vld [vmem:[#allocation5 + $0x4b8] sm:$0xf0]  ;;  %v8225_v50 = vor.u32 %v11241_v37, %v8222_v38  ;;  %v11261_v37 = vld [vmem:[#allocation5 + $0x34c] sm:$0xf] }
 0x183   :  { %3022 = vmatpush.bf16.msrb.mxu3 %v8829_v39  ;;  %3048 = vmatpush.bf16.msra.mxu1 %v8065_v40  ;;  %v8641_v39 = vor.u32 %v11345_v27, %v8638_v28  ;;  %v8481_v40 = vor.u32 %v11305_v29, %v8478_v30  ;;  %v11289_v27 = vld [vmem:[#allocation5 + $0x42c] sm:$0xf]  ;;  %v8414_v28 = vld [vmem:[#allocation5 + $0x438] sm:$0xf0] }
 0x184   :  { %v8302_v38 = vld [vmem:[#allocation5 + $0x358] sm:$0xf0]  ;;  %v11321_v62 = vld [vmem:[#allocation5 + $0x52c] sm:$0xf] }
 0x185   :  { %3011 = vmatpush.bf16.msrb.mxu2 %v8669_v54  ;;  %v11253_v10 = vld [vmem:[#allocation5 + $0x30c] sm:$0xf] }
 0x186   :  { %3037 = vmatpush.bf16.msra.mxu0 %v7905_v46  ;;  %v8622_v46 = vld [vmem:[#allocation5 + $0x5d8] sm:$0xf0] }
 0x187   :  { %3023 = vmatpush.bf16.msrb.mxu3 %v8813_v58  ;;  %3049 = vmatpush.bf16.msra.mxu1 %v8049_v59  ;;  %v8625_v54 = vor.u32 %v11341_v44, %v8622_v46  ;;  %v8350_v58 = vld [vmem:[#allocation5 + $0x3b8] sm:$0xf0]  ;;  %v11337_v59 = vld [vmem:[#allocation5 + $0x5ac] sm:$0xf]  ;;  %v8956_v46 = vld [vmem:[#allocation7 + $0x70] sm:$0xf] }
 0x188   :  { %v8353_v0 = vor.u32 %v11273_v56, %v8350_v58  ;;  %v8766_v58 = vld [vmem:[#allocation5 + $0x6f8] sm:$0xf0]  ;;  %v8957_v61 = vor.u32 %v11427_v47, %v8956_v46 }
 0x189   :  { %3012 = vmatpush.bf16.msrb.mxu2 %v8653_v9  ;;  %v8334_v9 = vld [vmem:[#allocation5 + $0x398] sm:$0xf0] }
 0x18a   :  { %3038 = vmatpush.bf16.msra.mxu0 %v7889_v63  ;;  %v12349_v1 = vpop.f32.mrf.mxu0  ;;  %v8209_v63 = vor.u32 %v11237_v51, %v8206_v52  ;;  %v8337_v16 = vor.u32 %v11269_v7, %v8334_v9  ;;  %v8142_v51 = vld [vmem:[#allocation5 + $0x218] sm:$0xf0]  ;;  %v11377_v52 = vld [vmem:[#allocation5 + $0x6ec] sm:$0xf] }
 0x18b   :  { %3024 = vmatpush.bf16.msrb.mxu3 %v8797_v13  ;;  %3050 = vmatpush.bf16.msra.mxu1 %v8033_v18  ;;  %v8430_v13 = vld [vmem:[#allocation5 + $0x458] sm:$0xf0]  ;;  %v11373_v7 = vld [vmem:[#allocation5 + $0x6cc] sm:$0xf] }
 0x18c   :  { %3013 = vmatmul.bf16.vlgmr.msrb.gmra.mxu2 %v12320_v4  ;;  %v8174_v18 = vld [vmem:[#allocation5 + $0x258] sm:$0xf0] }
 0x18d   :  { %3057 = vmatpush.bf16.msra.mxu2 %v8257_v12  ;;  %3039 = vmatmul.bf16.vlgmr.msra.gmra.mxu0 %v12294_v33  ;;  %v8369_v33 = vor.u32 %v11277_v41, %v8366_v43  ;;  %v11293_v12 = vld [vmem:[#allocation5 + $0x44c] sm:$0xf]  ;;  %v8177_v29 = vor.u32 %v11229_v17, %v8174_v18  ;;  %v8398_v43 = vld [vmem:[#allocation5 + $0x418] sm:$0xf0] }
 0x18e   :  { %3083 = vmatpush.bf16.msrb.mxu0 %v8513_v5  ;;  %v8609_v5 = vor.u32 %v11337_v59, %v8606_v60  ;;  %v8433_v22 = vor.u32 %v11293_v12, %v8430_v13  ;;  %v11285_v41 = vld [vmem:[#allocation5 + $0x40c] sm:$0xf]  ;;  %v8286_v60 = vld [vmem:[#allocation5 + $0x338] sm:$0xf0] }
 0x18f   :  { %3025 = vmatpush.bf16.msrb.mxu3 %v8781_v34  ;;  %3051 = vmatpush.bf16.msra.mxu1 %v8017_v35  ;;  %v8158_v34 = vld [vmem:[#allocation5 + $0x238] sm:$0xf0]  ;;  %v8577_v35 = vor.u32 %v11329_v25, %v8574_v26  ;;  %v8401_v56 = vor.u32 %v11285_v41, %v8398_v43  ;;  %v11257_v59 = vld [vmem:[#allocation5 + $0x32c] sm:$0xf]  ;;  %v11441_v41 = vld [vmem:[#allocation7 + $0xe4] sm:$0xf0] }
 0x190   :  { %v8750_v9 = vld [vmem:[#allocation5 + $0x6d8] sm:$0xf0]  ;;  %v11317_v13 = vld [vmem:[#allocation5 + $0x50c] sm:$0xf] }
 0x191   :  { %3058 = vmatpush.bf16.msra.mxu2 %v8241_v32  ;;  %v11225_v32 = vld [vmem:[#allocation5 + $0x22c] sm:$0xf]  ;;  %v8270_v12 = vld [vmem:[#allocation5 + $0x318] sm:$0xf0]  ;;  %v8753_v25 = vor.u32 %v11373_v7, %v8750_v9  ;;  %v11437_v7 = vld [vmem:[#allocation7 + $0xc4] sm:$0xf0] }
 0x192   :  { %3084 = vmatpush.bf16.msrb.mxu0 %v8497_v24  ;;  %3026 = vmatmul.bf16.vlgmr.msrb.gmra.mxu3 %v12324_v14  ;;  %v2782_v19 = vpop.f32.mrf.mxu0  ;;  %v8318_v24 = vld [vmem:[#allocation5 + $0x378] sm:$0xf0]  ;;  %v8161_v44 = vor.u32 %v11225_v32, %v8158_v34  ;;  %v11409_v17 = vld [vmem:[#allocation5 + $0x7ec] sm:$0xf]  ;;  %v8273_v26 = vor.u32 %v11253_v10, %v8270_v12 }
 0x193   :  { %3070 = vmatpush.bf16.msra.mxu3 %v8385_v36  ;;  %3096 = vmatpush.bf16.msrb.mxu1 %v8641_v39  ;;  %v8321_v30 = vor.u32 %v11265_v23, %v8318_v24  ;;  %v8417_v36 = vor.u32 %v11289_v27, %v8414_v28  ;;  %v11325_v39 = vld [vmem:[#allocation5 + $0x54c] sm:$0xf]  ;;  %v8894_v18 = vld [vmem:[#allocation5 + $0x7f8] sm:$0xf0]  ;;  %v8940_v19 = vld [vmem:[#allocation7 + $0x50] sm:$0xf] }
 0x194   :  { %3052 = vmatmul.bf16.vlgmr.msra.gmra.mxu1 %v12297_v57  ;;  %v12353_v57 = vpop.f32.mrf.mxu1  ;;  %v11443_v23 = vld [vmem:[#allocation7 + $0xf4] sm:$0xf0]  ;;  %v8734_v32 = vld [vmem:[#allocation5 + $0x6b8] sm:$0xf0] }
 0x195   :  { %3059 = vmatpush.bf16.msra.mxu2 %v8225_v50  ;;  %v8305_v50 = vor.u32 %v11261_v37, %v8302_v38  ;;  %v8932_v37 = vld [vmem:[#allocation7 + $0x40] sm:$0xf]  ;;  %v8718_v46 = vld [vmem:[#allocation5 + $0x698] sm:$0xf0] }
 0x196   :  { %3085 = vmatpush.bf16.msrb.mxu0 %v8481_v40  ;;  %v8558_v40 = vld [vmem:[#allocation5 + $0x558] sm:$0xf0] }
 0x197   :  { %3071 = vmatpush.bf16.msra.mxu3 %v8369_v33  ;;  %3097 = vmatpush.bf16.msrb.mxu1 %v8625_v54  ;;  %v11221_v33 = vld [vmem:[#allocation5 + $0x20c] sm:$0xf] }
 0x199   :  { %3060 = vmatpush.bf16.msra.mxu2 %v8209_v63  ;;  %v8542_v63 = vld [vmem:[#allocation5 + $0x538] sm:$0xf0] }
 0x19a   :  { %3086 = vmatpush.bf16.msrb.mxu0 %v8465_v55  ;;  %v12355_v54 = vpop.f32.mrf.mxu0  ;;  %v8561_v55 = vor.u32 %v11325_v39, %v8558_v40  ;;  %v8545_v11 = vor.u32 %v11321_v62, %v8542_v63  ;;  %v11421_v39 = vld [vmem:[#allocation7 + $0x44] sm:$0xf0]  ;;  %v9012_v40 = vld [vmem:[#allocation7 + $0xe0] sm:$0xf]  ;;  %v8702_v62 = vld [vmem:[#allocation5 + $0x678] sm:$0xf0]  ;;  %v2755_v63 = vadd.f32 %v12343_v21, %v12337_v48 }
 0x19b   :  { %3072 = vmatpush.bf16.msra.mxu3 %v8353_v0  ;;  %3098 = vmatpush.bf16.msrb.mxu1 %v8609_v5  ;;  %v8145_v0 = vor.u32 %v11221_v33, %v8142_v51  ;;  %v8769_v5 = vor.u32 %v11377_v52, %v8766_v58  ;;  %v8933_v47 = vor.u32 %v11421_v39, %v8932_v37  ;;  %v11419_v51 = vld [vmem:[#allocation7 + $0x34] sm:$0xf0]  ;;  %v9004_v52 = vld [vmem:[#allocation7 + $0xd0] sm:$0xf]  ;;  %v11413_v39 = vld [vmem:[#allocation7 + $0x4] sm:$0xf0] }
 0x19c   :  { %v2795_v49 = vpop.f32.mrf.mxu1  ;;  %v9013_v33 = vor.u32 %v11441_v41, %v9012_v40  ;;  %v2768_v9 = vadd.f32 %v12345_v45, %v2755_v63  ;;  %v11433_v40 = vld [vmem:[#allocation7 + $0xa4] sm:$0xf0]  ;;  %v11424_v63 = vld [vmem:[#allocation7 + $0x64] sm:$0xf] }
 0x19d   :  { %3061 = vmatpush.bf16.msra.mxu2 %v8193_v15  ;;  %v8526_v15 = vld [vmem:[#allocation5 + $0x518] sm:$0xf0] }
 0x19e   :  { %3087 = vmatpush.bf16.msrb.mxu0 %v8449_v6  ;;  %v8289_v6 = vor.u32 %v11257_v59, %v8286_v60  ;;  %v8529_v28 = vor.u32 %v11317_v13, %v8526_v15  ;;  %v8862_v49 = vld [vmem:[#allocation5 + $0x7b8] sm:$0xf0]  ;;  %v11357_v13 = vld [vmem:[#allocation5 + $0x64c] sm:$0xf]  ;;  %v2781_v48 = vadd.f32 %v12349_v1, %v2768_v9  ;;  %v11422_v9 = vld [vmem:[#allocation7 + $0x54] sm:$0xf] }
 0x19f   :  { %3073 = vmatpush.bf16.msra.mxu3 %v8337_v16  ;;  %3099 = vmatpush.bf16.msrb.mxu1 %v8593_v20  ;;  %v8949_v16 = vor.u32 %v11425_v3, %v8948_v2  ;;  %v11423_v20 = vld [vmem:[#allocation7 + $0x54] sm:$0xf0]  ;;  %v8846_v2 = vld [vmem:[#allocation5 + $0x798] sm:$0xf0]  ;;  %v8916_v3 = vld [vmem:[#allocation7 + $0x20] sm:$0xf] }
 0x1a0   :  { %v8941_v34 = vor.u32 %v11423_v20, %v8940_v19  ;;  %v8686_v15 = vld [vmem:[#allocation5 + $0x658] sm:$0xf0]  ;;  %v11415_v20 = vld [vmem:[#allocation7 + $0x14] sm:$0xf0]  ;;  %v2794_v45 = vadd.f32 %v12353_v57, %v2781_v48  ;;  %v11353_v1 = vld [vmem:[#allocation5 + $0x62c] sm:$0xf] }
 0x1a1   :  { %3062 = vmatpush.bf16.msra.mxu2 %v8177_v29  ;;  %v8897_v29 = vor.u32 %v11409_v17, %v8894_v18  ;;  %v8830_v17 = vld [vmem:[#allocation5 + $0x778] sm:$0xf0]  ;;  %v8908_v18 = vld [vmem:[#allocation7 + $0x10] sm:$0xf]  ;;  %v8980_v57 = vld [vmem:[#allocation7 + $0xa0] sm:$0xf] }
 0x1a2   :  { %3088 = vmatpush.bf16.msrb.mxu0 %v8433_v22  ;;  %v9020_v22 = vld [vmem:[#allocation7 + $0xf0] sm:$0xf]  ;;  %v2834_v27 = vpop.f32.mrf.mxu0 }
 0x1a3   :  { %3074 = vmatpush.bf16.msra.mxu3 %v8321_v30  ;;  %3100 = vmatpush.bf16.msrb.mxu1 %v8577_v35  ;;  %v11369_v30 = vld [vmem:[#allocation5 + $0x6ac] sm:$0xf]  ;;  %v9021_v38 = vor.u32 %v11443_v23, %v9020_v22  ;;  %v8988_v22 = vld [vmem:[#allocation7 + $0xb0] sm:$0xf]  ;;  %v11435_v23 = vld [vmem:[#allocation7 + $0xb4] sm:$0xf0] }
 0x1a4   :  { %v12357_v24 = vpop.f32.mrf.mxu1  ;;  %v11405_v35 = vld [vmem:[#allocation5 + $0x7cc] sm:$0xf]  ;;  %v8737_v43 = vor.u32 %v11369_v30, %v8734_v32  ;;  %v8909_v32 = vor.u32 %v11415_v20, %v8908_v18  ;;  %v8989_v37 = vor.u32 %v11435_v23, %v8988_v22  ;;  %v11420_v20 = vld [vmem:[#allocation7 + $0x44] sm:$0xf] }
 0x1a5   :  { %3063 = vmatpush.bf16.msra.mxu2 %v8161_v44  ;;  %v11365_v44 = vld [vmem:[#allocation5 + $0x68c] sm:$0xf] }
 0x1a6   :  { %3089 = vmatpush.bf16.msrb.mxu0 %v8417_v36  ;;  %v8878_v36 = vld [vmem:[#allocation5 + $0x7d8] sm:$0xf0]  ;;  %v8721_v58 = vor.u32 %v11365_v44, %v8718_v46  ;;  %v11426_v44 = vld [vmem:[#allocation7 + $0x74] sm:$0xf]  ;;  %v8934_v23 = vld [vmem:[#allocation7 + $0x48] sm:$0xf0] }
 0x1a7   :  { %3075 = vmatpush.bf16.msra.mxu3 %v8305_v50  ;;  %3101 = vmatpush.bf16.msrb.mxu1 %v8561_v55  ;;  %v8924_v50 = vld [vmem:[#allocation7 + $0x30] sm:$0xf]  ;;  %v11439_v55 = vld [vmem:[#allocation7 + $0xd4] sm:$0xf0]  ;;  %v8958_v46 = vld [vmem:[#allocation7 + $0x78] sm:$0xf0] }
 0x1a9   :  { %3064 = vmatpush.bf16.msra.mxu2 %v8145_v0  ;;  %v8925_v0 = vor.u32 %v11419_v51, %v8924_v50  ;;  %v8798_v51 = vld [vmem:[#allocation5 + $0x738] sm:$0xf0] }
 0x1aa   :  { %3090 = vmatpush.bf16.msrb.mxu0 %v8401_v56  ;;  %v12363_v59 = vpop.f32.mrf.mxu0 }
 0x1ab   :  { %3076 = vmatpush.bf16.msra.mxu3 %v8289_v6  ;;  %3102 = vmatpush.bf16.msrb.mxu1 %v8545_v11  ;;  %v8996_v6 = vld [vmem:[#allocation7 + $0xc0] sm:$0xf] }
 0x1ac   :  { %3065 = vmatmul.bf16.vlgmr.msra.gmra.mxu2 %v12302_v8  ;;  %v11401_v8 = vld [vmem:[#allocation5 + $0x7ac] sm:$0xf]  ;;  %v2847_v56 = vpop.f32.mrf.mxu1  ;;  %v8997_v19 = vor.u32 %v11437_v7, %v8996_v6 }
 0x1ad   :  { %3109 = vmatpush.bf16.msrb.mxu2 %v8769_v5  ;;  %3091 = vmatmul.bf16.vlgmr.msrb.gmra.mxu0 %v12310_v31  ;;  %v8881_v31 = vor.u32 %v11405_v35, %v8878_v36  ;;  %v8865_v60 = vor.u32 %v11401_v8, %v8862_v49  ;;  %v9005_v5 = vor.u32 %v11439_v55, %v9004_v52  ;;  %v8814_v35 = vld [vmem:[#allocation5 + $0x758] sm:$0xf0]  ;;  %v8900_v36 = vld [vmem:[#allocation7] sm:$0xf]  ;;  %v11349_v8 = vld [vmem:[#allocation5 + $0x60c] sm:$0xf] }
 0x1ae   :  { %3533 = vmatpush.bf16.msra.mxu0 %v8957_v61  ;;  %v11361_v61 = vld [vmem:[#allocation5 + $0x66c] sm:$0xf]  ;;  %v8654_v49 = vld [vmem:[#allocation5 + $0x618] sm:$0xf0]  ;;  %v8901_v50 = vor.u32 %v11413_v39, %v8900_v36  ;;  %v8981_v52 = vor.u32 %v11433_v40, %v8980_v57  ;;  %v8961_v56 = vor.u32 %v11426_v44, %v8958_v46  ;;  %v11459_v36 = vld [vmem:[#allocation7 + $0x174] sm:$0xf0] }
 0x1af   :  { %3077 = vmatpush.bf16.msra.mxu3 %v8273_v26  ;;  %3103 = vmatpush.bf16.msrb.mxu1 %v8529_v28  ;;  %v2806_v10 = vpop.f32.mrf.mxu2  ;;  %v8705_v11 = vor.u32 %v11361_v61, %v8702_v62  ;;  %v8689_v26 = vor.u32 %v11357_v13, %v8686_v15  ;;  %v8657_v62 = vor.u32 %v11349_v8, %v8654_v49  ;;  %v11442_v13 = vld [vmem:[#allocation7 + $0xf4] sm:$0xf]  ;;  %v9022_v15 = vld [vmem:[#allocation7 + $0xf8] sm:$0xf0]  ;;  %v11436_v44 = vld [vmem:[#allocation7 + $0xc4] sm:$0xf] }
 0x1b0   :  { %v2807_v30 = vadd.f32 %v2806_v10, %v2794_v45  ;;  %v8964_v10 = vld [vmem:[#allocation7 + $0x80] sm:$0xf]  ;;  %v9025_v22 = vor.u32 %v11442_v13, %v9022_v15  ;;  %v11440_v45 = vld [vmem:[#allocation7 + $0xe4] sm:$0xf]  ;;  %v8998_v46 = vld [vmem:[#allocation7 + $0xc8] sm:$0xf0] }
 0x1b1   :  { %3110 = vmatpush.bf16.msrb.mxu2 %v8753_v25  ;;  %v11457_v8 = vld [vmem:[#allocation7 + $0x164] sm:$0xf0] }
 0x1b2   :  { %3534 = vmatpush.bf16.msra.mxu0 %v8949_v16  ;;  %3078 = vmatmul.bf16.vlgmr.msra.gmra.mxu3 %v12305_v42  ;;  %v11397_v42 = vld [vmem:[#allocation5 + $0x78c] sm:$0xf]  ;;  %v2886_v27 = vpop.f32.mrf.mxu0 }
 0x1b3   :  { %3122 = vmatpush.bf16.msrb.mxu3 %v8897_v29  ;;  %3546 = vmatpush.bf16.msra.mxu1 %v9021_v38  ;;  %v8849_v12 = vor.u32 %v11397_v42, %v8846_v2  ;;  %v11393_v16 = vld [vmem:[#allocation5 + $0x76c] sm:$0xf]  ;;  %v8670_v29 = vld [vmem:[#allocation5 + $0x638] sm:$0xf0] }
 0x1b4   :  { %3104 = vmatmul.bf16.vlgmr.msrb.gmra.mxu1 %v12313_v53  ;;  %v11417_v53 = vld [vmem:[#allocation7 + $0x24] sm:$0xf0]  ;;  %v12370_v25 = vpop.f32.mrf.mxu1  ;;  %v8833_v28 = vor.u32 %v11393_v16, %v8830_v17  ;;  %v11381_v2 = vld [vmem:[#allocation5 + $0x70c] sm:$0xf]  ;;  %v12378_v17 = vld [vmem:[%s12648_s5] sm:$0xf] }
 0x1b5   :  { %3111 = vmatpush.bf16.msrb.mxu2 %v8737_v43  ;;  %v8917_v21 = vor.u32 %v11417_v53, %v8916_v3  ;;  %v2819_v38 = vpop.f32.mrf.mxu3  ;;  %v8782_v3 = vld [vmem:[#allocation5 + $0x718] sm:$0xf0]  ;;  %v1432_v18 = vperm.slane %v12378_v17, 1 }
 0x1b6   :  { %3535 = vmatpush.bf16.msra.mxu0 %v8941_v34  ;;  %v11389_v34 = vld [vmem:[#allocation5 + $0x74c] sm:$0xf]  ;;  %v2820_v41 = vadd.f32 %v2819_v38, %v2807_v30  ;;  %v8926_v30 = vld [vmem:[#allocation7 + $0x38] sm:$0xf0] }
 0x1b7   :  { %3123 = vmatpush.bf16.msrb.mxu3 %v8881_v31  ;;  %3547 = vmatpush.bf16.msra.mxu1 %v9013_v33  ;;  %v2808_v43 = vpop.f32.mrf.mxu2  ;;  %v8673_v31 = vor.u32 %v11353_v1, %v8670_v29  ;;  %v11385_v33 = vld [vmem:[#allocation5 + $0x72c] sm:$0xf]  ;;  %v2833_v27 = vadd.f32 %v12355_v54, %v1432_v18  ;;  %v8937_v1 = vor.u32 %v11420_v20, %v8934_v23  ;;  %v11418_v29 = vld [vmem:[#allocation7 + $0x34] sm:$0xf]  ;;  %v9052_v23 = vld [vmem:[#allocation7 + $0x130] sm:$0xf] }
 0x1b8   :  { %v3135_v55 = vmax.f32 %v2820_v41, 0.0  ;;  %v8801_v42 = vor.u32 %v11385_v33, %v8798_v51  ;;  %v8929_v54 = vor.u32 %v11418_v29, %v8926_v30  ;;  %v11416_v41 = vld [vmem:[#allocation7 + $0x24] sm:$0xf]  ;;  %v9001_v33 = vor.u32 %v11436_v44, %v8998_v46  ;;  %v11430_v20 = vld [vmem:[#allocation7 + $0x94] sm:$0xf] }
 0x1b9   :  { %3112 = vmatpush.bf16.msrb.mxu2 %v8721_v58  ;;  %v8972_v58 = vld [vmem:[#allocation7 + $0x90] sm:$0xf]  ;;  %v11428_v30 = vld [vmem:[#allocation7 + $0x84] sm:$0xf]  ;;  %v9078_v46 = vld [vmem:[#allocation7 + $0x168] sm:$0xf0] }
 0x1ba   :  { %3536 = vmatpush.bf16.msra.mxu0 %v8933_v47  ;;  %v8817_v47 = vor.u32 %v11389_v34, %v8814_v35  ;;  %v12372_v53 = vpack.c.bf16 %v3135_v55, %v3135_v55  ;;  %v11438_v34 = vld [vmem:[#allocation7 + $0xd4] sm:$0xf]  ;;  %v9084_v35 = vld [vmem:[#allocation7 + $0x170] sm:$0xf] }
 0x1bb   :  { %3124 = vmatpush.bf16.msrb.mxu3 %v8865_v60  ;;  %3548 = vmatpush.bf16.msra.mxu1 %v9005_v5  ;;  %v11431_v60 = vld [vmem:[#allocation7 + $0x94] sm:$0xf0]  ;;  %v9085_v39 = vor.u32 %v11459_v36, %v9084_v35  ;;  %v11434_v55 = vld [vmem:[#allocation7 + $0xb4] sm:$0xf] }
 0x1bc   :  { %v2899_v61 = vpop.f32.mrf.mxu1  ;;  %v8973_v5 = vor.u32 %v11431_v60, %v8972_v58  ;;  %v11447_v35 = vld [vmem:[#allocation7 + $0x114] sm:$0xf0] }
 0x1bd   :  { %3113 = vmatpush.bf16.msrb.mxu2 %v8705_v11  ;;  %v2821_v6 = vpop.f32.mrf.mxu3  ;;  %v11429_v11 = vld [vmem:[#allocation7 + $0x84] sm:$0xf0] }
 0x1be   :  { %3537 = vmatpush.bf16.msra.mxu0 %v8925_v0  ;;  %v8950_v0 = vld [vmem:[#allocation7 + $0x68] sm:$0xf0]  ;;  %v8965_v16 = vor.u32 %v11429_v11, %v8964_v10  ;;  %v9060_v11 = vld [vmem:[#allocation7 + $0x140] sm:$0xf] }
 0x1bf   :  { %3125 = vmatpush.bf16.msrb.mxu3 %v8849_v12  ;;  %3549 = vmatpush.bf16.msra.mxu1 %v8997_v19  ;;  %v8953_v7 = vor.u32 %v11424_v63, %v8950_v0  ;;  %v8942_v12 = vld [vmem:[#allocation7 + $0x58] sm:$0xf0]  ;;  %v2858_v48 = vpop.f32.mrf.mxu2  ;;  %v11455_v63 = vld [vmem:[#allocation7 + $0x154] sm:$0xf0] }
 0x1c0   :  { %v8945_v19 = vor.u32 %v11422_v9, %v8942_v12  ;;  %v8982_v9 = vld [vmem:[#allocation7 + $0xa8] sm:$0xf0]  ;;  %v11453_v12 = vld [vmem:[#allocation7 + $0x144] sm:$0xf0] }
 0x1c1   :  { %3114 = vmatpush.bf16.msrb.mxu2 %v8689_v26  ;;  %v9014_v26 = vld [vmem:[#allocation7 + $0xe8] sm:$0xf0] }
 0x1c2   :  { %3538 = vmatpush.bf16.msra.mxu0 %v8917_v21  ;;  %v8785_v21 = vor.u32 %v11381_v2, %v8782_v3  ;;  %v11412_v2 = vld [vmem:[#allocation7 + $0x4] sm:$0xf]  ;;  %v8902_v3 = vld [vmem:[#allocation7 + $0x8] sm:$0xf0] }
 0x1c3   :  { %3126 = vmatpush.bf16.msrb.mxu3 %v8833_v28  ;;  %3550 = vmatpush.bf16.msra.mxu1 %v8989_v37  ;;  %v2846_v37 = vadd.f32 %v12357_v24, %v2833_v27 }
 0x1c5   :  { %3115 = vmatpush.bf16.msrb.mxu2 %v8673_v31  ;;  %v2871_v28 = vpop.f32.mrf.mxu3  ;;  %v2859_v57 = vadd.f32 %v2858_v48, %v2846_v37  ;;  %v8918_v31 = vld [vmem:[#allocation7 + $0x28] sm:$0xf0]  ;;  %v9061_v48 = vor.u32 %v11453_v12, %v9060_v11  ;;  %v11444_v12 = vld [vmem:[#allocation7 + $0x104] sm:$0xf] }
 0x1c6   :  { %3539 = vmatpush.bf16.msra.mxu0 %v8909_v32  ;;  %v9017_v32 = vor.u32 %v11440_v45, %v9014_v26  ;;  %v8921_v24 = vor.u32 %v11416_v41, %v8918_v31  ;;  %v11451_v45 = vld [vmem:[#allocation7 + $0x134] sm:$0xf0] }
 0x1c7   :  { %3127 = vmatpush.bf16.msrb.mxu3 %v8817_v47  ;;  %3551 = vmatpush.bf16.msra.mxu1 %v8981_v52  ;;  %v2860_v38 = vpop.f32.mrf.mxu2  ;;  %v9076_v47 = vld [vmem:[#allocation7 + $0x160] sm:$0xf]  ;;  %v8910_v52 = vld [vmem:[#allocation7 + $0x18] sm:$0xf0] }
 0x1c8   :  { %v9077_v51 = vor.u32 %v11457_v8, %v9076_v47 }
 0x1c9   :  { %3116 = vmatpush.bf16.msrb.mxu2 %v8657_v62  ;;  %v9068_v62 = vld [vmem:[#allocation7 + $0x150] sm:$0xf] }
 0x1ca   :  { %3540 = vmatpush.bf16.msra.mxu0 %v8901_v50  ;;  %v12385_v40 = vpop.f32.mrf.mxu0  ;;  %v11414_v50 = vld [vmem:[#allocation7 + $0x14] sm:$0xf]  ;;  %v9069_v6 = vor.u32 %v11455_v63, %v9068_v62  ;;  %v9054_v63 = vld [vmem:[#allocation7 + $0x138] sm:$0xf0] }
 0x1cb   :  { %3128 = vmatpush.bf16.msrb.mxu3 %v8801_v42  ;;  %3552 = vmatpush.bf16.msra.mxu1 %v8973_v5  ;;  %v8913_v42 = vor.u32 %v11414_v50, %v8910_v52  ;;  %v9062_v52 = vld [vmem:[#allocation7 + $0x148] sm:$0xf0]  ;;  %v11450_v62 = vld [vmem:[#allocation7 + $0x134] sm:$0xf] }
 0x1cc   :  { %3117 = vmatmul.bf16.vlgmr.msrb.gmra.mxu2 %v12320_v4  ;;  %v9006_v4 = vld [vmem:[#allocation7 + $0xd8] sm:$0xf0] }
 0x1cd   :  { %3541 = vmatmul.bf16.vlgmr.msra.gmra.mxu0 %v12372_v53  ;;  %v9009_v43 = vor.u32 %v11438_v34, %v9006_v4  ;;  %3559 = vmatpush.bf16.msra.mxu2 %v9085_v39  ;;  %v2873_v49 = vpop.f32.mrf.mxu3  ;;  %v9036_v4 = vld [vmem:[#allocation7 + $0x110] sm:$0xf]  ;;  %v9028_v39 = vld [vmem:[#allocation7 + $0x100] sm:$0xf] }
 0x1ce   :  { %3585 = vmatpush.bf16.msrb.mxu0 %v8961_v56  ;;  %v8990_v56 = vld [vmem:[#allocation7 + $0xb8] sm:$0xf0]  ;;  %v9037_v38 = vor.u32 %v11447_v35, %v9036_v4  ;;  %v11454_v49 = vld [vmem:[#allocation7 + $0x154] sm:$0xf] }
 0x1cf   :  { %3129 = vmatpush.bf16.msrb.mxu3 %v8785_v21  ;;  %3553 = vmatpush.bf16.msra.mxu1 %v8965_v16  ;;  %v12388_v60 = vpop.f32.mrf.mxu1  ;;  %v2910_v61 = vpop.f32.mrf.mxu2  ;;  %v8993_v5 = vor.u32 %v11434_v55, %v8990_v56 }
 0x1d1   :  { %3560 = vmatpush.bf16.msra.mxu2 %v9077_v51  ;;  %v11452_v51 = vld [vmem:[#allocation7 + $0x144] sm:$0xf] }
 0x1d2   :  { %3586 = vmatpush.bf16.msrb.mxu0 %v8953_v7  ;;  %3130 = vmatmul.bf16.vlgmr.msrb.gmra.mxu3 %v12324_v14  ;;  %v2872_v14 = vadd.f32 %v2871_v28, %v2859_v57  ;;  %v2938_v0 = vpop.f32.mrf.mxu0  ;;  %v11432_v7 = vld [vmem:[#allocation7 + $0xa4] sm:$0xf]  ;;  %v9044_v28 = vld [vmem:[#allocation7 + $0x120] sm:$0xf]  ;;  %v11445_v57 = vld [vmem:[#allocation7 + $0x104] sm:$0xf0]  ;;  %v9065_v56 = vor.u32 %v11452_v51, %v9062_v52 }
 0x1d3   :  { %3598 = vmatpush.bf16.msrb.mxu1 %v9025_v22  ;;  %v8985_v15 = vor.u32 %v11432_v7, %v8982_v9  ;;  %v8974_v22 = vld [vmem:[#allocation7 + $0x98] sm:$0xf0]  ;;  %v9029_v41 = vor.u32 %v11445_v57, %v9028_v39  ;;  %v9057_v0 = vor.u32 %v11450_v62, %v9054_v63  ;;  %v1433_v7 = vperm.slane %v12378_v17, 2  ;;  %v9116_v57 = vld [vmem:[#allocation7 + $0x1b0] sm:$0xf] }
 0x1d4   :  { %v2885_v58 = vadd.f32 %v12363_v59, %v2872_v14  ;;  %v8905_v59 = vor.u32 %v11412_v2, %v8902_v3  ;;  %v8977_v27 = vor.u32 %v11430_v20, %v8974_v22  ;;  %v9046_v2 = vld [vmem:[#allocation7 + $0x128] sm:$0xf0]  ;;  %v9140_v22 = vld [vmem:[#allocation7 + $0x1e0] sm:$0xf]  ;;  %v9150_v51 = vld [vmem:[#allocation7 + $0x1f8] sm:$0xf0] }
 0x1d5   :  { %3561 = vmatpush.bf16.msra.mxu2 %v9069_v6  ;;  %v9038_v6 = vld [vmem:[#allocation7 + $0x118] sm:$0xf0] }
 0x1d6   :  { %3587 = vmatpush.bf16.msrb.mxu0 %v8945_v19  ;;  %v2898_v10 = vadd.f32 %v12370_v25, %v2885_v58  ;;  %v9053_v25 = vor.u32 %v11451_v45, %v9052_v23  ;;  %v11473_v23 = vld [vmem:[#allocation7 + $0x1e4] sm:$0xf0] }
 0x1d7   :  { %3599 = vmatpush.bf16.msrb.mxu1 %v9017_v32  ;;  %v2923_v21 = vpop.f32.mrf.mxu3  ;;  %v2951_v18 = vpop.f32.mrf.mxu1  ;;  %v8966_v32 = vld [vmem:[#allocation7 + $0x88] sm:$0xf0]  ;;  %v9141_v45 = vor.u32 %v11473_v23, %v9140_v22 }
 0x1d8   :  { %v2911_v13 = vadd.f32 %v2910_v61, %v2898_v10  ;;  %v2912_v19 = vpop.f32.mrf.mxu2  ;;  %v8969_v37 = vor.u32 %v11428_v30, %v8966_v32  ;;  %v9124_v32 = vld [vmem:[#allocation7 + $0x1c0] sm:$0xf] }
 0x1d9   :  { %3562 = vmatpush.bf16.msra.mxu2 %v9061_v48 }
 0x1da   :  { %3588 = vmatpush.bf16.msrb.mxu0 %v8937_v1  ;;  %v2924_v16 = vadd.f32 %v2923_v21, %v2911_v13  ;;  %v11449_v1 = vld [vmem:[#allocation7 + $0x124] sm:$0xf0]  ;;  %v9030_v13 = vld [vmem:[#allocation7 + $0x108] sm:$0xf0]  ;;  %v11475_v21 = vld [vmem:[#allocation7 + $0x1f4] sm:$0xf0] }
 0x1db   :  { %3600 = vmatpush.bf16.msrb.mxu1 %v9009_v43  ;;  %v9045_v34 = vor.u32 %v11449_v1, %v9044_v28  ;;  %v9086_v43 = vld [vmem:[#allocation7 + $0x178] sm:$0xf0]  ;;  %v9033_v48 = vor.u32 %v11444_v12, %v9030_v13 }
 0x1dc   :  { %v3136_v26 = vmax.f32 %v2924_v16, 0.0  ;;  %v9118_v12 = vld [vmem:[#allocation7 + $0x1b8] sm:$0xf0] }
 0x1dd   :  { %3563 = vmatpush.bf16.msra.mxu2 %v9053_v25  ;;  %v9132_v25 = vld [vmem:[#allocation7 + $0x1d0] sm:$0xf] }
 0x1de   :  { %3589 = vmatpush.bf16.msrb.mxu0 %v8929_v54  ;;  %v3140_v29 = vpack.c.bf16 %v3136_v26, %v3136_v26  ;;  %v11458_v54 = vld [vmem:[#allocation7 + $0x174] sm:$0xf] }
 0x1df   :  { %3601 = vmatpush.bf16.msrb.mxu1 %v9001_v33  ;;  %v2925_v36 = vpop.f32.mrf.mxu3  ;;  %v9089_v44 = vor.u32 %v11458_v54, %v9086_v43  ;;  %v11467_v54 = vld [vmem:[#allocation7 + $0x1b4] sm:$0xf0] }
 0x1e0   :  { %3554 = vmatmul.bf16.vlgmr.msra.gmra.mxu1 %v3140_v29 }
 0x1e1   :  { %3564 = vmatpush.bf16.msra.mxu2 %v9045_v34  ;;  %v11469_v34 = vld [vmem:[#allocation7 + $0x1c4] sm:$0xf0] }
 0x1e2   :  { %3590 = vmatpush.bf16.msrb.mxu0 %v8921_v24  ;;  %v9070_v24 = vld [vmem:[#allocation7 + $0x158] sm:$0xf0]  ;;  %v9125_v35 = vor.u32 %v11469_v34, %v9124_v32 }
 0x1e3   :  { %3602 = vmatpush.bf16.msrb.mxu1 %v8993_v5  ;;  %v9073_v33 = vor.u32 %v11454_v49, %v9070_v24  ;;  %v11446_v5 = vld [vmem:[#allocation7 + $0x114] sm:$0xf]  ;;  %v9092_v49 = vld [vmem:[#allocation7 + $0x180] sm:$0xf]  ;;  %v11461_v24 = vld [vmem:[#allocation7 + $0x184] sm:$0xf0] }
 0x1e4   :  { %v9041_v10 = vor.u32 %v11446_v5, %v9038_v6  ;;  %v11468_v5 = vld [vmem:[#allocation7 + $0x1c4] sm:$0xf]  ;;  %v9126_v6 = vld [vmem:[#allocation7 + $0x1c8] sm:$0xf0] }
 0x1e5   :  { %3565 = vmatpush.bf16.msra.mxu2 %v9037_v38 }
 0x1e6   :  { %3591 = vmatpush.bf16.msrb.mxu0 %v8913_v42  ;;  %v11448_v42 = vld [vmem:[#allocation7 + $0x124] sm:$0xf] }
 0x1e7   :  { %3603 = vmatpush.bf16.msrb.mxu1 %v8985_v15  ;;  %v9049_v3 = vor.u32 %v11448_v42, %v9046_v2  ;;  %v9148_v15 = vld [vmem:[#allocation7 + $0x1f0] sm:$0xf]  ;;  %v9134_v42 = vld [vmem:[#allocation7 + $0x1d8] sm:$0xf0] }
 0x1e8   :  { %v9149_v18 = vor.u32 %v11475_v21, %v9148_v15  ;;  %v11464_v15 = vld [vmem:[#allocation7 + $0x1a4] sm:$0xf] }
 0x1e9   :  { %3566 = vmatpush.bf16.msra.mxu2 %v9029_v41  ;;  %v9117_v41 = vor.u32 %v11467_v54, %v9116_v57 }
 0x1ea   :  { %3592 = vmatpush.bf16.msrb.mxu0 %v8905_v59  ;;  %v2988_v31 = vpop.f32.mrf.mxu0  ;;  %v2937_v59 = vadd.f32 %v12385_v40, %v1433_v7  ;;  %3572 = vmatpush.bf16.msra.mxu3 %v9149_v18  ;;  %v9102_v18 = vld [vmem:[#allocation7 + $0x198] sm:$0xf0] }
 0x1eb   :  { %3604 = vmatpush.bf16.msrb.mxu1 %v8977_v27  ;;  %v11471_v27 = vld [vmem:[#allocation7 + $0x1d4] sm:$0xf0] }
 0x1ec   :  { %v2950_v11 = vadd.f32 %v12388_v60, %v2937_v59  ;;  %v9133_v1 = vor.u32 %v11471_v27, %v9132_v25  ;;  %v9094_v25 = vld [vmem:[#allocation7 + $0x188] sm:$0xf0] }
 0x1ed   :  { %3593 = vmatmul.bf16.vlgmr.msrb.gmra.mxu0 %v12372_v53  ;;  %3611 = vmatpush.bf16.msrb.mxu2 %v9089_v44  ;;  %v11456_v53 = vld [vmem:[#allocation7 + $0x164] sm:$0xf]  ;;  %v11465_v44 = vld [vmem:[#allocation7 + $0x1a4] sm:$0xf0] }
 0x1ee   :  { %v9081_v14 = vor.u32 %v11456_v53, %v9078_v46  ;;  %3573 = vmatpush.bf16.msra.mxu3 %v9141_v45  ;;  %v9100_v46 = vld [vmem:[#allocation7 + $0x190] sm:$0xf] }
 0x1ef   :  { %3605 = vmatpush.bf16.msrb.mxu1 %v8969_v37  ;;  %v2962_v47 = vpop.f32.mrf.mxu2 }
 0x1f0   :  { %v2963_v16 = vadd.f32 %v2962_v47, %v2950_v11  ;;  %v11466_v11 = vld [vmem:[#allocation7 + $0x1b4] sm:$0xf] }
 0x1f1   :  { %v3001_v8 = vpop.f32.mrf.mxu1  ;;  %3612 = vmatpush.bf16.msrb.mxu2 %v9081_v14  ;;  %v11463_v14 = vld [vmem:[#allocation7 + $0x194] sm:$0xf0]  ;;  %v9121_v13 = vor.u32 %v11466_v11, %v9118_v12 }
 0x1f2   :  { %3606 = vmatmul.bf16.vlgmr.msrb.gmra.mxu1 %v3140_v29  ;;  %v2990_v50 = vpop.f32.mrf.mxu0  ;;  %3574 = vmatpush.bf16.msra.mxu3 %v9133_v1 }
 0x1f3   :  { %v11474_v50 = vld [vmem:[#allocation7 + $0x1f4] sm:$0xf] }
 0x1f4   :  { %v9153_v52 = vor.u32 %v11474_v50, %v9150_v51  ;;  %v11491_v50 = vld [vmem:[%s12651_s8 + $0x78] sm:$0xff]  ;;  %v11490_v51 = vld [vmem:[%s12651_s8 + $0x70] sm:$0xff] }
 0x1f5   :  { %3613 = vmatpush.bf16.msrb.mxu2 %v9073_v33  ;;  %v2975_v55 = vpop.f32.mrf.mxu3  ;;  %v9093_v33 = vor.u32 %v11461_v24, %v9092_v49  ;;  %v11483_v24 = vld [vmem:[%s12651_s8 + $0x38] sm:$0xff]  ;;  %3786 = vmatpush.bf16.msra.mxu1 %v11491_v50 }
 0x1f6   :  { %v2976_v20 = vadd.f32 %v2975_v55, %v2963_v16  ;;  %3575 = vmatpush.bf16.msra.mxu3 %v9125_v35  ;;  %v11462_v16 = vld [vmem:[#allocation7 + $0x194] sm:$0xf]  ;;  %3773 = vmatpush.bf16.msra.mxu0 %v11483_v24  ;;  %v11552_v24 = vld [vmem:[#allocation8 + $0x1c4] sm:$0xf] }
 0x1f7   :  { %v2964_v58 = vpop.f32.mrf.mxu2  ;;  %v9105_v23 = vor.u32 %v11462_v16, %v9102_v18 }
 0x1f8   :  { %v2989_v26 = vadd.f32 %v2988_v31, %v2976_v20  ;;  %v9108_v31 = vld [vmem:[#allocation7 + $0x1a0] sm:$0xf]  ;;  %v9142_v58 = vld [vmem:[#allocation7 + $0x1e8] sm:$0xf0]  ;;  %v1434_v20 = vperm.slane %v12378_v17, 3 }
 0x1f9   :  { %v3003_v61 = vpop.f32.mrf.mxu1  ;;  %3614 = vmatpush.bf16.msrb.mxu2 %v9065_v56  ;;  %v9109_v53 = vor.u32 %v11465_v44, %v9108_v31  ;;  %v11472_v56 = vld [vmem:[#allocation7 + $0x1e4] sm:$0xf]  ;;  %3787 = vmatpush.bf16.msra.mxu1 %v11490_v51  ;;  %v9318_v51 = vld [vmem:[#allocation8 + $0xa0] sm:$0xf] }
 0x1fa   :  { %v3002_v29 = vadd.f32 %v3001_v8, %v2989_v26  ;;  %3576 = vmatpush.bf16.msra.mxu3 %v9117_v41  ;;  %v9101_v8 = vor.u32 %v11463_v14, %v9100_v46  ;;  %v9145_v61 = vor.u32 %v11472_v56, %v9142_v58  ;;  %v11480_v56 = vld [vmem:[%s12651_s8 + $0x20] sm:$0xff]  ;;  %v11479_v58 = vld [vmem:[%s12651_s8 + $0x18] sm:$0xff] }
 0x1fd   :  { %3615 = vmatpush.bf16.msrb.mxu2 %v9057_v0  ;;  %v2977_v9 = vpop.f32.mrf.mxu3  ;;  %v11470_v0 = vld [vmem:[#allocation7 + $0x1d4] sm:$0xf] }
 0x1fe   :  { %3577 = vmatpush.bf16.msra.mxu3 %v9109_v53  ;;  %v9129_v9 = vor.u32 %v11468_v5, %v9126_v6  ;;  %v11488_v5 = vld [vmem:[%s12651_s8 + $0x60] sm:$0xff]  ;;  %v11487_v6 = vld [vmem:[%s12651_s8 + $0x58] sm:$0xff] }
 0x201   :  { %3616 = vmatpush.bf16.msrb.mxu2 %v9049_v3  ;;  %v9137_v3 = vor.u32 %v11470_v0, %v9134_v42  ;;  %v11477_v42 = vld [vmem:[%s12651_s8 + $0x8] sm:$0xff] }
 0x202   :  { %3578 = vmatpush.bf16.msra.mxu3 %v9101_v8 }
 0x205   :  { %3617 = vmatpush.bf16.msrb.mxu2 %v9041_v10 }
 0x206   :  { %3579 = vmatpush.bf16.msra.mxu3 %v9093_v33  ;;  %v11482_v33 = vld [vmem:[%s12651_s8 + $0x30] sm:$0xff] }
 0x207   :  { %3774 = vmatpush.bf16.msra.mxu0 %v11482_v33  ;;  %v9464_v33 = vld [vmem:[#allocation8 + $0x1d0] sm:$0xf0] }
 0x209   :  { %3618 = vmatpush.bf16.msrb.mxu2 %v9033_v48  ;;  %v9110_v48 = vld [vmem:[#allocation7 + $0x1a8] sm:$0xf0] }
 0x20a   :  { %v12395_v19 = vpop.f32.mrf.mxu0  ;;  %3624 = vmatpush.bf16.msrb.mxu3 %v9153_v52  ;;  %v9113_v21 = vor.u32 %v11464_v15, %v9110_v48  ;;  %v11481_v52 = vld [vmem:[%s12651_s8 + $0x28] sm:$0xff] }
 0x20b   :  { %v3041_v45 = vadd.f32 %v12395_v19, %v1434_v20  ;;  %3775 = vmatpush.bf16.msra.mxu0 %v11481_v52  ;;  %v11518_v52 = vld [vmem:[#allocation8 + $0xac] sm:$0xf0] }
 0x20e   :  { %3625 = vmatpush.bf16.msrb.mxu3 %v9145_v61 }
 0x20f   :  { %v3014_v40 = vpop.f32.mrf.mxu2  ;;  %3776 = vmatpush.bf16.msra.mxu0 %v11480_v56  ;;  %v9446_v56 = vld [vmem:[#allocation8 + $0x1a0] sm:$0xf] }
 0x210   :  { %v3015_v30 = vadd.f32 %v3014_v40, %v3002_v29  ;;  %v11460_v40 = vld [vmem:[#allocation7 + $0x184] sm:$0xf] }
 0x211   :  { %v12397_v60 = vpop.f32.mrf.mxu1  ;;  %v9097_v1 = vor.u32 %v11460_v40, %v9094_v25  ;;  %v11494_v40 = vld [vmem:[%s12653_s10 + $0x14] sm:$0xf] }
 0x212   :  { %v3042_v28 = vpop.f32.mrf.mxu0  ;;  %3626 = vmatpush.bf16.msrb.mxu3 %v9137_v3  ;;  %v3054_v26 = vadd.f32 %v12397_v60, %v3041_v45  ;;  %v11476_v3 = vld [vmem:[%s12651_s8] sm:$0xff]  ;;  %v9228_v45 = vld [vmem:[%s12653_s10 + $0x10] sm:$0xf] }
 0x213   :  { %3777 = vmatpush.bf16.msra.mxu0 %v11479_v58  ;;  %v11550_v58 = vld [vmem:[#allocation8 + $0x1ac] sm:$0xf0] }
 0x215   :  { %v3027_v4 = vpop.f32.mrf.mxu3 }
 0x216   :  { %v3028_v36 = vadd.f32 %v3027_v4, %v3015_v30  ;;  %3627 = vmatpush.bf16.msrb.mxu3 %v9129_v9  ;;  %v11485_v9 = vld [vmem:[%s12651_s8 + $0x48] sm:$0xff] }
 0x217   :  { %v3016_v38 = vpop.f32.mrf.mxu2 }
 0x218   :  { %v3137_v37 = vmax.f32 %v3028_v36, 0.0 }
 0x219   :  { %v3055_v39 = vpop.f32.mrf.mxu1 }
 0x21a   :  { %v3141_v43 = vpack.c.bf16 %v3137_v37, %v3137_v37  ;;  %3628 = vmatpush.bf16.msrb.mxu3 %v9121_v13  ;;  %v3207_v39 = vld [vmem:[%s12650_s7] sm:$0x3] }
 0x21b   :  { %v3209_v57 = vperm.slane %v3207_v39, 0  ;;  %v3210_v46 = vperm.slane %v3207_v39, 1 }
 0x21c   :  { %3567 = vmatmul.bf16.vlgmr.msra.gmra.mxu2 %v3141_v43 }
 0x21d   :  { %v3029_v47 = vpop.f32.mrf.mxu3 }
 0x21e   :  { %3629 = vmatpush.bf16.msrb.mxu3 %v9113_v21 }
 0x222   :  { %3630 = vmatpush.bf16.msrb.mxu3 %v9105_v23 }
 0x226   :  { %3631 = vmatpush.bf16.msrb.mxu3 %v9097_v1  ;;  %v9220_v1 = vld [vmem:[%s12653_s10] sm:$0xf] }
 0x22a   :  { %v3092_v55 = vpop.f32.mrf.mxu0 }
 0x22c   :  { %3619 = vmatmul.bf16.vlgmr.msrb.gmra.mxu2 %v3141_v43 }
 0x22f   :  { %v3066_v62 = vpop.f32.mrf.mxu2 }
 0x230   :  { %v3067_v27 = vadd.f32 %v3066_v62, %v3054_v26  ;;  %v11478_v62 = vld [vmem:[%s12651_s8 + $0x10] sm:$0xff]  ;;  %v11495_v26 = vld [vmem:[%s12653_s10 + $0x14] sm:$0xf0] }
 0x231   :  { %v3105_v63 = vpop.f32.mrf.mxu1  ;;  %3778 = vmatpush.bf16.msra.mxu0 %v11478_v62  ;;  %v9229_v25 = vor.u32 %v11495_v26, %v9228_v45  ;;  %v9319_v62 = vor.u32 %v11518_v52, %v9318_v51  ;;  %v11542_v45 = vld [vmem:[#allocation8 + $0x16c] sm:$0xf0]  ;;  %v11508_v26 = vld [vmem:[#allocation8 + $0x64] sm:$0xf] }
 0x232   :  { %v3094_v2 = vpop.f32.mrf.mxu0 }
 0x233   :  { %v11489_v2 = vld [vmem:[%s12651_s8 + $0x68] sm:$0xff]  ;;  %3842 = vmatpush.bf16.msra.mxu2 %v9229_v25  ;;  %v11540_v25 = vld [vmem:[#allocation8 + $0x164] sm:$0xf] }
 0x234   :  { %3788 = vmatpush.bf16.msra.mxu1 %v11489_v2 }
 0x235   :  { %v3079_v7 = vpop.f32.mrf.mxu3  ;;  %3779 = vmatpush.bf16.msra.mxu0 %v11477_v42  ;;  %v9448_v42 = vld [vmem:[#allocation8 + $0x1b0] sm:$0xf0] }
 0x236   :  { %v3080_v29 = vadd.f32 %v3079_v7, %v3067_v27  ;;  %v11486_v7 = vld [vmem:[%s12651_s8 + $0x50] sm:$0xff]  ;;  %v9230_v27 = vld [vmem:[%s12653_s10 + $0x18] sm:$0xf0] }
 0x237   :  { %v3068_v10 = vpop.f32.mrf.mxu2 }
 0x238   :  { %v3093_v30 = vadd.f32 %v3092_v55, %v3080_v29  ;;  %3789 = vmatpush.bf16.msra.mxu1 %v11488_v5  ;;  %v11484_v10 = vld [vmem:[%s12651_s8 + $0x40] sm:$0xff]  ;;  %v11493_v29 = vld [vmem:[%s12653_s10 + $0x4] sm:$0xf0] }
 0x239   :  { %v3107_v59 = vpop.f32.mrf.mxu1  ;;  %3780 = vmatpush.bf16.msra.mxu0 %v11476_v3  ;;  %v9447_v3 = vor.u32 %v11550_v58, %v9446_v56  ;;  %v11498_v56 = vld [vmem:[#allocation8 + $0xc] sm:$0xf0]  ;;  %v9366_v58 = vld [vmem:[#allocation8 + $0x100] sm:$0xf] }
 0x23a   :  { %v3106_v4 = vadd.f32 %v3105_v63, %v3093_v30  ;;  %v11492_v30 = vld [vmem:[%s12653_s10 + $0x4] sm:$0xf] }
 0x23c   :  { %3790 = vmatpush.bf16.msra.mxu1 %v11487_v6  ;;  %v9302_v6 = vld [vmem:[#allocation8 + $0x80] sm:$0xf] }
 0x23d   :  { %v3081_v22 = vpop.f32.mrf.mxu3 }
 0x240   :  { %3791 = vmatpush.bf16.msra.mxu1 %v11486_v7  ;;  %v11514_v7 = vld [vmem:[#allocation8 + $0x8c] sm:$0xf0] }
 0x244   :  { %3792 = vmatpush.bf16.msra.mxu1 %v11485_v9  ;;  %v9430_v9 = vld [vmem:[#allocation8 + $0x180] sm:$0xf] }
 0x248   :  { %3793 = vmatpush.bf16.msra.mxu1 %v11484_v10 }
 0x24a   :  { %v3542_v28 = vpop.f32.mrf.mxu0 }
 0x24b   :  { %v3543_v54 = vadd.f32 %v3542_v28, %v3209_v57  ;;  %v9233_v28 = vor.u32 %v11494_v40, %v9230_v27  ;;  %v9288_v40 = vld [vmem:[#allocation8 + $0x70] sm:$0xf0] }
 0x24c   :  { %v9416_v27 = vld [vmem:[#allocation8 + $0x170] sm:$0xf0] }
 0x24f   :  { %v3118_v32 = vpop.f32.mrf.mxu2 }
 0x250   :  { %v3119_v17 = vadd.f32 %v3118_v32, %v3106_v4  ;;  %v9221_v32 = vor.u32 %v11493_v29, %v9220_v1 }
 0x252   :  { %v3544_v34 = vpop.f32.mrf.mxu0  ;;  %3843 = vmatpush.bf16.msra.mxu2 %v9221_v32  ;;  %v9270_v32 = vld [vmem:[#allocation8 + $0x40] sm:$0xf] }
 0x253   :  { %v9222_v34 = vld [vmem:[%s12653_s10 + $0x8] sm:$0xf0] }
 0x254   :  { %v9225_v4 = vor.u32 %v11492_v30, %v9222_v34  ;;  %v9291_v30 = vor.u32 %v11508_v26, %v9288_v40  ;;  %v11506_v34 = vld [vmem:[#allocation8 + $0x4c] sm:$0xf0] }
 0x255   :  { %v3131_v35 = vpop.f32.mrf.mxu3 }
 0x256   :  { %v3132_v36 = vadd.f32 %v3131_v35, %v3119_v17  ;;  %v9350_v17 = vld [vmem:[#allocation8 + $0xe0] sm:$0xf]  ;;  %v11526_v35 = vld [vmem:[#allocation8 + $0xec] sm:$0xf0] }
 0x257   :  { %v3120_v38 = vpop.f32.mrf.mxu2 }
 0x258   :  { %v3138_v37 = vmax.f32 %v3132_v36, 0.0  ;;  %v9478_v36 = vld [vmem:[#allocation8 + $0x1e0] sm:$0xf]  ;;  %v11558_v38 = vld [vmem:[#allocation8 + $0x1ec] sm:$0xf0] }
 0x259   :  { %v9479_v39 = vor.u32 %v11558_v38, %v9478_v36  ;;  %v11504_v36 = vld [vmem:[#allocation8 + $0x44] sm:$0xf] }
 0x25a   :  { %v3142_v19 = vpack.c.bf16 %v3138_v37, %v3138_v37  ;;  %v9351_v37 = vor.u32 %v11526_v35, %v9350_v17  ;;  %v9419_v17 = vor.u32 %v11540_v25, %v9416_v27  ;;  %v11538_v35 = vld [vmem:[#allocation8 + $0x14c] sm:$0xf0]  ;;  %v11536_v38 = vld [vmem:[#allocation8 + $0x144] sm:$0xf]  ;;  %v9470_v25 = vld [vmem:[#allocation8 + $0x1c8] sm:$0xf] }
 0x25b   :  { %v11555_v27 = vld [vmem:[#allocation8 + $0x1d4] sm:$0xf0] }
 0x25c   :  { %3580 = vmatmul.bf16.vlgmr.msra.gmra.mxu3 %v3142_v19  ;;  %4260 = vmatpush.bf16.msrb.mxu2 %v9351_v37  ;;  %v9272_v37 = vld [vmem:[#allocation8 + $0x50] sm:$0xf0] }
 0x25d   :  { %v3133_v60 = vpop.f32.mrf.mxu3  ;;  %v3555_v43 = vpop.f32.mrf.mxu1  ;;  %3855 = vmatpush.bf16.msra.mxu3 %v9233_v28 }
 0x25e   :  { %v3556_v31 = vadd.f32 %v3555_v43, %v3543_v54  ;;  %v9352_v60 = vld [vmem:[#allocation8 + $0xf0] sm:$0xf0]  ;;  %v11556_v54 = vld [vmem:[#allocation8 + $0x1e4] sm:$0xf]  ;;  %v9334_v43 = vld [vmem:[#allocation8 + $0xc0] sm:$0xf] }
 0x261   :  { %3856 = vmatpush.bf16.msra.mxu3 %v9225_v4  ;;  %v9398_v4 = vld [vmem:[#allocation8 + $0x140] sm:$0xf] }
 0x265   :  { %v3557_v53 = vpop.f32.mrf.mxu1 }
 0x266   :  { %v9462_v53 = vld [vmem:[#allocation8 + $0x1c0] sm:$0xf] }
 0x26a   :  { %v3594_v41 = vpop.f32.mrf.mxu0 }
 0x26b   :  { %v3595_v14 = vadd.f32 %v3594_v41, %v3210_v46  ;;  %v9480_v41 = vld [vmem:[#allocation8 + $0x1f0] sm:$0xf0]  ;;  %v11554_v46 = vld [vmem:[#allocation8 + $0x1cc] sm:$0xf0] }
 0x26c   :  { %3632 = vmatmul.bf16.vlgmr.msrb.gmra.mxu3 %v3142_v19  ;;  %v11524_v19 = vld [vmem:[#allocation8 + $0xe4] sm:$0xf] }
 0x26d   :  { %v9355_v57 = vor.u32 %v11524_v19, %v9352_v60  ;;  %4273 = vmatpush.bf16.msrb.mxu3 %v9479_v39  ;;  %v9400_v19 = vld [vmem:[#allocation8 + $0x150] sm:$0xf0]  ;;  %v11957_v60 = vld [vmem:[%s12652_s9] ss:$0 sm:$0xff]  ;;  %v9271_v39 = vor.u32 %v11506_v34, %v9270_v32  ;;  %v9472_v32 = vld [vmem:[#allocation8 + $0x1d8] sm:$0xf0] }
 0x26f   :  { %v3607_v47 = vpop.f32.mrf.mxu1  ;;  %4286 = vmatpush.bf16.msrb.mxu0 %v9355_v57  ;;  %v9399_v57 = vor.u32 %v11538_v35, %v9398_v4  ;;  %v9471_v4 = vor.u32 %v11555_v27, %v9470_v25  ;;  %v9264_v27 = vld [vmem:[#allocation8 + $0x38] sm:$0xf0] }
 0x270   :  { %v3608_v8 = vadd.f32 %v3607_v47, %v3595_v14  ;;  %v9463_v47 = vor.u32 %v11554_v46, %v9462_v53  ;;  %v11534_v53 = vld [vmem:[#allocation8 + $0x12c] sm:$0xf0]  ;;  %v11500_v46 = vld [vmem:[#allocation8 + $0x24] sm:$0xf] }
 0x272   :  { %v3596_v44 = vpop.f32.mrf.mxu0  ;;  %4274 = vmatpush.bf16.msrb.mxu3 %v9463_v47  ;;  %v11532_v47 = vld [vmem:[#allocation8 + $0x124] sm:$0xf] }
 0x273   :  { %v11522_v44 = vld [vmem:[#allocation8 + $0xcc] sm:$0xf0] }
 0x274   :  { %v9335_v14 = vor.u32 %v11522_v44, %v9334_v43  ;;  %v11502_v43 = vld [vmem:[#allocation8 + $0x2c] sm:$0xf0]  ;;  %v9403_v44 = vor.u32 %v11536_v38, %v9400_v19  ;;  %v9454_v38 = vld [vmem:[#allocation8 + $0x1a8] sm:$0xf] }
 0x276   :  { %4261 = vmatpush.bf16.msrb.mxu2 %v9335_v14  ;;  %4275 = vmatpush.bf16.msrb.mxu3 %v9447_v3  ;;  %v9256_v14 = vld [vmem:[#allocation8 + $0x30] sm:$0xf0] }
 0x277   :  { %v3609_v49 = vpop.f32.mrf.mxu1  ;;  %v9368_v3 = vld [vmem:[#allocation8 + $0x110] sm:$0xf0] }
 0x278   :  { %v9336_v49 = vld [vmem:[#allocation8 + $0xd0] sm:$0xf0] }
 0x27a   :  { %4262 = vmatpush.bf16.msrb.mxu2 %v9319_v62 }
 0x29f   :  { %v3568_v55 = vpop.f32.mrf.mxu2 }
 0x2a0   :  { %v3569_v59 = vadd.f32 %v3568_v55, %v3556_v31  ;;  %v9483_v31 = vor.u32 %v11556_v54, %v9480_v41  ;;  %v9467_v55 = vor.u32 %v11552_v24, %v9464_v33  ;;  %v9275_v54 = vor.u32 %v11504_v36, %v9272_v37  ;;  %v9254_v41 = vld [vmem:[#allocation8 + $0x20] sm:$0xf]  ;;  %v9326_v36 = vld [vmem:[#allocation8 + $0xa8] sm:$0xf]  ;;  %v11519_v37 = vld [vmem:[#allocation8 + $0xb4] sm:$0xf0] }
 0x2a1   :  { %v3799_v24 = vld [vmem:[%s12668_s24] sm:$0xff]  ;;  %v9327_v19 = vor.u32 %v11519_v37, %v9326_v36  ;;  %v11497_v36 = vld [vmem:[#allocation8 + $0xc] sm:$0xf]  ;;  %v9248_v37 = vld [vmem:[#allocation8 + $0x18] sm:$0xf0] }
 0x2a2   :  { %4299 = vmatpush.bf16.msrb.mxu1 %v9483_v31  ;;  %v9382_v31 = vld [vmem:[#allocation8 + $0x120] sm:$0xf] }
 0x2a3   :  { %v9238_v33 = vld [vmem:[#allocation8] sm:$0xf]  ;;  %v9383_v52 = vor.u32 %v11534_v53, %v9382_v31  ;;  %v9456_v31 = vld [vmem:[#allocation8 + $0x1b8] sm:$0xf0]  ;;  %v9310_v53 = vld [vmem:[#allocation8 + $0x88] sm:$0xf] }
 0x2a6   :  { %4300 = vmatpush.bf16.msrb.mxu1 %v9467_v55  ;;  %v9259_v55 = vor.u32 %v11500_v46, %v9256_v14  ;;  %v11515_v46 = vld [vmem:[#allocation8 + $0x94] sm:$0xf0]  ;;  %v9438_v14 = vld [vmem:[#allocation8 + $0x188] sm:$0xf] }
 0x2a7   :  { %v3570_v61 = vpop.f32.mrf.mxu2 }
 0x2a8   :  { %v11516_v61 = vld [vmem:[#allocation8 + $0xa4] sm:$0xf] }
 0x2af   :  { %v3620_v63 = vpop.f32.mrf.mxu2 }
 0x2b0   :  { %v3621_v21 = vadd.f32 %v3620_v63, %v3608_v8  ;;  %v11520_v8 = vld [vmem:[#allocation8 + $0xc4] sm:$0xf]  ;;  %v9320_v63 = vld [vmem:[#allocation8 + $0xb0] sm:$0xf0] }
 0x2b1   :  { %v9339_v50 = vor.u32 %v11520_v8, %v9336_v49  ;;  %v9323_v5 = vor.u32 %v11516_v61, %v9320_v63  ;;  %v9384_v8 = vld [vmem:[#allocation8 + $0x130] sm:$0xf0]  ;;  %v11530_v61 = vld [vmem:[#allocation8 + $0x10c] sm:$0xf0] }
 0x2b2   :  { %v9387_v63 = vor.u32 %v11532_v47, %v9384_v8  ;;  %v9311_v47 = vor.u32 %v11515_v46, %v9310_v53  ;;  %v11547_v8 = vld [vmem:[#allocation8 + $0x194] sm:$0xf0] }
 0x2b3   :  { %4287 = vmatpush.bf16.msrb.mxu0 %v9339_v50  ;;  %v9255_v50 = vor.u32 %v11502_v43, %v9254_v41  ;;  %v11549_v43 = vld [vmem:[#allocation8 + $0x1ac] sm:$0xf] }
 0x2b7   :  { %v3622_v0 = vpop.f32.mrf.mxu2  ;;  %4288 = vmatpush.bf16.msrb.mxu0 %v9323_v5  ;;  %v9358_v5 = vld [vmem:[#allocation8 + $0xe8] sm:$0xf] }
 0x2b8   :  { %v11548_v0 = vld [vmem:[#allocation8 + $0x1a4] sm:$0xf] }
 0x2b9   :  { %v9451_v10 = vor.u32 %v11548_v0, %v9448_v42  ;;  %v11496_v0 = vld [vmem:[#allocation8 + $0x4] sm:$0xf]  ;;  %v9240_v42 = vld [vmem:[#allocation8 + $0x10] sm:$0xf0] }
 0x2bb   :  { %4301 = vmatpush.bf16.msrb.mxu1 %v9451_v10  ;;  %v11559_v10 = vld [vmem:[#allocation8 + $0x1f4] sm:$0xf0] }
 0x2df   :  { %v3581_v11 = vpop.f32.mrf.mxu3 }
 0x2e0   :  { %v3582_v12 = vadd.f32 %v3581_v11, %v3569_v59  ;;  %v11546_v59 = vld [vmem:[#allocation8 + $0x18c] sm:$0xf0]  ;;  %v11512_v11 = vld [vmem:[#allocation8 + $0x84] sm:$0xf] }
 0x2e2   :  { %v3637_v13 = vmax.f32 %v3582_v12, 0.0  ;;  %v9304_v12 = vld [vmem:[#allocation8 + $0x90] sm:$0xf0] }
 0x2e4   :  { %v3639_v15 = vpack.c.bf16 %v3637_v13, %v3637_v13  ;;  %v11544_v13 = vld [vmem:[#allocation8 + $0x184] sm:$0xf] }
 0x2e6   :  { %3781 = vmatmul.bf16.vlgmr.msra.gmra.mxu0 %v3639_v15  ;;  %v9432_v15 = vld [vmem:[#allocation8 + $0x190] sm:$0xf0] }
 0x2e7   :  { %v3583_v48 = vpop.f32.mrf.mxu3 }
 0x2e8   :  { %v9303_v48 = vor.u32 %v11514_v7, %v9302_v6  ;;  %v11527_v6 = vld [vmem:[#allocation8 + $0xf4] sm:$0xf0] }
 0x2ea   :  { %4263 = vmatpush.bf16.msrb.mxu2 %v9303_v48  ;;  %v9488_v48 = vld [vmem:[#allocation8 + $0x1f8] sm:$0xf0] }
 0x2ef   :  { %v3633_v16 = vpop.f32.mrf.mxu3 }
 0x2f0   :  { %v3634_v18 = vadd.f32 %v3633_v16, %v3621_v21  ;;  %v9431_v21 = vor.u32 %v11546_v59, %v9430_v9  ;;  %v9307_v16 = vor.u32 %v11512_v11, %v9304_v12  ;;  %v9486_v9 = vld [vmem:[#allocation8 + $0x1e8] sm:$0xf]  ;;  %v11525_v59 = vld [vmem:[#allocation8 + $0xec] sm:$0xf]  ;;  %v9239_v11 = vor.u32 %v11498_v56, %v9238_v33 }
 0x2f1   :  { %v9367_v12 = vor.u32 %v11530_v61, %v9366_v58  ;;  %v9294_v56 = vld [vmem:[#allocation8 + $0x68] sm:$0xf]  ;;  %v11511_v58 = vld [vmem:[#allocation8 + $0x74] sm:$0xf0] }
 0x2f2   :  { %v3638_v20 = vmax.f32 %v3634_v18, 0.0  ;;  %v9286_v18 = vld [vmem:[#allocation8 + $0x60] sm:$0xf]  ;;  %4276 = vmatpush.bf16.msrb.mxu3 %v9431_v21  ;;  %4289 = vmatpush.bf16.msrb.mxu0 %v9307_v16  ;;  %v9243_v16 = vor.u32 %v11496_v0, %v9240_v42  ;;  %v9422_v61 = vld [vmem:[#allocation8 + $0x168] sm:$0xf] }
 0x2f3   :  { %v11509_v0 = vld [vmem:[#allocation8 + $0x6c] sm:$0xf]  ;;  %v9296_v42 = vld [vmem:[#allocation8 + $0x78] sm:$0xf0] }
 0x2f4   :  { %v3640_v22 = vpack.c.bf16 %v3638_v20, %v3638_v20  ;;  %v11510_v20 = vld [vmem:[#allocation8 + $0x6c] sm:$0xf0] }
 0x2f5   :  { %v9287_v28 = vor.u32 %v11510_v20, %v9286_v18  ;;  %v9359_v20 = vor.u32 %v11527_v6, %v9358_v5  ;;  %v11541_v5 = vld [vmem:[#allocation8 + $0x16c] sm:$0xf]  ;;  %v9424_v6 = vld [vmem:[#allocation8 + $0x178] sm:$0xf0] }
 0x2f6   :  { %3794 = vmatmul.bf16.vlgmr.msra.gmra.mxu1 %v3640_v22  ;;  %v9414_v22 = vld [vmem:[#allocation8 + $0x160] sm:$0xf]  ;;  %4290 = vmatpush.bf16.msrb.mxu0 %v9291_v30  ;;  %v11553_v30 = vld [vmem:[#allocation8 + $0x1cc] sm:$0xf] }
 0x2f7   :  { %v3635_v23 = vpop.f32.mrf.mxu3  ;;  %v9415_v29 = vor.u32 %v11542_v45, %v9414_v22  ;;  %4264 = vmatpush.bf16.msrb.mxu2 %v9287_v28  ;;  %v9487_v22 = vor.u32 %v11559_v10, %v9486_v9  ;;  %v11523_v45 = vld [vmem:[#allocation8 + $0xd4] sm:$0xf0]  ;;  %v11521_v28 = vld [vmem:[#allocation8 + $0xcc] sm:$0xf]  ;;  %v9475_v35 = vor.u32 %v11553_v30, %v9472_v32  ;;  %v9427_v9 = vor.u32 %v11541_v5, %v9424_v6  ;;  %v9246_v32 = vld [vmem:[#allocation8 + $0x8] sm:$0xf] }
 0x2f8   :  { %v9435_v23 = vor.u32 %v11544_v13, %v9432_v15  ;;  %v9360_v13 = vld [vmem:[#allocation8 + $0xf8] sm:$0xf0]  ;;  %v11557_v15 = vld [vmem:[#allocation8 + $0x1ec] sm:$0xf]  ;;  %v11507_v10 = vld [vmem:[#allocation8 + $0x54] sm:$0xf0] }
 0x2f9   :  { %4277 = vmatpush.bf16.msrb.mxu3 %v9415_v29  ;;  %v9363_v26 = vor.u32 %v11525_v59, %v9360_v13  ;;  %v9491_v40 = vor.u32 %v11557_v15, %v9488_v48  ;;  %v9344_v29 = vld [vmem:[#allocation8 + $0xd8] sm:$0xf0]  ;;  %v9406_v59 = vld [vmem:[#allocation8 + $0x148] sm:$0xf]  ;;  %v11505_v15 = vld [vmem:[#allocation8 + $0x4c] sm:$0xf] }
 0x2fa   :  { %4302 = vmatpush.bf16.msrb.mxu1 %v9435_v23  ;;  %4291 = vmatpush.bf16.msrb.mxu0 %v9275_v54  ;;  %v9342_v23 = vld [vmem:[#allocation8 + $0xc8] sm:$0xf]  ;;  %v9280_v48 = vld [vmem:[#allocation8 + $0x58] sm:$0xf0]  ;;  %v10454_v6 = vld [vmem:[#allocation10 + $0x780] sm:$0xf] }
 0x2fb   :  { %4265 = vmatpush.bf16.msrb.mxu2 %v9271_v39  ;;  %v9343_v34 = vor.u32 %v11523_v45, %v9342_v23  ;;  %v11517_v39 = vld [vmem:[#allocation8 + $0xac] sm:$0xf]  ;;  %v9390_v45 = vld [vmem:[#allocation8 + $0x128] sm:$0xf] }
 0x2fd   :  { %4278 = vmatpush.bf16.msrb.mxu3 %v9399_v57  ;;  %v9328_v57 = vld [vmem:[#allocation8 + $0xb8] sm:$0xf0] }
 0x2fe   :  { %4303 = vmatpush.bf16.msrb.mxu1 %v9419_v17  ;;  %4292 = vmatpush.bf16.msrb.mxu0 %v9259_v55  ;;  %v9347_v17 = vor.u32 %v11521_v28, %v9344_v29  ;;  %v9331_v41 = vor.u32 %v11517_v39, %v9328_v57  ;;  %v11533_v28 = vld [vmem:[#allocation8 + $0x12c] sm:$0xf]  ;;  %v9251_v57 = vor.u32 %v11497_v36, %v9248_v37  ;;  %v11724_v36 = vld [vmem:[#allocation10 + $0x51c] sm:$0xf0] }
 0x2ff   :  { %4266 = vmatpush.bf16.msrb.mxu2 %v9255_v50  ;;  %v9439_v50 = vor.u32 %v11547_v8, %v9438_v14  ;;  %v11684_v8 = vld [vmem:[#allocation10 + $0x3dc] sm:$0xf0] }
 0x301   :  { %4279 = vmatpush.bf16.msrb.mxu3 %v9383_v52  ;;  %v9440_v52 = vld [vmem:[#allocation8 + $0x198] sm:$0xf0] }
 0x302   :  { %4304 = vmatpush.bf16.msrb.mxu1 %v9403_v44  ;;  %4293 = vmatpush.bf16.msrb.mxu0 %v9243_v16  ;;  %v9459_v44 = vor.u32 %v11549_v43, %v9456_v31  ;;  %v9283_v16 = vor.u32 %v11505_v15, %v9280_v48  ;;  %v9910_v15 = vld [vmem:[#allocation10 + $0x340] sm:$0xf] }
 0x303   :  { %4267 = vmatpush.bf16.msrb.mxu2 %v9239_v11  ;;  %v11539_v11 = vld [vmem:[#allocation8 + $0x154] sm:$0xf0]  ;;  %v11668_v48 = vld [vmem:[#allocation10 + $0x35c] sm:$0xf0] }
 0x304   :  { %v9407_v13 = vor.u32 %v11539_v11, %v9406_v59  ;;  %v11740_v59 = vld [vmem:[#allocation10 + $0x59c] sm:$0xf0] }
 0x305   :  { %4280 = vmatpush.bf16.msrb.mxu3 %v9367_v12 }
 0x306   :  { %4305 = vmatpush.bf16.msrb.mxu1 %v9387_v63  ;;  %4338 = vmatpush.bf16.msra.mxu0 %v9363_v26  ;;  %v11543_v63 = vld [vmem:[#allocation8 + $0x174] sm:$0xf0] }
 0x307   :  { %v11535_v26 = vld [vmem:[#allocation8 + $0x134] sm:$0xf0] }
 0x308   :  { %v9391_v29 = vor.u32 %v11535_v26, %v9390_v45  ;;  %v11796_v45 = vld [vmem:[#allocation10 + $0x75c] sm:$0xf0] }
 0x309   :  { %v10166_v26 = vld [vmem:[#allocation10 + $0x540] sm:$0xf] }
 0x30a   :  { %4339 = vmatpush.bf16.msra.mxu0 %v9347_v17 }
 0x30e   :  { %4340 = vmatpush.bf16.msra.mxu0 %v9331_v41  ;;  %v3806_v41 = vld [vmem:[%s12654_s11] sm:$0x3] }
 0x30f   :  { %v3808_v43 = vperm.slane %v3806_v41, 0  ;;  %v3809_v31 = vperm.slane %v3806_v41, 1  ;;  %v10358_v41 = vld [vmem:[#allocation10 + $0x6c0] sm:$0xf] }
 0x363   :  { %v12477_v2 = vpop.f32.mrf.mxu0 }
 0x364   :  { %v3783_v49 = vadd.f32 %v11957_v60, %v12477_v2  ;;  %v11528_v2 = vld [vmem:[#allocation8 + $0x104] sm:$0xf]  ;;  %v11551_v60 = vld [vmem:[#allocation8 + $0x1b4] sm:$0xf0] }
 0x365   :  { %v9371_v18 = vor.u32 %v11528_v2, %v9368_v3  ;;  %v9455_v54 = vor.u32 %v11551_v60, %v9454_v38  ;;  %v9423_v2 = vor.u32 %v11543_v63, %v9422_v61  ;;  %v9299_v3 = vor.u32 %v11509_v0, %v9296_v42  ;;  %v11529_v38 = vld [vmem:[#allocation8 + $0x10c] sm:$0xf]  ;;  %v9942_v63 = vld [vmem:[#allocation10 + $0x380] sm:$0xf] }
 0x366   :  { %v11676_v0 = vld [vmem:[#allocation10 + $0x39c] sm:$0xf0] }
 0x367   :  { %4306 = vmatpush.bf16.msrb.mxu1 %v9371_v18  ;;  %v9408_v18 = vld [vmem:[#allocation8 + $0x158] sm:$0xf0] }
 0x36b   :  { %v3784_v1 = vpop.f32.mrf.mxu0  ;;  %4351 = vmatpush.bf16.msra.mxu1 %v9491_v40  ;;  %v11501_v40 = vld [vmem:[#allocation8 + $0x2c] sm:$0xf] }
 0x36c   :  { %v9267_v30 = vor.u32 %v11501_v40, %v9264_v27  ;;  %v11732_v40 = vld [vmem:[#allocation10 + $0x55c] sm:$0xf0] }
 0x36d   :  { %v9878_v27 = vld [vmem:[#allocation10 + $0x300] sm:$0xf] }
 0x36f   :  { %4352 = vmatpush.bf16.msra.mxu1 %v9475_v35  ;;  %v11531_v35 = vld [vmem:[#allocation8 + $0x114] sm:$0xf0] }
 0x373   :  { %v3795_v51 = vpop.f32.mrf.mxu1  ;;  %4353 = vmatpush.bf16.msra.mxu1 %v9459_v44 }
 0x374   :  { %v3796_v62 = vadd.f32 %v3795_v51, %v3783_v49  ;;  %v11513_v49 = vld [vmem:[#allocation8 + $0x8c] sm:$0xf] }
 0x375   :  { %v11545_v51 = vld [vmem:[#allocation8 + $0x18c] sm:$0xf] }
 0x376   :  { %v3800_v7 = vadd.f32 %v3799_v24, %v3796_v62  ;;  %v9312_v24 = vld [vmem:[#allocation8 + $0x98] sm:$0xf0]  ;;  %v9443_v55 = vor.u32 %v11545_v51, %v9440_v52  ;;  %v9295_v62 = vor.u32 %v11511_v58, %v9294_v56  ;;  %v11748_v56 = vld [vmem:[#allocation10 + $0x5dc] sm:$0xf0] }
 0x377   :  { %v9315_v33 = vor.u32 %v11513_v49, %v9312_v24  ;;  %v9718_v49 = vld [vmem:[#allocation10 + $0x1c0] sm:$0xf] }
 0x378   :  { %v3801_v21 = vpack.c.bf16 %v3800_v7, %v3800_v7  ;;  %4354 = vmatpush.bf16.msra.mxu1 %v9443_v55  ;;  %v9278_v7 = vld [vmem:[#allocation8 + $0x48] sm:$0xf]  ;;  %v11620_v24 = vld [vmem:[#allocation10 + $0x1dc] sm:$0xf0] }
 0x379   :  { %4341 = vmatpush.bf16.msra.mxu0 %v9315_v33  ;;  %v9279_v12 = vor.u32 %v11507_v10, %v9278_v7  ;;  %v11812_v33 = vld [vmem:[#allocation10 + $0x7dc] sm:$0xf0]  ;;  %v9719_v42 = vor.u32 %v11620_v24, %v9718_v49 }
 0x37a   :  { %9234 = vmatmul.msk.bf16.vlgmr.msra.gmra.mxu2 %vm3832_vm0, %v3801_v21  ;;  %9235 = vmatmul.msk.bf16.vlgmr.msra.gmra.mxu3 %vm3832_vm0, %v3801_v21  ;;  %v11537_v21 = vld [vmem:[#allocation8 + $0x14c] sm:$0xf]  ;;  %v10230_v55 = vld [vmem:[#allocation10 + $0x5c0] sm:$0xf] }
 0x37b   :  { %v3797_v1 = vpop.f32.mrf.mxu1  ;;  %4312 = vmatpush.bf16.msra.mxu2 %v9359_v20  ;;  %4325 = vmatpush.bf16.msra.mxu3 %v9487_v22  ;;  %v9262_v20 = vld [vmem:[#allocation8 + $0x28] sm:$0xf]  ;;  %v11503_v22 = vld [vmem:[#allocation8 + $0x34] sm:$0xf0]  ;;  %v9411_v23 = vor.u32 %v11537_v21, %v9408_v18  ;;  %v10231_v7 = vor.u32 %v11748_v56, %v10230_v55  ;;  %v10198_v10 = vld [vmem:[#allocation10 + $0x580] sm:$0xf] }
 0x37c   :  { %4355 = vmatpush.bf16.msra.mxu1 %v9427_v9  ;;  %v9263_v25 = vor.u32 %v11503_v22, %v9262_v20  ;;  %v9392_v1 = vld [vmem:[#allocation8 + $0x138] sm:$0xf0]  ;;  %v11804_v9 = vld [vmem:[#allocation10 + $0x79c] sm:$0xf0] }
 0x37d   :  { %4342 = vmatpush.bf16.msra.mxu0 %v9299_v3  ;;  %v9395_v17 = vor.u32 %v11533_v28, %v9392_v1  ;;  %v11612_v3 = vld [vmem:[#allocation10 + $0x19c] sm:$0xf0]  ;;  %v10455_v20 = vor.u32 %v11804_v9, %v10454_v6 }
 0x37e   :  { %v11604_v18 = vld [vmem:[#allocation10 + $0x15c] sm:$0xf0] }
 0x37f   :  { %4313 = vmatpush.bf16.msra.mxu2 %v9343_v34  ;;  %4326 = vmatpush.bf16.msra.mxu3 %v9471_v4  ;;  %v11499_v34 = vld [vmem:[#allocation8 + $0x14] sm:$0xf0]  ;;  %v9374_v4 = vld [vmem:[#allocation8 + $0x108] sm:$0xf]  ;;  %v10422_v22 = vld [vmem:[#allocation10 + $0x740] sm:$0xf] }
 0x380   :  { %4356 = vmatpush.bf16.msra.mxu1 %v9411_v23  ;;  %v9247_v60 = vor.u32 %v11499_v34, %v9246_v32  ;;  %v9375_v39 = vor.u32 %v11531_v35, %v9374_v4  ;;  %v10199_v23 = vor.u32 %v11740_v59, %v10198_v10  ;;  %v11660_v28 = vld [vmem:[#allocation10 + $0x31c] sm:$0xf0]  ;;  %v10423_v32 = vor.u32 %v11796_v45, %v10422_v22  ;;  %v9720_v22 = vld [vmem:[#allocation10 + $0x1e0] sm:$0xf0] }
 0x381   :  { %4343 = vmatpush.bf16.msra.mxu0 %v9283_v16  ;;  %v9654_v16 = vld [vmem:[#allocation10 + $0x140] sm:$0xf]  ;;  %v10167_v4 = vor.u32 %v11732_v40, %v10166_v26  ;;  %v9879_v37 = vor.u32 %v11660_v28, %v9878_v27  ;;  %v10488_v27 = vld [vmem:[#allocation10 + $0x7e0] sm:$0xf0] }
 0x382   :  { %v9655_v1 = vor.u32 %v11604_v18, %v9654_v16  ;;  %v10390_v34 = vld [vmem:[#allocation10 + $0x700] sm:$0xf]  ;;  %v9976_v18 = vld [vmem:[#allocation10 + $0x3e0] sm:$0xf0] }
 0x383   :  { %4314 = vmatpush.bf16.msra.mxu2 %v9327_v19  ;;  %4327 = vmatpush.bf16.msra.mxu3 %v9455_v54  ;;  %v9376_v19 = vld [vmem:[#allocation8 + $0x118] sm:$0xf0]  ;;  %v10134_v35 = vld [vmem:[#allocation10 + $0x500] sm:$0xf] }
 0x384   :  { %4357 = vmatpush.bf16.msra.mxu1 %v9395_v17  ;;  %v9379_v54 = vor.u32 %v11529_v38, %v9376_v19  ;;  %v11788_v17 = vld [vmem:[#allocation10 + $0x71c] sm:$0xf0] }
 0x385   :  { %4344 = vmatpush.bf16.msra.mxu0 %v9267_v30  ;;  %v11596_v30 = vld [vmem:[#allocation10 + $0x11c] sm:$0xf0] }
 0x386   :  { %v9846_v38 = vld [vmem:[#allocation10 + $0x2c0] sm:$0xf] }
 0x387   :  { %4315 = vmatpush.bf16.msra.mxu2 %v9311_v47  ;;  %4328 = vmatpush.bf16.msra.mxu3 %v9439_v50  ;;  %v9974_v47 = vld [vmem:[#allocation10 + $0x3c0] sm:$0xf] }
 0x388   :  { %4358 = vmatpush.bf16.msra.mxu1 %v9379_v54  ;;  %v10486_v50 = vld [vmem:[#allocation10 + $0x7c0] sm:$0xf]  ;;  %v10391_v54 = vor.u32 %v11788_v17, %v10390_v34  ;;  %v9688_v34 = vld [vmem:[#allocation10 + $0x1a0] sm:$0xf0] }
 0x389   :  { %4345 = vmatpush.bf16.msra.mxu0 %v9251_v57  ;;  %v10487_v5 = vor.u32 %v11812_v33, %v10486_v50  ;;  %v11652_v19 = vld [vmem:[#allocation10 + $0x2dc] sm:$0xf0] }
 0x38a   :  { %v11588_v57 = vld [vmem:[#allocation10 + $0xdc] sm:$0xf0] }
 0x38b   :  { %4316 = vmatpush.bf16.msra.mxu2 %v9295_v62  ;;  %4329 = vmatpush.bf16.msra.mxu3 %v9423_v2  ;;  %v9975_v62 = vor.u32 %v11684_v8, %v9974_v47  ;;  %v9686_v2 = vld [vmem:[#allocation10 + $0x180] sm:$0xf] }
 0x38c   :  { %v9687_v21 = vor.u32 %v11612_v3, %v9686_v2  ;;  %v11644_v47 = vld [vmem:[#allocation10 + $0x29c] sm:$0xf0] }
 0x38d   :  { %v9558_v49 = vld [vmem:[#allocation10 + $0x80] sm:$0xf] }
 0x38e   :  { %v11580_v24 = vld [vmem:[#allocation10 + $0x9c] sm:$0xf0] }
 0x38f   :  { %4317 = vmatpush.bf16.msra.mxu2 %v9279_v12  ;;  %4330 = vmatpush.bf16.msra.mxu3 %v9407_v13  ;;  %v9943_v13 = vor.u32 %v11676_v0, %v9942_v63  ;;  %v10326_v33 = vld [vmem:[#allocation10 + $0x680] sm:$0xf] }
 0x390   :  { %v10070_v55 = vld [vmem:[#allocation10 + $0x480] sm:$0xf] }
 0x391   :  { %v11708_v56 = vld [vmem:[#allocation10 + $0x49c] sm:$0xf0] }
 0x392   :  { %v9782_v63 = vld [vmem:[#allocation10 + $0x240] sm:$0xf] }
 0x393   :  { %4318 = vmatpush.bf16.msra.mxu2 %v9263_v25  ;;  %4331 = vmatpush.bf16.msra.mxu3 %v9391_v29  ;;  %v9911_v25 = vor.u32 %v11668_v48, %v9910_v15  ;;  %v9622_v29 = vld [vmem:[#allocation10 + $0x100] sm:$0xf] }
 0x394   :  { %v11636_v0 = vld [vmem:[#allocation10 + $0x25c] sm:$0xf0] }
 0x395   :  { %v9526_v2 = vld [vmem:[#allocation10 + $0x40] sm:$0xf] }
 0x396   :  { %v11572_v3 = vld [vmem:[#allocation10 + $0x5c] sm:$0xf0] }
 0x397   :  { %4319 = vmatpush.bf16.msra.mxu2 %v9247_v60  ;;  %4332 = vmatpush.bf16.msra.mxu3 %v9375_v39  ;;  %v9623_v60 = vor.u32 %v11596_v30, %v9622_v29  ;;  %v9590_v39 = vld [vmem:[#allocation10 + $0xc0] sm:$0xf]  ;;  %v9944_v30 = vld [vmem:[#allocation10 + $0x3a0] sm:$0xf0] }
 0x398   :  { %v9591_v8 = vor.u32 %v11588_v57, %v9590_v39  ;;  %v10294_v6 = vld [vmem:[#allocation10 + $0x640] sm:$0xf]  ;;  %v11656_v57 = vld [vmem:[#allocation10 + $0x304] sm:$0xf] }
 0x399   :  { %v11764_v9 = vld [vmem:[#allocation10 + $0x65c] sm:$0xf0] }
 0x39a   :  { %v10038_v10 = vld [vmem:[#allocation10 + $0x440] sm:$0xf] }
 0x39b   :  { %v11700_v59 = vld [vmem:[#allocation10 + $0x45c] sm:$0xf0] }
 0x39c   :  { %v9494_v15 = vld [vmem:[#allocation10] sm:$0xf]  ;;  %v10039_v16 = vor.u32 %v11700_v59, %v10038_v10  ;;  %v10424_v10 = vld [vmem:[#allocation10 + $0x760] sm:$0xf0] }
 0x39d   :  { %v11564_v48 = vld [vmem:[#allocation10 + $0x1c] sm:$0xf0] }
 0x39e   :  { %v11756_v45 = vld [vmem:[#allocation10 + $0x61c] sm:$0xf0]  ;;  %v9495_v40 = vor.u32 %v11564_v48, %v9494_v15  ;;  %v11624_v48 = vld [vmem:[#allocation10 + $0x204] sm:$0xf] }
 0x3fd   :  { %v3845_v44 = vpop.f32.mrf.mxu2  ;;  %v3858_v53 = vpop.f32.mrf.mxu3 }
 0x3fe   :  { %v3846_v46 = vadd.f32 %v3845_v44, %v3808_v43  ;;  %v3859_v14 = vadd.f32 %v3858_v53, %v3809_v31  ;;  %v10135_v43 = vor.u32 %v11724_v36, %v10134_v35  ;;  %v11780_v31 = vld [vmem:[#allocation10 + $0x6dc] sm:$0xf0]  ;;  %v11664_v36 = vld [vmem:[#allocation10 + $0x344] sm:$0xf] }
 0x3ff   :  { %v10102_v44 = vld [vmem:[#allocation10 + $0x4c0] sm:$0xf]  ;;  %v10359_v50 = vor.u32 %v11780_v31, %v10358_v41  ;;  %v9880_v41 = vld [vmem:[#allocation10 + $0x320] sm:$0xf0] }
 0x400   :  { %v3862_v51 = vmax.f32 %v3846_v46, 0.0  ;;  %v3863_v52 = vmax.f32 %v3859_v14, 0.0  ;;  %v11716_v53 = vld [vmem:[#allocation10 + $0x4dc] sm:$0xf0]  ;;  %v9847_v46 = vor.u32 %v11652_v19, %v9846_v38  ;;  %v9912_v38 = vld [vmem:[#allocation10 + $0x360] sm:$0xf0] }
 0x401   :  { %v9814_v14 = vld [vmem:[#allocation10 + $0x280] sm:$0xf]  ;;  %v11600_v19 = vld [vmem:[#allocation10 + $0x144] sm:$0xf]  ;;  %v9915_v39 = vor.u32 %v11664_v36, %v9912_v38 }
 0x402   :  { %v12491_v58 = vpack.c.bf16 %v3862_v51, %v3862_v51  ;;  %v12493_v61 = vpack.c.bf16 %v3863_v52, %v3863_v52  ;;  %v10103_v51 = vor.u32 %v11716_v53, %v10102_v44  ;;  %v11772_v52 = vld [vmem:[#allocation10 + $0x69c] sm:$0xf0]  ;;  %v9624_v31 = vld [vmem:[#allocation10 + $0x120] sm:$0xf0]  ;;  %v9883_v44 = vor.u32 %v11656_v57, %v9880_v41 }
 0x403   :  { %v11768_v36 = vld [vmem:[#allocation10 + $0x684] sm:$0xf] }
 0x404   :  { %4268 = vmatmul.bf16.vlgmr.msrb.gmra.mxu2 %v12491_v58  ;;  %4281 = vmatmul.bf16.vlgmr.msrb.gmra.mxu3 %v12493_v61  ;;  %v11760_v57 = vld [vmem:[#allocation10 + $0x644] sm:$0xf] }
 0x405   :  { %4294 = vmatmul.bf16.vlgmr.msrb.gmra.mxu0 %v12491_v58  ;;  %4307 = vmatmul.bf16.vlgmr.msrb.gmra.mxu1 %v12493_v61  ;;  %v3847_v11 = vpop.f32.mrf.mxu2  ;;  %v3860_v12 = vpop.f32.mrf.mxu3 }
 0x406   :  { %5939 = vmatpush.bf16.msrb.mxu3 %v9975_v62  ;;  %5926 = vmatpush.bf16.msrb.mxu2 %v9719_v42  ;;  %v9815_v62 = vor.u32 %v11644_v47, %v9814_v14  ;;  %v9559_v42 = vor.u32 %v11580_v24, %v9558_v49  ;;  %v11628_v11 = vld [vmem:[#allocation10 + $0x21c] sm:$0xf0]  ;;  %v9527_v12 = vor.u32 %v11572_v3, %v9526_v2  ;;  %v9848_v14 = vld [vmem:[#allocation10 + $0x2e0] sm:$0xf0] }
 0x407   :  { %5965 = vmatpush.bf16.msrb.mxu1 %v10487_v5  ;;  %5952 = vmatpush.bf16.msrb.mxu0 %v10231_v7  ;;  %v10327_v5 = vor.u32 %v11772_v52, %v10326_v33  ;;  %v10071_v7 = vor.u32 %v11708_v56, %v10070_v55  ;;  %v9816_v49 = vld [vmem:[#allocation10 + $0x2a0] sm:$0xf0]  ;;  %v11692_v52 = vld [vmem:[#allocation10 + $0x41c] sm:$0xf0] }
 0x408   :  { %v11800_v24 = vld [vmem:[#allocation10 + $0x784] sm:$0xf] }
 0x409   :  { %v10456_v33 = vld [vmem:[#allocation10 + $0x7a0] sm:$0xf0] }
 0x40a   :  { %5940 = vmatpush.bf16.msrb.mxu3 %v9943_v13  ;;  %5927 = vmatpush.bf16.msrb.mxu2 %v9687_v21  ;;  %v11680_v13 = vld [vmem:[#allocation10 + $0x3c4] sm:$0xf]  ;;  %v10295_v21 = vor.u32 %v11764_v9, %v10294_v6  ;;  %v10459_v55 = vor.u32 %v11800_v24, %v10456_v33  ;;  %v12506_v24 = vld [vmem:[%s12656_s13] sm:$0xf] }
 0x40b   :  { %5966 = vmatpush.bf16.msrb.mxu1 %v10455_v20  ;;  %5953 = vmatpush.bf16.msrb.mxu0 %v10199_v23  ;;  %v11616_v20 = vld [vmem:[#allocation10 + $0x1c4] sm:$0xf]  ;;  %v10262_v23 = vld [vmem:[#allocation10 + $0x600] sm:$0xf]  ;;  %v9979_v28 = vor.u32 %v11680_v13, %v9976_v18 }
 0x40c   :  { %v9723_v29 = vor.u32 %v11616_v20, %v9720_v22  ;;  %v10232_v2 = vld [vmem:[#allocation10 + $0x5e0] sm:$0xf0] }
 0x40d   :  { %v9784_v6 = vld [vmem:[#allocation10 + $0x260] sm:$0xf0] }
 0x40e   :  { %5941 = vmatpush.bf16.msrb.mxu3 %v9911_v25  ;;  %5928 = vmatpush.bf16.msrb.mxu2 %v9655_v1  ;;  %v11808_v25 = vld [vmem:[#allocation10 + $0x7c4] sm:$0xf] }
 0x40f   :  { %5967 = vmatpush.bf16.msrb.mxu1 %v10423_v32  ;;  %5954 = vmatpush.bf16.msrb.mxu0 %v10167_v4  ;;  %v11672_v1 = vld [vmem:[#allocation10 + $0x384] sm:$0xf]  ;;  %v10263_v4 = vor.u32 %v11756_v45, %v10262_v23  ;;  %v10491_v17 = vor.u32 %v11808_v25, %v10488_v27 }
 0x410   :  { %v11608_v32 = vld [vmem:[#allocation10 + $0x184] sm:$0xf]  ;;  %v9947_v35 = vor.u32 %v11672_v1, %v9944_v30 }
 0x411   :  { %v10200_v13 = vld [vmem:[#allocation10 + $0x5a0] sm:$0xf0] }
 0x412   :  { %5942 = vmatpush.bf16.msrb.mxu3 %v9879_v37  ;;  %5929 = vmatpush.bf16.msrb.mxu2 %v9623_v60  ;;  %v9691_v37 = vor.u32 %v11608_v32, %v9688_v34  ;;  %v9656_v60 = vld [vmem:[#allocation10 + $0x160] sm:$0xf0] }
 0x413   :  { %5968 = vmatpush.bf16.msrb.mxu1 %v10391_v54  ;;  %5955 = vmatpush.bf16.msrb.mxu0 %v10135_v43  ;;  %v9659_v54 = vor.u32 %v11600_v19, %v9656_v60  ;;  %v11592_v43 = vld [vmem:[#allocation10 + $0x104] sm:$0xf] }
 0x414   :  { %4320 = vmatmul.bf16.vlgmr.msra.gmra.mxu2 %v12491_v58  ;;  %4333 = vmatmul.bf16.vlgmr.msra.gmra.mxu3 %v12493_v61  ;;  %v9627_v53 = vor.u32 %v11592_v43, %v9624_v31  ;;  %v11784_v18 = vld [vmem:[#allocation10 + $0x704] sm:$0xf] }
 0x415   :  { %4346 = vmatmul.bf16.vlgmr.msra.gmra.mxu0 %v12491_v58  ;;  %4359 = vmatmul.bf16.vlgmr.msra.gmra.mxu1 %v12493_v61  ;;  %v9783_v58 = vor.u32 %v11636_v0, %v9782_v63  ;;  %v9750_v61 = vld [vmem:[#allocation10 + $0x200] sm:$0xf]  ;;  %v9592_v63 = vld [vmem:[#allocation10 + $0xe0] sm:$0xf0] }
 0x416   :  { %5943 = vmatpush.bf16.msrb.mxu3 %v9847_v46  ;;  %5930 = vmatpush.bf16.msrb.mxu2 %v9591_v8  ;;  %v9751_v26 = vor.u32 %v11628_v11, %v9750_v61  ;;  %v11648_v46 = vld [vmem:[#allocation10 + $0x2c4] sm:$0xf] }
 0x417   :  { %5969 = vmatpush.bf16.msrb.mxu1 %v10359_v50  ;;  %5956 = vmatpush.bf16.msrb.mxu0 %v10103_v51  ;;  %v9851_v47 = vor.u32 %v11648_v46, %v9848_v14  ;;  %v11640_v8 = vld [vmem:[#allocation10 + $0x284] sm:$0xf]  ;;  %v10006_v51 = vld [vmem:[#allocation10 + $0x400] sm:$0xf] }
 0x418   :  { %v9819_v50 = vor.u32 %v11640_v8, %v9816_v49  ;;  %v10007_v56 = vor.u32 %v11692_v52, %v10006_v51  ;;  %v11744_v0 = vld [vmem:[#allocation10 + $0x5c4] sm:$0xf]  ;;  %v3933_v51 = vperm.slane %v12506_v24, 1 }
 0x419   :  { %v10235_v3 = vor.u32 %v11744_v0, %v10232_v2  ;;  %v9560_v61 = vld [vmem:[#allocation10 + $0xa0] sm:$0xf0]  ;;  %v11685_v2 = vld [vmem:[#allocation10 + $0x3e4] sm:$0xf0] }
 0x41a   :  { %5944 = vmatpush.bf16.msrb.mxu3 %v9815_v62  ;;  %5931 = vmatpush.bf16.msrb.mxu2 %v9559_v42  ;;  %v11584_v62 = vld [vmem:[#allocation10 + $0xc4] sm:$0xf] }
 0x41b   :  { %5970 = vmatpush.bf16.msrb.mxu1 %v10327_v5  ;;  %5957 = vmatpush.bf16.msrb.mxu0 %v10071_v7  ;;  %v9595_v42 = vor.u32 %v11584_v62, %v9592_v63  ;;  %v11632_v5 = vld [vmem:[#allocation10 + $0x244] sm:$0xf]  ;;  %v3932_v63 = vperm.slane %v12506_v24, 0 }
 0x41c   :  { %v11792_v7 = vld [vmem:[#allocation10 + $0x744] sm:$0xf]  ;;  %v9787_v9 = vor.u32 %v11632_v5, %v9784_v6 }
 0x41d   :  { %v10427_v59 = vor.u32 %v11792_v7, %v10424_v10  ;;  %v11736_v11 = vld [vmem:[#allocation10 + $0x584] sm:$0xf] }
 0x41e   :  { %5945 = vmatpush.bf16.msrb.mxu3 %v9783_v58  ;;  %5932 = vmatpush.bf16.msrb.mxu2 %v9527_v12  ;;  %v11576_v58 = vld [vmem:[#allocation10 + $0x84] sm:$0xf]  ;;  %v10203_v15 = vor.u32 %v11736_v11, %v10200_v13  ;;  %v9726_v13 = vld [vmem:[#allocation10 + $0x1c8] sm:$0xf] }
 0x41f   :  { %5971 = vmatpush.bf16.msrb.mxu1 %v10295_v21  ;;  %5958 = vmatpush.bf16.msrb.mxu0 %v10039_v16  ;;  %v9563_v12 = vor.u32 %v11576_v58, %v9560_v61  ;;  %v9752_v21 = vld [vmem:[#allocation10 + $0x220] sm:$0xf0]  ;;  %v11677_v58 = vld [vmem:[#allocation10 + $0x3a4] sm:$0xf0] }
 0x420   :  { %v9755_v16 = vor.u32 %v11624_v48, %v9752_v21  ;;  %v10392_v20 = vld [vmem:[#allocation10 + $0x720] sm:$0xf0] }
 0x421   :  { %v10395_v22 = vor.u32 %v11784_v18, %v10392_v20  ;;  %v11568_v23 = vld [vmem:[#allocation10 + $0x44] sm:$0xf]  ;;  %v9918_v18 = vld [vmem:[#allocation10 + $0x348] sm:$0xf] }
 0x422   :  { %5946 = vmatpush.bf16.msrb.mxu3 %v9751_v26  ;;  %5933 = vmatpush.bf16.msrb.mxu2 %v9495_v40  ;;  %v9528_v45 = vld [vmem:[#allocation10 + $0x60] sm:$0xf0]  ;;  %v11669_v20 = vld [vmem:[#allocation10 + $0x364] sm:$0xf0] }
 0x423   :  { %5972 = vmatpush.bf16.msrb.mxu1 %v10263_v4  ;;  %5959 = vmatpush.bf16.msrb.mxu0 %v10007_v56  ;;  %v11728_v26 = vld [vmem:[#allocation10 + $0x544] sm:$0xf]  ;;  %v9531_v40 = vor.u32 %v11568_v23, %v9528_v45  ;;  %v9694_v23 = vld [vmem:[#allocation10 + $0x188] sm:$0xf] }
 0x424   :  { %v10168_v25 = vld [vmem:[#allocation10 + $0x560] sm:$0xf0]  ;;  %v11613_v45 = vld [vmem:[#allocation10 + $0x1a4] sm:$0xf0] }
 0x425   :  { %v10171_v27 = vor.u32 %v11728_v26, %v10168_v25  ;;  %v10360_v1 = vld [vmem:[#allocation10 + $0x6e0] sm:$0xf0]  ;;  %v3935_v25 = vperm.slane %v12506_v24, 3 }
 0x426   :  { %5991 = vmatpush.bf16.msra.mxu3 %v9979_v28  ;;  %5978 = vmatpush.bf16.msra.mxu2 %v9723_v29  ;;  %v11776_v28 = vld [vmem:[#allocation10 + $0x6c4] sm:$0xf] }
 0x427   :  { %6017 = vmatpush.bf16.msra.mxu1 %v10491_v17  ;;  %6004 = vmatpush.bf16.msra.mxu0 %v10235_v3  ;;  %v10363_v29 = vor.u32 %v11776_v28, %v10360_v1  ;;  %v11560_v30 = vld [vmem:[#allocation10 + $0x4] sm:$0xf]  ;;  %v9695_v28 = vor.u32 %v11613_v45, %v9694_v23  ;;  %v9886_v1 = vld [vmem:[#allocation10 + $0x308] sm:$0xf] }
 0x428   :  { %v9496_v32 = vld [vmem:[#allocation10 + $0x20] sm:$0xf0]  ;;  %v11629_v23 = vld [vmem:[#allocation10 + $0x224] sm:$0xf0] }
 0x429   :  { %v11720_v34 = vld [vmem:[#allocation10 + $0x504] sm:$0xf]  ;;  %v9499_v4 = vor.u32 %v11560_v30, %v9496_v32  ;;  %v10398_v45 = vld [vmem:[#allocation10 + $0x708] sm:$0xf] }
 0x42a   :  { %5992 = vmatpush.bf16.msra.mxu3 %v9947_v35  ;;  %5979 = vmatpush.bf16.msra.mxu2 %v9691_v37  ;;  %v10136_v17 = vld [vmem:[#allocation10 + $0x520] sm:$0xf0] }
 0x42b   :  { %6018 = vmatpush.bf16.msra.mxu1 %v10459_v55  ;;  %6005 = vmatpush.bf16.msra.mxu0 %v10203_v15  ;;  %v10139_v35 = vor.u32 %v11720_v34, %v10136_v17  ;;  %v10328_v37 = vld [vmem:[#allocation10 + $0x6a0] sm:$0xf0]  ;;  %v11621_v15 = vld [vmem:[#allocation10 + $0x1e4] sm:$0xf0] }
 0x42c   :  { %v10331_v38 = vor.u32 %v11768_v36, %v10328_v37  ;;  %v11712_v19 = vld [vmem:[#allocation10 + $0x4c4] sm:$0xf]  ;;  %v9662_v34 = vld [vmem:[#allocation10 + $0x148] sm:$0xf]  ;;  %v3934_v36 = vperm.slane %v12506_v24, 2 }
 0x42d   :  { %v10104_v60 = vld [vmem:[#allocation10 + $0x4e0] sm:$0xf0]  ;;  %v9854_v37 = vld [vmem:[#allocation10 + $0x2c8] sm:$0xf] }
 0x42e   :  { %5993 = vmatpush.bf16.msra.mxu3 %v9915_v39  ;;  %5980 = vmatpush.bf16.msra.mxu2 %v9659_v54  ;;  %v10107_v39 = vor.u32 %v11712_v19, %v10104_v60  ;;  %v10296_v54 = vld [vmem:[#allocation10 + $0x660] sm:$0xf0]  ;;  %v11653_v60 = vld [vmem:[#allocation10 + $0x2e4] sm:$0xf0] }
 0x42f   :  { %6019 = vmatpush.bf16.msra.mxu1 %v10427_v59  ;;  %6006 = vmatpush.bf16.msra.mxu0 %v10171_v27  ;;  %v10299_v41 = vor.u32 %v11760_v57, %v10296_v54  ;;  %v11704_v43 = vld [vmem:[#allocation10 + $0x484] sm:$0xf]  ;;  %v9950_v59 = vld [vmem:[#allocation10 + $0x388] sm:$0xf]  ;;  %v9919_v27 = vor.u32 %v11669_v20, %v9918_v18 }
 0x430   :  { %v10072_v31 = vld [vmem:[#allocation10 + $0x4a0] sm:$0xf0]  ;;  %v9951_v21 = vor.u32 %v11677_v58, %v9950_v59  ;;  %v11813_v57 = vld [vmem:[#allocation10 + $0x7e4] sm:$0xf0] }
 0x431   :  { %v10264_v46 = vld [vmem:[#allocation10 + $0x620] sm:$0xf0]  ;;  %v9630_v54 = vld [vmem:[#allocation10 + $0x108] sm:$0xf] }
 0x432   :  { %5994 = vmatpush.bf16.msra.mxu3 %v9883_v44  ;;  %5981 = vmatpush.bf16.msra.mxu2 %v9627_v53  ;;  %v10075_v44 = vor.u32 %v11704_v43, %v10072_v31  ;;  %v11752_v53 = vld [vmem:[#allocation10 + $0x604] sm:$0xf]  ;;  %v11645_v24 = vld [vmem:[#allocation10 + $0x2a4] sm:$0xf0] }
 0x433   :  { %6020 = vmatpush.bf16.msra.mxu1 %v10395_v22  ;;  %6007 = vmatpush.bf16.msra.mxu0 %v10139_v35  ;;  %v10267_v14 = vor.u32 %v11752_v53, %v10264_v46  ;;  %v10040_v8 = vld [vmem:[#allocation10 + $0x460] sm:$0xf0]  ;;  %v9855_v46 = vor.u32 %v11653_v60, %v9854_v37  ;;  %v9758_v20 = vld [vmem:[#allocation10 + $0x208] sm:$0xf]  ;;  %v9952_v60 = vld [vmem:[#allocation10 + $0x3a8] sm:$0xf0] }
 0x434   :  { %v10008_v33 = vld [vmem:[#allocation10 + $0x420] sm:$0xf0] }
 0x436   :  { %5995 = vmatpush.bf16.msra.mxu3 %v9851_v47  ;;  %5982 = vmatpush.bf16.msra.mxu2 %v9595_v42  ;;  %v11696_v47 = vld [vmem:[#allocation10 + $0x444] sm:$0xf]  ;;  %v9982_v42 = vld [vmem:[#allocation10 + $0x3c8] sm:$0xf] }
 0x437   :  { %6021 = vmatpush.bf16.msra.mxu1 %v10363_v29  ;;  %6008 = vmatpush.bf16.msra.mxu0 %v10107_v39  ;;  %v10043_v49 = vor.u32 %v11696_v47, %v10040_v8  ;;  %v11661_v29 = vld [vmem:[#allocation10 + $0x324] sm:$0xf0] }
 0x438   :  { %v9887_v35 = vor.u32 %v11661_v29, %v9886_v1  ;;  %v10494_v39 = vld [vmem:[#allocation10 + $0x7c8] sm:$0xf] }
 0x439   :  { %v9822_v47 = vld [vmem:[#allocation10 + $0x288] sm:$0xf] }
 0x43a   :  { %5996 = vmatpush.bf16.msra.mxu3 %v9819_v50  ;;  %5983 = vmatpush.bf16.msra.mxu2 %v9563_v12  ;;  %v11688_v50 = vld [vmem:[#allocation10 + $0x404] sm:$0xf]  ;;  %v9534_v1 = vld [vmem:[#allocation10 + $0x48] sm:$0xf] }
 0x43b   :  { %6022 = vmatpush.bf16.msra.mxu1 %v10331_v38  ;;  %6009 = vmatpush.bf16.msra.mxu0 %v10075_v44  ;;  %v10011_v52 = vor.u32 %v11688_v50, %v10008_v33  ;;  %v10462_v50 = vld [vmem:[#allocation10 + $0x788] sm:$0xf] }
 0x43c   :  { %v11805_v33 = vld [vmem:[#allocation10 + $0x7a4] sm:$0xf0] }
 0x43d   :  { %v11573_v29 = vld [vmem:[#allocation10 + $0x64] sm:$0xf0] }
 0x43e   :  { %5997 = vmatpush.bf16.msra.mxu3 %v9787_v9  ;;  %5984 = vmatpush.bf16.msra.mxu2 %v9531_v40  ;;  %v9983_v9 = vor.u32 %v11685_v2, %v9982_v42  ;;  %v9823_v2 = vor.u32 %v11645_v24, %v9822_v47  ;;  %v9535_v37 = vor.u32 %v11573_v29, %v9534_v1  ;;  %v11665_v24 = vld [vmem:[#allocation10 + $0x34c] sm:$0xf] }
 0x43f   :  { %6023 = vmatpush.bf16.msra.mxu1 %v10299_v41  ;;  %6010 = vmatpush.bf16.msra.mxu0 %v10043_v49  ;;  %v11597_v41 = vld [vmem:[#allocation10 + $0x124] sm:$0xf0]  ;;  %v11641_v29 = vld [vmem:[#allocation10 + $0x28c] sm:$0xf] }
 0x440   :  { %v9631_v49 = vor.u32 %v11597_v41, %v9630_v54  ;;  %v10142_v54 = vld [vmem:[#allocation10 + $0x508] sm:$0xf] }
 0x441   :  { %v11725_v41 = vld [vmem:[#allocation10 + $0x524] sm:$0xf0] }
 0x442   :  { %5998 = vmatpush.bf16.msra.mxu3 %v9755_v16  ;;  %5985 = vmatpush.bf16.msra.mxu2 %v9499_v4  ;;  %v9727_v16 = vor.u32 %v11621_v15, %v9726_v13  ;;  %v11605_v4 = vld [vmem:[#allocation10 + $0x164] sm:$0xf0] }
 0x443   :  { %6024 = vmatpush.bf16.msra.mxu1 %v10267_v14  ;;  %6011 = vmatpush.bf16.msra.mxu0 %v10011_v52  ;;  %v9663_v19 = vor.u32 %v11605_v4, %v9662_v34  ;;  %v10495_v14 = vor.u32 %v11813_v57, %v10494_v39  ;;  %v11581_v15 = vld [vmem:[#allocation10 + $0xa4] sm:$0xf0]  ;;  %v9759_v34 = vor.u32 %v11629_v23, %v9758_v20  ;;  %v10496_v20 = vld [vmem:[#allocation10 + $0x7e8] sm:$0xf0] }
 0x444   :  { %v9502_v39 = vld [vmem:[#allocation10 + $0x8] sm:$0xf] }
 0x445   :  { %v11565_v57 = vld [vmem:[#allocation10 + $0x24] sm:$0xf0] }
 0x446   :  { %v9503_v47 = vor.u32 %v11565_v57, %v9502_v39 }
 0x482   :  { %v4295_v55 = vpop.f32.mrf.mxu0  ;;  %v4308_v56 = vpop.f32.mrf.mxu1 }
 0x483   :  { %v4296_v62 = vadd.f32 %v4295_v55, %v3933_v51 }
 0x485   :  { %v4309_v0 = vadd.f32 %v4308_v56, %v4296_v62  ;;  %v9598_v56 = vld [vmem:[#allocation10 + $0xc8] sm:$0xf] }
 0x486   :  { %v11589_v62 = vld [vmem:[#allocation10 + $0xe4] sm:$0xf0] }
 0x487   :  { %v4365_v3 = vmax.f32 %v4309_v0, 0.0  ;;  %v4269_v5 = vpop.f32.mrf.mxu2  ;;  %v4282_v6 = vpop.f32.mrf.mxu3  ;;  %v11749_v0 = vld [vmem:[#allocation10 + $0x5e4] sm:$0xf0]  ;;  %v9599_v58 = vor.u32 %v11589_v62, %v9598_v56  ;;  %v11609_v56 = vld [vmem:[#allocation10 + $0x18c] sm:$0xf] }
 0x488   :  { %v4270_v7 = vadd.f32 %v4269_v5, %v3932_v63  ;;  %v10238_v63 = vld [vmem:[#allocation10 + $0x5c8] sm:$0xf]  ;;  %v9696_v62 = vld [vmem:[#allocation10 + $0x1a8] sm:$0xf0] }
 0x489   :  { %v12510_v10 = vpack.c.bf16 %v4365_v3, %v4365_v3  ;;  %v10463_v3 = vor.u32 %v11805_v33, %v10462_v50  ;;  %v9790_v5 = vld [vmem:[#allocation10 + $0x248] sm:$0xf]  ;;  %v9920_v50 = vld [vmem:[#allocation10 + $0x368] sm:$0xf0] }
 0x48a   :  { %v4283_v61 = vadd.f32 %v4282_v6, %v4270_v7  ;;  %v4297_v11 = vpop.f32.mrf.mxu0  ;;  %v4310_v12 = vpop.f32.mrf.mxu1  ;;  %v11637_v6 = vld [vmem:[#allocation10 + $0x264] sm:$0xf0] }
 0x48b   :  { %5947 = vmatmul.bf16.vlgmr.msrb.gmra.mxu3 %v12510_v10  ;;  %v10430_v7 = vld [vmem:[#allocation10 + $0x748] sm:$0xf] }
 0x48c   :  { %v4364_v48 = vmax.f32 %v4283_v61, 0.0  ;;  %6043 = vmatpush.bf16.msrb.mxu3 %v9983_v9  ;;  %v11797_v9 = vld [vmem:[#allocation10 + $0x764] sm:$0xf0]  ;;  %v10239_v61 = vor.u32 %v11749_v0, %v10238_v63  ;;  %v9923_v63 = vor.u32 %v11665_v24, %v9920_v50  ;;  %v10208_v24 = vld [vmem:[#allocation10 + $0x5a8] sm:$0xf0] }
 0x48d   :  { %v9566_v11 = vld [vmem:[#allocation10 + $0x88] sm:$0xf]  ;;  %v10431_v18 = vor.u32 %v11797_v9, %v10430_v7 }
 0x48e   :  { %v12513_v22 = vpack.c.bf16 %v4364_v48, %v4364_v48  ;;  %v10206_v48 = vld [vmem:[#allocation10 + $0x588] sm:$0xf] }
 0x48f   :  { %v4271_v26 = vpop.f32.mrf.mxu2  ;;  %v4284_v40 = vpop.f32.mrf.mxu3  ;;  %v10302_v0 = vld [vmem:[#allocation10 + $0x648] sm:$0xf] }
 0x490   :  { %6044 = vmatpush.bf16.msrb.mxu3 %v9951_v21  ;;  %5934 = vmatmul.bf16.vlgmr.msrb.gmra.mxu2 %v12513_v22  ;;  %v11741_v21 = vld [vmem:[#allocation10 + $0x5a4] sm:$0xf0]  ;;  %v9567_v40 = vor.u32 %v11581_v15, %v9566_v11  ;;  %v9664_v11 = vld [vmem:[#allocation10 + $0x168] sm:$0xf0] }
 0x491   :  { %6030 = vmatpush.bf16.msrb.mxu2 %v9727_v16  ;;  %v9791_v16 = vor.u32 %v11637_v6, %v9790_v5  ;;  %v11789_v26 = vld [vmem:[#allocation10 + $0x724] sm:$0xf0]  ;;  %v9888_v5 = vld [vmem:[#allocation10 + $0x328] sm:$0xf0]  ;;  %v9699_v6 = vor.u32 %v11609_v56, %v9696_v62 }
 0x492   :  { %v4347_v30 = vpop.f32.mrf.mxu0  ;;  %v4360_v32 = vpop.f32.mrf.mxu1  ;;  %v10399_v4 = vor.u32 %v11789_v26, %v10398_v45  ;;  %v10078_v7 = vld [vmem:[#allocation10 + $0x488] sm:$0xf]  ;;  %v10400_v56 = vld [vmem:[#allocation10 + $0x728] sm:$0xf0] }
 0x493   :  { %v4348_v17 = vadd.f32 %v4347_v30, %v3935_v25  ;;  %v10207_v25 = vor.u32 %v11741_v21, %v10206_v48  ;;  %v10174_v30 = vld [vmem:[#allocation10 + $0x548] sm:$0xf]  ;;  %v11649_v48 = vld [vmem:[#allocation10 + $0x2cc] sm:$0xf] }
 0x494   :  { %6045 = vmatpush.bf16.msrb.mxu3 %v9919_v27  ;;  %v11681_v27 = vld [vmem:[#allocation10 + $0x3cc] sm:$0xf]  ;;  %v11709_v9 = vld [vmem:[#allocation10 + $0x4a4] sm:$0xf0] }
 0x495   :  { %v4361_v38 = vadd.f32 %v4360_v32, %v4348_v17  ;;  %6031 = vmatpush.bf16.msrb.mxu2 %v9695_v28  ;;  %v9984_v28 = vld [vmem:[#allocation10 + $0x3e8] sm:$0xf0]  ;;  %v11733_v32 = vld [vmem:[#allocation10 + $0x564] sm:$0xf0]  ;;  %v10079_v21 = vor.u32 %v11709_v9, %v10078_v7 }
 0x496   :  { %v9987_v17 = vor.u32 %v11681_v27, %v9984_v28  ;;  %v11757_v15 = vld [vmem:[#allocation10 + $0x624] sm:$0xf0]  ;;  %v9632_v27 = vld [vmem:[#allocation10 + $0x128] sm:$0xf0] }
 0x497   :  { %v4367_v43 = vmax.f32 %v4361_v38, 0.0  ;;  %v4321_v31 = vpop.f32.mrf.mxu2  ;;  %v4334_v44 = vpop.f32.mrf.mxu3  ;;  %v10175_v38 = vor.u32 %v11733_v32, %v10174_v30  ;;  %v10046_v45 = vld [vmem:[#allocation10 + $0x448] sm:$0xf]  ;;  %v9824_v32 = vld [vmem:[#allocation10 + $0x2a8] sm:$0xf0] }
 0x498   :  { %6046 = vmatpush.bf16.msrb.mxu3 %v9887_v35  ;;  %v4322_v53 = vadd.f32 %v4321_v31, %v3934_v36  ;;  %v10366_v35 = vld [vmem:[#allocation10 + $0x6c8] sm:$0xf]  ;;  %v11617_v31 = vld [vmem:[#allocation10 + $0x1cc] sm:$0xf]  ;;  %v9827_v39 = vor.u32 %v11641_v29, %v9824_v32  ;;  %v9926_v29 = vld [vmem:[#allocation10 + $0x350] sm:$0xf] }
 0x499   :  { %v12518_v8 = vpack.c.bf16 %v4367_v43, %v4367_v43  ;;  %6032 = vmatpush.bf16.msrb.mxu2 %v9663_v19  ;;  %v11781_v36 = vld [vmem:[#allocation10 + $0x6e4] sm:$0xf0]  ;;  %v11673_v19 = vld [vmem:[#allocation10 + $0x38c] sm:$0xf] }
 0x49a   :  { %v4335_v51 = vadd.f32 %v4334_v44, %v4322_v53  ;;  %v4349_v52 = vpop.f32.mrf.mxu0  ;;  %v4362_v55 = vpop.f32.mrf.mxu1  ;;  %v10367_v43 = vor.u32 %v11781_v36, %v10366_v35  ;;  %v9728_v44 = vld [vmem:[#allocation10 + $0x1e8] sm:$0xf0]  ;;  %v9955_v53 = vor.u32 %v11673_v19, %v9952_v60  ;;  %v11701_v26 = vld [vmem:[#allocation10 + $0x464] sm:$0xf0] }
 0x49b   :  { %5973 = vmatmul.bf16.vlgmr.msrb.gmra.mxu1 %v12518_v8  ;;  %5999 = vmatmul.bf16.vlgmr.msra.gmra.mxu3 %v12510_v10  ;;  %v9731_v33 = vor.u32 %v11617_v31, %v9728_v44  ;;  %v11717_v52 = vld [vmem:[#allocation10 + $0x4e4] sm:$0xf0]  ;;  %v10047_v30 = vor.u32 %v11701_v26, %v10046_v45  ;;  %v11745_v19 = vld [vmem:[#allocation10 + $0x5cc] sm:$0xf]  ;;  %v9734_v45 = vld [vmem:[#allocation10 + $0x1d0] sm:$0xf] }
 0x49c   :  { %v4366_v42 = vmax.f32 %v4335_v51, 0.0  ;;  %6047 = vmatpush.bf16.msrb.mxu3 %v9855_v46  ;;  %6069 = vmatpush.bf16.msrb.mxu1 %v10495_v14  ;;  %v10334_v46 = vld [vmem:[#allocation10 + $0x688] sm:$0xf]  ;;  %v10240_v60 = vld [vmem:[#allocation10 + $0x5e8] sm:$0xf0] }
 0x49d   :  { %6033 = vmatpush.bf16.msrb.mxu2 %v9631_v49  ;;  %v11773_v14 = vld [vmem:[#allocation10 + $0x6a4] sm:$0xf0]  ;;  %v10143_v49 = vor.u32 %v11725_v41, %v10142_v54  ;;  %v11633_v54 = vld [vmem:[#allocation10 + $0x24c] sm:$0xf]  ;;  %v11622_v26 = vld [vmem:[#allocation10 + $0x1ec] sm:$0xf0] }
 0x49e   :  { %v12522_v59 = vpack.c.bf16 %v4366_v42, %v4366_v42  ;;  %v10110_v51 = vld [vmem:[#allocation10 + $0x4c8] sm:$0xf]  ;;  %v10335_v55 = vor.u32 %v11773_v14, %v10334_v46  ;;  %v11793_v31 = vld [vmem:[#allocation10 + $0x74c] sm:$0xf]  ;;  %v10243_v46 = vor.u32 %v11745_v19, %v10240_v60  ;;  %v9735_v32 = vor.u32 %v11622_v26, %v9734_v45 }
 0x49f   :  { %v4323_v12 = vpop.f32.mrf.mxu2  ;;  %v4336_v13 = vpop.f32.mrf.mxu3  ;;  %v11765_v42 = vld [vmem:[#allocation10 + $0x664] sm:$0xf0]  ;;  %v10432_v44 = vld [vmem:[#allocation10 + $0x768] sm:$0xf0] }
 0x4a0   :  { %6048 = vmatpush.bf16.msrb.mxu3 %v9823_v2  ;;  %6070 = vmatpush.bf16.msrb.mxu1 %v10463_v3  ;;  %v10111_v2 = vor.u32 %v11717_v52, %v10110_v51  ;;  %v11657_v3 = vld [vmem:[#allocation10 + $0x30c] sm:$0xf]  ;;  %v10270_v13 = vld [vmem:[#allocation10 + $0x608] sm:$0xf] }
 0x4a1   :  { %5960 = vmatmul.bf16.vlgmr.msrb.gmra.mxu0 %v12522_v59  ;;  %5986 = vmatmul.bf16.vlgmr.msra.gmra.mxu2 %v12513_v22  ;;  %v9891_v12 = vor.u32 %v11657_v3, %v9888_v5  ;;  %v10014_v35 = vld [vmem:[#allocation10 + $0x408] sm:$0xf]  ;;  %v11577_v14 = vld [vmem:[#allocation10 + $0x8c] sm:$0xf] }
 0x4a2   :  { %6034 = vmatpush.bf16.msrb.mxu2 %v9599_v58  ;;  %6056 = vmatpush.bf16.msrb.mxu0 %v10239_v61  ;;  %v10303_v58 = vor.u32 %v11765_v42, %v10302_v0  ;;  %v11601_v61 = vld [vmem:[#allocation10 + $0x14c] sm:$0xf]  ;;  %v11693_v36 = vld [vmem:[#allocation10 + $0x424] sm:$0xf0]  ;;  %v9990_v0 = vld [vmem:[#allocation10 + $0x3d0] sm:$0xf] }
 0x4a3   :  { %v9667_v23 = vor.u32 %v11601_v61, %v9664_v11  ;;  %v10015_v41 = vor.u32 %v11693_v36, %v10014_v35  ;;  %v11625_v51 = vld [vmem:[#allocation10 + $0x20c] sm:$0xf]  ;;  %v11686_v42 = vld [vmem:[#allocation10 + $0x3ec] sm:$0xf0] }
 0x4a4   :  { %6049 = vmatpush.bf16.msrb.mxu3 %v9791_v16  ;;  %6071 = vmatpush.bf16.msrb.mxu1 %v10431_v18  ;;  %v9856_v16 = vld [vmem:[#allocation10 + $0x2e8] sm:$0xf0]  ;;  %v9702_v35 = vld [vmem:[#allocation10 + $0x190] sm:$0xf] }
 0x4a5   :  { %v11809_v18 = vld [vmem:[#allocation10 + $0x7cc] sm:$0xf]  ;;  %v9859_v28 = vor.u32 %v11649_v48, %v9856_v16  ;;  %v11678_v48 = vld [vmem:[#allocation10 + $0x3ac] sm:$0xf0] }
 0x4a6   :  { %6035 = vmatpush.bf16.msrb.mxu2 %v9567_v40  ;;  %6057 = vmatpush.bf16.msrb.mxu0 %v10207_v25  ;;  %v10271_v40 = vor.u32 %v11757_v15, %v10270_v13  ;;  %v11593_v25 = vld [vmem:[#allocation10 + $0x10c] sm:$0xf]  ;;  %v10499_v1 = vor.u32 %v11809_v18, %v10496_v20  ;;  %v9958_v15 = vld [vmem:[#allocation10 + $0x390] sm:$0xf] }
 0x4a7   :  { %v9760_v52 = vld [vmem:[#allocation10 + $0x228] sm:$0xf0]  ;;  %v11614_v36 = vld [vmem:[#allocation10 + $0x1ac] sm:$0xf0] }
 0x4a8   :  { %6050 = vmatpush.bf16.msrb.mxu3 %v9759_v34  ;;  %6072 = vmatpush.bf16.msrb.mxu1 %v10399_v4  ;;  %v11801_v34 = vld [vmem:[#allocation10 + $0x78c] sm:$0xf]  ;;  %v9763_v7 = vor.u32 %v11625_v51, %v9760_v52  ;;  %v11814_v51 = vld [vmem:[#allocation10 + $0x7ec] sm:$0xf0] }
 0x4a9   :  { %v10464_v4 = vld [vmem:[#allocation10 + $0x7a8] sm:$0xf0] }
 0x4aa   :  { %6036 = vmatpush.bf16.msrb.mxu2 %v9535_v37  ;;  %6058 = vmatpush.bf16.msrb.mxu0 %v10175_v38  ;;  %v11585_v37 = vld [vmem:[#allocation10 + $0xcc] sm:$0xf]  ;;  %v10467_v57 = vor.u32 %v11801_v34, %v10464_v4 }
 0x4ab   :  { %6025 = vmatmul.bf16.vlgmr.msra.gmra.mxu1 %v12518_v8  ;;  %6051 = vmatmul.bf16.vlgmr.msrb.gmra.mxu3 %v12510_v10  ;;  %v9600_v38 = vld [vmem:[#allocation10 + $0xe8] sm:$0xf0] }
 0x4ac   :  { %6095 = vmatpush.bf16.msra.mxu3 %v9987_v17  ;;  %6073 = vmatpush.bf16.msrb.mxu1 %v10367_v43  ;;  %v9635_v17 = vor.u32 %v11593_v25, %v9632_v27  ;;  %v9792_v43 = vld [vmem:[#allocation10 + $0x268] sm:$0xf0] }
 0x4ad   :  { %v9795_v50 = vor.u32 %v11633_v54, %v9792_v43  ;;  %v9536_v3 = vld [vmem:[#allocation10 + $0x68] sm:$0xf0]  ;;  %v9703_v54 = vor.u32 %v11614_v36, %v9702_v35  ;;  %v11790_v35 = vld [vmem:[#allocation10 + $0x72c] sm:$0xf0] }
 0x4ae   :  { %6037 = vmatpush.bf16.msrb.mxu2 %v9503_v47  ;;  %6059 = vmatpush.bf16.msrb.mxu0 %v10143_v49  ;;  %v9568_v47 = vld [vmem:[#allocation10 + $0xa8] sm:$0xf0] }
 0x4af   :  { %v11737_v49 = vld [vmem:[#allocation10 + $0x58c] sm:$0xf]  ;;  %v9571_v62 = vor.u32 %v11577_v14, %v9568_v47 }
 0x4b0   :  { %6096 = vmatpush.bf16.msra.mxu3 %v9955_v53  ;;  %6074 = vmatpush.bf16.msrb.mxu1 %v10335_v55  ;;  %v9603_v53 = vor.u32 %v11585_v37, %v9600_v38  ;;  %v11785_v55 = vld [vmem:[#allocation10 + $0x70c] sm:$0xf] }
 0x4b1   :  { %6012 = vmatmul.bf16.vlgmr.msra.gmra.mxu0 %v12522_v59  ;;  %6038 = vmatmul.bf16.vlgmr.msrb.gmra.mxu2 %v12513_v22  ;;  %v11729_v5 = vld [vmem:[#allocation10 + $0x54c] sm:$0xf]  ;;  %v10403_v9 = vor.u32 %v11785_v55, %v10400_v56 }
 0x4b2   :  { %6082 = vmatpush.bf16.msra.mxu2 %v9731_v33  ;;  %6060 = vmatpush.bf16.msrb.mxu0 %v10111_v2  ;;  %v10435_v33 = vor.u32 %v11793_v31, %v10432_v44  ;;  %v11569_v2 = vld [vmem:[#allocation10 + $0x4c] sm:$0xf]  ;;  %v9670_v44 = vld [vmem:[#allocation10 + $0x150] sm:$0xf] }
 0x4b3   :  { %v11777_v61 = vld [vmem:[#allocation10 + $0x6cc] sm:$0xf] }
 0x4b4   :  { %6097 = vmatpush.bf16.msra.mxu3 %v9923_v63  ;;  %6075 = vmatpush.bf16.msrb.mxu1 %v10303_v58  ;;  %v10211_v63 = vor.u32 %v11737_v49, %v10208_v24  ;;  %v9991_v58 = vor.u32 %v11686_v42, %v9990_v0  ;;  %v10368_v11 = vld [vmem:[#allocation10 + $0x6e8] sm:$0xf0]  ;;  %v9862_v49 = vld [vmem:[#allocation10 + $0x2d0] sm:$0xf] }
 0x4b5   :  { %v9504_v16 = vld [vmem:[#allocation10 + $0x28] sm:$0xf0]  ;;  %v11598_v0 = vld [vmem:[#allocation10 + $0x12c] sm:$0xf0] }
 0x4b6   :  { %6083 = vmatpush.bf16.msra.mxu2 %v9699_v6  ;;  %6061 = vmatpush.bf16.msrb.mxu0 %v10079_v21  ;;  %v10176_v6 = vld [vmem:[#allocation10 + $0x568] sm:$0xf0] }
 0x4b7   :  { %v10179_v13 = vor.u32 %v11729_v5, %v10176_v6  ;;  %v11561_v21 = vld [vmem:[#allocation10 + $0xc] sm:$0xf]  ;;  %v11646_v6 = vld [vmem:[#allocation10 + $0x2ac] sm:$0xf0] }
 0x4b8   :  { %6098 = vmatpush.bf16.msra.mxu3 %v9891_v12  ;;  %6076 = vmatpush.bf16.msrb.mxu1 %v10271_v40  ;;  %v9539_v12 = vor.u32 %v11569_v2, %v9536_v3  ;;  %v11721_v18 = vld [vmem:[#allocation10 + $0x50c] sm:$0xf]  ;;  %v9959_v40 = vor.u32 %v11678_v48, %v9958_v15  ;;  %v9830_v3 = vld [vmem:[#allocation10 + $0x290] sm:$0xf] }
 0x4b9   :  { %v10144_v20 = vld [vmem:[#allocation10 + $0x528] sm:$0xf0]  ;;  %v10246_v15 = vld [vmem:[#allocation10 + $0x5d0] sm:$0xf] }
 0x4ba   :  { %6084 = vmatpush.bf16.msra.mxu2 %v9667_v23  ;;  %6062 = vmatpush.bf16.msrb.mxu0 %v10047_v30  ;;  %v10371_v23 = vor.u32 %v11777_v61, %v10368_v11  ;;  %v11769_v25 = vld [vmem:[#allocation10 + $0x68c] sm:$0xf]  ;;  %v11670_v30 = vld [vmem:[#allocation10 + $0x36c] sm:$0xf0] }
 0x4bb   :  { %6077 = vmatmul.bf16.vlgmr.msrb.gmra.mxu1 %v12518_v8  ;;  %v10336_v27 = vld [vmem:[#allocation10 + $0x6a8] sm:$0xf0]  ;;  %v9927_v37 = vor.u32 %v11670_v30, %v9926_v29  ;;  %v11750_v48 = vld [vmem:[#allocation10 + $0x5ec] sm:$0xf0] }
 0x4bc   :  { %6099 = vmatpush.bf16.msra.mxu3 %v9859_v28  ;;  %6121 = vmatpush.bf16.msra.mxu1 %v10499_v1  ;;  %v9507_v28 = vor.u32 %v11561_v21, %v9504_v16  ;;  %v10147_v1 = vor.u32 %v11721_v18, %v10144_v20  ;;  %v11713_v34 = vld [vmem:[#allocation10 + $0x4cc] sm:$0xf]  ;;  %v9831_v21 = vor.u32 %v11646_v6, %v9830_v3  ;;  %v9798_v20 = vld [vmem:[#allocation10 + $0x250] sm:$0xf]  ;;  %v11666_v3 = vld [vmem:[#allocation10 + $0x354] sm:$0xf] }
 0x4bd   :  { %v10112_v4 = vld [vmem:[#allocation10 + $0x4e8] sm:$0xf0]  ;;  %v10247_v26 = vor.u32 %v11750_v48, %v10246_v15  ;;  %v11742_v29 = vld [vmem:[#allocation10 + $0x5ac] sm:$0xf0]  ;;  %v9928_v6 = vld [vmem:[#allocation10 + $0x370] sm:$0xf0] }
 0x4be   :  { %6085 = vmatpush.bf16.msra.mxu2 %v9635_v17  ;;  %6063 = vmatpush.bf16.msrb.mxu0 %v10015_v41  ;;  %v10339_v17 = vor.u32 %v11769_v25, %v10336_v27  ;;  %v11761_v38 = vld [vmem:[#allocation10 + $0x64c] sm:$0xf]  ;;  %v10115_v60 = vor.u32 %v11713_v34, %v10112_v4  ;;  %v11798_v25 = vld [vmem:[#allocation10 + $0x76c] sm:$0xf0] }
 0x4bf   :  { %v10304_v19 = vld [vmem:[#allocation10 + $0x668] sm:$0xf0]  ;;  %v9574_v27 = vld [vmem:[#allocation10 + $0x90] sm:$0xf] }
 0x4c0   :  { %6100 = vmatpush.bf16.msra.mxu3 %v9827_v39  ;;  %6122 = vmatpush.bf16.msra.mxu1 %v10467_v57  ;;  %v9894_v39 = vld [vmem:[#allocation10 + $0x310] sm:$0xf]  ;;  %v11705_v41 = vld [vmem:[#allocation10 + $0x48c] sm:$0xf]  ;;  %v10307_v31 = vor.u32 %v11761_v38, %v10304_v19  ;;  %v11682_v38 = vld [vmem:[#allocation10 + $0x3d4] sm:$0xf] }
 0x4c1   :  { %6064 = vmatmul.bf16.vlgmr.msrb.gmra.mxu0 %v12522_v59  ;;  %v11662_v57 = vld [vmem:[#allocation10 + $0x32c] sm:$0xf0]  ;;  %v10080_v43 = vld [vmem:[#allocation10 + $0x4a8] sm:$0xf0]  ;;  %v9992_v19 = vld [vmem:[#allocation10 + $0x3f0] sm:$0xf0] }
 0x4c2   :  { %6086 = vmatpush.bf16.msra.mxu2 %v9603_v53  ;;  %6108 = vmatpush.bf16.msra.mxu0 %v10243_v46  ;;  %v11606_v53 = vld [vmem:[#allocation10 + $0x16c] sm:$0xf0]  ;;  %v9895_v46 = vor.u32 %v11662_v57, %v9894_v39  ;;  %v11753_v14 = vld [vmem:[#allocation10 + $0x60c] sm:$0xf]  ;;  %v10083_v24 = vor.u32 %v11705_v41, %v10080_v43 }
 0x4c3   :  { %v10272_v47 = vld [vmem:[#allocation10 + $0x628] sm:$0xf0]  ;;  %v9671_v52 = vor.u32 %v11606_v53, %v9670_v44  ;;  %v11630_v4 = vld [vmem:[#allocation10 + $0x22c] sm:$0xf0] }
 0x4c4   :  { %6101 = vmatpush.bf16.msra.mxu3 %v9795_v50  ;;  %6123 = vmatpush.bf16.msra.mxu1 %v10435_v33  ;;  %v11654_v50 = vld [vmem:[#allocation10 + $0x2ec] sm:$0xf0]  ;;  %v11697_v55 = vld [vmem:[#allocation10 + $0x44c] sm:$0xf] }
 0x4c5   :  { %v10502_v33 = vld [vmem:[#allocation10 + $0x7d0] sm:$0xf]  ;;  %v10048_v56 = vld [vmem:[#allocation10 + $0x468] sm:$0xf0]  ;;  %v9863_v42 = vor.u32 %v11654_v50, %v9862_v49  ;;  %v9960_v49 = vld [vmem:[#allocation10 + $0x3b0] sm:$0xf0] }
 0x4c6   :  { %6087 = vmatpush.bf16.msra.mxu2 %v9571_v62  ;;  %6109 = vmatpush.bf16.msra.mxu0 %v10211_v63  ;;  %v10275_v62 = vor.u32 %v11753_v14, %v10272_v47  ;;  %v9638_v63 = vld [vmem:[#allocation10 + $0x110] sm:$0xf]  ;;  %v10503_v2 = vor.u32 %v11814_v51, %v10502_v33  ;;  %v10051_v5 = vor.u32 %v11697_v55, %v10048_v56  ;;  %v11689_v61 = vld [vmem:[#allocation10 + $0x40c] sm:$0xf]  ;;  %v11674_v47 = vld [vmem:[#allocation10 + $0x394] sm:$0xf] }
 0x4c7   :  { %v10016_v11 = vld [vmem:[#allocation10 + $0x428] sm:$0xf0]  ;;  %v11574_v39 = vld [vmem:[#allocation10 + $0x6c] sm:$0xf0]  ;;  %v9736_v55 = vld [vmem:[#allocation10 + $0x1f0] sm:$0xf0] }
 0x4c8   :  { %6102 = vmatpush.bf16.msra.mxu3 %v9763_v7  ;;  %6124 = vmatpush.bf16.msra.mxu1 %v10403_v9  ;;  %v10470_v7 = vld [vmem:[#allocation10 + $0x790] sm:$0xf]  ;;  %v10019_v18 = vor.u32 %v11689_v61, %v10016_v11  ;;  %v9704_v61 = vld [vmem:[#allocation10 + $0x1b0] sm:$0xf0] }
 0x4c9   :  { %v11806_v9 = vld [vmem:[#allocation10 + $0x7ac] sm:$0xf0] }
 0x4ca   :  { %6088 = vmatpush.bf16.msra.mxu2 %v9539_v12  ;;  %6110 = vmatpush.bf16.msra.mxu0 %v10179_v13  ;;  %v9606_v12 = vld [vmem:[#allocation10 + $0xd0] sm:$0xf]  ;;  %v10471_v16 = vor.u32 %v11806_v9, %v10470_v7 }
 0x4cb   :  { %6103 = vmatmul.bf16.vlgmr.msra.gmra.mxu3 %v12510_v10  ;;  %v11590_v13 = vld [vmem:[#allocation10 + $0xec] sm:$0xf0] }
 0x4cc   :  { %6147 = vmatpush.bf16.msrb.mxu3 %v9991_v58  ;;  %6125 = vmatpush.bf16.msra.mxu1 %v10371_v23  ;;  %v9639_v58 = vor.u32 %v11598_v0, %v9638_v63  ;;  %v11638_v23 = vld [vmem:[#allocation10 + $0x26c] sm:$0xf0]  ;;  %v9607_v45 = vor.u32 %v11590_v13, %v9606_v12  ;;  %v9931_v12 = vor.u32 %v11666_v3, %v9928_v6  ;;  %v10216_v3 = vld [vmem:[#allocation10 + $0x5b0] sm:$0xf0] }
 0x4cd   :  { %v9799_v30 = vor.u32 %v11638_v23, %v9798_v20  ;;  %v10182_v57 = vld [vmem:[#allocation10 + $0x550] sm:$0xf]  ;;  %v11626_v6 = vld [vmem:[#allocation10 + $0x214] sm:$0xf] }
 0x4ce   :  { %6089 = vmatpush.bf16.msra.mxu2 %v9507_v28  ;;  %6111 = vmatpush.bf16.msra.mxu0 %v10147_v1  ;;  %v11582_v28 = vld [vmem:[#allocation10 + $0xac] sm:$0xf0] }
 0x4cf   :  { %v10214_v1 = vld [vmem:[#allocation10 + $0x590] sm:$0xf]  ;;  %v9575_v36 = vor.u32 %v11582_v28, %v9574_v27 }
 0x4d0   :  { %6148 = vmatpush.bf16.msrb.mxu3 %v9959_v40  ;;  %6126 = vmatpush.bf16.msra.mxu1 %v10339_v17  ;;  %v10438_v40 = vld [vmem:[#allocation10 + $0x750] sm:$0xf] }
 0x4d1   :  { %6090 = vmatmul.bf16.vlgmr.msra.gmra.mxu2 %v12513_v22  ;;  %v10439_v34 = vor.u32 %v11798_v25, %v10438_v40  ;;  %v10406_v17 = vld [vmem:[#allocation10 + $0x710] sm:$0xf] }
 0x4d2   :  { %6134 = vmatpush.bf16.msrb.mxu2 %v9735_v32  ;;  %6112 = vmatpush.bf16.msra.mxu0 %v10115_v60  ;;  %v9766_v32 = vld [vmem:[#allocation10 + $0x210] sm:$0xf]  ;;  %v10407_v43 = vor.u32 %v11790_v35, %v10406_v17 }
 0x4d3   :  { %v9542_v60 = vld [vmem:[#allocation10 + $0x50] sm:$0xf]  ;;  %v9767_v41 = vor.u32 %v11630_v4, %v9766_v32  ;;  %v10504_v4 = vld [vmem:[#allocation10 + $0x7f0] sm:$0xf0] }
 0x4d4   :  { %6149 = vmatpush.bf16.msrb.mxu3 %v9927_v37  ;;  %6127 = vmatpush.bf16.msra.mxu1 %v10307_v31  ;;  %v10215_v37 = vor.u32 %v11742_v29, %v10214_v1  ;;  %v9995_v31 = vor.u32 %v11682_v38, %v9992_v19  ;;  %v10374_v44 = vld [vmem:[#allocation10 + $0x6d0] sm:$0xf]  ;;  %v11650_v29 = vld [vmem:[#allocation10 + $0x2d4] sm:$0xf] }
 0x4d5   :  { %v11782_v53 = vld [vmem:[#allocation10 + $0x6ec] sm:$0xf0] }
 0x4d6   :  { %6135 = vmatpush.bf16.msrb.mxu2 %v9703_v54  ;;  %6113 = vmatpush.bf16.msra.mxu0 %v10083_v24  ;;  %v11734_v54 = vld [vmem:[#allocation10 + $0x56c] sm:$0xf0]  ;;  %v10375_v56 = vor.u32 %v11782_v53, %v10374_v44 }
 0x4d7   :  { %v10183_v14 = vor.u32 %v11734_v54, %v10182_v57  ;;  %v9510_v24 = vld [vmem:[#allocation10 + $0x10] sm:$0xf]  ;;  %v9832_v57 = vld [vmem:[#allocation10 + $0x2b0] sm:$0xf0] }
 0x4d8   :  { %6150 = vmatpush.bf16.msrb.mxu3 %v9895_v46  ;;  %6128 = vmatpush.bf16.msra.mxu1 %v10275_v62  ;;  %v9543_v46 = vor.u32 %v11574_v39, %v9542_v60  ;;  %v11566_v50 = vld [vmem:[#allocation10 + $0x2c] sm:$0xf0]  ;;  %v9963_v62 = vor.u32 %v11674_v47, %v9960_v49  ;;  %v11642_v39 = vld [vmem:[#allocation10 + $0x294] sm:$0xf] }
 0x4d9   :  { %v10150_v33 = vld [vmem:[#allocation10 + $0x510] sm:$0xf]  ;;  %v9511_v63 = vor.u32 %v11566_v50, %v9510_v24  ;;  %v11746_v47 = vld [vmem:[#allocation10 + $0x5d4] sm:$0xf]  ;;  %v9835_v24 = vor.u32 %v11642_v39, %v9832_v57  ;;  %v9934_v39 = vld [vmem:[#allocation10 + $0x358] sm:$0xf] }
 0x4da   :  { %6136 = vmatpush.bf16.msrb.mxu2 %v9671_v52  ;;  %6114 = vmatpush.bf16.msra.mxu0 %v10051_v5  ;;  %v11726_v51 = vld [vmem:[#allocation10 + $0x52c] sm:$0xf0]  ;;  %v11618_v52 = vld [vmem:[#allocation10 + $0x1d4] sm:$0xf] }
 0x4db   :  { %6129 = vmatmul.bf16.vlgmr.msra.gmra.mxu1 %v12518_v8  ;;  %v10151_v0 = vor.u32 %v11726_v51, %v10150_v33  ;;  %v9739_v5 = vor.u32 %v11618_v52, %v9736_v55  ;;  %v10118_v7 = vld [vmem:[#allocation10 + $0x4d0] sm:$0xf]  ;;  %v10248_v49 = vld [vmem:[#allocation10 + $0x5f0] sm:$0xf0] }
 0x4dc   :  { %6151 = vmatpush.bf16.msrb.mxu3 %v9863_v42  ;;  %6173 = vmatpush.bf16.msrb.mxu1 %v10503_v2  ;;  %v10342_v42 = vld [vmem:[#allocation10 + $0x690] sm:$0xf]  ;;  %v11634_v52 = vld [vmem:[#allocation10 + $0x254] sm:$0xf] }
 0x4dd   :  { %v11774_v2 = vld [vmem:[#allocation10 + $0x6ac] sm:$0xf0]  ;;  %v9800_v55 = vld [vmem:[#allocation10 + $0x270] sm:$0xf0] }
 0x4de   :  { %6137 = vmatpush.bf16.msrb.mxu2 %v9639_v58  ;;  %6115 = vmatpush.bf16.msra.mxu0 %v10019_v18  ;;  %v11718_v9 = vld [vmem:[#allocation10 + $0x4ec] sm:$0xf0]  ;;  %v11610_v58 = vld [vmem:[#allocation10 + $0x194] sm:$0xf]  ;;  %v10343_v11 = vor.u32 %v11774_v2, %v10342_v42 }
 0x4df   :  { %v10119_v13 = vor.u32 %v11718_v9, %v10118_v7  ;;  %v10310_v15 = vld [vmem:[#allocation10 + $0x650] sm:$0xf]  ;;  %v9896_v18 = vld [vmem:[#allocation10 + $0x330] sm:$0xf0] }
 0x4e0   :  { %6152 = vmatpush.bf16.msrb.mxu3 %v9831_v21  ;;  %6174 = vmatpush.bf16.msrb.mxu1 %v10471_v16  ;;  %v11766_v48 = vld [vmem:[#allocation10 + $0x66c] sm:$0xf0]  ;;  %v11658_v21 = vld [vmem:[#allocation10 + $0x314] sm:$0xf]  ;;  %v9707_v16 = vor.u32 %v11610_v58, %v9704_v61 }
 0x4e1   :  { %6116 = vmatmul.bf16.vlgmr.msra.gmra.mxu0 %v12522_v59  ;;  %v10086_v20 = vld [vmem:[#allocation10 + $0x490] sm:$0xf]  ;;  %v10311_v40 = vor.u32 %v11766_v48, %v10310_v15  ;;  %v9899_v27 = vor.u32 %v11658_v21, %v9896_v18  ;;  %v9576_v42 = vld [vmem:[#allocation10 + $0xb0] sm:$0xf0]  ;;  %v11687_v15 = vld [vmem:[#allocation10 + $0x3f4] sm:$0xf0] }
 0x4e2   :  { %6138 = vmatpush.bf16.msrb.mxu2 %v9607_v45  ;;  %6160 = vmatpush.bf16.msrb.mxu0 %v10247_v26  ;;  %v11710_v23 = vld [vmem:[#allocation10 + $0x4ac] sm:$0xf0]  ;;  %v11602_v45 = vld [vmem:[#allocation10 + $0x154] sm:$0xf] }
 0x4e3   :  { %v9672_v26 = vld [vmem:[#allocation10 + $0x170] sm:$0xf0]  ;;  %v10278_v25 = vld [vmem:[#allocation10 + $0x610] sm:$0xf]  ;;  %v10087_v28 = vor.u32 %v11710_v23, %v10086_v20 }
 0x4e4   :  { %6153 = vmatpush.bf16.msrb.mxu3 %v9799_v30  ;;  %6175 = vmatpush.bf16.msrb.mxu1 %v10439_v34  ;;  %v11758_v1 = vld [vmem:[#allocation10 + $0x62c] sm:$0xf0]  ;;  %v9864_v30 = vld [vmem:[#allocation10 + $0x2f0] sm:$0xf0]  ;;  %v9675_v32 = vor.u32 %v11602_v45, %v9672_v26 }
 0x4e5   :  { %v11810_v34 = vld [vmem:[#allocation10 + $0x7d4] sm:$0xf]  ;;  %v10054_v17 = vld [vmem:[#allocation10 + $0x450] sm:$0xf]  ;;  %v10279_v38 = vor.u32 %v11758_v1, %v10278_v25  ;;  %v9867_v19 = vor.u32 %v11650_v29, %v9864_v30  ;;  %v11679_v1 = vld [vmem:[#allocation10 + $0x3b4] sm:$0xf0] }
 0x4e6   :  { %6139 = vmatpush.bf16.msrb.mxu2 %v9575_v36  ;;  %6161 = vmatpush.bf16.msrb.mxu0 %v10215_v37  ;;  %v11702_v35 = vld [vmem:[#allocation10 + $0x46c] sm:$0xf0]  ;;  %v11594_v36 = vld [vmem:[#allocation10 + $0x114] sm:$0xf]  ;;  %v10507_v60 = vor.u32 %v11810_v34, %v10504_v4  ;;  %v9742_v4 = vld [vmem:[#allocation10 + $0x1d8] sm:$0xf] }
 0x4e7   :  { %v9640_v37 = vld [vmem:[#allocation10 + $0x130] sm:$0xf0]  ;;  %v10055_v54 = vor.u32 %v11702_v35, %v10054_v17  ;;  %v10022_v44 = vld [vmem:[#allocation10 + $0x410] sm:$0xf]  ;;  %v11623_v17 = vld [vmem:[#allocation10 + $0x1f4] sm:$0xf0] }
 0x4e8   :  { %6154 = vmatpush.bf16.msrb.mxu3 %v9767_v41  ;;  %6176 = vmatpush.bf16.msrb.mxu1 %v10407_v43  ;;  %v9643_v41 = vor.u32 %v11594_v36, %v9640_v37  ;;  %v11802_v43 = vld [vmem:[#allocation10 + $0x794] sm:$0xf]  ;;  %v11694_v53 = vld [vmem:[#allocation10 + $0x42c] sm:$0xf0]  ;;  %v9743_v57 = vor.u32 %v11623_v17, %v9742_v4 }
 0x4e9   :  { %v10023_v33 = vor.u32 %v11694_v53, %v10022_v44  ;;  %v11738_v2 = vld [vmem:[#allocation10 + $0x594] sm:$0xf]  ;;  %v11615_v44 = vld [vmem:[#allocation10 + $0x1b4] sm:$0xf0] }
 0x4ea   :  { %6140 = vmatpush.bf16.msrb.mxu2 %v9543_v46  ;;  %6162 = vmatpush.bf16.msrb.mxu0 %v10183_v14  ;;  %v11586_v46 = vld [vmem:[#allocation10 + $0xd4] sm:$0xf] }
 0x4eb   :  { %6155 = vmatmul.bf16.vlgmr.msrb.gmra.mxu3 %v12510_v10  ;;  %v9608_v14 = vld [vmem:[#allocation10 + $0xf0] sm:$0xf0] }
 0x4ec   :  { %6199 = vmatpush.bf16.msra.mxu3 %v9995_v31  ;;  %6177 = vmatpush.bf16.msrb.mxu1 %v10375_v56  ;;  %v10472_v31 = vld [vmem:[#allocation10 + $0x7b0] sm:$0xf0]  ;;  %v9611_v51 = vor.u32 %v11586_v46, %v9608_v14 }
 0x4ed   :  { %v10475_v50 = vor.u32 %v11802_v43, %v10472_v31  ;;  %v11794_v56 = vld [vmem:[#allocation10 + $0x754] sm:$0xf]  ;;  %v9710_v31 = vld [vmem:[#allocation10 + $0x198] sm:$0xf] }
 0x4ee   :  { %6141 = vmatpush.bf16.msrb.mxu2 %v9511_v63  ;;  %6163 = vmatpush.bf16.msrb.mxu0 %v10151_v0  ;;  %v10440_v63 = vld [vmem:[#allocation10 + $0x770] sm:$0xf0] }
 0x4ef   :  { %v11578_v0 = vld [vmem:[#allocation10 + $0x94] sm:$0xf]  ;;  %v10443_v7 = vor.u32 %v11794_v56, %v10440_v63  ;;  %v11607_v56 = vld [vmem:[#allocation10 + $0x174] sm:$0xf0] }
 0x4f0   :  { %6200 = vmatpush.bf16.msra.mxu3 %v9963_v62  ;;  %6178 = vmatpush.bf16.msrb.mxu1 %v10343_v11  ;;  %v10251_v62 = vor.u32 %v11746_v47, %v10248_v49  ;;  %v9579_v9 = vor.u32 %v11578_v0, %v9576_v42  ;;  %v9768_v58 = vld [vmem:[#allocation10 + $0x230] sm:$0xf0] }
 0x4f1   :  { %6142 = vmatmul.bf16.vlgmr.msrb.gmra.mxu2 %v12513_v22  ;;  %v11786_v61 = vld [vmem:[#allocation10 + $0x714] sm:$0xf]  ;;  %v9771_v20 = vor.u32 %v11626_v6, %v9768_v58 }
 0x4f2   :  { %6186 = vmatpush.bf16.msra.mxu2 %v9739_v5  ;;  %6164 = vmatpush.bf16.msrb.mxu0 %v10119_v13  ;;  %v9803_v5 = vor.u32 %v11634_v52, %v9800_v55  ;;  %v10408_v11 = vld [vmem:[#allocation10 + $0x730] sm:$0xf0]  ;;  %v9998_v13 = vld [vmem:[#allocation10 + $0x3d8] sm:$0xf] }
 0x4f3   :  { %v11570_v48 = vld [vmem:[#allocation10 + $0x54] sm:$0xf]  ;;  %v10411_v23 = vor.u32 %v11786_v61, %v10408_v11  ;;  %v9999_v45 = vor.u32 %v11687_v15, %v9998_v13  ;;  %v9678_v55 = vld [vmem:[#allocation10 + $0x158] sm:$0xf]  ;;  %v12545_v15 = vld [vmem:[%s12658_s15] sm:$0xff] }
 0x4f4   :  { %6201 = vmatpush.bf16.msra.mxu3 %v9931_v12  ;;  %6179 = vmatpush.bf16.msrb.mxu1 %v10311_v40  ;;  %v10219_v12 = vor.u32 %v11738_v2, %v10216_v3  ;;  %v9544_v21 = vld [vmem:[#allocation10 + $0x70] sm:$0xf0]  ;;  %v9870_v3 = vld [vmem:[#allocation10 + $0x2d8] sm:$0xf]  ;;  %v9679_v6 = vor.u32 %v11607_v56, %v9678_v55  ;;  %v11683_v55 = vld [vmem:[#allocation10 + $0x3dc] sm:$0xf] }
 0x4f5   :  { %v10184_v18 = vld [vmem:[#allocation10 + $0x570] sm:$0xf0]  ;;  %v9547_v25 = vor.u32 %v11570_v48, %v9544_v21  ;;  %v9646_v11 = vld [vmem:[#allocation10 + $0x118] sm:$0xf]  ;;  %v10000_v56 = vld [vmem:[#allocation10 + $0x3f8] sm:$0xf0] }
 0x4f6   :  { %6187 = vmatpush.bf16.msra.mxu2 %v9707_v16  ;;  %6165 = vmatpush.bf16.msrb.mxu0 %v10087_v28  ;;  %v11730_v16 = vld [vmem:[#allocation10 + $0x554] sm:$0xf]  ;;  %v9966_v28 = vld [vmem:[#allocation10 + $0x398] sm:$0xf] }
 0x4f7   :  { %v11778_v26 = vld [vmem:[#allocation10 + $0x6d4] sm:$0xf]  ;;  %v9967_v36 = vor.u32 %v11679_v1, %v9966_v28  ;;  %v4630_v28 = vperm.slane %v12545_v15, 0  ;;  %v9614_v1 = vld [vmem:[#allocation10 + $0xd8] sm:$0xf] }
 0x4f8   :  { %6202 = vmatpush.bf16.msra.mxu3 %v9899_v27  ;;  %6180 = vmatpush.bf16.msrb.mxu1 %v10279_v38  ;;  %v10376_v40 = vld [vmem:[#allocation10 + $0x6f0] sm:$0xf0]  ;;  %v10187_v27 = vor.u32 %v11730_v16, %v10184_v18  ;;  %v9838_v18 = vld [vmem:[#allocation10 + $0x298] sm:$0xf] }
 0x4f9   :  { %v11562_v29 = vld [vmem:[#allocation10 + $0x14] sm:$0xf]  ;;  %v10379_v35 = vor.u32 %v11778_v26, %v10376_v40  ;;  %v11807_v40 = vld [vmem:[#allocation10 + $0x7b4] sm:$0xf0] }
 0x4fa   :  { %6188 = vmatpush.bf16.msra.mxu2 %v9675_v32  ;;  %6166 = vmatpush.bf16.msrb.mxu0 %v10055_v54  ;;  %v9512_v30 = vld [vmem:[#allocation10 + $0x30] sm:$0xf0]  ;;  %v11671_v54 = vld [vmem:[#allocation10 + $0x374] sm:$0xf0] }
 0x4fb   :  { %6181 = vmatmul.bf16.vlgmr.msrb.gmra.mxu1 %v12518_v8  ;;  %v11722_v32 = vld [vmem:[#allocation10 + $0x514] sm:$0xf]  ;;  %v9515_v37 = vor.u32 %v11562_v29, %v9512_v30  ;;  %v9935_v46 = vor.u32 %v11671_v54, %v9934_v39  ;;  %v11591_v29 = vld [vmem:[#allocation10 + $0xf4] sm:$0xf0] }
 0x4fc   :  { %6203 = vmatpush.bf16.msra.mxu3 %v9867_v19  ;;  %6225 = vmatpush.bf16.msra.mxu1 %v10507_v60  ;;  %v10152_v34 = vld [vmem:[#allocation10 + $0x530] sm:$0xf0]  ;;  %v10254_v30 = vld [vmem:[#allocation10 + $0x5d8] sm:$0xf] }
 0x4fd   :  { %v10155_v38 = vor.u32 %v11722_v32, %v10152_v34  ;;  %v11770_v19 = vld [vmem:[#allocation10 + $0x694] sm:$0xf]  ;;  %v11751_v32 = vld [vmem:[#allocation10 + $0x5f4] sm:$0xf0] }
 0x4fe   :  { %6189 = vmatpush.bf16.msra.mxu2 %v9643_v41  ;;  %6167 = vmatpush.bf16.msrb.mxu0 %v10023_v33  ;;  %v10344_v60 = vld [vmem:[#allocation10 + $0x6b0] sm:$0xf0]  ;;  %v11663_v33 = vld [vmem:[#allocation10 + $0x334] sm:$0xf0]  ;;  %v10255_v39 = vor.u32 %v11751_v32, %v10254_v30  ;;  %v11667_v32 = vld [vmem:[#allocation10 + $0x35c] sm:$0xf] }
 0x4ff   :  { %v11714_v41 = vld [vmem:[#allocation10 + $0x4d4] sm:$0xf]  ;;  %v10347_v53 = vor.u32 %v11770_v19, %v10344_v60  ;;  %v10446_v19 = vld [vmem:[#allocation10 + $0x758] sm:$0xf] }
 0x500   :  { %6204 = vmatpush.bf16.msra.mxu3 %v9835_v24  ;;  %6226 = vmatpush.bf16.msra.mxu1 %v10475_v50  ;;  %v10120_v43 = vld [vmem:[#allocation10 + $0x4f0] sm:$0xf0]  ;;  %v9902_v24 = vld [vmem:[#allocation10 + $0x318] sm:$0xf]  ;;  %v9711_v50 = vor.u32 %v11615_v44, %v9710_v31 }
 0x501   :  { %6168 = vmatmul.bf16.vlgmr.msrb.gmra.mxu0 %v12522_v59  ;;  %v10123_v14 = vor.u32 %v11714_v41, %v10120_v43  ;;  %v11762_v47 = vld [vmem:[#allocation10 + $0x654] sm:$0xf]  ;;  %v9903_v0 = vor.u32 %v11663_v33, %v9902_v24  ;;  %v9582_v54 = vld [vmem:[#allocation10 + $0x98] sm:$0xf] }
 0x502   :  { %6190 = vmatpush.bf16.msra.mxu2 %v9611_v51  ;;  %6212 = vmatpush.bf16.msra.mxu0 %v10251_v62  ;;  %v10312_v49 = vld [vmem:[#allocation10 + $0x670] sm:$0xf0]  ;;  %v11583_v41 = vld [vmem:[#allocation10 + $0xb4] sm:$0xf0] }
 0x503   :  { %v11706_v51 = vld [vmem:[#allocation10 + $0x494] sm:$0xf]  ;;  %v10315_v62 = vor.u32 %v11762_v47, %v10312_v49  ;;  %v10222_v43 = vld [vmem:[#allocation10 + $0x598] sm:$0xf]  ;;  %v9583_v49 = vor.u32 %v11583_v41, %v9582_v54 }
 0x504   :  { %6205 = vmatpush.bf16.msra.mxu3 %v9803_v5  ;;  %6227 = vmatpush.bf16.msra.mxu1 %v10443_v7  ;;  %v10088_v52 = vld [vmem:[#allocation10 + $0x4b0] sm:$0xf0]  ;;  %v11655_v5 = vld [vmem:[#allocation10 + $0x2f4] sm:$0xf0] }
 0x505   :  { %v11754_v63 = vld [vmem:[#allocation10 + $0x614] sm:$0xf]  ;;  %v10091_v42 = vor.u32 %v11706_v51, %v10088_v52  ;;  %v10510_v7 = vld [vmem:[#allocation10 + $0x7d8] sm:$0xf]  ;;  %v9871_v21 = vor.u32 %v11655_v5, %v9870_v3 }
 0x506   :  { %6191 = vmatpush.bf16.msra.mxu2 %v9579_v9  ;;  %6213 = vmatpush.bf16.msra.mxu0 %v10219_v12  ;;  %v10280_v2 = vld [vmem:[#allocation10 + $0x630] sm:$0xf0]  ;;  %v11815_v9 = vld [vmem:[#allocation10 + $0x7f4] sm:$0xf0] }
 0x507   :  { %v11698_v58 = vld [vmem:[#allocation10 + $0x454] sm:$0xf]  ;;  %v11599_v12 = vld [vmem:[#allocation10 + $0x134] sm:$0xf0]  ;;  %v10283_v13 = vor.u32 %v11754_v63, %v10280_v2  ;;  %v10511_v16 = vor.u32 %v11815_v9, %v10510_v7 }
 0x508   :  { %6206 = vmatpush.bf16.msra.mxu3 %v9771_v20  ;;  %6228 = vmatpush.bf16.msra.mxu1 %v10411_v23  ;;  %v10056_v61 = vld [vmem:[#allocation10 + $0x470] sm:$0xf0]  ;;  %v11647_v20 = vld [vmem:[#allocation10 + $0x2b4] sm:$0xf0]  ;;  %v9647_v26 = vor.u32 %v11599_v12, %v9646_v11  ;;  %v11675_v11 = vld [vmem:[#allocation10 + $0x39c] sm:$0xf] }
 0x509   :  { %v10478_v23 = vld [vmem:[#allocation10 + $0x798] sm:$0xf]  ;;  %v9839_v34 = vor.u32 %v11647_v20, %v9838_v18  ;;  %v9968_v12 = vld [vmem:[#allocation10 + $0x3b8] sm:$0xf0] }
 0x50a   :  { %6192 = vmatpush.bf16.msra.mxu2 %v9547_v25  ;;  %6214 = vmatpush.bf16.msra.mxu0 %v10187_v27  ;;  %v11690_v25 = vld [vmem:[#allocation10 + $0x414] sm:$0xf]  ;;  %v10479_v4 = vor.u32 %v11807_v40, %v10478_v23  ;;  %v11743_v31 = vld [vmem:[#allocation10 + $0x5b4] sm:$0xf0]  ;;  %v11619_v23 = vld [vmem:[#allocation10 + $0x1dc] sm:$0xf] }
 0x50b   :  { %6207 = vmatmul.bf16.vlgmr.msra.gmra.mxu3 %v12510_v10  ;;  %v10024_v27 = vld [vmem:[#allocation10 + $0x430] sm:$0xf0]  ;;  %v11631_v24 = vld [vmem:[#allocation10 + $0x234] sm:$0xf0]  ;;  %v10223_v52 = vor.u32 %v11743_v31, %v10222_v43  ;;  %v11659_v43 = vld [vmem:[#allocation10 + $0x31c] sm:$0xf] }
 0x50c   :  { %6251 = vmatpush.bf16.msrb.mxu3 %v9999_v45  ;;  %6229 = vmatpush.bf16.msra.mxu1 %v10379_v35  ;;  %v10059_v45 = vor.u32 %v11698_v58, %v10056_v61  ;;  %v10027_v35 = vor.u32 %v11690_v25, %v10024_v27  ;;  %v11791_v33 = vld [vmem:[#allocation10 + $0x734] sm:$0xf0]  ;;  %v9971_v25 = vor.u32 %v11675_v11, %v9968_v12  ;;  %v11643_v12 = vld [vmem:[#allocation10 + $0x29c] sm:$0xf] }
 0x50d   :  { %v11575_v63 = vld [vmem:[#allocation10 + $0x74] sm:$0xf0] }
 0x50e   :  { %6193 = vmatpush.bf16.msra.mxu2 %v9515_v37  ;;  %6215 = vmatpush.bf16.msra.mxu0 %v10155_v38  ;;  %v5948_v48 = vpop.f32.mrf.mxu3  ;;  %v9806_v37 = vld [vmem:[#allocation10 + $0x258] sm:$0xf] }
 0x50f   :  { %v11639_v38 = vld [vmem:[#allocation10 + $0x274] sm:$0xf0] }
 0x510   :  { %6252 = vmatpush.bf16.msrb.mxu3 %v9967_v36  ;;  %6230 = vmatpush.bf16.msra.mxu1 %v10347_v53  ;;  %v9615_v36 = vor.u32 %v11591_v29, %v9614_v1  ;;  %v9807_v53 = vor.u32 %v11639_v38, %v9806_v37  ;;  %v10382_v7 = vld [vmem:[#allocation10 + $0x6d8] sm:$0xf]  ;;  %v11611_v37 = vld [vmem:[#allocation10 + $0x19c] sm:$0xf] }
 0x511   :  { %6194 = vmatmul.bf16.vlgmr.msra.gmra.mxu2 %v12513_v22  ;;  %v11783_v9 = vld [vmem:[#allocation10 + $0x6f4] sm:$0xf0]  ;;  %v9712_v38 = vld [vmem:[#allocation10 + $0x1b8] sm:$0xf0] }
 0x512   :  { %6238 = vmatpush.bf16.msrb.mxu2 %v9743_v57  ;;  %6216 = vmatpush.bf16.msra.mxu0 %v10123_v14  ;;  %v11799_v57 = vld [vmem:[#allocation10 + $0x774] sm:$0xf0]  ;;  %v10383_v40 = vor.u32 %v11783_v9, %v10382_v7  ;;  %v9715_v31 = vor.u32 %v11611_v37, %v9712_v38  ;;  %v9648_v7 = vld [vmem:[#allocation10 + $0x138] sm:$0xf0] }
 0x513   :  { %v5935_v17 = vpop.f32.mrf.mxu2  ;;  %v10447_v47 = vor.u32 %v11799_v57, %v10446_v19  ;;  %v10350_v29 = vld [vmem:[#allocation10 + $0x698] sm:$0xf]  ;;  %v11795_v37 = vld [vmem:[#allocation10 + $0x75c] sm:$0xf] }
 0x514   :  { %6253 = vmatpush.bf16.msrb.mxu3 %v9935_v46  ;;  %6231 = vmatpush.bf16.msra.mxu1 %v10315_v62  ;;  %v5936_v60 = vadd.f32 %v5935_v17, %v4630_v28  ;;  %v9774_v46 = vld [vmem:[#allocation10 + $0x218] sm:$0xf]  ;;  %v9936_v17 = vld [vmem:[#allocation10 + $0x378] sm:$0xf0] }
 0x515   :  { %v9550_v62 = vld [vmem:[#allocation10 + $0x58] sm:$0xf]  ;;  %v9775_v2 = vor.u32 %v11631_v24, %v9774_v46  ;;  %v9680_v24 = vld [vmem:[#allocation10 + $0x178] sm:$0xf0] }
 0x516   :  { %6239 = vmatpush.bf16.msrb.mxu2 %v9711_v50  ;;  %6217 = vmatpush.bf16.msra.mxu0 %v10091_v42  ;;  %v5950_v44 = vpop.f32.mrf.mxu3  ;;  %v5949_v14 = vadd.f32 %v5948_v48, %v5936_v60  ;;  %v10414_v50 = vld [vmem:[#allocation10 + $0x718] sm:$0xf]  ;;  %v9551_v58 = vor.u32 %v11575_v63, %v9550_v62  ;;  %v11651_v62 = vld [vmem:[#allocation10 + $0x2dc] sm:$0xf] }
 0x517   :  { %v11735_v42 = vld [vmem:[#allocation10 + $0x574] sm:$0xf0]  ;;  %v10415_v3 = vor.u32 %v11791_v33, %v10414_v50  ;;  %v9904_v44 = vld [vmem:[#allocation10 + $0x338] sm:$0xf0] }
 0x518   :  { %6254 = vmatpush.bf16.msrb.mxu3 %v9903_v0  ;;  %6232 = vmatpush.bf16.msra.mxu1 %v10283_v13  ;;  %v5974_v51 = vpop.f32.mrf.mxu1  ;;  %v10190_v0 = vld [vmem:[#allocation10 + $0x558] sm:$0xf]  ;;  %v9872_v63 = vld [vmem:[#allocation10 + $0x2f8] sm:$0xf0] }
 0x519   :  { %v10191_v61 = vor.u32 %v11735_v42, %v10190_v0  ;;  %v9518_v13 = vld [vmem:[#allocation10 + $0x18] sm:$0xf]  ;;  %v11811_v42 = vld [vmem:[#allocation10 + $0x7dc] sm:$0xf] }
 0x51a   :  { %6240 = vmatpush.bf16.msrb.mxu2 %v9679_v6  ;;  %6218 = vmatpush.bf16.msra.mxu0 %v10059_v45  ;;  %v10003_v6 = vor.u32 %v11683_v55, %v10000_v56  ;;  %v11567_v48 = vld [vmem:[#allocation10 + $0x34] sm:$0xf0]  ;;  %v9744_v45 = vld [vmem:[#allocation10 + $0x1f8] sm:$0xf0] }
 0x51b   :  { %6233 = vmatmul.bf16.vlgmr.msra.gmra.mxu1 %v12518_v8  ;;  %v5937_v5 = vpop.f32.mrf.mxu2  ;;  %v9519_v28 = vor.u32 %v11567_v48, %v9518_v13  ;;  %v11775_v30 = vld [vmem:[#allocation10 + $0x6b4] sm:$0xf0]  ;;  %v9840_v13 = vld [vmem:[#allocation10 + $0x2b8] sm:$0xf0] }
 0x51c   :  { %6255 = vmatpush.bf16.msrb.mxu3 %v9871_v21  ;;  %6277 = vmatpush.bf16.msrb.mxu1 %v10511_v16  ;;  %v10158_v21 = vld [vmem:[#allocation10 + $0x518] sm:$0xf]  ;;  %v10351_v19 = vor.u32 %v11775_v30, %v10350_v29  ;;  %v9843_v30 = vor.u32 %v11643_v12, %v9840_v13  ;;  %v11563_v12 = vld [vmem:[#allocation10 + $0x1c] sm:$0xf] }
 0x51d   :  { %v11727_v16 = vld [vmem:[#allocation10 + $0x534] sm:$0xf0]  ;;  %v9520_v13 = vld [vmem:[#allocation10 + $0x38] sm:$0xf0] }
 0x51e   :  { %6241 = vmatpush.bf16.msrb.mxu2 %v9647_v26  ;;  %6219 = vmatpush.bf16.msra.mxu0 %v10027_v35  ;;  %v5961_v18 = vpop.f32.mrf.mxu0  ;;  %v12550_v20 = vpop.f32.mrf.mxu3  ;;  %v10159_v1 = vor.u32 %v11727_v16, %v10158_v21  ;;  %v10126_v35 = vld [vmem:[#allocation10 + $0x4d8] sm:$0xf]  ;;  %v11803_v16 = vld [vmem:[#allocation10 + $0x79c] sm:$0xf] }
 0x51f   :  { %v5962_v26 = vadd.f32 %v5961_v18, %v5949_v14  ;;  %v10318_v54 = vld [vmem:[#allocation10 + $0x658] sm:$0xf]  ;;  %v10480_v18 = vld [vmem:[#allocation10 + $0x7b8] sm:$0xf0] }
 0x520   :  { %6256 = vmatpush.bf16.msrb.mxu3 %v9839_v34  ;;  %6278 = vmatpush.bf16.msrb.mxu1 %v10479_v4  ;;  %v5976_v27 = vpop.f32.mrf.mxu1  ;;  %v9747_v4 = vor.u32 %v11619_v23, %v9744_v45  ;;  %v11767_v41 = vld [vmem:[#allocation10 + $0x674] sm:$0xf0] }
 0x521   :  { %6220 = vmatmul.bf16.vlgmr.msra.gmra.mxu0 %v12522_v59  ;;  %v12552_v34 = vadd.f32 %v5974_v51, %v5962_v26  ;;  %v11711_v46 = vld [vmem:[#allocation10 + $0x4b4] sm:$0xf0]  ;;  %v10319_v50 = vor.u32 %v11767_v41, %v10318_v54  ;;  %v9616_v27 = vld [vmem:[#allocation10 + $0xf8] sm:$0xf0] }
 0x522   :  { %6242 = vmatpush.bf16.msrb.mxu2 %v9615_v36  ;;  %6264 = vmatpush.bf16.msrb.mxu0 %v10255_v39  ;;  %v11719_v36 = vld [vmem:[#allocation10 + $0x4f4] sm:$0xf0]  ;;  %v9939_v39 = vor.u32 %v11667_v32, %v9936_v17  ;;  %v10483_v32 = vor.u32 %v11803_v16, %v10480_v18  ;;  %v11739_v54 = vld [vmem:[#allocation10 + $0x59c] sm:$0xf]  ;;  %v10574_v16 = vld [vmem:[#allocation11 + $0x70] sm:$0xf] }
 0x523   :  { %v10127_v57 = vor.u32 %v11719_v36, %v10126_v35  ;;  %v10286_v33 = vld [vmem:[#allocation10 + $0x618] sm:$0xf]  ;;  %v11635_v35 = vld [vmem:[#allocation10 + $0x25c] sm:$0xf] }
 0x524   :  { %6257 = vmatpush.bf16.msrb.mxu3 %v9807_v53  ;;  %6279 = vmatpush.bf16.msrb.mxu1 %v10447_v47  ;;  %v12555_v60 = vpop.f32.mrf.mxu2  ;;  %v10094_v53 = vld [vmem:[#allocation10 + $0x498] sm:$0xf]  ;;  %v9808_v36 = vld [vmem:[#allocation10 + $0x278] sm:$0xf0] }
 0x525   :  { %v10095_v55 = vor.u32 %v11711_v46, %v10094_v53  ;;  %v11759_v56 = vld [vmem:[#allocation10 + $0x634] sm:$0xf0]  ;;  %v10224_v41 = vld [vmem:[#allocation10 + $0x5b8] sm:$0xf0] }
 0x526   :  { %6243 = vmatpush.bf16.msrb.mxu2 %v9583_v49  ;;  %6265 = vmatpush.bf16.msrb.mxu0 %v10223_v52  ;;  %v5963_v14 = vpop.f32.mrf.mxu0  ;;  %v6002_v47 = vpop.f32.mrf.mxu3  ;;  %v11603_v49 = vld [vmem:[#allocation10 + $0x15c] sm:$0xf]  ;;  %v9907_v52 = vor.u32 %v11659_v43, %v9904_v44  ;;  %v11703_v5 = vld [vmem:[#allocation10 + $0x474] sm:$0xf0]  ;;  %v10287_v9 = vor.u32 %v11759_v56, %v10286_v33  ;;  %v9811_v43 = vor.u32 %v11635_v35, %v9808_v36 }
 0x527   :  { %v9683_v0 = vor.u32 %v11603_v49, %v9680_v24  ;;  %v10030_v23 = vld [vmem:[#allocation10 + $0x418] sm:$0xf]  ;;  %v9776_v14 = vld [vmem:[#allocation10 + $0x238] sm:$0xf0]  ;;  %v10227_v33 = vor.u32 %v11739_v54, %v10224_v41 }
 0x528   :  { %6258 = vmatpush.bf16.msrb.mxu3 %v9775_v2  ;;  %6280 = vmatpush.bf16.msrb.mxu1 %v10415_v3  ;;  %v12558_v51 = vpop.f32.mrf.mxu1  ;;  %v10512_v2 = vld [vmem:[#allocation10 + $0x7f8] sm:$0xf0]  ;;  %v10062_v3 = vld [vmem:[#allocation10 + $0x458] sm:$0xf] }
 0x529   :  { %v10515_v11 = vor.u32 %v11811_v42, %v10512_v2  ;;  %v10063_v48 = vor.u32 %v11703_v5, %v10062_v3  ;;  %v11787_v47 = vld [vmem:[#allocation10 + $0x71c] sm:$0xf]  ;;  %v11831_v18 = vld [vmem:[#allocation11 + $0x74] sm:$0xf0] }
 0x52a   :  { %6244 = vmatpush.bf16.msrb.mxu2 %v9551_v58  ;;  %6266 = vmatpush.bf16.msrb.mxu0 %v10191_v61  ;;  %v9875_v61 = vor.u32 %v11651_v62, %v9872_v63  ;;  %v10416_v49 = vld [vmem:[#allocation10 + $0x738] sm:$0xf0] }
 0x52b   :  { %6259 = vmatmul.bf16.vlgmr.msrb.gmra.mxu3 %v12510_v10  ;;  %v11571_v56 = vld [vmem:[#allocation10 + $0x5c] sm:$0xf]  ;;  %v10419_v3 = vor.u32 %v11787_v47, %v10416_v49  ;;  %v10558_v47 = vld [vmem:[#allocation11 + $0x50] sm:$0xf]  ;;  %v11827_v49 = vld [vmem:[#allocation11 + $0x54] sm:$0xf0] }
 0x52c   :  { %6303 = vmatpush.bf16.msra.mxu3 %v10003_v6  ;;  %6281 = vmatpush.bf16.msrb.mxu1 %v10383_v40  ;;  %v11595_v6 = vld [vmem:[#allocation10 + $0x11c] sm:$0xf]  ;;  %v5989_v58 = vpop.f32.mrf.mxu2  ;;  %v11695_v40 = vld [vmem:[#allocation10 + $0x434] sm:$0xf0] }
 0x52d   :  { %v9651_v21 = vor.u32 %v11595_v6, %v9648_v7  ;;  %v9552_v62 = vld [vmem:[#allocation10 + $0x78] sm:$0xf0] }
 0x52e   :  { %6245 = vmatpush.bf16.msrb.mxu2 %v9519_v28  ;;  %6267 = vmatpush.bf16.msrb.mxu0 %v10159_v1  ;;  %v12560_v45 = vpop.f32.mrf.mxu0  ;;  %v12562_v26 = vpop.f32.mrf.mxu3  ;;  %v11747_v28 = vld [vmem:[#allocation10 + $0x5dc] sm:$0xf] }
 0x52f   :  { %v10256_v1 = vld [vmem:[#allocation10 + $0x5f8] sm:$0xf0] }
 0x530   :  { %6304 = vmatpush.bf16.msra.mxu3 %v9971_v25  ;;  %6282 = vmatpush.bf16.msrb.mxu1 %v10351_v19  ;;  %v11587_v25 = vld [vmem:[#allocation10 + $0xdc] sm:$0xf]  ;;  %v6028_v29 = vpop.f32.mrf.mxu1  ;;  %v10259_v38 = vor.u32 %v11747_v28, %v10256_v1 }
 0x531   :  { %6246 = vmatmul.bf16.vlgmr.msrb.gmra.mxu2 %v12513_v22  ;;  %v9619_v17 = vor.u32 %v11587_v25, %v9616_v27  ;;  %v10448_v19 = vld [vmem:[#allocation10 + $0x778] sm:$0xf0]  ;;  %v9523_v27 = vor.u32 %v11563_v12, %v9520_v13  ;;  %v10598_v13 = vld [vmem:[#allocation11 + $0xa0] sm:$0xf] }
 0x532   :  { %6290 = vmatpush.bf16.msra.mxu2 %v9747_v4  ;;  %6268 = vmatpush.bf16.msrb.mxu0 %v10127_v57  ;;  %v10031_v4 = vor.u32 %v11695_v40, %v10030_v23  ;;  %v9584_v57 = vld [vmem:[#allocation10 + $0xb8] sm:$0xf0]  ;;  %v10451_v53 = vor.u32 %v11795_v37, %v10448_v19  ;;  %v11829_v19 = vld [vmem:[#allocation11 + $0x64] sm:$0xf0] }
 0x533   :  { %v11731_v63 = vld [vmem:[#allocation10 + $0x55c] sm:$0xf] }
 0x534   :  { %6305 = vmatpush.bf16.msra.mxu3 %v9939_v39  ;;  %6283 = vmatpush.bf16.msrb.mxu1 %v10319_v50  ;;  %v11579_v39 = vld [vmem:[#allocation10 + $0x9c] sm:$0xf]  ;;  %v12565_v44 = vpop.f32.mrf.mxu2 }
 0x535   :  { %v9587_v46 = vor.u32 %v11579_v39, %v9584_v57  ;;  %v11779_v6 = vld [vmem:[#allocation10 + $0x6dc] sm:$0xf] }
 0x536   :  { %6291 = vmatpush.bf16.msra.mxu2 %v9715_v31  ;;  %6269 = vmatpush.bf16.msrb.mxu0 %v10095_v55  ;;  %v11627_v31 = vld [vmem:[#allocation10 + $0x21c] sm:$0xf]  ;;  %v6015_v24 = vpop.f32.mrf.mxu0  ;;  %v6054_v50 = vpop.f32.mrf.mxu3  ;;  %v11847_v55 = vld [vmem:[#allocation11 + $0xf4] sm:$0xf0] }
 0x537   :  { %v9779_v2 = vor.u32 %v11627_v31, %v9776_v14  ;;  %v10384_v7 = vld [vmem:[#allocation10 + $0x6f8] sm:$0xf0]  ;;  %v10614_v31 = vld [vmem:[#allocation11 + $0xc0] sm:$0xf]  ;;  %v4631_v24 = vperm.slane %v12545_v15, 1 }
 0x538   :  { %6306 = vmatpush.bf16.msra.mxu3 %v9907_v52  ;;  %6284 = vmatpush.bf16.msrb.mxu1 %v10287_v9  ;;  %v10638_v52 = vld [vmem:[#allocation11 + $0xf0] sm:$0xf]  ;;  %v12568_v42 = vpop.f32.mrf.mxu1  ;;  %v9555_v9 = vor.u32 %v11571_v56, %v9552_v62  ;;  %v10387_v40 = vor.u32 %v11779_v6, %v10384_v7  ;;  %v11771_v1 = vld [vmem:[#allocation10 + $0x69c] sm:$0xf] }
 0x539   :  { %v10639_v5 = vor.u32 %v11847_v55, %v10638_v52  ;;  %v10352_v29 = vld [vmem:[#allocation10 + $0x6b8] sm:$0xf0]  ;;  %v10606_v62 = vld [vmem:[#allocation11 + $0xb0] sm:$0xf] }
 0x53a   :  { %6292 = vmatpush.bf16.msra.mxu2 %v9683_v0  ;;  %6270 = vmatpush.bf16.msrb.mxu0 %v10063_v48  ;;  %v10192_v0 = vld [vmem:[#allocation10 + $0x578] sm:$0xf0]  ;;  %v10355_v39 = vor.u32 %v11771_v1, %v10352_v29  ;;  %v11823_v1 = vld [vmem:[#allocation11 + $0x34] sm:$0xf0]  ;;  %v10702_v29 = vld [vmem:[#allocation11 + $0x170] sm:$0xf] }
 0x53b   :  { %6285 = vmatmul.bf16.vlgmr.msrb.gmra.mxu1 %v12518_v8  ;;  %v10195_v58 = vor.u32 %v11731_v63, %v10192_v0  ;;  %v11723_v48 = vld [vmem:[#allocation10 + $0x51c] sm:$0xf]  ;;  %v11839_v63 = vld [vmem:[#allocation11 + $0xb4] sm:$0xf0] }
 0x53c   :  { %6307 = vmatpush.bf16.msra.mxu3 %v9875_v61  ;;  %6329 = vmatpush.bf16.msra.mxu1 %v10515_v11  ;;  %v10630_v61 = vld [vmem:[#allocation11 + $0xe0] sm:$0xf]  ;;  %v11845_v11 = vld [vmem:[#allocation11 + $0xe4] sm:$0xf0]  ;;  %v6041_v23 = vpop.f32.mrf.mxu2  ;;  %v11715_v35 = vld [vmem:[#allocation10 + $0x4dc] sm:$0xf] }
 0x53d   :  { %v10631_v25 = vor.u32 %v11845_v11, %v10630_v61  ;;  %v10128_v36 = vld [vmem:[#allocation10 + $0x4f8] sm:$0xf0]  ;;  %v10607_v11 = vor.u32 %v11839_v63, %v10606_v62  ;;  %v10758_v23 = vld [vmem:[#allocation11 + $0x1e0] sm:$0xf]  ;;  %v11859_v63 = vld [vmem:[#allocation11 + $0x154] sm:$0xf0] }
 0x53e   :  { %6293 = vmatpush.bf16.msra.mxu2 %v9651_v21  ;;  %6271 = vmatpush.bf16.msrb.mxu0 %v10031_v4  ;;  %v10160_v21 = vld [vmem:[#allocation10 + $0x538] sm:$0xf0]  ;;  %v10575_v4 = vor.u32 %v11831_v18, %v10574_v16  ;;  %v10131_v54 = vor.u32 %v11715_v35, %v10128_v36 }
 0x53f   :  { %v10163_v28 = vor.u32 %v11723_v48, %v10160_v21  ;;  %v11763_v41 = vld [vmem:[#allocation10 + $0x65c] sm:$0xf]  ;;  %v11837_v48 = vld [vmem:[#allocation11 + $0xa4] sm:$0xf0] }
 0x540   :  { %6308 = vmatpush.bf16.msra.mxu3 %v9843_v30  ;;  %6330 = vmatpush.bf16.msra.mxu1 %v10483_v32  ;;  %v10622_v30 = vld [vmem:[#allocation11 + $0xd0] sm:$0xf]  ;;  %v12571_v32 = vpop.f32.mrf.mxu0  ;;  %v6080_v37 = vpop.f32.mrf.mxu1  ;;  %v10096_v14 = vld [vmem:[#allocation10 + $0x4b8] sm:$0xf0] }
 0x541   :  { %6272 = vmatmul.bf16.vlgmr.msrb.gmra.mxu0 %v12522_v59  ;;  %v10288_v56 = vld [vmem:[#allocation10 + $0x638] sm:$0xf0] }
 0x542   :  { %6294 = vmatpush.bf16.msra.mxu2 %v9619_v17  ;;  %6316 = vmatpush.bf16.msra.mxu0 %v10259_v38  ;;  %v11843_v17 = vld [vmem:[#allocation11 + $0xd4] sm:$0xf0]  ;;  %v10566_v38 = vld [vmem:[#allocation11 + $0x60] sm:$0xf]  ;;  %v11699_v6 = vld [vmem:[#allocation10 + $0x45c] sm:$0xf] }
 0x543   :  { %v10623_v57 = vor.u32 %v11843_v17, %v10622_v30  ;;  %v10064_v7 = vld [vmem:[#allocation10 + $0x478] sm:$0xf0]  ;;  %v11863_v30 = vld [vmem:[#allocation11 + $0x174] sm:$0xf0] }
 0x544   :  { %6309 = vmatpush.bf16.msra.mxu3 %v9811_v43  ;;  %6331 = vmatpush.bf16.msra.mxu1 %v10451_v53  ;;  %v10320_v43 = vld [vmem:[#allocation10 + $0x678] sm:$0xf0]  ;;  %v11841_v53 = vld [vmem:[#allocation11 + $0xc4] sm:$0xf0]  ;;  %v10067_v16 = vor.u32 %v11699_v6, %v10064_v7  ;;  %v4632_v6 = vperm.slane %v12545_v15, 2 }
 0x545   :  { %v10323_v50 = vor.u32 %v11763_v41, %v10320_v43  ;;  %v10615_v52 = vor.u32 %v11841_v53, %v10614_v31  ;;  %v11821_v41 = vld [vmem:[#allocation11 + $0x24] sm:$0xf0]  ;;  %v10694_v31 = vld [vmem:[#allocation11 + $0x160] sm:$0xf] }
 0x546   :  { %6295 = vmatpush.bf16.msra.mxu2 %v9587_v46  ;;  %6317 = vmatpush.bf16.msra.mxu0 %v10227_v33  ;;  %v11707_v46 = vld [vmem:[#allocation10 + $0x49c] sm:$0xf] }
 0x547   :  { %v11755_v33 = vld [vmem:[#allocation10 + $0x61c] sm:$0xf]  ;;  %v10099_v55 = vor.u32 %v11707_v46, %v10096_v14 }
 0x548   :  { %6310 = vmatpush.bf16.msra.mxu3 %v9779_v2  ;;  %6332 = vmatpush.bf16.msra.mxu1 %v10419_v3  ;;  %v6067_v0 = vpop.f32.mrf.mxu0  ;;  %v10559_v2 = vor.u32 %v11827_v49, %v10558_v47  ;;  %v10766_v3 = vld [vmem:[#allocation11 + $0x1f0] sm:$0xf]  ;;  %v10291_v61 = vor.u32 %v11755_v33, %v10288_v56 }
 0x549   :  { %v10686_v56 = vld [vmem:[#allocation11 + $0x150] sm:$0xf] }
 0x54a   :  { %6296 = vmatpush.bf16.msra.mxu2 %v9555_v9  ;;  %6318 = vmatpush.bf16.msra.mxu0 %v10195_v58  ;;  %v10550_v9 = vld [vmem:[#allocation11 + $0x40] sm:$0xf]  ;;  %v11825_v58 = vld [vmem:[#allocation11 + $0x44] sm:$0xf0]  ;;  %v10894_v0 = vld [vmem:[#allocation11 + $0x2f0] sm:$0xf] }
 0x54b   :  { %6311 = vmatmul.bf16.vlgmr.msra.gmra.mxu3 %v12510_v10  ;;  %v10567_v10 = vor.u32 %v11829_v19, %v10566_v38  ;;  %v10551_v18 = vor.u32 %v11825_v58, %v10550_v9  ;;  %v10590_v38 = vld [vmem:[#allocation11 + $0x90] sm:$0xf]  ;;  %v11835_v19 = vld [vmem:[#allocation11 + $0x94] sm:$0xf0] }
 0x54c   :  { %7145 = vmatpush.bf16.msrb.mxu3 %v10639_v5  ;;  %6333 = vmatpush.bf16.msra.mxu1 %v10387_v40  ;;  %v11879_v5 = vld [vmem:[#allocation11 + $0x1f4] sm:$0xf0]  ;;  %v11877_v40 = vld [vmem:[#allocation11 + $0x1e4] sm:$0xf0]  ;;  %v10591_v53 = vor.u32 %v11835_v19, %v10590_v38  ;;  %v10734_v58 = vld [vmem:[#allocation11 + $0x1b0] sm:$0xf]  ;;  %v6040_v38 = vadd.f32 %v12565_v44, %v4632_v6 }
 0x54d   :  { %v10767_v12 = vor.u32 %v11879_v5, %v10766_v3  ;;  %v10759_v17 = vor.u32 %v11877_v40, %v10758_v23  ;;  %v11895_v23 = vld [vmem:[#allocation11 + $0x274] sm:$0xf0] }
 0x54e   :  { %6297 = vmatpush.bf16.msra.mxu2 %v9523_v27  ;;  %6319 = vmatpush.bf16.msra.mxu0 %v10163_v28  ;;  %v12576_v21 = vpop.f32.mrf.mxu3  ;;  %v10032_v27 = vld [vmem:[#allocation10 + $0x438] sm:$0xf0]  ;;  %v10542_v28 = vld [vmem:[#allocation11 + $0x30] sm:$0xf]  ;;  %v11851_v6 = vld [vmem:[#allocation11 + $0x114] sm:$0xf0] }
 0x54f   :  { %v10543_v37 = vor.u32 %v11823_v1, %v10542_v28  ;;  %v6342_v28 = vmax.f32 %v12552_v34, 0.0  ;;  %v11855_v34 = vld [vmem:[#allocation11 + $0x134] sm:$0xf0] }
 0x550   :  { %7146 = vmatpush.bf16.msrb.mxu3 %v10631_v25  ;;  %6334 = vmatpush.bf16.msra.mxu1 %v10355_v39  ;;  %v11691_v25 = vld [vmem:[#allocation10 + $0x41c] sm:$0xf]  ;;  %v10750_v39 = vld [vmem:[#allocation11 + $0x1d0] sm:$0xf] }
 0x551   :  { %6298 = vmatmul.bf16.vlgmr.msra.gmra.mxu2 %v12513_v22  ;;  %v5988_v22 = vadd.f32 %v12555_v60, %v4631_v24  ;;  %v10035_v36 = vor.u32 %v11691_v25, %v10032_v27  ;;  %v11833_v24 = vld [vmem:[#allocation11 + $0x84] sm:$0xf0]  ;;  %v10886_v25 = vld [vmem:[#allocation11 + $0x2e0] sm:$0xf] }
 0x552   :  { %7132 = vmatpush.bf16.msrb.mxu2 %v10575_v4  ;;  %6320 = vmatpush.bf16.msra.mxu0 %v10131_v54  ;;  %v10599_v4 = vor.u32 %v11837_v48, %v10598_v13  ;;  %v10534_v54 = vld [vmem:[#allocation11 + $0x20] sm:$0xf]  ;;  %v11909_v27 = vld [vmem:[#allocation11 + $0x2e4] sm:$0xf0] }
 0x553   :  { %v6001_v60 = vadd.f32 %v12550_v20, %v5988_v22  ;;  %v11875_v20 = vld [vmem:[#allocation11 + $0x1d4] sm:$0xf0]  ;;  %v10535_v49 = vor.u32 %v11821_v41, %v10534_v54  ;;  %v10678_v13 = vld [vmem:[#allocation11 + $0x140] sm:$0xf]  ;;  %v10878_v41 = vld [vmem:[#allocation11 + $0x2d0] sm:$0xf] }
 0x554   :  { %7147 = vmatpush.bf16.msrb.mxu3 %v10623_v57  ;;  %6335 = vmatpush.bf16.msra.mxu1 %v10323_v50  ;;  %v10703_v57 = vor.u32 %v11863_v30, %v10702_v29  ;;  %v6091_v43 = vpop.f32.mrf.mxu2  ;;  %v10751_v14 = vor.u32 %v11875_v20, %v10750_v39  ;;  %v11873_v50 = vld [vmem:[#allocation11 + $0x1c4] sm:$0xf0]  ;;  %v11871_v22 = vld [vmem:[#allocation11 + $0x1b4] sm:$0xf0]  ;;  %v10822_v39 = vld [vmem:[#allocation11 + $0x260] sm:$0xf]  ;;  %v10887_v20 = vor.u32 %v11909_v27, %v10886_v25 }
 0x555   :  { %v6014_v35 = vadd.f32 %v12560_v45, %v6001_v60  ;;  %v10582_v45 = vld [vmem:[#allocation11 + $0x80] sm:$0xf]  ;;  %v10735_v60 = vor.u32 %v11871_v22, %v10734_v58  ;;  %v10862_v22 = vld [vmem:[#allocation11 + $0x2b0] sm:$0xf]  ;;  %v11901_v27 = vld [vmem:[#allocation11 + $0x2a4] sm:$0xf0] }
 0x556   :  { %7133 = vmatpush.bf16.msrb.mxu2 %v10567_v10  ;;  %6321 = vmatpush.bf16.msra.mxu0 %v10099_v55  ;;  %v11861_v10 = vld [vmem:[#allocation11 + $0x164] sm:$0xf0]  ;;  %v6106_v47 = vpop.f32.mrf.mxu3  ;;  %v11819_v55 = vld [vmem:[#allocation11 + $0x14] sm:$0xf0]  ;;  %v10583_v3 = vor.u32 %v11833_v24, %v10582_v45  ;;  %v10854_v25 = vld [vmem:[#allocation11 + $0x2a0] sm:$0xf] }
 0x557   :  { %v6027_v46 = vadd.f32 %v12558_v51, %v6014_v35  ;;  %v10695_v33 = vor.u32 %v11861_v10, %v10694_v31  ;;  %v4633_v51 = vperm.slane %v12545_v15, 3  ;;  %v10726_v35 = vld [vmem:[#allocation11 + $0x1a0] sm:$0xf]  ;;  %v12593_v31 = vpack.c.bf16 %v6342_v28, %v6342_v28  ;;  %v11853_v24 = vld [vmem:[#allocation11 + $0x124] sm:$0xf0] }
 0x558   :  { %7148 = vmatpush.bf16.msrb.mxu3 %v10615_v52  ;;  %6336 = vmatpush.bf16.msra.mxu1 %v10291_v61  ;;  %v10526_v52 = vld [vmem:[#allocation11 + $0x10] sm:$0xf]  ;;  %v12582_v62 = vpop.f32.mrf.mxu1  ;;  %v10687_v61 = vor.u32 %v11859_v63, %v10686_v56  ;;  %v10662_v47 = vld [vmem:[#allocation11 + $0x120] sm:$0xf] }
 0x559   :  { %v6343_v5 = vmax.f32 %v6027_v46, 0.0  ;;  %v10527_v9 = vor.u32 %v11819_v55, %v10526_v52  ;;  %v6092_v40 = vadd.f32 %v6091_v43, %v4633_v51  ;;  %v11907_v43 = vld [vmem:[#allocation11 + $0x2d4] sm:$0xf0]  ;;  %v10718_v46 = vld [vmem:[#allocation11 + $0x190] sm:$0xf] }
 0x55a   :  { %7134 = vmatpush.bf16.msrb.mxu2 %v10559_v2  ;;  %6322 = vmatpush.bf16.msra.mxu0 %v10067_v16  ;;  %v11911_v2 = vld [vmem:[#allocation11 + $0x2f4] sm:$0xf0]  ;;  %v11905_v52 = vld [vmem:[#allocation11 + $0x2c4] sm:$0xf0]  ;;  %v10710_v51 = vld [vmem:[#allocation11 + $0x180] sm:$0xf] }
 0x55b   :  { %6337 = vmatmul.bf16.vlgmr.msra.gmra.mxu1 %v12518_v8  ;;  %v10742_v8 = vld [vmem:[#allocation11 + $0x1c0] sm:$0xf]  ;;  %v10895_v48 = vor.u32 %v11911_v2, %v10894_v0  ;;  %v12588_v1 = vpack.c.bf16 %v6343_v5, %v6343_v5  ;;  %v6105_v54 = vadd.f32 %v12576_v21, %v6092_v40  ;;  %v11891_v21 = vld [vmem:[#allocation11 + $0x254] sm:$0xf0]  ;;  %v10663_v2 = vor.u32 %v11853_v24, %v10662_v47  ;;  %v10654_v5 = vld [vmem:[#allocation11 + $0x110] sm:$0xf] }
 0x55c   :  { %7149 = vmatpush.bf16.msrb.mxu3 %v10607_v11  ;;  %7171 = vmatpush.bf16.msrb.mxu1 %v10767_v12  ;;  %v10743_v7 = vor.u32 %v11873_v50, %v10742_v8  ;;  %v10518_v11 = vld [vmem:[#allocation11] sm:$0xf]  ;;  %v11817_v12 = vld [vmem:[#allocation11 + $0x4] sm:$0xf0]  ;;  %v6093_v16 = vpop.f32.mrf.mxu2  ;;  %v10814_v8 = vld [vmem:[#allocation11 + $0x250] sm:$0xf]  ;;  %v10879_v50 = vor.u32 %v11907_v43, %v10878_v41 }
 0x55d   :  { %v10519_v30 = vor.u32 %v11817_v12, %v10518_v11  ;;  %v10646_v16 = vld [vmem:[#allocation11 + $0x100] sm:$0xf]  ;;  %v10958_v28 = vld [vmem:[#allocation11 + $0x370] sm:$0xf] }
 0x55e   :  { %7135 = vmatpush.bf16.msrb.mxu2 %v10551_v18  ;;  %6323 = vmatpush.bf16.msra.mxu0 %v10035_v36  ;;  %v11857_v18 = vld [vmem:[#allocation11 + $0x144] sm:$0xf0]  ;;  %v6117_v29 = vpop.f32.mrf.mxu0  ;;  %v10942_v47 = vld [vmem:[#allocation11 + $0x350] sm:$0xf] }
 0x55f   :  { %v11869_v36 = vld [vmem:[#allocation11 + $0x1a4] sm:$0xf0] }
 0x560   :  { %7150 = vmatpush.bf16.msrb.mxu3 %v10599_v4  ;;  %7172 = vmatpush.bf16.msrb.mxu1 %v10759_v17  ;;  %v10679_v4 = vor.u32 %v11857_v18, %v10678_v13  ;;  %v6132_v19 = vpop.f32.mrf.mxu1  ;;  %v10727_v10 = vor.u32 %v11869_v36, %v10726_v35  ;;  %v10655_v13 = vor.u32 %v11851_v6, %v10654_v5  ;;  %v11849_v18 = vld [vmem:[#allocation11 + $0x104] sm:$0xf0]  ;;  %v11844_v5 = vld [vmem:[#allocation11 + $0xe4] sm:$0xf]  ;;  %v10632_v6 = vld [vmem:[#allocation11 + $0xe8] sm:$0xf0] }
 0x561   :  { %6324 = vmatmul.bf16.vlgmr.msra.gmra.mxu0 %v12522_v59  ;;  %v10830_v59 = vld [vmem:[#allocation11 + $0x270] sm:$0xf]  ;;  %v11885_v35 = vld [vmem:[#allocation11 + $0x224] sm:$0xf0]  ;;  %v10855_v36 = vor.u32 %v11901_v27, %v10854_v25  ;;  %v11826_v25 = vld [vmem:[#allocation11 + $0x54] sm:$0xf] }
 0x562   :  { %7136 = vmatpush.bf16.msrb.mxu2 %v10543_v37  ;;  %7158 = vmatpush.bf16.msrb.mxu0 %v10703_v57  ;;  %v10831_v17 = vor.u32 %v11895_v23, %v10830_v59  ;;  %v10670_v37 = vld [vmem:[#allocation11 + $0x130] sm:$0xf]  ;;  %v11893_v57 = vld [vmem:[#allocation11 + $0x264] sm:$0xf0]  ;;  %v11887_v23 = vld [vmem:[#allocation11 + $0x234] sm:$0xf0] }
 0x563   :  { %v10671_v44 = vor.u32 %v11855_v34, %v10670_v37  ;;  %v10823_v45 = vor.u32 %v11893_v57, %v10822_v39  ;;  %v10798_v59 = vld [vmem:[#allocation11 + $0x230] sm:$0xf]  ;;  %v11899_v34 = vld [vmem:[#allocation11 + $0x294] sm:$0xf0]  ;;  %v10950_v39 = vld [vmem:[#allocation11 + $0x360] sm:$0xf] }
 0x564   :  { %7151 = vmatpush.bf16.msrb.mxu3 %v10591_v53  ;;  %7173 = vmatpush.bf16.msrb.mxu1 %v10751_v14  ;;  %v6118_v53 = vadd.f32 %v6117_v29, %v6105_v54  ;;  %v11867_v14 = vld [vmem:[#allocation11 + $0x194] sm:$0xf0]  ;;  %v10846_v37 = vld [vmem:[#allocation11 + $0x290] sm:$0xf]  ;;  %v11925_v57 = vld [vmem:[#allocation11 + $0x364] sm:$0xf0] }
 0x565   :  { %v10719_v56 = vor.u32 %v11867_v14, %v10718_v46  ;;  %v10951_v46 = vor.u32 %v11925_v57, %v10950_v39  ;;  %v11897_v14 = vld [vmem:[#allocation11 + $0x284] sm:$0xf0]  ;;  %v10560_v27 = vld [vmem:[#allocation11 + $0x58] sm:$0xf0]  ;;  %v11022_v39 = vld [vmem:[#allocation11 + $0x3f0] sm:$0xf] }
 0x566   :  { %7137 = vmatpush.bf16.msrb.mxu2 %v10535_v49  ;;  %7159 = vmatpush.bf16.msrb.mxu0 %v10695_v33  ;;  %v6053_v49 = vadd.f32 %v12562_v26, %v6040_v38  ;;  %v10870_v33 = vld [vmem:[#allocation11 + $0x2c0] sm:$0xf]  ;;  %v6119_v63 = vpop.f32.mrf.mxu0  ;;  %v6131_v0 = vadd.f32 %v12582_v62, %v6118_v53  ;;  %v10815_v26 = vor.u32 %v11891_v21, %v10814_v8  ;;  %v11883_v53 = vld [vmem:[#allocation11 + $0x214] sm:$0xf0]  ;;  %v11846_v8 = vld [vmem:[#allocation11 + $0xf4] sm:$0xf] }
 0x567   :  { %v10871_v58 = vor.u32 %v11905_v52, %v10870_v33  ;;  %v10640_v21 = vld [vmem:[#allocation11 + $0xf8] sm:$0xf0]  ;;  %v10774_v33 = vld [vmem:[#allocation11 + $0x200] sm:$0xf]  ;;  %v11881_v52 = vld [vmem:[#allocation11 + $0x204] sm:$0xf0] }
 0x568   :  { %7152 = vmatpush.bf16.msrb.mxu3 %v10583_v3  ;;  %7174 = vmatpush.bf16.msrb.mxu1 %v10743_v7  ;;  %v6066_v55 = vadd.f32 %v12571_v32, %v6053_v49  ;;  %v11865_v3 = vld [vmem:[#allocation11 + $0x184] sm:$0xf0]  ;;  %v10806_v7 = vld [vmem:[#allocation11 + $0x240] sm:$0xf]  ;;  %v6345_v12 = vmax.f32 %v6131_v0, 0.0 }
 0x569   :  { %v10711_v32 = vor.u32 %v11865_v3, %v10710_v51  ;;  %v11923_v49 = vld [vmem:[#allocation11 + $0x354] sm:$0xf0]  ;;  %v10934_v51 = vld [vmem:[#allocation11 + $0x340] sm:$0xf]  ;;  %v11921_v3 = vld [vmem:[#allocation11 + $0x344] sm:$0xf0] }
 0x56a   :  { %7138 = vmatpush.bf16.msrb.mxu2 %v10527_v9  ;;  %7160 = vmatpush.bf16.msrb.mxu0 %v10687_v61  ;;  %v11889_v9 = vld [vmem:[#allocation11 + $0x244] sm:$0xf0]  ;;  %v11903_v61 = vld [vmem:[#allocation11 + $0x2b4] sm:$0xf0]  ;;  %v6079_v11 = vadd.f32 %v12568_v42, %v6066_v55  ;;  %v12602_v42 = vpack.c.bf16 %v6345_v12, %v6345_v12  ;;  %v11830_v55 = vld [vmem:[#allocation11 + $0x74] sm:$0xf]  ;;  %v10943_v63 = vor.u32 %v11923_v49, %v10942_v47 }
 0x56b   :  { %7153 = vmatmul.bf16.vlgmr.msrb.gmra.mxu3 %v12588_v1  ;;  %v10863_v40 = vor.u32 %v11903_v61, %v10862_v22  ;;  %v11828_v61 = vld [vmem:[#allocation11 + $0x64] sm:$0xf]  ;;  %v10568_v12 = vld [vmem:[#allocation11 + $0x68] sm:$0xf0]  ;;  %v11943_v57 = vld [vmem:[#allocation11 + $0x3f4] sm:$0xf0] }
 0x56c   :  { %7197 = vmatpush.bf16.msra.mxu3 %v10895_v48  ;;  %7175 = vmatpush.bf16.msrb.mxu1 %v10735_v60  ;;  %v10807_v48 = vor.u32 %v11889_v9, %v10806_v7  ;;  %v11927_v60 = vld [vmem:[#allocation11 + $0x374] sm:$0xf0]  ;;  %v6344_v29 = vmax.f32 %v6079_v11, 0.0  ;;  %v10775_v9 = vor.u32 %v11881_v52, %v10774_v33  ;;  %v11941_v47 = vld [vmem:[#allocation11 + $0x3e4] sm:$0xf0] }
 0x56d   :  { %v10959_v38 = vor.u32 %v11927_v60, %v10958_v28 }
 0x56e   :  { %7139 = vmatpush.bf16.msrb.mxu2 %v10519_v30  ;;  %7161 = vmatpush.bf16.msrb.mxu0 %v10679_v4  ;;  %v12600_v62 = vpop.f32.mrf.mxu3  ;;  %v10647_v30 = vor.u32 %v11849_v18, %v10646_v16  ;;  %v10799_v4 = vor.u32 %v11887_v23, %v10798_v59  ;;  %v12606_v43 = vpack.c.bf16 %v6344_v29, %v6344_v29  ;;  %v11919_v16 = vld [vmem:[#allocation11 + $0x334] sm:$0xf0]  ;;  %v11842_v59 = vld [vmem:[#allocation11 + $0xd4] sm:$0xf]  ;;  %v10624_v23 = vld [vmem:[#allocation11 + $0xd8] sm:$0xf0] }
 0x56f   :  { %v10627_v29 = vor.u32 %v11842_v59, %v10624_v23 }
 0x570   :  { %7198 = vmatpush.bf16.msra.mxu3 %v10887_v20  ;;  %7176 = vmatpush.bf16.msrb.mxu1 %v10727_v10  ;;  %v4634_v20 = vperm.slane %v12545_v15, 4  ;;  %v10782_v10 = vld [vmem:[#allocation11 + $0x210] sm:$0xf] }
 0x571   :  { %7140 = vmatmul.bf16.vlgmr.msrb.gmra.mxu2 %v12593_v31 }
 0x572   :  { %7184 = vmatpush.bf16.msra.mxu2 %v10831_v17  ;;  %7162 = vmatpush.bf16.msrb.mxu0 %v10671_v44  ;;  %v10790_v17 = vld [vmem:[#allocation11 + $0x220] sm:$0xf]  ;;  %v10847_v44 = vor.u32 %v11899_v34, %v10846_v37 }
 0x573   :  { %v10791_v41 = vor.u32 %v11885_v35, %v10790_v17  ;;  %v11840_v17 = vld [vmem:[#allocation11 + $0xc4] sm:$0xf]  ;;  %v10616_v35 = vld [vmem:[#allocation11 + $0xc8] sm:$0xf0] }
 0x574   :  { %7199 = vmatpush.bf16.msra.mxu3 %v10879_v50  ;;  %7177 = vmatpush.bf16.msrb.mxu1 %v10719_v56  ;;  %v6143_v19 = vpop.f32.mrf.mxu2  ;;  %v10783_v50 = vor.u32 %v11883_v53, %v10782_v10  ;;  %v11915_v10 = vld [vmem:[#allocation11 + $0x314] sm:$0xf0]  ;;  %v11023_v53 = vor.u32 %v11943_v57, %v11022_v39  ;;  %v10520_v57 = vld [vmem:[#allocation11 + $0x8] sm:$0xf0] }
 0x575   :  { %v6144_v15 = vadd.f32 %v6143_v19, %v4634_v20  ;;  %v11824_v19 = vld [vmem:[#allocation11 + $0x44] sm:$0xf]  ;;  %v10552_v20 = vld [vmem:[#allocation11 + $0x48] sm:$0xf0] }
 0x576   :  { %7185 = vmatpush.bf16.msra.mxu2 %v10823_v45  ;;  %7163 = vmatpush.bf16.msrb.mxu0 %v10663_v2  ;;  %v6158_v54 = vpop.f32.mrf.mxu3  ;;  %v10838_v45 = vld [vmem:[#allocation11 + $0x280] sm:$0xf]  ;;  %v10576_v2 = vld [vmem:[#allocation11 + $0x78] sm:$0xf0]  ;;  %v10555_v49 = vor.u32 %v11824_v19, %v10552_v20  ;;  %v11816_v19 = vld [vmem:[#allocation11 + $0x4] sm:$0xf] }
 0x577   :  { %v10839_v56 = vor.u32 %v11897_v14, %v10838_v45  ;;  %v6157_v7 = vadd.f32 %v12600_v62, %v6144_v15  ;;  %v10579_v22 = vor.u32 %v11830_v55, %v10576_v2  ;;  %v10571_v62 = vor.u32 %v11828_v61, %v10568_v12  ;;  %v10608_v45 = vld [vmem:[#allocation11 + $0xb8] sm:$0xf0]  ;;  %v11014_v14 = vld [vmem:[#allocation11 + $0x3e0] sm:$0xf]  ;;  %v11894_v20 = vld [vmem:[#allocation11 + $0x274] sm:$0xf] }
 0x578   :  { %7200 = vmatpush.bf16.msra.mxu3 %v10871_v58  ;;  %7178 = vmatpush.bf16.msrb.mxu1 %v10711_v32  ;;  %v6182_v24 = vpop.f32.mrf.mxu1  ;;  %v10935_v32 = vor.u32 %v11921_v3, %v10934_v51  ;;  %v10619_v54 = vor.u32 %v11840_v17, %v10616_v35  ;;  %v10902_v55 = vld [vmem:[#allocation11 + $0x300] sm:$0xf]  ;;  %v10704_v2 = vld [vmem:[#allocation11 + $0x178] sm:$0xf0]  ;;  %v10990_v17 = vld [vmem:[#allocation11 + $0x3b0] sm:$0xf] }
 0x579   :  { %v10592_v61 = vld [vmem:[#allocation11 + $0x98] sm:$0xf0]  ;;  %v11935_v35 = vld [vmem:[#allocation11 + $0x3b4] sm:$0xf0] }
 0x57a   :  { %7186 = vmatpush.bf16.msra.mxu2 %v10815_v26  ;;  %7164 = vmatpush.bf16.msrb.mxu0 %v10655_v13  ;;  %v10643_v26 = vor.u32 %v11846_v8, %v10640_v21  ;;  %v10635_v13 = vor.u32 %v11844_v5, %v10632_v6  ;;  %v11836_v8 = vld [vmem:[#allocation11 + $0xa4] sm:$0xf]  ;;  %v10600_v21 = vld [vmem:[#allocation11 + $0xa8] sm:$0xf0] }
 0x57b   :  { %7179 = vmatmul.bf16.vlgmr.msrb.gmra.mxu1 %v12602_v42  ;;  %v11820_v6 = vld [vmem:[#allocation11 + $0x24] sm:$0xf] }
 0x57c   :  { %7201 = vmatpush.bf16.msra.mxu3 %v10863_v40  ;;  %v6145_v0 = vpop.f32.mrf.mxu2  ;;  %7223 = vmatpush.bf16.msra.mxu1 %v11023_v53  ;;  %v11856_v53 = vld [vmem:[#allocation11 + $0x144] sm:$0xf] }
 0x57d   :  { %v11862_v0 = vld [vmem:[#allocation11 + $0x174] sm:$0xf] }
 0x57e   :  { %7187 = vmatpush.bf16.msra.mxu2 %v10807_v48  ;;  %7165 = vmatpush.bf16.msrb.mxu0 %v10647_v30  ;;  %v6169_v58 = vpop.f32.mrf.mxu0  ;;  %v10926_v48 = vld [vmem:[#allocation11 + $0x330] sm:$0xf]  ;;  %v10918_v30 = vld [vmem:[#allocation11 + $0x320] sm:$0xf] }
 0x57f   :  { %v6170_v11 = vadd.f32 %v6169_v58, %v6157_v7  ;;  %v10927_v28 = vor.u32 %v11919_v16, %v10926_v48  ;;  %v10536_v7 = vld [vmem:[#allocation11 + $0x28] sm:$0xf0]  ;;  %v11834_v58 = vld [vmem:[#allocation11 + $0x94] sm:$0xf]  ;;  %v11937_v48 = vld [vmem:[#allocation11 + $0x3c4] sm:$0xf0] }
 0x580   :  { %7202 = vmatpush.bf16.msra.mxu3 %v10855_v36  ;;  %v6184_v18 = vpop.f32.mrf.mxu1  ;;  %v12618_v16 = vld [vmem:[%s12658_s15] sm:$0xff]  ;;  %v10539_v59 = vor.u32 %v11820_v6, %v10536_v7  ;;  %v11910_v6 = vld [vmem:[#allocation11 + $0x2f4] sm:$0xf]  ;;  %v10896_v7 = vld [vmem:[#allocation11 + $0x2f8] sm:$0xf0] }
 0x581   :  { %7166 = vmatmul.bf16.vlgmr.msrb.gmra.mxu0 %v12606_v43  ;;  %v6183_v40 = vadd.f32 %v6182_v24, %v6170_v11  ;;  %v10544_v24 = vld [vmem:[#allocation11 + $0x38] sm:$0xf0]  ;;  %v10696_v11 = vld [vmem:[#allocation11 + $0x168] sm:$0xf0]  ;;  %v4635_v18 = vperm.slane %v12618_v16, 5 }
 0x582   :  { %7188 = vmatpush.bf16.msra.mxu2 %v10799_v4  ;;  %7210 = vmatpush.bf16.msra.mxu0 %v10959_v38  ;;  %v11917_v4 = vld [vmem:[#allocation11 + $0x324] sm:$0xf0]  ;;  %v10563_v38 = vor.u32 %v11826_v25, %v10560_v27  ;;  %v10528_v25 = vld [vmem:[#allocation11 + $0x18] sm:$0xf0]  ;;  %v10595_v27 = vor.u32 %v11834_v58, %v10592_v61  ;;  %v10664_v61 = vld [vmem:[#allocation11 + $0x128] sm:$0xf0] }
 0x583   :  { %v6346_v60 = vmax.f32 %v6183_v40, 0.0  ;;  %v10919_v34 = vor.u32 %v11917_v4, %v10918_v30  ;;  %v11858_v30 = vld [vmem:[#allocation11 + $0x154] sm:$0xf]  ;;  %v10688_v4 = vld [vmem:[#allocation11 + $0x158] sm:$0xf0] }
 0x584   :  { %7203 = vmatpush.bf16.msra.mxu3 %v10847_v44  ;;  %v11838_v44 = vld [vmem:[#allocation11 + $0xb4] sm:$0xf] }
 0x585   :  { %v12610_v36 = vpack.c.bf16 %v6346_v60, %v6346_v60  ;;  %v10611_v52 = vor.u32 %v11838_v44, %v10608_v45  ;;  %v10680_v44 = vld [vmem:[#allocation11 + $0x148] sm:$0xf0] }
 0x586   :  { %7189 = vmatpush.bf16.msra.mxu2 %v10791_v41  ;;  %7211 = vmatpush.bf16.msra.mxu0 %v10951_v46  ;;  %v6171_v37 = vpop.f32.mrf.mxu0  ;;  %v10910_v41 = vld [vmem:[#allocation11 + $0x310] sm:$0xf]  ;;  %v11822_v46 = vld [vmem:[#allocation11 + $0x34] sm:$0xf] }
 0x587   :  { %v10911_v15 = vor.u32 %v11915_v10, %v10910_v41  ;;  %v10547_v3 = vor.u32 %v11822_v46, %v10544_v24  ;;  %v10691_v10 = vor.u32 %v11858_v30, %v10688_v4  ;;  %v10523_v46 = vor.u32 %v11816_v19, %v10520_v57  ;;  %v11878_v30 = vld [vmem:[#allocation11 + $0x1f4] sm:$0xf]  ;;  %v10880_v19 = vld [vmem:[#allocation11 + $0x2d8] sm:$0xf0]  ;;  %v10760_v57 = vld [vmem:[#allocation11 + $0x1e8] sm:$0xf0] }
 0x588   :  { %7204 = vmatpush.bf16.msra.mxu3 %v10839_v56  ;;  %v11913_v56 = vld [vmem:[#allocation11 + $0x304] sm:$0xf0] }
 0x589   :  { %v10903_v5 = vor.u32 %v11913_v56, %v10902_v55  ;;  %v11854_v55 = vld [vmem:[#allocation11 + $0x134] sm:$0xf]  ;;  %v10672_v56 = vld [vmem:[#allocation11 + $0x138] sm:$0xf0] }
 0x58a   :  { %7190 = vmatpush.bf16.msra.mxu2 %v10783_v50  ;;  %7212 = vmatpush.bf16.msra.mxu0 %v10943_v63  ;;  %v11015_v50 = vor.u32 %v11941_v47, %v11014_v14  ;;  %v11006_v63 = vld [vmem:[#allocation11 + $0x3d0] sm:$0xf]  ;;  %v10982_v47 = vld [vmem:[#allocation11 + $0x3a0] sm:$0xf] }
 0x58c   :  { %7249 = vmatpush.bf16.msrb.mxu3 %v10643_v26  ;;  %v11939_v26 = vld [vmem:[#allocation11 + $0x3d4] sm:$0xf0]  ;;  %7224 = vmatpush.bf16.msra.mxu1 %v11015_v50 }
 0x58d   :  { %v11007_v51 = vor.u32 %v11939_v26, %v11006_v63  ;;  %v11890_v26 = vld [vmem:[#allocation11 + $0x254] sm:$0xf] }
 0x58e   :  { %7191 = vmatpush.bf16.msra.mxu2 %v10775_v9  ;;  %7213 = vmatpush.bf16.msra.mxu0 %v10935_v32  ;;  %v12613_v33 = vpop.f32.mrf.mxu3  ;;  %v10603_v9 = vor.u32 %v11836_v8, %v10600_v21  ;;  %v11860_v32 = vld [vmem:[#allocation11 + $0x164] sm:$0xf]  ;;  %v10824_v21 = vld [vmem:[#allocation11 + $0x268] sm:$0xf0] }
 0x58f   :  { %v10699_v60 = vor.u32 %v11860_v32, %v10696_v11  ;;  %v11892_v8 = vld [vmem:[#allocation11 + $0x264] sm:$0xf] }
 0x590   :  { %7250 = vmatpush.bf16.msrb.mxu3 %v10635_v13  ;;  %7225 = vmatpush.bf16.msra.mxu1 %v11007_v51  ;;  %v10998_v13 = vld [vmem:[#allocation11 + $0x3c0] sm:$0xf]  ;;  %v10974_v51 = vld [vmem:[#allocation11 + $0x390] sm:$0xf] }
 0x591   :  { %7192 = vmatmul.bf16.vlgmr.msra.gmra.mxu2 %v12610_v36  ;;  %v10999_v23 = vor.u32 %v11937_v48, %v10998_v13  ;;  %v11888_v13 = vld [vmem:[#allocation11 + $0x244] sm:$0xf]  ;;  %v10808_v48 = vld [vmem:[#allocation11 + $0x248] sm:$0xf0] }
 0x592   :  { %7236 = vmatpush.bf16.msrb.mxu2 %v10579_v22  ;;  %7214 = vmatpush.bf16.msra.mxu0 %v10927_v28  ;;  %v10707_v22 = vor.u32 %v11862_v0, %v10704_v2  ;;  %v11832_v28 = vld [vmem:[#allocation11 + $0x84] sm:$0xf]  ;;  %v10827_v2 = vor.u32 %v11892_v8, %v10824_v21  ;;  %v10792_v21 = vld [vmem:[#allocation11 + $0x228] sm:$0xf0] }
 0x593   :  { %v11884_v8 = vld [vmem:[#allocation11 + $0x224] sm:$0xf] }
 0x594   :  { %7251 = vmatpush.bf16.msrb.mxu3 %v10627_v29  ;;  %v6195_v12 = vpop.f32.mrf.mxu2  ;;  %v10584_v29 = vld [vmem:[#allocation11 + $0x88] sm:$0xf0]  ;;  %7226 = vmatpush.bf16.msra.mxu1 %v10999_v23 }
 0x595   :  { %v6196_v39 = vadd.f32 %v6195_v12, %v4635_v18  ;;  %v10587_v41 = vor.u32 %v11832_v28, %v10584_v29  ;;  %v10899_v12 = vor.u32 %v11910_v6, %v10896_v7  ;;  %v10966_v18 = vld [vmem:[#allocation11 + $0x380] sm:$0xf]  ;;  %v10656_v29 = vld [vmem:[#allocation11 + $0x118] sm:$0xf0]  ;;  %v11900_v7 = vld [vmem:[#allocation11 + $0x2a4] sm:$0xf] }
 0x596   :  { %7237 = vmatpush.bf16.msrb.mxu2 %v10571_v62  ;;  %7215 = vmatpush.bf16.msra.mxu0 %v10919_v34  ;;  %v6210_v40 = vpop.f32.mrf.mxu3  ;;  %v11818_v62 = vld [vmem:[#allocation11 + $0x14] sm:$0xf]  ;;  %v10991_v34 = vor.u32 %v11935_v35, %v10990_v17 }
 0x597   :  { %v6209_v24 = vadd.f32 %v12613_v33, %v6196_v39  ;;  %v10816_v33 = vld [vmem:[#allocation11 + $0x258] sm:$0xf0]  ;;  %v11908_v40 = vld [vmem:[#allocation11 + $0x2e4] sm:$0xf]  ;;  %v11886_v35 = vld [vmem:[#allocation11 + $0x234] sm:$0xf] }
 0x598   :  { %7252 = vmatpush.bf16.msrb.mxu3 %v10619_v54  ;;  %v6234_v37 = vpop.f32.mrf.mxu1  ;;  %v10832_v54 = vld [vmem:[#allocation11 + $0x278] sm:$0xf0]  ;;  %7227 = vmatpush.bf16.msra.mxu1 %v10991_v34  ;;  %v10819_v11 = vor.u32 %v11890_v26, %v10816_v33  ;;  %v11876_v39 = vld [vmem:[#allocation11 + $0x1e4] sm:$0xf]  ;;  %v11882_v26 = vld [vmem:[#allocation11 + $0x214] sm:$0xf] }
 0x599   :  { %v10835_v14 = vor.u32 %v11894_v20, %v10832_v54  ;;  %v10800_v20 = vld [vmem:[#allocation11 + $0x238] sm:$0xf0]  ;;  %v11848_v54 = vld [vmem:[#allocation11 + $0x104] sm:$0xf] }
 0x59a   :  { %7238 = vmatpush.bf16.msrb.mxu2 %v10563_v38  ;;  %7216 = vmatpush.bf16.msra.mxu0 %v10911_v15  ;;  %v10531_v38 = vor.u32 %v11818_v62, %v10528_v25  ;;  %v10683_v15 = vor.u32 %v11856_v53, %v10680_v44  ;;  %v10888_v62 = vld [vmem:[#allocation11 + $0x2e8] sm:$0xf0]  ;;  %v11874_v44 = vld [vmem:[#allocation11 + $0x1d4] sm:$0xf] }
 0x59b   :  { %v10891_v17 = vor.u32 %v11908_v40, %v10888_v62 }
 0x59c   :  { %7253 = vmatpush.bf16.msrb.mxu3 %v10611_v52  ;;  %v6197_v45 = vpop.f32.mrf.mxu2 }
 0x59d   :  { %v10752_v45 = vld [vmem:[#allocation11 + $0x1d8] sm:$0xf0] }
 0x59e   :  { %7239 = vmatpush.bf16.msrb.mxu2 %v10555_v49  ;;  %7217 = vmatpush.bf16.msra.mxu0 %v10903_v5  ;;  %v11933_v49 = vld [vmem:[#allocation11 + $0x3a4] sm:$0xf0]  ;;  %v6221_v52 = vpop.f32.mrf.mxu0 }
 0x59f   :  { %v10983_v50 = vor.u32 %v11933_v49, %v10982_v47  ;;  %v6222_v63 = vadd.f32 %v6221_v52, %v6209_v24  ;;  %v11904_v47 = vld [vmem:[#allocation11 + $0x2c4] sm:$0xf]  ;;  %v10872_v49 = vld [vmem:[#allocation11 + $0x2c8] sm:$0xf0]  ;;  %v11902_v52 = vld [vmem:[#allocation11 + $0x2b4] sm:$0xf] }
 0x5a0   :  { %7254 = vmatpush.bf16.msrb.mxu3 %v10603_v9  ;;  %v6236_v0 = vpop.f32.mrf.mxu1  ;;  %v10675_v9 = vor.u32 %v11854_v55, %v10672_v56  ;;  %v10795_v56 = vor.u32 %v11884_v8, %v10792_v21 }
 0x5a1   :  { %7228 = vmatpush.bf16.msra.mxu1 %v10983_v50  ;;  %v6235_v5 = vadd.f32 %v6234_v37, %v6222_v63  ;;  %v11906_v37 = vld [vmem:[#allocation11 + $0x2d4] sm:$0xf]  ;;  %v10875_v50 = vor.u32 %v11904_v47, %v10872_v49  ;;  %v10864_v63 = vld [vmem:[#allocation11 + $0x2b8] sm:$0xf0]  ;;  %v11872_v0 = vld [vmem:[#allocation11 + $0x1c4] sm:$0xf] }
 0x5a2   :  { %7240 = vmatpush.bf16.msrb.mxu2 %v10547_v3  ;;  %7262 = vmatpush.bf16.msrb.mxu0 %v10707_v22  ;;  %v11931_v3 = vld [vmem:[#allocation11 + $0x394] sm:$0xf0]  ;;  %v11852_v22 = vld [vmem:[#allocation11 + $0x124] sm:$0xf]  ;;  %v10867_v6 = vor.u32 %v11902_v52, %v10864_v63  ;;  %v10928_v63 = vld [vmem:[#allocation11 + $0x338] sm:$0xf0] }
 0x5a3   :  { %v10975_v58 = vor.u32 %v11931_v3, %v10974_v51  ;;  %v6347_v32 = vmax.f32 %v6235_v5, 0.0  ;;  %v10667_v25 = vor.u32 %v11852_v22, %v10664_v61  ;;  %v10784_v51 = vld [vmem:[#allocation11 + $0x218] sm:$0xf0]  ;;  %v4636_v5 = vperm.slane %v12618_v16, 6  ;;  %v11870_v22 = vld [vmem:[#allocation11 + $0x1b4] sm:$0xf] }
 0x5a4   :  { %7255 = vmatpush.bf16.msrb.mxu3 %v10595_v27  ;;  %v11850_v27 = vld [vmem:[#allocation11 + $0x114] sm:$0xf]  ;;  %v10736_v61 = vld [vmem:[#allocation11 + $0x1b8] sm:$0xf0] }
 0x5a5   :  { %7229 = vmatpush.bf16.msra.mxu1 %v10975_v58  ;;  %v12623_v23 = vpack.c.bf16 %v6347_v32, %v6347_v32  ;;  %v10659_v34 = vor.u32 %v11850_v27, %v10656_v29  ;;  %v10856_v58 = vld [vmem:[#allocation11 + $0x2a8] sm:$0xf0]  ;;  %v11868_v27 = vld [vmem:[#allocation11 + $0x1a4] sm:$0xf] }
 0x5a6   :  { %7241 = vmatpush.bf16.msrb.mxu2 %v10539_v59  ;;  %7263 = vmatpush.bf16.msrb.mxu0 %v10699_v60  ;;  %v11929_v59 = vld [vmem:[#allocation11 + $0x384] sm:$0xf0]  ;;  %v6223_v60 = vpop.f32.mrf.mxu0 }
 0x5a7   :  { %v10967_v28 = vor.u32 %v11929_v59, %v10966_v18  ;;  %7205 = vmatmul.bf16.vlgmr.msra.gmra.mxu3 %v12623_v23  ;;  %v10859_v18 = vor.u32 %v11900_v7, %v10856_v58  ;;  %v11898_v59 = vld [vmem:[#allocation11 + $0x294] sm:$0xf] }
 0x5a8   :  { %7256 = vmatpush.bf16.msrb.mxu3 %v10587_v41  ;;  %v10648_v41 = vld [vmem:[#allocation11 + $0x108] sm:$0xf0]  ;;  %v11914_v7 = vld [vmem:[#allocation11 + $0x314] sm:$0xf] }
 0x5a9   :  { %7230 = vmatpush.bf16.msra.mxu1 %v10967_v28  ;;  %v10651_v24 = vor.u32 %v11848_v54, %v10648_v41  ;;  %v10728_v28 = vld [vmem:[#allocation11 + $0x1a8] sm:$0xf0]  ;;  %v11864_v41 = vld [vmem:[#allocation11 + $0x184] sm:$0xf] }
 0x5aa   :  { %7242 = vmatpush.bf16.msrb.mxu2 %v10531_v38  ;;  %7264 = vmatpush.bf16.msrb.mxu0 %v10691_v10  ;;  %v10811_v38 = vor.u32 %v11888_v13, %v10808_v48  ;;  %v10763_v10 = vor.u32 %v11876_v39, %v10760_v57  ;;  %v10739_v13 = vor.u32 %v11870_v22, %v10736_v61  ;;  %v11926_v39 = vld [vmem:[#allocation11 + $0x374] sm:$0xf]  ;;  %v10960_v57 = vld [vmem:[#allocation11 + $0x378] sm:$0xf0] }
 0x5ab   :  { %v10731_v60 = vor.u32 %v11868_v27, %v10728_v28  ;;  %v11016_v27 = vld [vmem:[#allocation11 + $0x3e8] sm:$0xf0] }
 0x5ac   :  { %7301 = vmatpush.bf16.msra.mxu3 %v10899_v12  ;;  %v10776_v12 = vld [vmem:[#allocation11 + $0x208] sm:$0xf0] }
 0x5ae   :  { %7243 = vmatpush.bf16.msrb.mxu2 %v10523_v46  ;;  %7265 = vmatpush.bf16.msrb.mxu0 %v10683_v15  ;;  %v6260_v53 = vpop.f32.mrf.mxu3  ;;  %v10883_v46 = vor.u32 %v11906_v37, %v10880_v19  ;;  %v10755_v15 = vor.u32 %v11874_v44, %v10752_v45  ;;  %v10720_v37 = vld [vmem:[#allocation11 + $0x198] sm:$0xf0] }
 0x5b0   :  { %7302 = vmatpush.bf16.msra.mxu3 %v10891_v17 }
 0x5b1   :  { %7244 = vmatmul.bf16.vlgmr.msrb.gmra.mxu2 %v12593_v31  ;;  %v10768_v31 = vld [vmem:[#allocation11 + $0x1f8] sm:$0xf0] }
 0x5b2   :  { %7288 = vmatpush.bf16.msra.mxu2 %v10835_v14  ;;  %7266 = vmatpush.bf16.msrb.mxu0 %v10675_v9  ;;  %v10771_v4 = vor.u32 %v11878_v30, %v10768_v31  ;;  %v10803_v14 = vor.u32 %v11886_v35, %v10800_v20  ;;  %v10787_v9 = vor.u32 %v11882_v26, %v10784_v51  ;;  %v10840_v35 = vld [vmem:[#allocation11 + $0x288] sm:$0xf0]  ;;  %v11916_v51 = vld [vmem:[#allocation11 + $0x324] sm:$0xf] }
 0x5b4   :  { %7275 = vmatpush.bf16.msrb.mxu1 %v10771_v4  ;;  %7303 = vmatpush.bf16.msra.mxu3 %v10883_v46  ;;  %v6247_v55 = vpop.f32.mrf.mxu2  ;;  %v11896_v4 = vld [vmem:[#allocation11 + $0x284] sm:$0xf] }
 0x5b5   :  { %v6248_v48 = vadd.f32 %v6247_v55, %v4636_v5  ;;  %v10843_v20 = vor.u32 %v11896_v4, %v10840_v35  ;;  %v11924_v46 = vld [vmem:[#allocation11 + $0x364] sm:$0xf] }
 0x5b6   :  { %7289 = vmatpush.bf16.msra.mxu2 %v10827_v2  ;;  %7267 = vmatpush.bf16.msrb.mxu0 %v10667_v25  ;;  %v10744_v2 = vld [vmem:[#allocation11 + $0x1c8] sm:$0xf0]  ;;  %v6262_v33 = vpop.f32.mrf.mxu3  ;;  %v10848_v25 = vld [vmem:[#allocation11 + $0x298] sm:$0xf0] }
 0x5b7   :  { %v10747_v3 = vor.u32 %v11872_v0, %v10744_v2  ;;  %7257 = vmatmul.bf16.vlgmr.msrb.gmra.mxu3 %v12588_v1  ;;  %v6261_v29 = vadd.f32 %v6260_v53, %v6248_v48  ;;  %v10851_v31 = vor.u32 %v11898_v59, %v10848_v25  ;;  %v11866_v1 = vld [vmem:[#allocation11 + $0x194] sm:$0xf]  ;;  %v10963_v53 = vor.u32 %v11926_v39, %v10960_v57  ;;  %v11940_v25 = vld [vmem:[#allocation11 + $0x3e4] sm:$0xf]  ;;  %v10992_v57 = vld [vmem:[#allocation11 + $0x3b8] sm:$0xf0] }
 0x5b8   :  { %7276 = vmatpush.bf16.msrb.mxu1 %v10763_v10  ;;  %7304 = vmatpush.bf16.msra.mxu3 %v10875_v50  ;;  %v6286_v32 = vpop.f32.mrf.mxu1  ;;  %v10723_v19 = vor.u32 %v11866_v1, %v10720_v37  ;;  %v10712_v10 = vld [vmem:[#allocation11 + $0x188] sm:$0xf0]  ;;  %v4637_v0 = vperm.slane %v12618_v16, 7  ;;  %v11912_v16 = vld [vmem:[#allocation11 + $0x304] sm:$0xf] }
 0x5b9   :  { %v10715_v44 = vor.u32 %v11864_v41, %v10712_v10  ;;  %v10936_v50 = vld [vmem:[#allocation11 + $0x348] sm:$0xf0]  ;;  %v11942_v48 = vld [vmem:[#allocation11 + $0x3f4] sm:$0xf]  ;;  %v11936_v1 = vld [vmem:[#allocation11 + $0x3c4] sm:$0xf] }
 0x5ba   :  { %7290 = vmatpush.bf16.msra.mxu2 %v10819_v11  ;;  %7268 = vmatpush.bf16.msrb.mxu0 %v10659_v34  ;;  %v11880_v11 = vld [vmem:[#allocation11 + $0x204] sm:$0xf]  ;;  %v11000_v37 = vld [vmem:[#allocation11 + $0x3c8] sm:$0xf0]  ;;  %v11934_v39 = vld [vmem:[#allocation11 + $0x3b4] sm:$0xf] }
 0x5bb   :  { %v10779_v62 = vor.u32 %v11880_v11, %v10776_v12  ;;  %v10904_v11 = vld [vmem:[#allocation11 + $0x308] sm:$0xf0]  ;;  %v10995_v41 = vor.u32 %v11934_v39, %v10992_v57  ;;  %v11932_v10 = vld [vmem:[#allocation11 + $0x3a4] sm:$0xf] }
 0x5bc   :  { %7277 = vmatpush.bf16.msrb.mxu1 %v10755_v15  ;;  %7305 = vmatpush.bf16.msra.mxu3 %v10867_v6  ;;  %v6249_v40 = vpop.f32.mrf.mxu2  ;;  %v11920_v15 = vld [vmem:[#allocation11 + $0x344] sm:$0xf]  ;;  %v10907_v59 = vor.u32 %v11912_v16, %v10904_v11 }
 0x5bd   :  { %v10939_v52 = vor.u32 %v11920_v15, %v10936_v50 }
 0x5be   :  { %7291 = vmatpush.bf16.msra.mxu2 %v10811_v38  ;;  %7269 = vmatpush.bf16.msrb.mxu0 %v10651_v24  ;;  %v6273_v30 = vpop.f32.mrf.mxu0  ;;  %v10944_v24 = vld [vmem:[#allocation11 + $0x358] sm:$0xf0] }
 0x5bf   :  { %v6274_v17 = vadd.f32 %v6273_v30, %v6261_v29  ;;  %v11938_v29 = vld [vmem:[#allocation11 + $0x3d4] sm:$0xf]  ;;  %v11008_v30 = vld [vmem:[#allocation11 + $0x3d8] sm:$0xf0] }
 0x5c0   :  { %7278 = vmatpush.bf16.msrb.mxu1 %v10747_v3  ;;  %7306 = vmatpush.bf16.msra.mxu3 %v10859_v18  ;;  %v6288_v38 = vpop.f32.mrf.mxu1  ;;  %v10920_v3 = vld [vmem:[#allocation11 + $0x328] sm:$0xf0]  ;;  %v11024_v18 = vld [vmem:[#allocation11 + $0x3f8] sm:$0xf0] }
 0x5c1   :  { %v6287_v34 = vadd.f32 %v6286_v32, %v6274_v17  ;;  %v10923_v33 = vor.u32 %v11916_v51, %v10920_v3  ;;  %v11011_v17 = vor.u32 %v11938_v29, %v11008_v30 }
 0x5c2   :  { %7292 = vmatpush.bf16.msra.mxu2 %v10803_v14  ;;  %v10952_v14 = vld [vmem:[#allocation11 + $0x368] sm:$0xf0] }
 0x5c3   :  { %v6348_v54 = vmax.f32 %v6287_v34, 0.0  ;;  %v10955_v49 = vor.u32 %v11924_v46, %v10952_v14  ;;  %v11930_v14 = vld [vmem:[#allocation11 + $0x394] sm:$0xf] }
 0x5c4   :  { %7279 = vmatpush.bf16.msrb.mxu1 %v10739_v13  ;;  %7307 = vmatpush.bf16.msra.mxu3 %v10851_v31  ;;  %v12635_v31 = vld [vmem:[%s12660_s17] sm:$0x3]  ;;  %s12150_s17 = smov [#allocation13]  }
 0x5c5   :  { %v6356_v45 = vpack.c.bf16 %v6348_v54, %v6348_v54  ;;  %v6488_v35 = vperm.slane %v12635_v31, 0  ;;  %s7347_s6 = sshll.u32 %s12150_s17, 4  ;;  %s7348_s6 = int_to_ptr.vmem [resolvable:$true] %s7347_s6 }
 0x5c6   :  { %7293 = vmatpush.bf16.msra.mxu2 %v10795_v56  ;;  %v6275_v47 = vpop.f32.mrf.mxu0  ;;  %v11918_v56 = vld [vmem:[#allocation11 + $0x334] sm:$0xf] }
 0x5c7   :  { %7218 = vmatmul.bf16.vlgmr.msra.gmra.mxu0 %v6356_v45  ;;  %v10931_v26 = vor.u32 %v11918_v56, %v10928_v63  ;;  %v10976_v47 = vld [vmem:[#allocation11 + $0x398] sm:$0xf0] }
 0x5c8   :  { %7280 = vmatpush.bf16.msrb.mxu1 %v10731_v60  ;;  %7308 = vmatpush.bf16.msra.mxu3 %v10843_v20  ;;  %v11019_v60 = vor.u32 %v11940_v25, %v11016_v27 }
 0x5c9   :  { %7314 = vmatpush.bf16.msra.mxu0 %v10963_v53  ;;  %v10984_v53 = vld [vmem:[#allocation11 + $0x3a8] sm:$0xf0] }
 0x5ca   :  { %7294 = vmatpush.bf16.msra.mxu2 %v10787_v9  ;;  %v10912_v9 = vld [vmem:[#allocation11 + $0x318] sm:$0xf0]  ;;  %v10987_v46 = vor.u32 %v11932_v10, %v10984_v53 }
 0x5cb   :  { %7309 = vmatmul.bf16.vlgmr.msra.gmra.mxu3 %v12623_v23  ;;  %v10915_v61 = vor.u32 %v11914_v7, %v10912_v9 }
 0x5cc   :  { %7281 = vmatpush.bf16.msrb.mxu1 %v10723_v19  ;;  %v11003_v19 = vor.u32 %v11936_v1, %v11000_v37 }
 0x5cd   :  { %7315 = vmatpush.bf16.msra.mxu0 %v10955_v49 }
 0x5ce   :  { %7295 = vmatpush.bf16.msra.mxu2 %v10779_v62  ;;  %v6312_v8 = vpop.f32.mrf.mxu3 }
 0x5d0   :  { %7282 = vmatpush.bf16.msrb.mxu1 %v10715_v44 }
 0x5d1   :  { %7296 = vmatmul.bf16.vlgmr.msra.gmra.mxu2 %v12610_v36  ;;  %v11922_v36 = vld [vmem:[#allocation11 + $0x354] sm:$0xf] }
 0x5d2   :  { %v10947_v21 = vor.u32 %v11922_v36, %v10944_v24  ;;  %v10979_v24 = vor.u32 %v11930_v14, %v10976_v47 }
 0x5d4   :  { %7316 = vmatpush.bf16.msra.mxu0 %v10947_v21  ;;  %v6299_v55 = vpop.f32.mrf.mxu2  ;;  %v10968_v21 = vld [vmem:[#allocation11 + $0x388] sm:$0xf0] }
 0x5d5   :  { %v6300_v5 = vadd.f32 %v6299_v55, %v4637_v0 }
 0x5d6   :  { %v6314_v2 = vpop.f32.mrf.mxu3 }
 0x5d7   :  { %7270 = vmatmul.bf16.vlgmr.msrb.gmra.mxu0 %v12606_v43  ;;  %v6313_v58 = vadd.f32 %v6312_v8, %v6300_v5  ;;  %v11027_v43 = vor.u32 %v11942_v48, %v11024_v18  ;;  %v11928_v8 = vld [vmem:[#allocation11 + $0x384] sm:$0xf]  ;;  %v6489_v18 = vperm.slane %v12635_v31, 1 }
 0x5d8   :  { %7317 = vmatpush.bf16.msra.mxu0 %v10939_v52  ;;  %v6338_v23 = vpop.f32.mrf.mxu1  ;;  %v10971_v52 = vor.u32 %v11928_v8, %v10968_v21 }
 0x5dc   :  { %7318 = vmatpush.bf16.msra.mxu0 %v10931_v26  ;;  %v6301_v6 = vpop.f32.mrf.mxu2 }
 0x5de   :  { %v6325_v22 = vpop.f32.mrf.mxu0 }
 0x5df   :  { %v6326_v32 = vadd.f32 %v6325_v22, %v6313_v58 }
 0x5e0   :  { %7319 = vmatpush.bf16.msra.mxu0 %v10923_v33  ;;  %v6340_v12 = vpop.f32.mrf.mxu1 }
 0x5e1   :  { %v6339_v13 = vadd.f32 %v6338_v23, %v6326_v32 }
 0x5e3   :  { %v6349_v40 = vmax.f32 %v6339_v13, 0.0 }
 0x5e4   :  { %7320 = vmatpush.bf16.msra.mxu0 %v10915_v61 }
 0x5e5   :  { %v6357_v62 = vpack.c.bf16 %v6349_v40, %v6349_v40 }
 0x5e6   :  { %v6327_v28 = vpop.f32.mrf.mxu0 }
 0x5e7   :  { %7231 = vmatmul.bf16.vlgmr.msra.gmra.mxu1 %v6357_v62 }
 0x5e8   :  { %7321 = vmatpush.bf16.msra.mxu0 %v10907_v59  ;;  %7327 = vmatpush.bf16.msra.mxu1 %v11027_v43 }
 0x5eb   :  { %7322 = vmatmul.bf16.vlgmr.msra.gmra.mxu0 %v6356_v45 }
 0x5ec   :  { %7328 = vmatpush.bf16.msra.mxu1 %v11019_v60 }
 0x5ee   :  { %v7154_v4 = vpop.f32.mrf.mxu3 }
 0x5f0   :  { %7329 = vmatpush.bf16.msra.mxu1 %v11011_v17 }
 0x5f4   :  { %v7141_v38 = vpop.f32.mrf.mxu2  ;;  %7330 = vmatpush.bf16.msra.mxu1 %v11003_v19 }
 0x5f5   :  { %v7142_v34 = vadd.f32 %v7141_v38, %v6488_v35 }
 0x5f6   :  { %v7156_v20 = vpop.f32.mrf.mxu3 }
 0x5f7   :  { %v7155_v54 = vadd.f32 %v7154_v4, %v7142_v34  ;;  %7283 = vmatmul.bf16.vlgmr.msrb.gmra.mxu1 %v12602_v42 }
 0x5f8   :  { %v7180_v44 = vpop.f32.mrf.mxu1  ;;  %7331 = vmatpush.bf16.msra.mxu1 %v10995_v41 }
 0x5fc   :  { %v7143_v45 = vpop.f32.mrf.mxu2  ;;  %7332 = vmatpush.bf16.msra.mxu1 %v10987_v46 }
 0x5fe   :  { %v7167_v49 = vpop.f32.mrf.mxu0 }
 0x5ff   :  { %v7168_v36 = vadd.f32 %v7167_v49, %v7155_v54 }
 0x600   :  { %v7182_v15 = vpop.f32.mrf.mxu1  ;;  %7333 = vmatpush.bf16.msra.mxu1 %v10979_v24 }
 0x601   :  { %v7181_v50 = vadd.f32 %v7180_v44, %v7168_v36 }
 0x604   :  { %7334 = vmatpush.bf16.msra.mxu1 %v10971_v52 }
 0x606   :  { %v7169_v55 = vpop.f32.mrf.mxu0 }
 0x607   :  { %7335 = vmatmul.bf16.vlgmr.msra.gmra.mxu1 %v6357_v62 }
 0x614   :  { %v7193_v56 = vpop.f32.mrf.mxu2 }
 0x615   :  { %v7194_v42 = vadd.f32 %v7193_v56, %v7181_v50 }
 0x61c   :  { %v7195_v63 = vpop.f32.mrf.mxu2 }
 0x62a   :  { %v7206_v2 = vpop.f32.mrf.mxu3 }
 0x62b   :  { %v7207_v32 = vadd.f32 %v7206_v2, %v7194_v42 }
 0x632   :  { %v7208_v51 = vpop.f32.mrf.mxu3 }
 0x634   :  { %v7245_v0 = vpop.f32.mrf.mxu2 }
 0x635   :  { %v7246_v40 = vadd.f32 %v7245_v0, %v6489_v18 }
 0x63a   :  { %v7258_v3 = vpop.f32.mrf.mxu3 }
 0x63b   :  { %v7259_v43 = vadd.f32 %v7258_v3, %v7246_v40 }
 0x63c   :  { %v7247_v26 = vpop.f32.mrf.mxu2 }
 0x642   :  { %v7260_v5 = vpop.f32.mrf.mxu3 }
 0x644   :  { %v7219_v23 = vpop.f32.mrf.mxu0 }
 0x645   :  { %v7220_v16 = vadd.f32 %v7219_v23, %v7207_v32 }
 0x64c   :  { %v7221_v6 = vpop.f32.mrf.mxu0 }
 0x64e   :  { %v7310_v7 = vpop.f32.mrf.mxu3 }
 0x654   :  { %v7297_v33 = vpop.f32.mrf.mxu2  ;;  %v7271_v58 = vpop.f32.mrf.mxu0 }
 0x655   :  { %v7272_v25 = vadd.f32 %v7271_v58, %v7259_v43 }
 0x656   :  { %v7312_v22 = vpop.f32.mrf.mxu3 }
 0x65c   :  { %v7299_v9 = vpop.f32.mrf.mxu2  ;;  %v7273_v61 = vpop.f32.mrf.mxu0 }
 0x664   :  { %v7232_v11 = vpop.f32.mrf.mxu1 }
 0x665   :  { %v7233_v12 = vadd.f32 %v7232_v11, %v7220_v16 }
 0x667   :  { %7340 = vst [vmem:[#allocation13] sm:$0xff] %v7233_v12 }
 0x668   :  { %v7323_v13 = vpop.f32.mrf.mxu0 }
 0x66c   :  { %v7234_v48 = vpop.f32.mrf.mxu1 }
 0x670   :  { %v7325_v59 = vpop.f32.mrf.mxu0 }
 0x674   :  { %v7284_v62 = vpop.f32.mrf.mxu1 }
 0x675   :  { %v7285_v27 = vadd.f32 %v7284_v62, %v7272_v25 }
 0x677   :  { %v7298_v28 = vadd.f32 %v7297_v33, %v7285_v27 }
 0x679   :  { %v7311_v29 = vadd.f32 %v7310_v7, %v7298_v28 }
 0x67b   :  { %v7324_v30 = vadd.f32 %v7323_v13, %v7311_v29 }
 0x67c   :  { %v7286_v60 = vpop.f32.mrf.mxu1 }
 0x684   :  { %v7336_v4 = vpop.f32.mrf.mxu1 }
 0x685   :  { %v7337_v17 = vadd.f32 %v7336_v4, %v7324_v30 }
 0x687   :  { %7341 = vst [vmem:[#allocation13 + $0x8] sm:$0xff] %v7337_v17 }
 0x688   :  { %7352 = dma.vmem_to_hbm [thread:$0]  %s7348_s6, 256, %s7350_s4, [#allocation4]  }
 0x68c   :  { %v7338_v31 = vpop.f32.mrf.mxu1 }
 0x68d   :  { %12136 = dma.done.wait [#allocation4], 256  }
 0x68e   :  { %12137 = vsyncadd [#allocation4], 4294967040 }
 0x68f   :  { %7357 = vsyncpa [#allocation3], 1 }
 0x690   :  { %7358 = vsyncpa [#allocation6], 1 }
 0x691   :  { %7359 = vsyncpa [#allocation9], 1 }
 0x692   :  { %7360 = vsyncpa [#allocation12], 1 }
 0x693   :  { %7361 = vsyncpa [#allocation4], 1 }

</bundles_post_ra>
